<compile_context>
chip_gen: v6e
topology: v6e:2x2x1
jax: 0.10.0
libtpu: 0.0.40
codegen_flags: <defaults>
</compile_context>

<pallas_src>
import functools
import numpy as np
import jax
import jax.numpy as jnp
from jax.experimental import pallas as pl

# ----------------------------- model hyper-parameters -----------------------------
BATCH = 2
IN_CHANNELS = 3
T_LEN = 16
NUM_JOINTS = 12          # V
NUM_PEOPLE = 6           # M
HIDDEN_CHANNELS = 8
HIDDEN_DIM = 32
SPATIAL_K = 3            # A.size(0)
TEMPORAL_K = 9
TEMPORAL_PAD = 4
EPS_BN = 1e-5

# (in_c, out_c, stride, residual_kind) for the six st_gcn blocks
ST_GCN_CFGS = (
    (IN_CHANNELS, HIDDEN_CHANNELS, 1, "none"),
    (HIDDEN_CHANNELS, HIDDEN_CHANNELS, 1, "identity"),
    (HIDDEN_CHANNELS, 2 * HIDDEN_CHANNELS, 2, "conv"),
    (2 * HIDDEN_CHANNELS, 2 * HIDDEN_CHANNELS, 1, "identity"),
    (2 * HIDDEN_CHANNELS, 4 * HIDDEN_CHANNELS, 2, "conv"),
    (4 * HIDDEN_CHANNELS, HIDDEN_DIM, 1,
     "identity" if 4 * HIDDEN_CHANNELS == HIDDEN_DIM else "conv"),
)


# ----------------------------- deterministic buffers -----------------------------
def build_graph_A(v):
    # TODO(synk): Graph class source not provided — deterministic 3-partition
    # (identity / 1-hop ring / 2-hop ring) row-normalised adjacency (K=3, V, V).
    a0 = np.eye(v)
    ring = np.zeros((v, v))
    two = np.zeros((v, v))
    for i in range(v):
        ring[i, (i + 1) % v] = 1.0
        ring[i, (i - 1) % v] = 1.0
        two[i, (i + 2) % v] = 1.0
        two[i, (i - 2) % v] = 1.0
    a1 = ring / ring.sum(-1, keepdims=True)
    a2 = two / two.sum(-1, keepdims=True)
    return np.stack([a0, a1, a2]).astype(np.float32)


def build_P():
    p_sem = np.zeros((6, 2))
    p_sem[[0, 1, 2], [0]] = 1
    p_sem[[3, 4, 5], [1]] = 1
    p_sym = np.zeros((6, 2))
    p_sym[[0, 1, 4, 5], [0]] = 1
    p_sym[[2, 3], [1]] = 1
    return np.stack([p_sem, p_sym])[None].astype(np.float32)  # (1, 2, 6, 2)


# ----------------------------- parameters -----------------------------
def init_params(key):
    ks = iter(jax.random.split(key, 256))

    def nrm(shape, scale=0.1):
        return (scale * jax.random.normal(next(ks), shape)).astype(jnp.float32)

    def bn(c):
        return dict(gamma=1.0 + nrm((c,), 0.05), beta=nrm((c,), 0.05),
                    mean=nrm((c,), 0.05), var=1.0 + jnp.abs(nrm((c,), 0.05)))

    params = dict(
        A=jnp.asarray(build_graph_A(NUM_JOINTS)),
        P=jnp.asarray(build_P()),
        data_bn=bn(NUM_JOINTS * IN_CHANNELS),
    )
    st = []
    for (cin, cout, _stride, res_kind) in ST_GCN_CFGS:
        p = dict(
            gcn_w=nrm((cout * SPATIAL_K, cin)), gcn_b=nrm((cout * SPATIAL_K,)),
            tcn_bn1=bn(cout),
            tcn_w=nrm((cout, cout, TEMPORAL_K)), tcn_b=nrm((cout,)),
            tcn_bn2=bn(cout),
            edge_importance=jnp.ones((SPATIAL_K, NUM_JOINTS, NUM_JOINTS), jnp.float32),
        )
        if res_kind == "conv":
            p["res_w"] = nrm((cout, cin))
            p["res_b"] = nrm((cout,))
            p["res_bn"] = bn(cout)
        st.append(p)
    params["st_gcn"] = st
    params["hgnn"] = [
        dict(hcn_w=nrm((HIDDEN_DIM, 2 * HIDDEN_DIM)), hcn_b=nrm((HIDDEN_DIM,)),
             people_importance=jnp.ones((1, 2, 6, 2), jnp.float32))
        for _ in range(2)
    ]
    return params


def fold_bn(bn):
    scale = bn["gamma"] / jnp.sqrt(bn["var"] + EPS_BN)
    shift = bn["beta"] - bn["mean"] * scale
    return scale, shift


# ----------------------------- one-time weight folding (init, not per-forward) -----------------------------
def fold_params(params, remain_joint, n=BATCH, m=NUM_PEOPLE):
    rj = np.asarray(remain_joint, dtype=np.int32)
    vr = int(rj.size)
    nm = n * m
    rows = nm * vr

    # data_bn (eval) -> elementwise affine plane on the (n·m·v, t·c) layout.
    sd, shd = fold_bn(params["data_bn"])                       # channel index = v*C + c
    sd_vc = sd.reshape(NUM_JOINTS, IN_CHANNELS)[rj]
    shd_vc = shd.reshape(NUM_JOINTS, IN_CHANNELS)[rj]
    dbn_scale = jnp.broadcast_to(sd_vc[None, :, None, :],
                                 (nm, vr, T_LEN, IN_CHANNELS)
                                 ).reshape(rows, T_LEN * IN_CHANNELS).astype(jnp.float32)
    dbn_shift = jnp.broadcast_to(shd_vc[None, :, None, :],
                                 (nm, vr, T_LEN, IN_CHANNELS)
                                 ).reshape(rows, T_LEN * IN_CHANNELS).astype(jnp.float32)

    A = params["A"]
    I_nm = jnp.eye(nm, dtype=jnp.float32)
    B_list, blocks, res_kinds = [], [], []
    macs = 0
    t_in = T_LEN
    for (cin, cout, stride, res_kind), p in zip(ST_GCN_CFGS, params["st_gcn"]):
        A_imp = (A * p["edge_importance"])[:, rj][:, :, rj]    # (K, vr, vr)
        s1, sh1 = fold_bn(p["tcn_bn1"])
        Wg = p["gcn_w"].reshape(SPATIAL_K, cout, cin)
        n1 = t_in * cout

        # stage 1 right weights (gcn 1x1 conv per k, BN1 scale folded), lane-concat over k
        s1_row = jnp.tile(s1, t_in)
        R_cat = jnp.concatenate(
            [jnp.kron(jnp.eye(t_in, dtype=jnp.float32), Wg[k].T) * s1_row[None, :]
             for k in range(SPATIAL_K)], axis=1).astype(jnp.bfloat16)   # (t_in*cin, 3*n1)

        # stage 1 left weights: spatial aggregation, block-diagonal over the N·M samples
        for k in range(SPATIAL_K):
            B_list.append(jnp.kron(I_nm, A_imp[k].T).astype(jnp.bfloat16))

        # stage 1 additive plane: gcn bias through A, BN1 scale/shift folded
        colsum = A_imp.sum(axis=1)                              # (K, vr): sum_v A[k, v, w]
        bg = p["gcn_b"].reshape(SPATIAL_K, cout)
        bias_wc = jnp.einsum("kw,ko->wo", colsum, bg) * s1[None, :] + sh1[None, :]
        bias1 = jnp.broadcast_to(bias_wc[None, :, None, :],
                                 (nm, vr, t_in, cout)).reshape(rows, n1).astype(jnp.float32)

        # stage 2: temporal (9,1) conv as a banded matmul weight, BN2 folded
        t_out = (t_in + 2 * TEMPORAL_PAD - TEMPORAL_K) // stride + 1
        s2, sh2 = fold_bn(p["tcn_bn2"])
        ti = jnp.arange(t_in)[:, None]
        to = jnp.arange(t_out)[None, :]
        tap = ti - to * stride + TEMPORAL_PAD
        valid = ((tap >= 0) & (tap < TEMPORAL_K)).astype(jnp.float32)
        w_tap = jnp.transpose(p["tcn_w"], (2, 1, 0))            # (KT, ci=cout, co=cout)
        Kt = w_tap[jnp.clip(tap, 0, TEMPORAL_K - 1)] * valid[..., None, None]
        Kt = (jnp.transpose(Kt, (0, 2, 1, 3)) * s2).reshape(t_in * cout, t_out * cout)
        b2 = jnp.tile(p["tcn_b"] * s2 + sh2, t_out)

        blk = dict(R=R_cat, bias1=bias1, Kt=Kt.astype(jnp.bfloat16))
        if res_kind == "conv":                                  # 1x1 conv residual + BN folded
            sr, shr = fold_bn(p["res_bn"])
            Wr = p["res_w"] * sr[:, None]
            br = p["res_b"] * sr + shr
            sel = (ti == to * stride).astype(jnp.float32)
            Kr = sel[:, None, :, None] * Wr.T[None, :, None, :]
            blk["Kr"] = Kr.reshape(t_in * cin, t_out * cout).astype(jnp.bfloat16)
            b2 = b2 + jnp.tile(br, t_out)
            macs += rows * (t_in * cin) * (t_out * cout)
        blk["b2"] = b2.reshape(1, -1).astype(jnp.float32)
        blocks.append(blk)
        res_kinds.append(res_kind)
        macs += (rows * (t_in * cin) * (SPATIAL_K * n1) + SPATIAL_K * rows * rows * n1
                 + rows * (t_in * cout) * (t_out * cout))
        t_in = t_out

    t_f, c_f = t_in, ST_GCN_CFGS[-1][1]
    poolV = jnp.kron(I_nm, jnp.full((1, vr), 1.0 / vr)).astype(jnp.bfloat16)      # (nm, rows)
    poolM = jnp.kron(jnp.eye(n, dtype=jnp.float32),
                     jnp.full((1, m), 1.0 / m)).astype(jnp.bfloat16)              # (n, nm)

    # TODO(synk): ConvPersonGraphical source unavailable — hypergraph-conv interpretation
    # (H·Hᵀ people mixing per hypergraph + linear + ReLU); Gumbel / random-edge-zeroing omitted.
    hgnn_layers = []
    I_n = jnp.eye(n, dtype=jnp.float32)
    for p in params["hgnn"]:
        Pimp = (params["P"] * p["people_importance"])[0]        # (2, M, E)
        WT = p["hcn_w"].T                                        # (2C, C)
        hgnn_layers.append(dict(
            M0=jnp.kron(I_n, Pimp[0] @ Pimp[0].T).astype(jnp.bfloat16),
            M1=jnp.kron(I_n, Pimp[1] @ Pimp[1].T).astype(jnp.bfloat16),
            Wa=WT[:HIDDEN_DIM].astype(jnp.bfloat16),
            Wb=WT[HIDDEN_DIM:].astype(jnp.bfloat16),
            b=p["hcn_b"].reshape(1, -1).astype(jnp.float32),
        ))
        macs += 2 * (nm * nm * HIDDEN_DIM + nm * HIDDEN_DIM * HIDDEN_DIM)
    macs += nm * rows * c_f + n * nm * HIDDEN_DIM

    consts = dict(dbn_scale=dbn_scale, dbn_shift=dbn_shift,
                  B=jnp.stack(B_list), blocks=blocks,
                  poolV=poolV, poolM=poolM, hgnn=hgnn_layers)
    meta = dict(rows=rows, vr=vr, t_f=t_f, c_f=c_f,
                res_kinds=tuple(res_kinds), macs=int(macs))
    return consts, meta


# ----------------------------- the fused Pallas kernel -----------------------------
def _make_kernel(treedef, meta):
    res_kinds = meta["res_kinds"]
    t_f, c_f = meta["t_f"], meta["c_f"]

    def kernel(x_ref, *refs):
        out_ref = refs[-1]
        c = jax.tree_util.tree_unflatten(treedef, refs[:-1])
        b_all = c["B"]                                           # (6*K, rows, rows) bf16

        # data_bn (eval) folded to an elementwise affine on the (n·m·v, t·c) layout
        x = x_ref[...] * c["dbn_scale"][...] + c["dbn_shift"][...]
        x = x.astype(jnp.bfloat16)

        for bi, blk in enumerate(c["blocks"]):
            # --- stage 1: gcn 1x1 conv + 'nkctv,kvw' graph contraction + BN1 + ReLU ---
            g_all = jnp.dot(x, blk["R"][...], preferred_element_type=jnp.float32)
            n1 = g_all.shape[1] // SPATIAL_K
            acc = blk["bias1"][...]
            for k in range(SPATIAL_K):
                gk = g_all[:, k * n1:(k + 1) * n1].astype(jnp.bfloat16)
                acc = acc + jnp.dot(b_all[SPATIAL_K * bi + k], gk,
                                    preferred_element_type=jnp.float32)
            z = jnp.maximum(acc, 0.0).astype(jnp.bfloat16)

            # --- stage 2: temporal (9,1) conv + BN2 + residual + ReLU ---
            acc2 = jnp.dot(z, blk["Kt"][...], preferred_element_type=jnp.float32)
            acc2 = acc2 + blk["b2"][...]
            rk = res_kinds[bi]
            if rk == "identity":          # epilogue add, no eye() through the MXU
                acc2 = acc2 + x.astype(jnp.float32)
            elif rk == "conv":            # banded (tiny) 1x1-conv residual matmul
                acc2 = acc2 + jnp.dot(x, blk["Kr"][...],
                                      preferred_element_type=jnp.float32)
            x = jnp.maximum(acc2, 0.0).astype(jnp.bfloat16)

        # --- F.avg_pool2d over (T, V): lane-group sum over T, matmul-mean over V ---
        xf = x.astype(jnp.float32)
        pooled = xf[:, 0:c_f]
        for j in range(1, t_f):
            pooled = pooled + xf[:, j * c_f:(j + 1) * c_f]
        pooled = (pooled * (1.0 / t_f)).astype(jnp.bfloat16)
        h = jnp.dot(c["poolV"][...], pooled, preferred_element_type=jnp.float32)  # (n*m, C)

        # --- hgnn x2: hypergraph person mixing + linear + ReLU ---
        for layer in c["hgnn"]:
            hb = h.astype(jnp.bfloat16)
            m0 = jnp.dot(layer["M0"][...], hb, preferred_element_type=jnp.float32)
            m1 = jnp.dot(layer["M1"][...], hb, preferred_element_type=jnp.float32)
            u = jnp.dot(m0.astype(jnp.bfloat16), layer["Wa"][...],
                        preferred_element_type=jnp.float32)
            u = u + jnp.dot(m1.astype(jnp.bfloat16), layer["Wb"][...],
                            preferred_element_type=jnp.float32)
            h = jnp.maximum(u + layer["b"][...], 0.0)

        # --- final mean over people ---
        out_ref[...] = jnp.dot(c["poolM"][...], h.astype(jnp.bfloat16),
                               preferred_element_type=jnp.float32)

    return kernel


# ----------------------------- public forward builder -----------------------------
def make_forward(params, ignore_joint=()):
    remain_joint = sorted(set(range(NUM_JOINTS)) - set(ignore_joint))
    consts, meta = fold_params(params, remain_joint)
    leaves, treedef = jax.tree_util.tree_flatten(consts)
    kernel = _make_kernel(treedef, meta)

    rows = meta["rows"]
    in_cols = T_LEN * IN_CHANNELS
    bytes_accessed = int(sum(int(np.prod(l.shape)) * l.dtype.itemsize for l in leaves)
                         + rows * in_cols * 4 + BATCH * HIDDEN_DIM * 4)
    cost = pl.CostEstimate(flops=2 * meta["macs"], transcendentals=0,
                           bytes_accessed=bytes_accessed)

    fused = pl.pallas_call(
        kernel,
        out_shape=jax.ShapeDtypeStruct((BATCH, HIDDEN_DIM), jnp.float32),
        cost_estimate=cost,
    )

    rj = np.asarray(remain_joint, dtype=np.int32)
    take_joints = len(remain_joint) != NUM_JOINTS

    @jax.jit
    def forward(x):
        # x: (N, C, T, V, M) — exactly the PyTorch Model_Linear input convention.
        # TODO(synk): ignore_people / remain_people of hgnn is tied to the stochastic
        # CUDA path and the unavailable ConvPersonGraphical; omitted (eval-mode approx).
        xt = jnp.transpose(x, (0, 4, 3, 2, 1))            # (N, M, V, T, C)
        if take_joints:
            xt = xt[:, :, rj]
        x_rows = xt.reshape(rows, in_cols).astype(jnp.float32)
        return fused(x_rows, *leaves)

    return forward


# ----------------------------- main -----------------------------
if __name__ == "__main__":
    key = jax.random.PRNGKey(0)
    kx, kp = jax.random.split(key)
    x = jax.random.normal(
        kx, (BATCH, IN_CHANNELS, T_LEN, NUM_JOINTS, NUM_PEOPLE), dtype=jnp.float32
    )
    params = init_params(kp)

    fwd = make_forward(params)
    out = jax.block_until_ready(fwd(x))

    assert out.shape == (BATCH, HIDDEN_DIM), out.shape
    assert bool(jnp.all(jnp.isfinite(out)))
    print("KERNEL_OK")
</pallas_src>

<mosaic_0001>
module attributes {stable_mosaic.version = 11 : i64} {
  func.func @kernel(%arg0: memref<144x48xf32, #tpu.memory_space<vmem>>, %arg1: memref<18x144x144xbf16, #tpu.memory_space<vmem>>, %arg2: memref<128x128xbf16, #tpu.memory_space<vmem>>, %arg3: memref<48x384xbf16, #tpu.memory_space<vmem>>, %arg4: memref<1x128xf32, #tpu.memory_space<vmem>>, %arg5: memref<144x128xf32, #tpu.memory_space<vmem>>, %arg6: memref<128x128xbf16, #tpu.memory_space<vmem>>, %arg7: memref<128x384xbf16, #tpu.memory_space<vmem>>, %arg8: memref<1x128xf32, #tpu.memory_space<vmem>>, %arg9: memref<144x128xf32, #tpu.memory_space<vmem>>, %arg10: memref<128x128xbf16, #tpu.memory_space<vmem>>, %arg11: memref<256x128xbf16, #tpu.memory_space<vmem>>, %arg12: memref<128x768xbf16, #tpu.memory_space<vmem>>, %arg13: memref<1x128xf32, #tpu.memory_space<vmem>>, %arg14: memref<144x256xf32, #tpu.memory_space<vmem>>, %arg15: memref<128x128xbf16, #tpu.memory_space<vmem>>, %arg16: memref<128x384xbf16, #tpu.memory_space<vmem>>, %arg17: memref<1x128xf32, #tpu.memory_space<vmem>>, %arg18: memref<144x128xf32, #tpu.memory_space<vmem>>, %arg19: memref<128x128xbf16, #tpu.memory_space<vmem>>, %arg20: memref<256x128xbf16, #tpu.memory_space<vmem>>, %arg21: memref<128x768xbf16, #tpu.memory_space<vmem>>, %arg22: memref<1x128xf32, #tpu.memory_space<vmem>>, %arg23: memref<144x256xf32, #tpu.memory_space<vmem>>, %arg24: memref<128x128xbf16, #tpu.memory_space<vmem>>, %arg25: memref<128x384xbf16, #tpu.memory_space<vmem>>, %arg26: memref<1x128xf32, #tpu.memory_space<vmem>>, %arg27: memref<144x128xf32, #tpu.memory_space<vmem>>, %arg28: memref<144x48xf32, #tpu.memory_space<vmem>>, %arg29: memref<144x48xf32, #tpu.memory_space<vmem>>, %arg30: memref<12x12xbf16, #tpu.memory_space<vmem>>, %arg31: memref<12x12xbf16, #tpu.memory_space<vmem>>, %arg32: memref<32x32xbf16, #tpu.memory_space<vmem>>, %arg33: memref<32x32xbf16, #tpu.memory_space<vmem>>, %arg34: memref<1x32xf32, #tpu.memory_space<vmem>>, %arg35: memref<12x12xbf16, #tpu.memory_space<vmem>>, %arg36: memref<12x12xbf16, #tpu.memory_space<vmem>>, %arg37: memref<32x32xbf16, #tpu.memory_space<vmem>>, %arg38: memref<32x32xbf16, #tpu.memory_space<vmem>>, %arg39: memref<1x32xf32, #tpu.memory_space<vmem>>, %arg40: memref<2x12xbf16, #tpu.memory_space<vmem>>, %arg41: memref<12x144xbf16, #tpu.memory_space<vmem>>, %arg42: memref<2x32xf32, #tpu.memory_space<vmem>>) attributes {dimension_semantics = [], scalar_prefetch = 0 : i64, scratch_operands = 0 : i64, tpu.core_type = #tpu.core_type<tc>} {
    %c0 = arith.constant 0 : index
    %c0_0 = arith.constant 0 : index
    %0 = vector.load %arg0[%c0, %c0_0] : memref<144x48xf32, #tpu.memory_space<vmem>>, vector<144x48xf32>
    %c0_1 = arith.constant 0 : index
    %c0_2 = arith.constant 0 : index
    %1 = vector.load %arg28[%c0_1, %c0_2] : memref<144x48xf32, #tpu.memory_space<vmem>>, vector<144x48xf32>
    %2 = arith.mulf %0, %1 : vector<144x48xf32>
    %c0_3 = arith.constant 0 : index
    %c0_4 = arith.constant 0 : index
    %3 = vector.load %arg29[%c0_3, %c0_4] : memref<144x48xf32, #tpu.memory_space<vmem>>, vector<144x48xf32>
    %4 = arith.addf %2, %3 : vector<144x48xf32>
    %5 = arith.truncf %4 : vector<144x48xf32> to vector<144x48xbf16>
    %c0_5 = arith.constant 0 : index
    %c0_6 = arith.constant 0 : index
    %6 = vector.load %arg3[%c0_5, %c0_6] : memref<48x384xbf16, #tpu.memory_space<vmem>>, vector<48x384xbf16>
    %cst = arith.constant dense<0.000000e+00> : vector<144x384xf32>
    %7 = tpu.matmul %5, %6, %cst {dimension_numbers = #tpu.dot_dimension_numbers<[1], [0], [0], [1], [0, 0, 1, 1], [], []>} : vector<144x48xbf16>, vector<48x384xbf16>, vector<144x384xf32> -> vector<144x384xf32>
    %c0_7 = arith.constant 0 : index
    %c0_8 = arith.constant 0 : index
    %8 = vector.load %arg5[%c0_7, %c0_8] : memref<144x128xf32, #tpu.memory_space<vmem>>, vector<144x128xf32>
    %9 = vector.extract_strided_slice %7 {offsets = [0, 0], sizes = [144, 128], strides = [1, 1]} : vector<144x384xf32> to vector<144x128xf32>
    %10 = arith.truncf %9 : vector<144x128xf32> to vector<144x128xbf16>
    %c0_9 = arith.constant 0 : index
    %c0_10 = arith.constant 0 : index
    %c0_11 = arith.constant 0 : index
    %11 = vector.load %arg1[%c0_9, %c0_10, %c0_11] : memref<18x144x144xbf16, #tpu.memory_space<vmem>>, vector<1x144x144xbf16>
    %12 = vector.shape_cast %11 : vector<1x144x144xbf16> to vector<144x144xbf16>
    %cst_12 = arith.constant dense<0.000000e+00> : vector<144x128xf32>
    %13 = tpu.matmul %12, %10, %cst_12 {dimension_numbers = #tpu.dot_dimension_numbers<[1], [0], [0], [1], [0, 0, 1, 1], [], []>} : vector<144x144xbf16>, vector<144x128xbf16>, vector<144x128xf32> -> vector<144x128xf32>
    %14 = arith.addf %8, %13 : vector<144x128xf32>
    %15 = vector.extract_strided_slice %7 {offsets = [0, 128], sizes = [144, 128], strides = [1, 1]} : vector<144x384xf32> to vector<144x128xf32>
    %16 = arith.truncf %15 : vector<144x128xf32> to vector<144x128xbf16>
    %c1 = arith.constant 1 : index
    %c0_13 = arith.constant 0 : index
    %c0_14 = arith.constant 0 : index
    %17 = vector.load %arg1[%c1, %c0_13, %c0_14] : memref<18x144x144xbf16, #tpu.memory_space<vmem>>, vector<1x144x144xbf16>
    %18 = vector.shape_cast %17 : vector<1x144x144xbf16> to vector<144x144xbf16>
    %cst_15 = arith.constant dense<0.000000e+00> : vector<144x128xf32>
    %19 = tpu.matmul %18, %16, %cst_15 {dimension_numbers = #tpu.dot_dimension_numbers<[1], [0], [0], [1], [0, 0, 1, 1], [], []>} : vector<144x144xbf16>, vector<144x128xbf16>, vector<144x128xf32> -> vector<144x128xf32>
    %20 = arith.addf %14, %19 : vector<144x128xf32>
    %21 = vector.extract_strided_slice %7 {offsets = [0, 256], sizes = [144, 128], strides = [1, 1]} : vector<144x384xf32> to vector<144x128xf32>
    %22 = arith.truncf %21 : vector<144x128xf32> to vector<144x128xbf16>
    %c2 = arith.constant 2 : index
    %c0_16 = arith.constant 0 : index
    %c0_17 = arith.constant 0 : index
    %23 = vector.load %arg1[%c2, %c0_16, %c0_17] : memref<18x144x144xbf16, #tpu.memory_space<vmem>>, vector<1x144x144xbf16>
    %24 = vector.shape_cast %23 : vector<1x144x144xbf16> to vector<144x144xbf16>
    %cst_18 = arith.constant dense<0.000000e+00> : vector<144x128xf32>
    %25 = tpu.matmul %24, %22, %cst_18 {dimension_numbers = #tpu.dot_dimension_numbers<[1], [0], [0], [1], [0, 0, 1, 1], [], []>} : vector<144x144xbf16>, vector<144x128xbf16>, vector<144x128xf32> -> vector<144x128xf32>
    %26 = arith.addf %20, %25 : vector<144x128xf32>
    %cst_19 = arith.constant 0.000000e+00 : f32
    %27 = vector.broadcast %cst_19 : f32 to vector<144x128xf32>
    %28 = arith.maximumf %26, %27 : vector<144x128xf32>
    %29 = arith.truncf %28 : vector<144x128xf32> to vector<144x128xbf16>
    %c0_20 = arith.constant 0 : index
    %c0_21 = arith.constant 0 : index
    %30 = vector.load %arg2[%c0_20, %c0_21] : memref<128x128xbf16, #tpu.memory_space<vmem>>, vector<128x128xbf16>
    %cst_22 = arith.constant dense<0.000000e+00> : vector<144x128xf32>
    %31 = tpu.matmul %29, %30, %cst_22 {dimension_numbers = #tpu.dot_dimension_numbers<[1], [0], [0], [1], [0, 0, 1, 1], [], []>} : vector<144x128xbf16>, vector<128x128xbf16>, vector<144x128xf32> -> vector<144x128xf32>
    %c0_23 = arith.constant 0 : index
    %c0_24 = arith.constant 0 : index
    %32 = vector.load %arg4[%c0_23, %c0_24] : memref<1x128xf32, #tpu.memory_space<vmem>>, vector<1x128xf32>
    %33 = vector.broadcast %32 : vector<1x128xf32> to vector<144x128xf32>
    %34 = arith.addf %31, %33 : vector<144x128xf32>
    %cst_25 = arith.constant 0.000000e+00 : f32
    %35 = vector.broadcast %cst_25 : f32 to vector<144x128xf32>
    %36 = arith.maximumf %34, %35 : vector<144x128xf32>
    %37 = arith.truncf %36 : vector<144x128xf32> to vector<144x128xbf16>
    %c0_26 = arith.constant 0 : index
    %c0_27 = arith.constant 0 : index
    %38 = vector.load %arg7[%c0_26, %c0_27] : memref<128x384xbf16, #tpu.memory_space<vmem>>, vector<128x384xbf16>
    %cst_28 = arith.constant dense<0.000000e+00> : vector<144x384xf32>
    %39 = tpu.matmul %37, %38, %cst_28 {dimension_numbers = #tpu.dot_dimension_numbers<[1], [0], [0], [1], [0, 0, 1, 1], [], []>} : vector<144x128xbf16>, vector<128x384xbf16>, vector<144x384xf32> -> vector<144x384xf32>
    %c0_29 = arith.constant 0 : index
    %c0_30 = arith.constant 0 : index
    %40 = vector.load %arg9[%c0_29, %c0_30] : memref<144x128xf32, #tpu.memory_space<vmem>>, vector<144x128xf32>
    %41 = vector.extract_strided_slice %39 {offsets = [0, 0], sizes = [144, 128], strides = [1, 1]} : vector<144x384xf32> to vector<144x128xf32>
    %42 = arith.truncf %41 : vector<144x128xf32> to vector<144x128xbf16>
    %c3 = arith.constant 3 : index
    %c0_31 = arith.constant 0 : index
    %c0_32 = arith.constant 0 : index
    %43 = vector.load %arg1[%c3, %c0_31, %c0_32] : memref<18x144x144xbf16, #tpu.memory_space<vmem>>, vector<1x144x144xbf16>
    %44 = vector.shape_cast %43 : vector<1x144x144xbf16> to vector<144x144xbf16>
    %cst_33 = arith.constant dense<0.000000e+00> : vector<144x128xf32>
    %45 = tpu.matmul %44, %42, %cst_33 {dimension_numbers = #tpu.dot_dimension_numbers<[1], [0], [0], [1], [0, 0, 1, 1], [], []>} : vector<144x144xbf16>, vector<144x128xbf16>, vector<144x128xf32> -> vector<144x128xf32>
    %46 = arith.addf %40, %45 : vector<144x128xf32>
    %47 = vector.extract_strided_slice %39 {offsets = [0, 128], sizes = [144, 128], strides = [1, 1]} : vector<144x384xf32> to vector<144x128xf32>
    %48 = arith.truncf %47 : vector<144x128xf32> to vector<144x128xbf16>
    %c4 = arith.constant 4 : index
    %c0_34 = arith.constant 0 : index
    %c0_35 = arith.constant 0 : index
    %49 = vector.load %arg1[%c4, %c0_34, %c0_35] : memref<18x144x144xbf16, #tpu.memory_space<vmem>>, vector<1x144x144xbf16>
    %50 = vector.shape_cast %49 : vector<1x144x144xbf16> to vector<144x144xbf16>
    %cst_36 = arith.constant dense<0.000000e+00> : vector<144x128xf32>
    %51 = tpu.matmul %50, %48, %cst_36 {dimension_numbers = #tpu.dot_dimension_numbers<[1], [0], [0], [1], [0, 0, 1, 1], [], []>} : vector<144x144xbf16>, vector<144x128xbf16>, vector<144x128xf32> -> vector<144x128xf32>
    %52 = arith.addf %46, %51 : vector<144x128xf32>
    %53 = vector.extract_strided_slice %39 {offsets = [0, 256], sizes = [144, 128], strides = [1, 1]} : vector<144x384xf32> to vector<144x128xf32>
    %54 = arith.truncf %53 : vector<144x128xf32> to vector<144x128xbf16>
    %c5 = arith.constant 5 : index
    %c0_37 = arith.constant 0 : index
    %c0_38 = arith.constant 0 : index
    %55 = vector.load %arg1[%c5, %c0_37, %c0_38] : memref<18x144x144xbf16, #tpu.memory_space<vmem>>, vector<1x144x144xbf16>
    %56 = vector.shape_cast %55 : vector<1x144x144xbf16> to vector<144x144xbf16>
    %cst_39 = arith.constant dense<0.000000e+00> : vector<144x128xf32>
    %57 = tpu.matmul %56, %54, %cst_39 {dimension_numbers = #tpu.dot_dimension_numbers<[1], [0], [0], [1], [0, 0, 1, 1], [], []>} : vector<144x144xbf16>, vector<144x128xbf16>, vector<144x128xf32> -> vector<144x128xf32>
    %58 = arith.addf %52, %57 : vector<144x128xf32>
    %cst_40 = arith.constant 0.000000e+00 : f32
    %59 = vector.broadcast %cst_40 : f32 to vector<144x128xf32>
    %60 = arith.maximumf %58, %59 : vector<144x128xf32>
    %61 = arith.truncf %60 : vector<144x128xf32> to vector<144x128xbf16>
    %c0_41 = arith.constant 0 : index
    %c0_42 = arith.constant 0 : index
    %62 = vector.load %arg6[%c0_41, %c0_42] : memref<128x128xbf16, #tpu.memory_space<vmem>>, vector<128x128xbf16>
    %cst_43 = arith.constant dense<0.000000e+00> : vector<144x128xf32>
    %63 = tpu.matmul %61, %62, %cst_43 {dimension_numbers = #tpu.dot_dimension_numbers<[1], [0], [0], [1], [0, 0, 1, 1], [], []>} : vector<144x128xbf16>, vector<128x128xbf16>, vector<144x128xf32> -> vector<144x128xf32>
    %c0_44 = arith.constant 0 : index
    %c0_45 = arith.constant 0 : index
    %64 = vector.load %arg8[%c0_44, %c0_45] : memref<1x128xf32, #tpu.memory_space<vmem>>, vector<1x128xf32>
    %65 = vector.broadcast %64 : vector<1x128xf32> to vector<144x128xf32>
    %66 = arith.addf %63, %65 : vector<144x128xf32>
    %67 = arith.extf %37 : vector<144x128xbf16> to vector<144x128xf32>
    %68 = arith.addf %66, %67 : vector<144x128xf32>
    %cst_46 = arith.constant 0.000000e+00 : f32
    %69 = vector.broadcast %cst_46 : f32 to vector<144x128xf32>
    %70 = arith.maximumf %68, %69 : vector<144x128xf32>
    %71 = arith.truncf %70 : vector<144x128xf32> to vector<144x128xbf16>
    %c0_47 = arith.constant 0 : index
    %c0_48 = arith.constant 0 : index
    %72 = vector.load %arg12[%c0_47, %c0_48] : memref<128x768xbf16, #tpu.memory_space<vmem>>, vector<128x768xbf16>
    %cst_49 = arith.constant dense<0.000000e+00> : vector<144x768xf32>
    %73 = tpu.matmul %71, %72, %cst_49 {dimension_numbers = #tpu.dot_dimension_numbers<[1], [0], [0], [1], [0, 0, 1, 1], [], []>} : vector<144x128xbf16>, vector<128x768xbf16>, vector<144x768xf32> -> vector<144x768xf32>
    %c0_50 = arith.constant 0 : index
    %c0_51 = arith.constant 0 : index
    %74 = vector.load %arg14[%c0_50, %c0_51] : memref<144x256xf32, #tpu.memory_space<vmem>>, vector<144x256xf32>
    %75 = vector.extract_strided_slice %73 {offsets = [0, 0], sizes = [144, 256], strides = [1, 1]} : vector<144x768xf32> to vector<144x256xf32>
    %76 = arith.truncf %75 : vector<144x256xf32> to vector<144x256xbf16>
    %c6 = arith.constant 6 : index
    %c0_52 = arith.constant 0 : index
    %c0_53 = arith.constant 0 : index
    %77 = vector.load %arg1[%c6, %c0_52, %c0_53] : memref<18x144x144xbf16, #tpu.memory_space<vmem>>, vector<1x144x144xbf16>
    %78 = vector.shape_cast %77 : vector<1x144x144xbf16> to vector<144x144xbf16>
    %cst_54 = arith.constant dense<0.000000e+00> : vector<144x256xf32>
    %79 = tpu.matmul %78, %76, %cst_54 {dimension_numbers = #tpu.dot_dimension_numbers<[1], [0], [0], [1], [0, 0, 1, 1], [], []>} : vector<144x144xbf16>, vector<144x256xbf16>, vector<144x256xf32> -> vector<144x256xf32>
    %80 = arith.addf %74, %79 : vector<144x256xf32>
    %81 = vector.extract_strided_slice %73 {offsets = [0, 256], sizes = [144, 256], strides = [1, 1]} : vector<144x768xf32> to vector<144x256xf32>
    %82 = arith.truncf %81 : vector<144x256xf32> to vector<144x256xbf16>
    %c7 = arith.constant 7 : index
    %c0_55 = arith.constant 0 : index
    %c0_56 = arith.constant 0 : index
    %83 = vector.load %arg1[%c7, %c0_55, %c0_56] : memref<18x144x144xbf16, #tpu.memory_space<vmem>>, vector<1x144x144xbf16>
    %84 = vector.shape_cast %83 : vector<1x144x144xbf16> to vector<144x144xbf16>
    %cst_57 = arith.constant dense<0.000000e+00> : vector<144x256xf32>
    %85 = tpu.matmul %84, %82, %cst_57 {dimension_numbers = #tpu.dot_dimension_numbers<[1], [0], [0], [1], [0, 0, 1, 1], [], []>} : vector<144x144xbf16>, vector<144x256xbf16>, vector<144x256xf32> -> vector<144x256xf32>
    %86 = arith.addf %80, %85 : vector<144x256xf32>
    %87 = vector.extract_strided_slice %73 {offsets = [0, 512], sizes = [144, 256], strides = [1, 1]} : vector<144x768xf32> to vector<144x256xf32>
    %88 = arith.truncf %87 : vector<144x256xf32> to vector<144x256xbf16>
    %c8 = arith.constant 8 : index
    %c0_58 = arith.constant 0 : index
    %c0_59 = arith.constant 0 : index
    %89 = vector.load %arg1[%c8, %c0_58, %c0_59] : memref<18x144x144xbf16, #tpu.memory_space<vmem>>, vector<1x144x144xbf16>
    %90 = vector.shape_cast %89 : vector<1x144x144xbf16> to vector<144x144xbf16>
    %cst_60 = arith.constant dense<0.000000e+00> : vector<144x256xf32>
    %91 = tpu.matmul %90, %88, %cst_60 {dimension_numbers = #tpu.dot_dimension_numbers<[1], [0], [0], [1], [0, 0, 1, 1], [], []>} : vector<144x144xbf16>, vector<144x256xbf16>, vector<144x256xf32> -> vector<144x256xf32>
    %92 = arith.addf %86, %91 : vector<144x256xf32>
    %cst_61 = arith.constant 0.000000e+00 : f32
    %93 = vector.broadcast %cst_61 : f32 to vector<144x256xf32>
    %94 = arith.maximumf %92, %93 : vector<144x256xf32>
    %95 = arith.truncf %94 : vector<144x256xf32> to vector<144x256xbf16>
    %c0_62 = arith.constant 0 : index
    %c0_63 = arith.constant 0 : index
    %96 = vector.load %arg11[%c0_62, %c0_63] : memref<256x128xbf16, #tpu.memory_space<vmem>>, vector<256x128xbf16>
    %cst_64 = arith.constant dense<0.000000e+00> : vector<144x128xf32>
    %97 = tpu.matmul %95, %96, %cst_64 {dimension_numbers = #tpu.dot_dimension_numbers<[1], [0], [0], [1], [0, 0, 1, 1], [], []>} : vector<144x256xbf16>, vector<256x128xbf16>, vector<144x128xf32> -> vector<144x128xf32>
    %c0_65 = arith.constant 0 : index
    %c0_66 = arith.constant 0 : index
    %98 = vector.load %arg13[%c0_65, %c0_66] : memref<1x128xf32, #tpu.memory_space<vmem>>, vector<1x128xf32>
    %99 = vector.broadcast %98 : vector<1x128xf32> to vector<144x128xf32>
    %100 = arith.addf %97, %99 : vector<144x128xf32>
    %c0_67 = arith.constant 0 : index
    %c0_68 = arith.constant 0 : index
    %101 = vector.load %arg10[%c0_67, %c0_68] : memref<128x128xbf16, #tpu.memory_space<vmem>>, vector<128x128xbf16>
    %cst_69 = arith.constant dense<0.000000e+00> : vector<144x128xf32>
    %102 = tpu.matmul %71, %101, %cst_69 {dimension_numbers = #tpu.dot_dimension_numbers<[1], [0], [0], [1], [0, 0, 1, 1], [], []>} : vector<144x128xbf16>, vector<128x128xbf16>, vector<144x128xf32> -> vector<144x128xf32>
    %103 = arith.addf %100, %102 : vector<144x128xf32>
    %cst_70 = arith.constant 0.000000e+00 : f32
    %104 = vector.broadcast %cst_70 : f32 to vector<144x128xf32>
    %105 = arith.maximumf %103, %104 : vector<144x128xf32>
    %106 = arith.truncf %105 : vector<144x128xf32> to vector<144x128xbf16>
    %c0_71 = arith.constant 0 : index
    %c0_72 = arith.constant 0 : index
    %107 = vector.load %arg16[%c0_71, %c0_72] : memref<128x384xbf16, #tpu.memory_space<vmem>>, vector<128x384xbf16>
    %cst_73 = arith.constant dense<0.000000e+00> : vector<144x384xf32>
    %108 = tpu.matmul %106, %107, %cst_73 {dimension_numbers = #tpu.dot_dimension_numbers<[1], [0], [0], [1], [0, 0, 1, 1], [], []>} : vector<144x128xbf16>, vector<128x384xbf16>, vector<144x384xf32> -> vector<144x384xf32>
    %c0_74 = arith.constant 0 : index
    %c0_75 = arith.constant 0 : index
    %109 = vector.load %arg18[%c0_74, %c0_75] : memref<144x128xf32, #tpu.memory_space<vmem>>, vector<144x128xf32>
    %110 = vector.extract_strided_slice %108 {offsets = [0, 0], sizes = [144, 128], strides = [1, 1]} : vector<144x384xf32> to vector<144x128xf32>
    %111 = arith.truncf %110 : vector<144x128xf32> to vector<144x128xbf16>
    %c9 = arith.constant 9 : index
    %c0_76 = arith.constant 0 : index
    %c0_77 = arith.constant 0 : index
    %112 = vector.load %arg1[%c9, %c0_76, %c0_77] : memref<18x144x144xbf16, #tpu.memory_space<vmem>>, vector<1x144x144xbf16>
    %113 = vector.shape_cast %112 : vector<1x144x144xbf16> to vector<144x144xbf16>
    %cst_78 = arith.constant dense<0.000000e+00> : vector<144x128xf32>
    %114 = tpu.matmul %113, %111, %cst_78 {dimension_numbers = #tpu.dot_dimension_numbers<[1], [0], [0], [1], [0, 0, 1, 1], [], []>} : vector<144x144xbf16>, vector<144x128xbf16>, vector<144x128xf32> -> vector<144x128xf32>
    %115 = arith.addf %109, %114 : vector<144x128xf32>
    %116 = vector.extract_strided_slice %108 {offsets = [0, 128], sizes = [144, 128], strides = [1, 1]} : vector<144x384xf32> to vector<144x128xf32>
    %117 = arith.truncf %116 : vector<144x128xf32> to vector<144x128xbf16>
    %c10 = arith.constant 10 : index
    %c0_79 = arith.constant 0 : index
    %c0_80 = arith.constant 0 : index
    %118 = vector.load %arg1[%c10, %c0_79, %c0_80] : memref<18x144x144xbf16, #tpu.memory_space<vmem>>, vector<1x144x144xbf16>
    %119 = vector.shape_cast %118 : vector<1x144x144xbf16> to vector<144x144xbf16>
    %cst_81 = arith.constant dense<0.000000e+00> : vector<144x128xf32>
    %120 = tpu.matmul %119, %117, %cst_81 {dimension_numbers = #tpu.dot_dimension_numbers<[1], [0], [0], [1], [0, 0, 1, 1], [], []>} : vector<144x144xbf16>, vector<144x128xbf16>, vector<144x128xf32> -> vector<144x128xf32>
    %121 = arith.addf %115, %120 : vector<144x128xf32>
    %122 = vector.extract_strided_slice %108 {offsets = [0, 256], sizes = [144, 128], strides = [1, 1]} : vector<144x384xf32> to vector<144x128xf32>
    %123 = arith.truncf %122 : vector<144x128xf32> to vector<144x128xbf16>
    %c11 = arith.constant 11 : index
    %c0_82 = arith.constant 0 : index
    %c0_83 = arith.constant 0 : index
    %124 = vector.load %arg1[%c11, %c0_82, %c0_83] : memref<18x144x144xbf16, #tpu.memory_space<vmem>>, vector<1x144x144xbf16>
    %125 = vector.shape_cast %124 : vector<1x144x144xbf16> to vector<144x144xbf16>
    %cst_84 = arith.constant dense<0.000000e+00> : vector<144x128xf32>
    %126 = tpu.matmul %125, %123, %cst_84 {dimension_numbers = #tpu.dot_dimension_numbers<[1], [0], [0], [1], [0, 0, 1, 1], [], []>} : vector<144x144xbf16>, vector<144x128xbf16>, vector<144x128xf32> -> vector<144x128xf32>
    %127 = arith.addf %121, %126 : vector<144x128xf32>
    %cst_85 = arith.constant 0.000000e+00 : f32
    %128 = vector.broadcast %cst_85 : f32 to vector<144x128xf32>
    %129 = arith.maximumf %127, %128 : vector<144x128xf32>
    %130 = arith.truncf %129 : vector<144x128xf32> to vector<144x128xbf16>
    %c0_86 = arith.constant 0 : index
    %c0_87 = arith.constant 0 : index
    %131 = vector.load %arg15[%c0_86, %c0_87] : memref<128x128xbf16, #tpu.memory_space<vmem>>, vector<128x128xbf16>
    %cst_88 = arith.constant dense<0.000000e+00> : vector<144x128xf32>
    %132 = tpu.matmul %130, %131, %cst_88 {dimension_numbers = #tpu.dot_dimension_numbers<[1], [0], [0], [1], [0, 0, 1, 1], [], []>} : vector<144x128xbf16>, vector<128x128xbf16>, vector<144x128xf32> -> vector<144x128xf32>
    %c0_89 = arith.constant 0 : index
    %c0_90 = arith.constant 0 : index
    %133 = vector.load %arg17[%c0_89, %c0_90] : memref<1x128xf32, #tpu.memory_space<vmem>>, vector<1x128xf32>
    %134 = vector.broadcast %133 : vector<1x128xf32> to vector<144x128xf32>
    %135 = arith.addf %132, %134 : vector<144x128xf32>
    %136 = arith.extf %106 : vector<144x128xbf16> to vector<144x128xf32>
    %137 = arith.addf %135, %136 : vector<144x128xf32>
    %cst_91 = arith.constant 0.000000e+00 : f32
    %138 = vector.broadcast %cst_91 : f32 to vector<144x128xf32>
    %139 = arith.maximumf %137, %138 : vector<144x128xf32>
    %140 = arith.truncf %139 : vector<144x128xf32> to vector<144x128xbf16>
    %c0_92 = arith.constant 0 : index
    %c0_93 = arith.constant 0 : index
    %141 = vector.load %arg21[%c0_92, %c0_93] : memref<128x768xbf16, #tpu.memory_space<vmem>>, vector<128x768xbf16>
    %cst_94 = arith.constant dense<0.000000e+00> : vector<144x768xf32>
    %142 = tpu.matmul %140, %141, %cst_94 {dimension_numbers = #tpu.dot_dimension_numbers<[1], [0], [0], [1], [0, 0, 1, 1], [], []>} : vector<144x128xbf16>, vector<128x768xbf16>, vector<144x768xf32> -> vector<144x768xf32>
    %c0_95 = arith.constant 0 : index
    %c0_96 = arith.constant 0 : index
    %143 = vector.load %arg23[%c0_95, %c0_96] : memref<144x256xf32, #tpu.memory_space<vmem>>, vector<144x256xf32>
    %144 = vector.extract_strided_slice %142 {offsets = [0, 0], sizes = [144, 256], strides = [1, 1]} : vector<144x768xf32> to vector<144x256xf32>
    %145 = arith.truncf %144 : vector<144x256xf32> to vector<144x256xbf16>
    %c12 = arith.constant 12 : index
    %c0_97 = arith.constant 0 : index
    %c0_98 = arith.constant 0 : index
    %146 = vector.load %arg1[%c12, %c0_97, %c0_98] : memref<18x144x144xbf16, #tpu.memory_space<vmem>>, vector<1x144x144xbf16>
    %147 = vector.shape_cast %146 : vector<1x144x144xbf16> to vector<144x144xbf16>
    %cst_99 = arith.constant dense<0.000000e+00> : vector<144x256xf32>
    %148 = tpu.matmul %147, %145, %cst_99 {dimension_numbers = #tpu.dot_dimension_numbers<[1], [0], [0], [1], [0, 0, 1, 1], [], []>} : vector<144x144xbf16>, vector<144x256xbf16>, vector<144x256xf32> -> vector<144x256xf32>
    %149 = arith.addf %143, %148 : vector<144x256xf32>
    %150 = vector.extract_strided_slice %142 {offsets = [0, 256], sizes = [144, 256], strides = [1, 1]} : vector<144x768xf32> to vector<144x256xf32>
    %151 = arith.truncf %150 : vector<144x256xf32> to vector<144x256xbf16>
    %c13 = arith.constant 13 : index
    %c0_100 = arith.constant 0 : index
    %c0_101 = arith.constant 0 : index
    %152 = vector.load %arg1[%c13, %c0_100, %c0_101] : memref<18x144x144xbf16, #tpu.memory_space<vmem>>, vector<1x144x144xbf16>
    %153 = vector.shape_cast %152 : vector<1x144x144xbf16> to vector<144x144xbf16>
    %cst_102 = arith.constant dense<0.000000e+00> : vector<144x256xf32>
    %154 = tpu.matmul %153, %151, %cst_102 {dimension_numbers = #tpu.dot_dimension_numbers<[1], [0], [0], [1], [0, 0, 1, 1], [], []>} : vector<144x144xbf16>, vector<144x256xbf16>, vector<144x256xf32> -> vector<144x256xf32>
    %155 = arith.addf %149, %154 : vector<144x256xf32>
    %156 = vector.extract_strided_slice %142 {offsets = [0, 512], sizes = [144, 256], strides = [1, 1]} : vector<144x768xf32> to vector<144x256xf32>
    %157 = arith.truncf %156 : vector<144x256xf32> to vector<144x256xbf16>
    %c14 = arith.constant 14 : index
    %c0_103 = arith.constant 0 : index
    %c0_104 = arith.constant 0 : index
    %158 = vector.load %arg1[%c14, %c0_103, %c0_104] : memref<18x144x144xbf16, #tpu.memory_space<vmem>>, vector<1x144x144xbf16>
    %159 = vector.shape_cast %158 : vector<1x144x144xbf16> to vector<144x144xbf16>
    %cst_105 = arith.constant dense<0.000000e+00> : vector<144x256xf32>
    %160 = tpu.matmul %159, %157, %cst_105 {dimension_numbers = #tpu.dot_dimension_numbers<[1], [0], [0], [1], [0, 0, 1, 1], [], []>} : vector<144x144xbf16>, vector<144x256xbf16>, vector<144x256xf32> -> vector<144x256xf32>
    %161 = arith.addf %155, %160 : vector<144x256xf32>
    %cst_106 = arith.constant 0.000000e+00 : f32
    %162 = vector.broadcast %cst_106 : f32 to vector<144x256xf32>
    %163 = arith.maximumf %161, %162 : vector<144x256xf32>
    %164 = arith.truncf %163 : vector<144x256xf32> to vector<144x256xbf16>
    %c0_107 = arith.constant 0 : index
    %c0_108 = arith.constant 0 : index
    %165 = vector.load %arg20[%c0_107, %c0_108] : memref<256x128xbf16, #tpu.memory_space<vmem>>, vector<256x128xbf16>
    %cst_109 = arith.constant dense<0.000000e+00> : vector<144x128xf32>
    %166 = tpu.matmul %164, %165, %cst_109 {dimension_numbers = #tpu.dot_dimension_numbers<[1], [0], [0], [1], [0, 0, 1, 1], [], []>} : vector<144x256xbf16>, vector<256x128xbf16>, vector<144x128xf32> -> vector<144x128xf32>
    %c0_110 = arith.constant 0 : index
    %c0_111 = arith.constant 0 : index
    %167 = vector.load %arg22[%c0_110, %c0_111] : memref<1x128xf32, #tpu.memory_space<vmem>>, vector<1x128xf32>
    %168 = vector.broadcast %167 : vector<1x128xf32> to vector<144x128xf32>
    %169 = arith.addf %166, %168 : vector<144x128xf32>
    %c0_112 = arith.constant 0 : index
    %c0_113 = arith.constant 0 : index
    %170 = vector.load %arg19[%c0_112, %c0_113] : memref<128x128xbf16, #tpu.memory_space<vmem>>, vector<128x128xbf16>
    %cst_114 = arith.constant dense<0.000000e+00> : vector<144x128xf32>
    %171 = tpu.matmul %140, %170, %cst_114 {dimension_numbers = #tpu.dot_dimension_numbers<[1], [0], [0], [1], [0, 0, 1, 1], [], []>} : vector<144x128xbf16>, vector<128x128xbf16>, vector<144x128xf32> -> vector<144x128xf32>
    %172 = arith.addf %169, %171 : vector<144x128xf32>
    %cst_115 = arith.constant 0.000000e+00 : f32
    %173 = vector.broadcast %cst_115 : f32 to vector<144x128xf32>
    %174 = arith.maximumf %172, %173 : vector<144x128xf32>
    %175 = arith.truncf %174 : vector<144x128xf32> to vector<144x128xbf16>
    %c0_116 = arith.constant 0 : index
    %c0_117 = arith.constant 0 : index
    %176 = vector.load %arg25[%c0_116, %c0_117] : memref<128x384xbf16, #tpu.memory_space<vmem>>, vector<128x384xbf16>
    %cst_118 = arith.constant dense<0.000000e+00> : vector<144x384xf32>
    %177 = tpu.matmul %175, %176, %cst_118 {dimension_numbers = #tpu.dot_dimension_numbers<[1], [0], [0], [1], [0, 0, 1, 1], [], []>} : vector<144x128xbf16>, vector<128x384xbf16>, vector<144x384xf32> -> vector<144x384xf32>
    %c0_119 = arith.constant 0 : index
    %c0_120 = arith.constant 0 : index
    %178 = vector.load %arg27[%c0_119, %c0_120] : memref<144x128xf32, #tpu.memory_space<vmem>>, vector<144x128xf32>
    %179 = vector.extract_strided_slice %177 {offsets = [0, 0], sizes = [144, 128], strides = [1, 1]} : vector<144x384xf32> to vector<144x128xf32>
    %180 = arith.truncf %179 : vector<144x128xf32> to vector<144x128xbf16>
    %c15 = arith.constant 15 : index
    %c0_121 = arith.constant 0 : index
    %c0_122 = arith.constant 0 : index
    %181 = vector.load %arg1[%c15, %c0_121, %c0_122] : memref<18x144x144xbf16, #tpu.memory_space<vmem>>, vector<1x144x144xbf16>
    %182 = vector.shape_cast %181 : vector<1x144x144xbf16> to vector<144x144xbf16>
    %cst_123 = arith.constant dense<0.000000e+00> : vector<144x128xf32>
    %183 = tpu.matmul %182, %180, %cst_123 {dimension_numbers = #tpu.dot_dimension_numbers<[1], [0], [0], [1], [0, 0, 1, 1], [], []>} : vector<144x144xbf16>, vector<144x128xbf16>, vector<144x128xf32> -> vector<144x128xf32>
    %184 = arith.addf %178, %183 : vector<144x128xf32>
    %185 = vector.extract_strided_slice %177 {offsets = [0, 128], sizes = [144, 128], strides = [1, 1]} : vector<144x384xf32> to vector<144x128xf32>
    %186 = arith.truncf %185 : vector<144x128xf32> to vector<144x128xbf16>
    %c16 = arith.constant 16 : index
    %c0_124 = arith.constant 0 : index
    %c0_125 = arith.constant 0 : index
    %187 = vector.load %arg1[%c16, %c0_124, %c0_125] : memref<18x144x144xbf16, #tpu.memory_space<vmem>>, vector<1x144x144xbf16>
    %188 = vector.shape_cast %187 : vector<1x144x144xbf16> to vector<144x144xbf16>
    %cst_126 = arith.constant dense<0.000000e+00> : vector<144x128xf32>
    %189 = tpu.matmul %188, %186, %cst_126 {dimension_numbers = #tpu.dot_dimension_numbers<[1], [0], [0], [1], [0, 0, 1, 1], [], []>} : vector<144x144xbf16>, vector<144x128xbf16>, vector<144x128xf32> -> vector<144x128xf32>
    %190 = arith.addf %184, %189 : vector<144x128xf32>
    %191 = vector.extract_strided_slice %177 {offsets = [0, 256], sizes = [144, 128], strides = [1, 1]} : vector<144x384xf32> to vector<144x128xf32>
    %192 = arith.truncf %191 : vector<144x128xf32> to vector<144x128xbf16>
    %c17 = arith.constant 17 : index
    %c0_127 = arith.constant 0 : index
    %c0_128 = arith.constant 0 : index
    %193 = vector.load %arg1[%c17, %c0_127, %c0_128] : memref<18x144x144xbf16, #tpu.memory_space<vmem>>, vector<1x144x144xbf16>
    %194 = vector.shape_cast %193 : vector<1x144x144xbf16> to vector<144x144xbf16>
    %cst_129 = arith.constant dense<0.000000e+00> : vector<144x128xf32>
    %195 = tpu.matmul %194, %192, %cst_129 {dimension_numbers = #tpu.dot_dimension_numbers<[1], [0], [0], [1], [0, 0, 1, 1], [], []>} : vector<144x144xbf16>, vector<144x128xbf16>, vector<144x128xf32> -> vector<144x128xf32>
    %196 = arith.addf %190, %195 : vector<144x128xf32>
    %cst_130 = arith.constant 0.000000e+00 : f32
    %197 = vector.broadcast %cst_130 : f32 to vector<144x128xf32>
    %198 = arith.maximumf %196, %197 : vector<144x128xf32>
    %199 = arith.truncf %198 : vector<144x128xf32> to vector<144x128xbf16>
    %c0_131 = arith.constant 0 : index
    %c0_132 = arith.constant 0 : index
    %200 = vector.load %arg24[%c0_131, %c0_132] : memref<128x128xbf16, #tpu.memory_space<vmem>>, vector<128x128xbf16>
    %cst_133 = arith.constant dense<0.000000e+00> : vector<144x128xf32>
    %201 = tpu.matmul %199, %200, %cst_133 {dimension_numbers = #tpu.dot_dimension_numbers<[1], [0], [0], [1], [0, 0, 1, 1], [], []>} : vector<144x128xbf16>, vector<128x128xbf16>, vector<144x128xf32> -> vector<144x128xf32>
    %c0_134 = arith.constant 0 : index
    %c0_135 = arith.constant 0 : index
    %202 = vector.load %arg26[%c0_134, %c0_135] : memref<1x128xf32, #tpu.memory_space<vmem>>, vector<1x128xf32>
    %203 = vector.broadcast %202 : vector<1x128xf32> to vector<144x128xf32>
    %204 = arith.addf %201, %203 : vector<144x128xf32>
    %205 = arith.extf %175 : vector<144x128xbf16> to vector<144x128xf32>
    %206 = arith.addf %204, %205 : vector<144x128xf32>
    %cst_136 = arith.constant 0.000000e+00 : f32
    %207 = vector.broadcast %cst_136 : f32 to vector<144x128xf32>
    %208 = arith.maximumf %206, %207 : vector<144x128xf32>
    %209 = arith.truncf %208 : vector<144x128xf32> to vector<144x128xbf16>
    %210 = arith.extf %209 : vector<144x128xbf16> to vector<144x128xf32>
    %211 = vector.extract_strided_slice %210 {offsets = [0, 0], sizes = [144, 32], strides = [1, 1]} : vector<144x128xf32> to vector<144x32xf32>
    %212 = vector.extract_strided_slice %210 {offsets = [0, 32], sizes = [144, 32], strides = [1, 1]} : vector<144x128xf32> to vector<144x32xf32>
    %213 = arith.addf %211, %212 : vector<144x32xf32>
    %214 = vector.extract_strided_slice %210 {offsets = [0, 64], sizes = [144, 32], strides = [1, 1]} : vector<144x128xf32> to vector<144x32xf32>
    %215 = arith.addf %213, %214 : vector<144x32xf32>
    %216 = vector.extract_strided_slice %210 {offsets = [0, 96], sizes = [144, 32], strides = [1, 1]} : vector<144x128xf32> to vector<144x32xf32>
    %217 = arith.addf %215, %216 : vector<144x32xf32>
    %cst_137 = arith.constant 2.500000e-01 : f32
    %218 = vector.broadcast %cst_137 : f32 to vector<144x32xf32>
    %219 = arith.mulf %217, %218 : vector<144x32xf32>
    %220 = arith.truncf %219 : vector<144x32xf32> to vector<144x32xbf16>
    %c0_138 = arith.constant 0 : index
    %c0_139 = arith.constant 0 : index
    %221 = vector.load %arg41[%c0_138, %c0_139] : memref<12x144xbf16, #tpu.memory_space<vmem>>, vector<12x144xbf16>
    %cst_140 = arith.constant dense<0.000000e+00> : vector<12x32xf32>
    %222 = tpu.matmul %221, %220, %cst_140 {dimension_numbers = #tpu.dot_dimension_numbers<[1], [0], [0], [1], [0, 0, 1, 1], [], []>} : vector<12x144xbf16>, vector<144x32xbf16>, vector<12x32xf32> -> vector<12x32xf32>
    %223 = arith.truncf %222 : vector<12x32xf32> to vector<12x32xbf16>
    %c0_141 = arith.constant 0 : index
    %c0_142 = arith.constant 0 : index
    %224 = vector.load %arg30[%c0_141, %c0_142] : memref<12x12xbf16, #tpu.memory_space<vmem>>, vector<12x12xbf16>
    %cst_143 = arith.constant dense<0.000000e+00> : vector<12x32xf32>
    %225 = tpu.matmul %224, %223, %cst_143 {dimension_numbers = #tpu.dot_dimension_numbers<[1], [0], [0], [1], [0, 0, 1, 1], [], []>} : vector<12x12xbf16>, vector<12x32xbf16>, vector<12x32xf32> -> vector<12x32xf32>
    %c0_144 = arith.constant 0 : index
    %c0_145 = arith.constant 0 : index
    %226 = vector.load %arg31[%c0_144, %c0_145] : memref<12x12xbf16, #tpu.memory_space<vmem>>, vector<12x12xbf16>
    %cst_146 = arith.constant dense<0.000000e+00> : vector<12x32xf32>
    %227 = tpu.matmul %226, %223, %cst_146 {dimension_numbers = #tpu.dot_dimension_numbers<[1], [0], [0], [1], [0, 0, 1, 1], [], []>} : vector<12x12xbf16>, vector<12x32xbf16>, vector<12x32xf32> -> vector<12x32xf32>
    %228 = arith.truncf %225 : vector<12x32xf32> to vector<12x32xbf16>
    %c0_147 = arith.constant 0 : index
    %c0_148 = arith.constant 0 : index
    %229 = vector.load %arg32[%c0_147, %c0_148] : memref<32x32xbf16, #tpu.memory_space<vmem>>, vector<32x32xbf16>
    %cst_149 = arith.constant dense<0.000000e+00> : vector<12x32xf32>
    %230 = tpu.matmul %228, %229, %cst_149 {dimension_numbers = #tpu.dot_dimension_numbers<[1], [0], [0], [1], [0, 0, 1, 1], [], []>} : vector<12x32xbf16>, vector<32x32xbf16>, vector<12x32xf32> -> vector<12x32xf32>
    %231 = arith.truncf %227 : vector<12x32xf32> to vector<12x32xbf16>
    %c0_150 = arith.constant 0 : index
    %c0_151 = arith.constant 0 : index
    %232 = vector.load %arg33[%c0_150, %c0_151] : memref<32x32xbf16, #tpu.memory_space<vmem>>, vector<32x32xbf16>
    %cst_152 = arith.constant dense<0.000000e+00> : vector<12x32xf32>
    %233 = tpu.matmul %231, %232, %cst_152 {dimension_numbers = #tpu.dot_dimension_numbers<[1], [0], [0], [1], [0, 0, 1, 1], [], []>} : vector<12x32xbf16>, vector<32x32xbf16>, vector<12x32xf32> -> vector<12x32xf32>
    %234 = arith.addf %230, %233 : vector<12x32xf32>
    %c0_153 = arith.constant 0 : index
    %c0_154 = arith.constant 0 : index
    %235 = vector.load %arg34[%c0_153, %c0_154] : memref<1x32xf32, #tpu.memory_space<vmem>>, vector<1x32xf32>
    %236 = vector.broadcast %235 : vector<1x32xf32> to vector<12x32xf32>
    %237 = arith.addf %234, %236 : vector<12x32xf32>
    %cst_155 = arith.constant 0.000000e+00 : f32
    %238 = vector.broadcast %cst_155 : f32 to vector<12x32xf32>
    %239 = arith.maximumf %237, %238 : vector<12x32xf32>
    %240 = arith.truncf %239 : vector<12x32xf32> to vector<12x32xbf16>
    %c0_156 = arith.constant 0 : index
    %c0_157 = arith.constant 0 : index
    %241 = vector.load %arg35[%c0_156, %c0_157] : memref<12x12xbf16, #tpu.memory_space<vmem>>, vector<12x12xbf16>
    %cst_158 = arith.constant dense<0.000000e+00> : vector<12x32xf32>
    %242 = tpu.matmul %241, %240, %cst_158 {dimension_numbers = #tpu.dot_dimension_numbers<[1], [0], [0], [1], [0, 0, 1, 1], [], []>} : vector<12x12xbf16>, vector<12x32xbf16>, vector<12x32xf32> -> vector<12x32xf32>
    %c0_159 = arith.constant 0 : index
    %c0_160 = arith.constant 0 : index
    %243 = vector.load %arg36[%c0_159, %c0_160] : memref<12x12xbf16, #tpu.memory_space<vmem>>, vector<12x12xbf16>
    %cst_161 = arith.constant dense<0.000000e+00> : vector<12x32xf32>
    %244 = tpu.matmul %243, %240, %cst_161 {dimension_numbers = #tpu.dot_dimension_numbers<[1], [0], [0], [1], [0, 0, 1, 1], [], []>} : vector<12x12xbf16>, vector<12x32xbf16>, vector<12x32xf32> -> vector<12x32xf32>
    %245 = arith.truncf %242 : vector<12x32xf32> to vector<12x32xbf16>
    %c0_162 = arith.constant 0 : index
    %c0_163 = arith.constant 0 : index
    %246 = vector.load %arg37[%c0_162, %c0_163] : memref<32x32xbf16, #tpu.memory_space<vmem>>, vector<32x32xbf16>
    %cst_164 = arith.constant dense<0.000000e+00> : vector<12x32xf32>
    %247 = tpu.matmul %245, %246, %cst_164 {dimension_numbers = #tpu.dot_dimension_numbers<[1], [0], [0], [1], [0, 0, 1, 1], [], []>} : vector<12x32xbf16>, vector<32x32xbf16>, vector<12x32xf32> -> vector<12x32xf32>
    %248 = arith.truncf %244 : vector<12x32xf32> to vector<12x32xbf16>
    %c0_165 = arith.constant 0 : index
    %c0_166 = arith.constant 0 : index
    %249 = vector.load %arg38[%c0_165, %c0_166] : memref<32x32xbf16, #tpu.memory_space<vmem>>, vector<32x32xbf16>
    %cst_167 = arith.constant dense<0.000000e+00> : vector<12x32xf32>
    %250 = tpu.matmul %248, %249, %cst_167 {dimension_numbers = #tpu.dot_dimension_numbers<[1], [0], [0], [1], [0, 0, 1, 1], [], []>} : vector<12x32xbf16>, vector<32x32xbf16>, vector<12x32xf32> -> vector<12x32xf32>
    %251 = arith.addf %247, %250 : vector<12x32xf32>
    %c0_168 = arith.constant 0 : index
    %c0_169 = arith.constant 0 : index
    %252 = vector.load %arg39[%c0_168, %c0_169] : memref<1x32xf32, #tpu.memory_space<vmem>>, vector<1x32xf32>
    %253 = vector.broadcast %252 : vector<1x32xf32> to vector<12x32xf32>
    %254 = arith.addf %251, %253 : vector<12x32xf32>
    %cst_170 = arith.constant 0.000000e+00 : f32
    %255 = vector.broadcast %cst_170 : f32 to vector<12x32xf32>
    %256 = arith.maximumf %254, %255 : vector<12x32xf32>
    %c0_171 = arith.constant 0 : index
    %c0_172 = arith.constant 0 : index
    %257 = vector.load %arg40[%c0_171, %c0_172] : memref<2x12xbf16, #tpu.memory_space<vmem>>, vector<2x12xbf16>
    %258 = arith.truncf %256 : vector<12x32xf32> to vector<12x32xbf16>
    %cst_173 = arith.constant dense<0.000000e+00> : vector<2x32xf32>
    %259 = tpu.matmul %257, %258, %cst_173 {dimension_numbers = #tpu.dot_dimension_numbers<[1], [0], [0], [1], [0, 0, 1, 1], [], []>} : vector<2x12xbf16>, vector<12x32xbf16>, vector<2x32xf32> -> vector<2x32xf32>
    %c0_174 = arith.constant 0 : index
    %c0_175 = arith.constant 0 : index
    %260 = vector.load %arg42[%c0_174, %c0_175] : memref<2x32xf32, #tpu.memory_space<vmem>>, vector<2x32xf32>
    tpu.vector_store %arg42[%c0_174, %c0_175], %259 {strides = array<i32>} : memref<2x32xf32, #tpu.memory_space<vmem>>, vector<2x32xf32>,
    return
  }
}

</mosaic_0001>

<bundles_post_ra>
// kernel: forward.1
= control target key start
LH: loop header
LB: loop body
LE: loop exit
PB: predicated region body
PF: predicated region fallthrough
CT: control target
= control target key end

     0   :  { %s15216_s6 = smov 1   ;;  %s15217_s10 = smov 2   ;;  %s18632_s0 = inlined_call_operand.smem [shape: u32[43], index: -1, kind: input, shape index: {}] }
   0x1   :  { %s15315_s5 = sld [smem:[%s18632_s0]]   ;;  %s15218_s14 = smov 3  }
   0x2   :  { %s15320_s9 = sld [smem:[%s18632_s0 + %s15216_s6]]   ;;  %s15219_s18 = smov 4  }
   0x3   :  { %s15325_s13 = sld [smem:[%s18632_s0 + %s15217_s10]]   ;;  %s15220_s22 = smov 5  }
   0x4   :  { %s15330_s17 = sld [smem:[%s18632_s0 + %s15218_s14]]   ;;  %s15221_s26 = smov 6  }
   0x5   :  { %s15335_s21 = sld [smem:[%s18632_s0 + %s15219_s18]]   ;;  %s15222_s30 = smov 7  }
   0x6   :  { %s15340_s25 = sld [smem:[%s18632_s0 + %s15220_s22]]   ;;  %s15223_s4 = smov 8  }
   0x7   :  { %18696 = sst [smem:[#allocation80_spill]] %s15315_s5  ;;  %s15224_s10 = smov 9  }
   0x8   :  { %18697 = sst [smem:[#allocation81_spill]] %s15320_s9  ;;  %s15225_s15 = smov 10  }
   0x9   :  { %s15345_s29 = sld [smem:[%s18632_s0 + %s15221_s26]]   ;;  %s15226_s20 = smov 11  }
   0xa   :  { %18698 = sst [smem:[#allocation82_spill]] %s15330_s17  ;;  %s15227_s26 = smov 12  }
   0xb   :  { %s15350_s3 = sld [smem:[%s18632_s0 + %s15222_s30]]   ;;  %s15228_s1 = smov 13  }
   0xc   :  { %18699 = sst [smem:[#allocation83_spill]] %s15340_s25  ;;  %s15229_s7 = smov 14  }
   0xd   :  { %s15355_s8 = sld [smem:[%s18632_s0 + %s15223_s4]]   ;;  %s15231_s22 = smov 16  }
   0xe   :  { %s15360_s14 = sld [smem:[%s18632_s0 + %s15224_s10]]   ;;  %s15232_s28 = smov 17  }
   0xf   :  { %s15365_s19 = sld [smem:[%s18632_s0 + %s15225_s15]]   ;;  %s15230_s15 = smov 15  }
  0x10   :  { %s15370_s24 = sld [smem:[%s18632_s0 + %s15226_s20]]  }
  0x11   :  { %18700 = sst [smem:[#allocation84_spill]] %s15350_s3 }
  0x12   :  { %s15375_s30 = sld [smem:[%s18632_s0 + %s15227_s26]]  }
  0x13   :  { %s15380_s6 = sld [smem:[%s18632_s0 + %s15228_s1]]  }
  0x14   :  { %18701 = sst [smem:[#allocation85_spill]] %s15360_s14 }
  0x15   :  { %s15385_s12 = sld [smem:[%s18632_s0 + %s15229_s7]]   ;;  %s15233_s7 = smov 18  }
  0x16   :  { %18702 = sst [smem:[#allocation86_spill]] %s15370_s24 }
  0x17   :  { %s15390_s20 = sld [smem:[%s18632_s0 + %s15230_s15]]   ;;  %s15234_s15 = smov 19  }
  0x18   :  { %18703 = sst [smem:[#allocation87_spill]] %s15375_s30 }
  0x19   :  { %s15395_s27 = sld [smem:[%s18632_s0 + %s15231_s22]]   ;;  %s15235_s22 = smov 20  }
  0x1a   :  { %s15400_s4 = sld [smem:[%s18632_s0 + %s15232_s28]]   ;;  %s15236_s28 = smov 21  }
  0x1b   :  { %18704 = sst [smem:[#allocation88_spill]] %s15385_s12 }
  0x1c   :  { %s15405_s12 = sld [smem:[%s18632_s0 + %s15233_s7]]   ;;  %s15237_s7 = smov 22  }
  0x1d   :  { %18705 = sst [smem:[#allocation89_spill]] %s15390_s20 }
  0x1e   :  { %s15410_s30 = sld [smem:[%s18632_s0 + %s15234_s15]]   ;;  %s15238_s15 = smov 23  }
  0x1f   :  { %s15415_s5 = sld [smem:[%s18632_s0 + %s15235_s22]]   ;;  %s15239_s22 = smov 24  }
  0x20   :  { %18706 = sst [smem:[#allocation90_spill]] %s15400_s4 }
  0x21   :  { %s15420_s4 = sld [smem:[%s18632_s0 + %s15236_s28]]   ;;  %s15240_s28 = smov 25  }
  0x22   :  { %s15425_s20 = sld [smem:[%s18632_s0 + %s15237_s7]]   ;;  %s15241_s7 = smov 26  }
  0x23   :  { %s15435_s24 = sld [smem:[%s18632_s0 + %s15239_s22]]   ;;  %s15243_s22 = smov 28  }
  0x24   :  { %18707 = sst [smem:[#allocation91_spill]] %s15410_s30 }
  0x25   :  { %s15430_s30 = sld [smem:[%s18632_s0 + %s15238_s15]]   ;;  %s15242_s15 = smov 27  }
  0x26   :  { %s15455_s14 = sld [smem:[%s18632_s0 + %s15243_s22]]   ;;  %s15247_s22 = smov 32  }
  0x27   :  { %18708 = sst [smem:[#allocation92_spill]] %s15420_s4 }
  0x28   :  { %18709 = sst [smem:[#allocation93_spill]] %s15425_s20 }
  0x29   :  { %s15440_s4 = sld [smem:[%s18632_s0 + %s15240_s28]]   ;;  %s15244_s28 = smov 29  }
  0x2a   :  { %s15445_s20 = sld [smem:[%s18632_s0 + %s15241_s7]]   ;;  %s15245_s7 = smov 30  }
  0x2b   :  { %18710 = sst [smem:[#allocation94_spill]] %s15430_s30 }
  0x2c   :  { %s15450_s30 = sld [smem:[%s18632_s0 + %s15242_s15]]   ;;  %s15246_s15 = smov 31  }
  0x2d   :  { %s15465_s3 = sld [smem:[%s18632_s0 + %s15245_s7]]   ;;  %s15249_s7 = smov 34  }
  0x2e   :  { %s15475_s25 = sld [smem:[%s18632_s0 + %s15247_s22]]   ;;  %s15251_s22 = smov 36  }
  0x2f   :  { %18711 = sst [smem:[#allocation95_spill]] %s15440_s4 }
  0x30   :  { %s15460_s4 = sld [smem:[%s18632_s0 + %s15244_s28]]   ;;  %s15248_s28 = smov 33  }
  0x31   :  { %s15485_s17 = sld [smem:[%s18632_s0 + %s15249_s7]]   ;;  %s15253_s7 = smov 38  }
  0x32   :  { %18712 = sst [smem:[#allocation96_spill]] %s15450_s30 }
  0x33   :  { %s15470_s30 = sld [smem:[%s18632_s0 + %s15246_s15]]   ;;  %s15250_s15 = smov 35  }
  0x34   :  { %s15495_s9 = sld [smem:[%s18632_s0 + %s15251_s22]]   ;;  %s15255_s22 = smov 40  }
  0x36   :  { %18713 = sst [smem:[#allocation97_spill]] %s15460_s4 }
  0x37   :  { %s15480_s4 = sld [smem:[%s18632_s0 + %s15248_s28]]   ;;  %s15252_s28 = smov 37  }
  0x38   :  { %18716 = sst [smem:[#allocation100_spill]] %s15485_s17 }
  0x39   :  { %18714 = sst [smem:[#allocation98_spill]] %s15470_s30 }
  0x3a   :  { %s15490_s30 = sld [smem:[%s18632_s0 + %s15250_s15]]   ;;  %s15254_s15 = smov 39  }
  0x3b   :  { %18718 = sst [smem:[#allocation102_spill]] %s15495_s9 }
  0x3c   :  { %s15505_s17 = sld [smem:[%s18632_s0 + %s15253_s7]]   ;;  %s15257_s7 = smov 42  }
  0x3d   :  { %18715 = sst [smem:[#allocation99_spill]] %s15480_s4 }
  0x3e   :  { %s15500_s4 = sld [smem:[%s18632_s0 + %s15252_s28]]   ;;  %s15256_s28 = smov 41  }
  0x3f   :  { %s15515_s9 = sld [smem:[%s18632_s0 + %s15255_s22]]  }
  0x40   :  { %18717 = sst [smem:[#allocation101_spill]] %s15490_s30 }
  0x41   :  { %s15510_s30 = sld [smem:[%s18632_s0 + %s15254_s15]]  }
  0x42   :  { %18720 = sst [smem:[#allocation104_spill]] %s15505_s17 }
  0x43   :  { %s15525_s17 = sld [smem:[%s18632_s0 + %s15257_s7]]  }
  0x44   :  { %18719 = sst [smem:[#allocation103_spill]] %s15500_s4 }
  0x45   :  { %s15520_s4 = sld [smem:[%s18632_s0 + %s15256_s28]]  }
  0x46   :  { %90 = vsyncpa [#allocation3], 0 }
  0x47   :  { %91 = vsyncpa [#allocation6], 0 }
  0x48   :  { %92 = vsyncpa [#allocation9], 0 }
  0x49   :  { %93 = vsyncpa [#allocation12], 0 }
  0x4a   :  { %94 = vsyncpa [#allocation15], 0 }
  0x4b   :  { %95 = vsyncpa [#allocation18], 0 }
  0x4c   :  { %96 = vsyncpa [#allocation21], 0 }
  0x4d   :  { %97 = vsyncpa [#allocation24], 0 }
  0x4e   :  { %98 = vsyncpa [#allocation27], 0 }
  0x4f   :  { %99 = vsyncpa [#allocation30], 0 }
  0x50   :  { %100 = vsyncpa [#allocation33], 0 }
  0x51   :  { %101 = vsyncpa [#allocation36], 0 }
  0x52   :  { %102 = vsyncpa [#allocation39], 0 }
  0x53   :  { %103 = vsyncpa [#allocation42], 0 }
  0x54   :  { %104 = vsyncpa [#allocation45], 0 }
  0x55   :  { %105 = vsyncpa [#allocation48], 0 }
  0x56   :  { %106 = vsyncpa [#allocation51], 0 }
  0x57   :  { %107 = vsyncpa [#allocation54], 0 }
  0x58   :  { %108 = vsyncpa [#allocation57], 0 }
  0x59   :  { %109 = vsyncpa [#allocation4], 0  ;;  %s15258_s0 = smov [#allocation5]  }
  0x5a   :  { %s129_s15 = sshll.u32 %s15258_s0, 4  ;;  %s130_s15 = int_to_ptr.vmem [resolvable:$true] %s129_s15 }
  0x5b   :  { %s14424_s16 = scalar_lea.vmem %s130_s15, 1024  ;;  %p14429_p1 = scmp.lt.s32.totalorder %s130_s15, %s130_s15 }
  0x5c   :  { %p14425_p0 = scmp.ne.s32.totalorder %s130_s15, %s14424_s16  ;;  %p14430_p2 = scmp.lt.s32.totalorder %s14424_s16, %s14424_s16 }
  0x5e   :  { %p14431_p3 = por %p14430_p2, %p14429_p1 }
  0x60   :  { %p14432_p4 = pnand %p14431_p3, %p14425_p0 }
  0x62   :  { %14435 = shalt.err (!%p14432_p4)
}
  0x63   :  { %s15259_s18 = smov 64   ;;  %s15260_s22 = smov 4  }
  0x64   :  { %135 = dma.hbm_to_vmem [thread:$0]  %s15325_s13, 1024, %s130_s15, [#allocation6], %s15259_s18, %s15259_s18, %s15260_s22  }
  0x65   :  { %s15261_s23 = smov [#allocation8]   ;;  %s15262_s28 = smov [#allocation11]  }
  0x66   :  { %s154_s26 = sshll.u32 %s15261_s23, 4  ;;  %s175_s1 = sshll.u32 %s15262_s28, 4  ;;  %s155_s26 = int_to_ptr.vmem [resolvable:$true] %s154_s26  ;;  %s176_s1 = int_to_ptr.vmem [resolvable:$true] %s175_s1 }
  0x67   :  { %s14444_s2 = scalar_lea.vmem %s155_s26, 16  ;;  %s14448_s7 = scalar_lea.vmem %s155_s26, 32 }
  0x68   :  { %p14445_p5 = scmp.ne.s32.totalorder %s155_s26, %s14444_s2  ;;  %p14449_p6 = scmp.lt.s32.totalorder %s155_s26, %s155_s26 }
  0x69   :  { %p14450_p7 = scmp.lt.s32.totalorder %s14448_s7, %s14444_s2 }
  0x6b   :  { %p14451_p8 = por %p14450_p7, %p14449_p6 }
  0x6d   :  { %p14452_p9 = pnand %p14451_p8, %p14445_p5 }
  0x6f   :  { %14455 = shalt.err (!%p14452_p9)
}
  0x70   :  { %157 = dma.hbm_to_vmem [thread:$0]  %s15335_s21, 16, %s155_s26, [#allocation9]  }
  0x71   :  { %s14464_s10 = scalar_lea.vmem %s176_s1, 1024  ;;  %p14469_p11 = scmp.lt.s32.totalorder %s176_s1, %s176_s1 }
  0x72   :  { %p14465_p10 = scmp.ne.s32.totalorder %s176_s1, %s14464_s10  ;;  %p14470_p12 = scmp.lt.s32.totalorder %s14464_s10, %s14464_s10 }
  0x74   :  { %p14471_p13 = por %p14470_p12, %p14469_p11 }
  0x76   :  { %p14472_p0 = pnand %p14471_p13, %p14465_p10 }
  0x78   :  { %14475 = shalt.err (!%p14472_p0)
}
  0x79   :  { %181 = dma.hbm_to_vmem [thread:$0]  %s15345_s29, 1024, %s176_s1, [#allocation12], %s15259_s18, %s15259_s18, %s15260_s22  }
  0x7a   :  { %s15263_s13 = smov [#allocation14]   ;;  %s15264_s0 = smov [#allocation17]  }
  0x7b   :  { %s200_s11 = sshll.u32 %s15263_s13, 4  ;;  %s221_s15 = sshll.u32 %s15264_s0, 4  ;;  %s201_s11 = int_to_ptr.vmem [resolvable:$true] %s200_s11  ;;  %s222_s15 = int_to_ptr.vmem [resolvable:$true] %s221_s15 }
  0x7c   :  { %s14484_s16 = scalar_lea.vmem %s201_s11, 16  ;;  %s14488_s21 = scalar_lea.vmem %s201_s11, 32 }
  0x7d   :  { %p14485_p1 = scmp.ne.s32.totalorder %s201_s11, %s14484_s16  ;;  %p14489_p2 = scmp.lt.s32.totalorder %s201_s11, %s201_s11 }
  0x7e   :  { %p14490_p3 = scmp.lt.s32.totalorder %s14488_s21, %s14484_s16 }
  0x80   :  { %p14491_p4 = por %p14490_p3, %p14489_p2 }
  0x82   :  { %p14492_p5 = pnand %p14491_p4, %p14485_p1 }
  0x84   :  { %14495 = shalt.err (!%p14492_p5)
}
  0x85   :  { %203 = dma.hbm_to_vmem [thread:$0]  %s15355_s8, 16, %s201_s11, [#allocation15]  }
  0x86   :  { %s14504_s23 = scalar_lea.vmem %s222_s15, 1024  ;;  %p14509_p7 = scmp.lt.s32.totalorder %s222_s15, %s222_s15 }
  0x87   :  { %p14505_p6 = scmp.ne.s32.totalorder %s222_s15, %s14504_s23  ;;  %p14510_p8 = scmp.lt.s32.totalorder %s14504_s23, %s14504_s23 }
  0x89   :  { %p14511_p9 = por %p14510_p8, %p14509_p7 }
  0x8b   :  { %p14512_p10 = pnand %p14511_p9, %p14505_p6 }
  0x8d   :  { %14515 = shalt.err (!%p14512_p10)
}
  0x8e   :  { %227 = dma.hbm_to_vmem [thread:$0]  %s15365_s19, 1024, %s222_s15, [#allocation18], %s15259_s18, %s15259_s18, %s15260_s22  }
  0x8f   :  { %s15265_s29 = smov [#allocation20]  }
  0x90   :  { %s248_s26 = sshll.u32 %s15265_s29, 4  ;;  %s249_s26 = int_to_ptr.vmem [resolvable:$true] %s248_s26 }
  0x91   :  { %s14524_s28 = scalar_lea.vmem %s249_s26, 16  ;;  %s14528_s1 = scalar_lea.vmem %s249_s26, 32 }
  0x92   :  { %p14525_p11 = scmp.ne.s32.totalorder %s249_s26, %s14524_s28  ;;  %p14529_p12 = scmp.lt.s32.totalorder %s249_s26, %s249_s26 }
  0x93   :  { %p14530_p13 = scmp.lt.s32.totalorder %s14528_s1, %s14524_s28 }
  0x95   :  { %p14531_p0 = por %p14530_p13, %p14529_p12 }
  0x97   :  { %p14532_p1 = pnand %p14531_p0, %p14525_p11 }
  0x99   :  { %14535 = shalt.err (!%p14532_p1)
}
  0x9a   :  { %251 = dma.hbm_to_vmem [thread:$0]  %s15380_s6, 16, %s249_s26, [#allocation21]  }
  0x9b   :  { %s15266_s8 = smov [#allocation23]  }
  0x9c   :  { %s271_s2 = sshll.u32 %s15266_s8, 4  ;;  %s272_s2 = int_to_ptr.vmem [resolvable:$true] %s271_s2 }
  0x9d   :  { %s14544_s7 = scalar_lea.vmem %s272_s2, 3072  ;;  %p14549_p3 = scmp.lt.s32.totalorder %s272_s2, %s272_s2 }
  0x9e   :  { %p14545_p2 = scmp.ne.s32.totalorder %s272_s2, %s14544_s7  ;;  %p14550_p4 = scmp.lt.s32.totalorder %s14544_s7, %s14544_s7 }
  0xa0   :  { %p14551_p5 = por %p14550_p4, %p14549_p3 }
  0xa2   :  { %p14552_p6 = pnand %p14551_p5, %p14545_p2 }
  0xa4   :  { %14555 = shalt.err (!%p14552_p6)
}
  0xa5   :  { %s15267_s19 = smov 192   ;;  %s15268_s10 = smov 12  }
  0xa6   :  { %277 = dma.hbm_to_vmem [thread:$0]  %s15395_s27, 3072, %s272_s2, [#allocation24], %s15267_s19, %s15267_s19, %s15268_s10  }
  0xa7   :  { %s15269_s13 = smov [#allocation26]   ;;  %s15270_s6 = smov [#allocation29]  }
  0xa8   :  { %s293_s11 = sshll.u32 %s15269_s13, 4  ;;  %s317_s0 = sshll.u32 %s15270_s6, 4  ;;  %s294_s11 = int_to_ptr.vmem [resolvable:$true] %s293_s11  ;;  %s318_s0 = int_to_ptr.vmem [resolvable:$true] %s317_s0 }
  0xa9   :  { %s14564_s15 = scalar_lea.vmem %s294_s11, 2304  ;;  %p14569_p8 = scmp.lt.s32.totalorder %s294_s11, %s294_s11 }
  0xaa   :  { %p14565_p7 = scmp.ne.s32.totalorder %s294_s11, %s14564_s15  ;;  %p14570_p9 = scmp.lt.s32.totalorder %s14564_s15, %s14564_s15 }
  0xac   :  { %p14571_p10 = por %p14570_p9, %p14569_p8 }
  0xae   :  { %p14572_p11 = pnand %p14571_p10, %p14565_p7 }
  0xb0   :  { %14575 = shalt.err (!%p14572_p11)
}
  0xb1   :  { %s15271_s16 = smov 128   ;;  %s15272_s21 = smov 8  }
  0xb2   :  { %299 = dma.hbm_to_vmem [thread:$0]  %s15405_s12, 2304, %s294_s11, [#allocation27], %s15271_s16, %s15271_s16, %s15272_s21  }
  0xb3   :  { %s14584_s27 = scalar_lea.vmem %s318_s0, 2048  ;;  %p14589_p13 = scmp.lt.s32.totalorder %s318_s0, %s318_s0 }
  0xb4   :  { %p14585_p12 = scmp.ne.s32.totalorder %s318_s0, %s14584_s27  ;;  %p14590_p0 = scmp.lt.s32.totalorder %s14584_s27, %s14584_s27 }
  0xb6   :  { %p14591_p1 = por %p14590_p0, %p14589_p13 }
  0xb8   :  { %p14592_p2 = pnand %p14591_p1, %p14585_p12 }
  0xba   :  { %14595 = shalt.err (!%p14592_p2)
}
  0xbb   :  { %323 = dma.hbm_to_vmem [thread:$0]  %s15415_s5, 2048, %s318_s0, [#allocation30], %s15259_s18, %s15259_s18, %s15260_s22  }
  0xbc   :  { %s15273_s23 = smov [#allocation32]   ;;  %s15274_s26 = smov [#allocation35]  }
  0xbd   :  { %s343_s29 = sshll.u32 %s15273_s23, 4  ;;  %s368_s28 = sshll.u32 %s15274_s26, 4  ;;  %s344_s29 = int_to_ptr.vmem [resolvable:$true] %s343_s29  ;;  %s369_s28 = int_to_ptr.vmem [resolvable:$true] %s368_s28 }
  0xbe   :  { %s14604_s1 = scalar_lea.vmem %s344_s29, 1024  ;;  %p14609_p4 = scmp.lt.s32.totalorder %s344_s29, %s344_s29 }
  0xbf   :  { %p14605_p3 = scmp.ne.s32.totalorder %s344_s29, %s14604_s1  ;;  %p14610_p5 = scmp.lt.s32.totalorder %s14604_s1, %s14604_s1 }
  0xc1   :  { %p14611_p6 = por %p14610_p5, %p14609_p4 }
  0xc3   :  { %p14612_p7 = pnand %p14611_p6, %p14605_p3 }
  0xc5   :  { %14615 = shalt.err (!%p14612_p7)
}
  0xc6   :  { %349 = dma.hbm_to_vmem [thread:$0]  %s15435_s24, 1024, %s344_s29, [#allocation33], %s15259_s18, %s15259_s18, %s15260_s22  }
  0xc7   :  { %s14624_s12 = scalar_lea.vmem %s369_s28, 16  ;;  %s14628_s5 = scalar_lea.vmem %s369_s28, 32 }
  0xc8   :  { %p14625_p8 = scmp.ne.s32.totalorder %s369_s28, %s14624_s12  ;;  %p14629_p9 = scmp.lt.s32.totalorder %s369_s28, %s369_s28 }
  0xc9   :  { %p14630_p10 = scmp.lt.s32.totalorder %s14628_s5, %s14624_s12 }
  0xcb   :  { %p14631_p11 = por %p14630_p10, %p14629_p9 }
  0xcd   :  { %p14632_p12 = pnand %p14631_p11, %p14625_p8 }
  0xcf   :  { %14635 = shalt.err (!%p14632_p12)
}
  0xd0   :  { %371 = dma.hbm_to_vmem [thread:$0]  %s15445_s20, 16, %s369_s28, [#allocation36]  }
  0xd1   :  { %s15275_s8 = smov [#allocation38]   ;;  %s15276_s7 = smov [#allocation41]  }
  0xd2   :  { %s389_s2 = sshll.u32 %s15275_s8, 4  ;;  %s413_s13 = sshll.u32 %s15276_s7, 4  ;;  %s390_s2 = int_to_ptr.vmem [resolvable:$true] %s389_s2  ;;  %s414_s13 = int_to_ptr.vmem [resolvable:$true] %s413_s13 }
  0xd3   :  { %s14644_s11 = scalar_lea.vmem %s390_s2, 2304  ;;  %p14649_p0 = scmp.lt.s32.totalorder %s390_s2, %s390_s2 }
  0xd4   :  { %p14645_p13 = scmp.ne.s32.totalorder %s390_s2, %s14644_s11  ;;  %p14650_p1 = scmp.lt.s32.totalorder %s14644_s11, %s14644_s11 }
  0xd6   :  { %p14651_p2 = por %p14650_p1, %p14649_p0 }
  0xd8   :  { %p14652_p3 = pnand %p14651_p2, %p14645_p13 }
  0xda   :  { %14655 = shalt.err (!%p14652_p3)
}
  0xdb   :  { %395 = dma.hbm_to_vmem [thread:$0]  %s15455_s14, 2304, %s390_s2, [#allocation39], %s15271_s16, %s15271_s16, %s15272_s21  }
  0xdc   :  { %s14664_s24 = scalar_lea.vmem %s414_s13, 128  ;;  %p14669_p5 = scmp.lt.s32.totalorder %s414_s13, %s414_s13 }
  0xdd   :  { %p14665_p4 = scmp.ne.s32.totalorder %s414_s13, %s14664_s24  ;;  %p14670_p6 = scmp.lt.s32.totalorder %s14664_s24, %s14664_s24 }
  0xdf   :  { %p14671_p7 = por %p14670_p6, %p14669_p5 }
  0xe1   :  { %p14672_p8 = pnand %p14671_p7, %p14665_p4 }
  0xe3   :  { %14675 = shalt.err (!%p14672_p8)
}
  0xe4   :  { %419 = dma.hbm_to_vmem [thread:$0]  %s15465_s3, 128, %s414_s13, [#allocation42], %s15259_s18, %s15259_s18, %s15260_s22  }
  0xe5   :  { %s15277_s20 = smov [#allocation44]   ;;  %s15278_s0 = smov [#allocation47]  }
  0xe6   :  { %s437_s6 = sshll.u32 %s15277_s20, 4  ;;  %s462_s15 = sshll.u32 %s15278_s0, 4  ;;  %s438_s6 = int_to_ptr.vmem [resolvable:$true] %s437_s6  ;;  %s463_s15 = int_to_ptr.vmem [resolvable:$true] %s462_s15 }
  0xe7   :  { %s14684_s27 = scalar_lea.vmem %s438_s6, 256  ;;  %p14689_p10 = scmp.lt.s32.totalorder %s438_s6, %s438_s6 }
  0xe8   :  { %p14685_p9 = scmp.ne.s32.totalorder %s438_s6, %s14684_s27  ;;  %p14690_p11 = scmp.lt.s32.totalorder %s14684_s27, %s14684_s27 }
  0xea   :  { %p14691_p12 = por %p14690_p11, %p14689_p10 }
  0xec   :  { %p14692_p13 = pnand %p14691_p12, %p14685_p9 }
  0xee   :  { %14695 = shalt.err (!%p14692_p13)
}
  0xef   :  { %443 = dma.hbm_to_vmem [thread:$0]  %s15475_s25, 256, %s438_s6, [#allocation45], %s15259_s18, %s15259_s18, %s15260_s22  }
  0xf0   :  { %s14704_s14 = scalar_lea.vmem %s463_s15, 16  ;;  %s14708_s3 = scalar_lea.vmem %s463_s15, 32 }
  0xf1   :  { %p14705_p0 = scmp.ne.s32.totalorder %s463_s15, %s14704_s14  ;;  %p14709_p1 = scmp.lt.s32.totalorder %s463_s15, %s463_s15 }
  0xf2   :  { %p14710_p2 = scmp.lt.s32.totalorder %s14708_s3, %s14704_s14 }
  0xf4   :  { %p14711_p3 = por %p14710_p2, %p14709_p1 }
  0xf6   :  { %p14712_p4 = pnand %p14711_p3, %p14705_p0 }
  0xf8   :  { %14715 = shalt.err (!%p14712_p4)
}
  0xf9   :  { %s18721_s23 = sld [smem:[#allocation100_spill]]  ;;  %s15279_s29 = smov [#allocation50]  }
  0xfa   :  { %s483_s26 = sshll.u32 %s15279_s29, 4  ;;  %s15280_s28 = smov [#allocation53]   ;;  %s484_s26 = int_to_ptr.vmem [resolvable:$true] %s483_s26 }
  0xfb   :  { %s507_s1 = sshll.u32 %s15280_s28, 4  ;;  %s14724_s12 = scalar_lea.vmem %s484_s26, 128  ;;  %s508_s1 = int_to_ptr.vmem [resolvable:$true] %s507_s1 }
  0xfc   :  { %p14725_p5 = scmp.ne.s32.totalorder %s484_s26, %s14724_s12  ;;  %p14729_p6 = scmp.lt.s32.totalorder %s484_s26, %s484_s26 }
  0xfd   :  { %p14730_p7 = scmp.lt.s32.totalorder %s14724_s12, %s14724_s12 }
  0xff   :  { %465 = dma.hbm_to_vmem [thread:$0]  %s18721_s23, 16, %s463_s15, [#allocation48]  }
 0x100   :  { %p14731_p8 = por %p14730_p7, %p14729_p6 }
 0x102   :  { %p14732_p9 = pnand %p14731_p8, %p14725_p5 }
 0x104   :  { %14735 = shalt.err (!%p14732_p9)
}
 0x105   :  { %s18722_s25 = sld [smem:[#allocation102_spill]]  ;;  %s14744_s5 = scalar_lea.vmem %s508_s1, 256 }
 0x106   :  { %p14745_p10 = scmp.ne.s32.totalorder %s508_s1, %s14744_s5  ;;  %p14749_p11 = scmp.lt.s32.totalorder %s508_s1, %s508_s1 }
 0x107   :  { %p14750_p12 = scmp.lt.s32.totalorder %s14744_s5, %s14744_s5 }
 0x109   :  { %p14751_p13 = por %p14750_p12, %p14749_p11 }
 0x10b   :  { %489 = dma.hbm_to_vmem [thread:$0]  %s18722_s25, 128, %s484_s26, [#allocation51], %s15259_s18, %s15259_s18, %s15260_s22  }
 0x10c   :  { %p14752_p0 = pnand %p14751_p13, %p14745_p10 }
 0x10e   :  { %14755 = shalt.err (!%p14752_p0)
}
 0x10f   :  { %s18723_s8 = sld [smem:[#allocation104_spill]]  ;;  %s15281_s2 = smov [#allocation56]  }
 0x110   :  { %s530_s7 = sshll.u32 %s15281_s2, 4  ;;  %s15282_s13 = smov [#allocation2]   ;;  %s531_s7 = int_to_ptr.vmem [resolvable:$true] %s530_s7 }
 0x111   :  { %s117_s11 = sshll.u32 %s15282_s13, 4  ;;  %s14764_s24 = scalar_lea.vmem %s531_s7, 16  ;;  %s118_s11 = int_to_ptr.vmem [resolvable:$true] %s117_s11 }
 0x112   :  { %p14765_p1 = scmp.ne.s32.totalorder %s531_s7, %s14764_s24  ;;  %s14768_s20 = scalar_lea.vmem %s531_s7, 32 }
 0x113   :  { %p14769_p2 = scmp.lt.s32.totalorder %s531_s7, %s531_s7  ;;  %p14770_p3 = scmp.lt.s32.totalorder %s14768_s20, %s14764_s24 }
 0x115   :  { %513 = dma.hbm_to_vmem [thread:$0]  %s18723_s8, 256, %s508_s1, [#allocation54], %s15259_s18, %s15259_s18, %s15260_s22  }
 0x116   :  { %p14771_p4 = por %p14770_p3, %p14769_p2 }
 0x118   :  { %p14772_p5 = pnand %p14771_p4, %p14765_p1 }
 0x11a   :  { %14775 = shalt.err (!%p14772_p5)
}
 0x11b   :  { %533 = dma.hbm_to_vmem [thread:$0]  %s15515_s9, 16, %s531_s7, [#allocation57]  }
 0x11c   :  { %s14784_s6 = scalar_lea.vmem %s118_s11, 41472  ;;  %p14789_p7 = scmp.lt.s32.totalorder %s118_s11, %s118_s11 }
 0x11d   :  { %p14785_p6 = scmp.ne.s32.totalorder %s118_s11, %s14784_s6  ;;  %p14790_p8 = scmp.lt.s32.totalorder %s14784_s6, %s14784_s6 }
 0x11f   :  { %p14791_p9 = por %p14790_p8, %p14789_p7 }
 0x121   :  { %p14792_p10 = pnand %p14791_p9, %p14785_p6 }
 0x123   :  { %14795 = shalt.err (!%p14792_p10)
}
 0x124   :  { %s18724_s0 = sld [smem:[#allocation81_spill]]  ;;  %s15283_s15 = smov [#allocation7]  }
 0x125   :  { %s141_s27 = sshll.u32 %s15283_s15, 4  ;;  %s15284_s14 = smov [#allocation10]   ;;  %s142_s27 = int_to_ptr.vmem [resolvable:$true] %s141_s27 }
 0x126   :  { %s163_s3 = sshll.u32 %s15284_s14, 4  ;;  %s14804_s23 = scalar_lea.vmem %s142_s27, 1152  ;;  %s164_s3 = int_to_ptr.vmem [resolvable:$true] %s163_s3 }
 0x127   :  { %p14805_p11 = scmp.ne.s32.totalorder %s142_s27, %s14804_s23  ;;  %p14809_p12 = scmp.lt.s32.totalorder %s142_s27, %s142_s27 }
 0x128   :  { %p14810_p13 = scmp.lt.s32.totalorder %s14804_s23, %s14804_s23 }
 0x12a   :  { %123 = dma.hbm_to_vmem [thread:$0]  %s18724_s0, 41472, %s118_s11, [#allocation3], %s15271_s16, %s15271_s16, %s15272_s21  }
 0x12b   :  { %p14811_p0 = por %p14810_p13, %p14809_p12 }
 0x12d   :  { %p14812_p1 = pnand %p14811_p0, %p14805_p11 }
 0x12f   :  { %14815 = shalt.err (!%p14812_p1)
}
 0x130   :  { %s18725_s9 = sld [smem:[#allocation82_spill]]  ;;  %s14824_s29 = scalar_lea.vmem %s164_s3, 2304 }
 0x131   :  { %p14825_p2 = scmp.ne.s32.totalorder %s164_s3, %s14824_s29  ;;  %p14829_p3 = scmp.lt.s32.totalorder %s164_s3, %s164_s3 }
 0x132   :  { %p14830_p4 = scmp.lt.s32.totalorder %s14824_s29, %s14824_s29 }
 0x134   :  { %p14831_p5 = por %p14830_p4, %p14829_p3 }
 0x136   :  { %147 = dma.hbm_to_vmem [thread:$0]  %s18725_s9, 1152, %s142_s27, [#allocation6], %s15267_s19, %s15267_s19, %s15268_s10  }
 0x137   :  { %p14832_p6 = pnand %p14831_p5, %p14825_p2 }
 0x139   :  { %14835 = shalt.err (!%p14832_p6)
}
 0x13a   :  { %s18726_s26 = sld [smem:[#allocation83_spill]]  ;;  %s15285_s28 = smov [#allocation13]  }
 0x13b   :  { %s187_s1 = sshll.u32 %s15285_s28, 4  ;;  %s15286_s12 = smov [#allocation16]   ;;  %s188_s1 = int_to_ptr.vmem [resolvable:$true] %s187_s1 }
 0x13c   :  { %s209_s25 = sshll.u32 %s15286_s12, 4  ;;  %s14844_s5 = scalar_lea.vmem %s188_s1, 3072  ;;  %s210_s25 = int_to_ptr.vmem [resolvable:$true] %s209_s25 }
 0x13d   :  { %p14845_p7 = scmp.ne.s32.totalorder %s188_s1, %s14844_s5  ;;  %p14849_p8 = scmp.lt.s32.totalorder %s188_s1, %s188_s1 }
 0x13e   :  { %p14850_p9 = scmp.lt.s32.totalorder %s14844_s5, %s14844_s5 }
 0x140   :  { %169 = dma.hbm_to_vmem [thread:$0]  %s18726_s26, 2304, %s164_s3, [#allocation9], %s15271_s16, %s15271_s16, %s15272_s21  }
 0x141   :  { %p14851_p10 = por %p14850_p9, %p14849_p8 }
 0x143   :  { %p14852_p11 = pnand %p14851_p10, %p14845_p7 }
 0x145   :  { %14855 = shalt.err (!%p14852_p11)
}
 0x146   :  { %s18727_s8 = sld [smem:[#allocation84_spill]]  ;;  %s14864_s2 = scalar_lea.vmem %s210_s25, 2304 }
 0x147   :  { %p14865_p12 = scmp.ne.s32.totalorder %s210_s25, %s14864_s2  ;;  %p14869_p13 = scmp.lt.s32.totalorder %s210_s25, %s210_s25 }
 0x148   :  { %p14870_p0 = scmp.lt.s32.totalorder %s14864_s2, %s14864_s2 }
 0x14a   :  { %p14871_p1 = por %p14870_p0, %p14869_p13 }
 0x14c   :  { %193 = dma.hbm_to_vmem [thread:$0]  %s18727_s8, 3072, %s188_s1, [#allocation12], %s15267_s19, %s15267_s19, %s15268_s10  }
 0x14d   :  { %p14872_p2 = pnand %p14871_p1, %p14865_p12 }
 0x14f   :  { %14875 = shalt.err (!%p14872_p2)
}
 0x150   :  { %s18728_s7 = sld [smem:[#allocation85_spill]]  ;;  %s15287_s13 = smov [#allocation19]  }
 0x151   :  { %s233_s11 = sshll.u32 %s15287_s13, 4  ;;  %s15288_s24 = smov [#allocation22]   ;;  %s234_s11 = int_to_ptr.vmem [resolvable:$true] %s233_s11 }
 0x152   :  { %s259_s20 = sshll.u32 %s15288_s24, 4  ;;  %s14884_s6 = scalar_lea.vmem %s234_s11, 2048  ;;  %s260_s20 = int_to_ptr.vmem [resolvable:$true] %s259_s20 }
 0x153   :  { %p14885_p3 = scmp.ne.s32.totalorder %s234_s11, %s14884_s6  ;;  %p14889_p4 = scmp.lt.s32.totalorder %s234_s11, %s234_s11 }
 0x154   :  { %p14890_p5 = scmp.lt.s32.totalorder %s14884_s6, %s14884_s6 }
 0x156   :  { %215 = dma.hbm_to_vmem [thread:$0]  %s18728_s7, 2304, %s210_s25, [#allocation15], %s15271_s16, %s15271_s16, %s15272_s21  }
 0x157   :  { %p14891_p6 = por %p14890_p5, %p14889_p4 }
 0x159   :  { %p14892_p7 = pnand %p14891_p6, %p14885_p3 }
 0x15b   :  { %14895 = shalt.err (!%p14892_p7)
}
 0x15c   :  { %s18729_s0 = sld [smem:[#allocation86_spill]]  ;;  %s14904_s15 = scalar_lea.vmem %s260_s20, 1024 }
 0x15d   :  { %p14905_p8 = scmp.ne.s32.totalorder %s260_s20, %s14904_s15  ;;  %p14909_p9 = scmp.lt.s32.totalorder %s260_s20, %s260_s20 }
 0x15e   :  { %p14910_p10 = scmp.lt.s32.totalorder %s14904_s15, %s14904_s15 }
 0x160   :  { %p14911_p11 = por %p14910_p10, %p14909_p9 }
 0x162   :  { %239 = dma.hbm_to_vmem [thread:$0]  %s18729_s0, 2048, %s234_s11, [#allocation18], %s15259_s18, %s15259_s18, %s15260_s22  }
 0x163   :  { %p14912_p12 = pnand %p14911_p11, %p14905_p8 }
 0x165   :  { %14915 = shalt.err (!%p14912_p12)
}
 0x166   :  { %s18730_s27 = sld [smem:[#allocation89_spill]]  ;;  %s15289_s14 = smov [#allocation25]  }
 0x167   :  { %s284_s3 = sshll.u32 %s15289_s14, 4  ;;  %s15290_s23 = smov [#allocation28]   ;;  %s285_s3 = int_to_ptr.vmem [resolvable:$true] %s284_s3 }
 0x168   :  { %s305_s9 = sshll.u32 %s15290_s23, 4  ;;  %s14924_s29 = scalar_lea.vmem %s285_s3, 16  ;;  %s306_s9 = int_to_ptr.vmem [resolvable:$true] %s305_s9 }
 0x169   :  { %p14925_p13 = scmp.ne.s32.totalorder %s285_s3, %s14924_s29  ;;  %s14928_s26 = scalar_lea.vmem %s285_s3, 32 }
 0x16a   :  { %p14929_p0 = scmp.lt.s32.totalorder %s285_s3, %s285_s3  ;;  %p14930_p1 = scmp.lt.s32.totalorder %s14928_s26, %s14924_s29 }
 0x16c   :  { %265 = dma.hbm_to_vmem [thread:$0]  %s18730_s27, 1024, %s260_s20, [#allocation21], %s15259_s18, %s15259_s18, %s15260_s22  }
 0x16d   :  { %p14931_p2 = por %p14930_p1, %p14929_p0 }
 0x16f   :  { %p14932_p3 = pnand %p14931_p2, %p14925_p13 }
 0x171   :  { %14935 = shalt.err (!%p14932_p3)
}
 0x172   :  { %s18731_s28 = sld [smem:[#allocation90_spill]]  ;;  %s14944_s1 = scalar_lea.vmem %s306_s9, 1024 }
 0x173   :  { %p14945_p4 = scmp.ne.s32.totalorder %s306_s9, %s14944_s1  ;;  %p14949_p5 = scmp.lt.s32.totalorder %s306_s9, %s306_s9 }
 0x174   :  { %p14950_p6 = scmp.lt.s32.totalorder %s14944_s1, %s14944_s1 }
 0x176   :  { %p14951_p7 = por %p14950_p6, %p14949_p5 }
 0x178   :  { %287 = dma.hbm_to_vmem [thread:$0]  %s18731_s28, 16, %s285_s3, [#allocation24]  }
 0x179   :  { %p14952_p8 = pnand %p14951_p7, %p14945_p4 }
 0x17b   :  { %14955 = shalt.err (!%p14952_p8)
}
 0x17c   :  { %s18732_s12 = sld [smem:[#allocation91_spill]]  ;;  %s15291_s25 = smov [#allocation31]  }
 0x17d   :  { %s332_s5 = sshll.u32 %s15291_s25, 4  ;;  %s15292_s8 = smov [#allocation34]   ;;  %s333_s5 = int_to_ptr.vmem [resolvable:$true] %s332_s5 }
 0x17e   :  { %s355_s2 = sshll.u32 %s15292_s8, 4  ;;  %s14964_s7 = scalar_lea.vmem %s333_s5, 16  ;;  %s356_s2 = int_to_ptr.vmem [resolvable:$true] %s355_s2 }
 0x17f   :  { %p14965_p9 = scmp.ne.s32.totalorder %s333_s5, %s14964_s7  ;;  %s14968_s13 = scalar_lea.vmem %s333_s5, 32 }
 0x180   :  { %p14969_p10 = scmp.lt.s32.totalorder %s333_s5, %s333_s5  ;;  %p14970_p11 = scmp.lt.s32.totalorder %s14968_s13, %s14964_s7 }
 0x182   :  { %311 = dma.hbm_to_vmem [thread:$0]  %s18732_s12, 1024, %s306_s9, [#allocation27], %s15259_s18, %s15259_s18, %s15260_s22  }
 0x183   :  { %p14971_p12 = por %p14970_p11, %p14969_p10 }
 0x185   :  { %p14972_p13 = pnand %p14971_p12, %p14965_p9 }
 0x187   :  { %14975 = shalt.err (!%p14972_p13)
}
 0x188   :  { %s18733_s11 = sld [smem:[#allocation93_spill]]  ;;  %s14984_s24 = scalar_lea.vmem %s356_s2, 3072 }
 0x189   :  { %p14985_p0 = scmp.ne.s32.totalorder %s356_s2, %s14984_s24  ;;  %p14989_p1 = scmp.lt.s32.totalorder %s356_s2, %s356_s2 }
 0x18a   :  { %p14990_p2 = scmp.lt.s32.totalorder %s14984_s24, %s14984_s24 }
 0x18c   :  { %p14991_p3 = por %p14990_p2, %p14989_p1 }
 0x18e   :  { %335 = dma.hbm_to_vmem [thread:$0]  %s18733_s11, 16, %s333_s5, [#allocation30]  }
 0x18f   :  { %p14992_p4 = pnand %p14991_p3, %p14985_p0 }
 0x191   :  { %14995 = shalt.err (!%p14992_p4)
}
 0x192   :  { %s18734_s20 = sld [smem:[#allocation95_spill]]  ;;  %s15293_s6 = smov [#allocation37]  }
 0x193   :  { %s377_s0 = sshll.u32 %s15293_s6, 4  ;;  %s15294_s15 = smov [#allocation40]   ;;  %s378_s0 = int_to_ptr.vmem [resolvable:$true] %s377_s0 }
 0x194   :  { %s401_s27 = sshll.u32 %s15294_s15, 4  ;;  %s15004_s14 = scalar_lea.vmem %s378_s0, 2304  ;;  %s402_s27 = int_to_ptr.vmem [resolvable:$true] %s401_s27 }
 0x195   :  { %p15005_p5 = scmp.ne.s32.totalorder %s378_s0, %s15004_s14  ;;  %p15009_p6 = scmp.lt.s32.totalorder %s378_s0, %s378_s0 }
 0x196   :  { %p15010_p7 = scmp.lt.s32.totalorder %s15004_s14, %s15004_s14 }
 0x198   :  { %361 = dma.hbm_to_vmem [thread:$0]  %s18734_s20, 3072, %s356_s2, [#allocation33], %s15267_s19, %s15267_s19, %s15268_s10  }
 0x199   :  { %p15011_p8 = por %p15010_p7, %p15009_p6 }
 0x19b   :  { %p15012_p9 = pnand %p15011_p8, %p15005_p5 }
 0x19d   :  { %15015 = shalt.err (!%p15012_p9)
}
 0x19e   :  { %s18735_s3 = sld [smem:[#allocation96_spill]]  ;;  %s15024_s23 = scalar_lea.vmem %s402_s27, 2304 }
 0x19f   :  { %p15025_p10 = scmp.ne.s32.totalorder %s402_s27, %s15024_s23  ;;  %p15029_p11 = scmp.lt.s32.totalorder %s402_s27, %s402_s27 }
 0x1a0   :  { %p15030_p12 = scmp.lt.s32.totalorder %s15024_s23, %s15024_s23 }
 0x1a2   :  { %p15031_p13 = por %p15030_p12, %p15029_p11 }
 0x1a4   :  { %383 = dma.hbm_to_vmem [thread:$0]  %s18735_s3, 2304, %s378_s0, [#allocation36], %s15271_s16, %s15271_s16, %s15272_s21  }
 0x1a5   :  { %p15032_p0 = pnand %p15031_p13, %p15025_p10 }
 0x1a7   :  { %15035 = shalt.err (!%p15032_p0)
}
 0x1a8   :  { %s18736_s19 = sld [smem:[#allocation97_spill]]  ;;  %s15295_s10 = smov [#allocation43]  }
 0x1a9   :  { %s425_s9 = sshll.u32 %s15295_s10, 4  ;;  %s15296_s29 = smov [#allocation46]   ;;  %s426_s9 = int_to_ptr.vmem [resolvable:$true] %s425_s9 }
 0x1aa   :  { %s449_s26 = sshll.u32 %s15296_s29, 4  ;;  %s15044_s28 = scalar_lea.vmem %s426_s9, 128  ;;  %s450_s26 = int_to_ptr.vmem [resolvable:$true] %s449_s26 }
 0x1ab   :  { %p15045_p1 = scmp.ne.s32.totalorder %s426_s9, %s15044_s28  ;;  %p15049_p2 = scmp.lt.s32.totalorder %s426_s9, %s426_s9 }
 0x1ac   :  { %p15050_p3 = scmp.lt.s32.totalorder %s15044_s28, %s15044_s28 }
 0x1ae   :  { %407 = dma.hbm_to_vmem [thread:$0]  %s18736_s19, 2304, %s402_s27, [#allocation39], %s15271_s16, %s15271_s16, %s15272_s21  }
 0x1af   :  { %p15051_p4 = por %p15050_p3, %p15049_p2 }
 0x1b1   :  { %p15052_p5 = pnand %p15051_p4, %p15045_p1 }
 0x1b3   :  { %15055 = shalt.err (!%p15052_p5)
}
 0x1b4   :  { %s18737_s1 = sld [smem:[#allocation98_spill]]  ;;  %s15064_s12 = scalar_lea.vmem %s450_s26, 256 }
 0x1b5   :  { %p15065_p6 = scmp.ne.s32.totalorder %s450_s26, %s15064_s12  ;;  %p15069_p7 = scmp.lt.s32.totalorder %s450_s26, %s450_s26 }
 0x1b6   :  { %p15070_p8 = scmp.lt.s32.totalorder %s15064_s12, %s15064_s12 }
 0x1b8   :  { %p15071_p9 = por %p15070_p8, %p15069_p7 }
 0x1ba   :  { %431 = dma.hbm_to_vmem [thread:$0]  %s18737_s1, 128, %s426_s9, [#allocation42], %s15259_s18, %s15259_s18, %s15260_s22  }
 0x1bb   :  { %p15072_p10 = pnand %p15071_p9, %p15065_p6 }
 0x1bd   :  { %15075 = shalt.err (!%p15072_p10)
}
 0x1be   :  { %s18738_s25 = sld [smem:[#allocation99_spill]]  ;;  %s15297_s5 = smov [#allocation49]  }
 0x1bf   :  { %s471_s8 = sshll.u32 %s15297_s5, 4  ;;  %s15298_s2 = smov [#allocation52]   ;;  %s472_s8 = int_to_ptr.vmem [resolvable:$true] %s471_s8 }
 0x1c0   :  { %s495_s7 = sshll.u32 %s15298_s2, 4  ;;  %s15084_s13 = scalar_lea.vmem %s472_s8, 128  ;;  %s496_s7 = int_to_ptr.vmem [resolvable:$true] %s495_s7 }
 0x1c1   :  { %p15085_p11 = scmp.ne.s32.totalorder %s472_s8, %s15084_s13  ;;  %p15089_p12 = scmp.lt.s32.totalorder %s472_s8, %s472_s8 }
 0x1c2   :  { %p15090_p13 = scmp.lt.s32.totalorder %s15084_s13, %s15084_s13 }
 0x1c4   :  { %455 = dma.hbm_to_vmem [thread:$0]  %s18738_s25, 256, %s450_s26, [#allocation45], %s15259_s18, %s15259_s18, %s15260_s22  }
 0x1c5   :  { %p15091_p0 = por %p15090_p13, %p15089_p12 }
 0x1c7   :  { %p15092_p1 = pnand %p15091_p0, %p15085_p11 }
 0x1c9   :  { %15095 = shalt.err (!%p15092_p1)
}
 0x1ca   :  { %s18739_s11 = sld [smem:[#allocation101_spill]]  ;;  %s15104_s24 = scalar_lea.vmem %s496_s7, 256 }
 0x1cb   :  { %p15105_p2 = scmp.ne.s32.totalorder %s496_s7, %s15104_s24  ;;  %p15109_p3 = scmp.lt.s32.totalorder %s496_s7, %s496_s7 }
 0x1cc   :  { %p15110_p4 = scmp.lt.s32.totalorder %s15104_s24, %s15104_s24 }
 0x1ce   :  { %p15111_p5 = por %p15110_p4, %p15109_p3 }
 0x1d0   :  { %477 = dma.hbm_to_vmem [thread:$0]  %s18739_s11, 128, %s472_s8, [#allocation48], %s15259_s18, %s15259_s18, %s15260_s22  }
 0x1d1   :  { %p15112_p6 = pnand %p15111_p5, %p15105_p2 }
 0x1d3   :  { %15115 = shalt.err (!%p15112_p6)
}
 0x1d4   :  { %s18740_s20 = sld [smem:[#allocation103_spill]]  ;;  %s15299_s6 = smov [#allocation55]  }
 0x1d5   :  { %s520_s0 = sshll.u32 %s15299_s6, 4  ;;  %s15300_s15 = smov [#allocation58]   ;;  %s521_s0 = int_to_ptr.vmem [resolvable:$true] %s520_s0 }
 0x1d6   :  { %s539_s27 = sshll.u32 %s15300_s15, 4  ;;  %s15124_s14 = scalar_lea.vmem %s521_s0, 16  ;;  %s540_s27 = int_to_ptr.vmem [resolvable:$true] %s539_s27 }
 0x1d7   :  { %p15125_p7 = scmp.ne.s32.totalorder %s521_s0, %s15124_s14  ;;  %s15128_s3 = scalar_lea.vmem %s521_s0, 32 }
 0x1d8   :  { %p15129_p8 = scmp.lt.s32.totalorder %s521_s0, %s521_s0  ;;  %p15130_p9 = scmp.lt.s32.totalorder %s15128_s3, %s15124_s14 }
 0x1da   :  { %501 = dma.hbm_to_vmem [thread:$0]  %s18740_s20, 256, %s496_s7, [#allocation51], %s15259_s18, %s15259_s18, %s15260_s22  }
 0x1db   :  { %p15131_p10 = por %p15130_p9, %p15129_p8 }
 0x1dd   :  { %p15132_p11 = pnand %p15131_p10, %p15125_p7 }
 0x1df   :  { %15135 = shalt.err (!%p15132_p11)
}
 0x1e0   :  { %523 = dma.hbm_to_vmem [thread:$0]  %s15510_s30, 16, %s521_s0, [#allocation54]  }
 0x1e1   :  { %s15144_s23 = scalar_lea.vmem %s540_s27, 256  ;;  %p15149_p13 = scmp.lt.s32.totalorder %s540_s27, %s540_s27 }
 0x1e2   :  { %p15145_p12 = scmp.ne.s32.totalorder %s540_s27, %s15144_s23  ;;  %p15150_p0 = scmp.lt.s32.totalorder %s15144_s23, %s15144_s23 }
 0x1e4   :  { %p15151_p1 = por %p15150_p0, %p15149_p13 }
 0x1e6   :  { %p15152_p2 = pnand %p15151_p1, %p15145_p12 }
 0x1e8   :  { %15155 = shalt.err (!%p15152_p2)
}
 0x1e9   :  { %545 = dma.hbm_to_vmem [thread:$0]  %s15520_s4, 256, %s540_s27, [#allocation57], %s15271_s16, %s15271_s16, %s15272_s21  }
 0x1ea   :  { %15176 = dma.done.wait [#allocation3], 41472  }
 0x1eb   :  { %15177 = vsyncadd [#allocation3], 4294925824 }
 0x1ec   :  { %15178 = dma.done.wait [#allocation6], 2176  }
 0x1ed   :  { %15179 = vsyncadd [#allocation6], 4294965120 }
 0x1ee   :  { %15180 = dma.done.wait [#allocation9], 2320  }
 0x1ef   :  { %15181 = vsyncadd [#allocation9], 4294964976 }
 0x1f0   :  { %15182 = dma.done.wait [#allocation12], 4096  }
 0x1f1   :  { %15183 = vsyncadd [#allocation12], 4294963200 }
 0x1f2   :  { %15184 = dma.done.wait [#allocation15], 2320  }
 0x1f3   :  { %15185 = vsyncadd [#allocation15], 4294964976 }
 0x1f4   :  { %15186 = dma.done.wait [#allocation18], 3072  }
 0x1f5   :  { %15187 = vsyncadd [#allocation18], 4294964224 }
 0x1f6   :  { %15188 = dma.done.wait [#allocation21], 1040  }
 0x1f7   :  { %15189 = vsyncadd [#allocation21], 4294966256 }
 0x1f8   :  { %15190 = dma.done.wait [#allocation24], 3088  }
 0x1f9   :  { %15191 = vsyncadd [#allocation24], 4294964208 }
 0x1fa   :  { %15192 = dma.done.wait [#allocation27], 3328  }
 0x1fb   :  { %15193 = vsyncadd [#allocation27], 4294963968 }
 0x1fc   :  { %15194 = dma.done.wait [#allocation30], 2064  }
 0x1fd   :  { %15195 = vsyncadd [#allocation30], 4294965232 }
 0x1fe   :  { %15196 = dma.done.wait [#allocation33], 4096  }
 0x1ff   :  { %15197 = vsyncadd [#allocation33], 4294963200 }
 0x200   :  { %15198 = dma.done.wait [#allocation36], 2320  }
 0x201   :  { %15199 = vsyncadd [#allocation36], 4294964976 }
 0x202   :  { %15200 = dma.done.wait [#allocation39], 4608  }
 0x203   :  { %15201 = vsyncadd [#allocation39], 4294962688 }
 0x204   :  { %15202 = dma.done.wait [#allocation42], 256  }
 0x205   :  { %15203 = vsyncadd [#allocation42], 4294967040 }
 0x206   :  { %15204 = dma.done.wait [#allocation45], 512  }
 0x207   :  { %15205 = vsyncadd [#allocation45], 4294966784 }
 0x208   :  { %15206 = dma.done.wait [#allocation48], 144  }
 0x209   :  { %15207 = vsyncadd [#allocation48], 4294967152 }
 0x20a   :  { %15208 = dma.done.wait [#allocation51], 384  }
 0x20b   :  { %15209 = vsyncadd [#allocation51], 4294966912 }
 0x20c   :  { %15210 = dma.done.wait [#allocation54], 272  }
 0x20d   :  { %15211 = vsyncadd [#allocation54], 4294967024 }
 0x20e   :  { %15212 = dma.done.wait [#allocation57], 272  }
 0x20f   :  { %15213 = vsyncadd [#allocation57], 4294967024  ;;  %s18741_s30 = sld [smem:[#allocation80_spill]]  ;;  %v18640_v0 = vmov 0   ;;  %v18638_v1 = vmov 0.0   ;;  %vm15303_vm0 = vmmov 0  }
 0x210   :  { %877 = vmatprep.mubr.bf16.mxu0 %v18640_v0  ;;  %12731 = vmatprep.subr.bf16.mxu1 %v18638_v1  ;;  %v13529_v2 = vld [vmem:[#allocation7 + $0x34] ss:$12 sps:$4 sm:$0xff]   ;;  %v13531_v3 = vld [vmem:[#allocation7 + $0x30] ss:$12 sps:$4 sm:$0xff]   ;;  %v13534_v5 = vld [vmem:[#allocation7 + $0x18] ss:$12 sps:$4 sm:$0xff]  }
 0x211   :  { %12737 = vmatprep.mubr.msk.bf16.mxu1 %vm15303_vm0, %v18638_v1  ;;  %855 = vmatprep.subr.bf16.mxu0 %v13529_v2  ;;  %v13532_v4 = vld [vmem:[#allocation7 + $0x1c] ss:$12 sps:$4 sm:$0xff]   ;;  %v13535_v6 = vld [vmem:[#allocation7 + $0x4] ss:$12 sps:$4 sm:$0xff]   ;;  %v676_v9 = vld [vmem:[#allocation38] sm:$0xff]  ;;  %vm817_vm1 = vcmask 392192  }
 0x212   :  { %856 = vmatpush1.bf16.msra.mxu0 %v13531_v3  ;;  %v677_v10 = vld [vmem:[#allocation38 + $0x8] sm:$0xff]  ;;  %v712_v12 = vld [vmem:[#allocation40] sm:$0xff]  ;;  %v713_v13 = vld [vmem:[#allocation40 + $0x8] sm:$0xff]  ;;  %vm1199_vm2 = vcmask 130048   ;;  %s18753_s4 = sld [smem:[#allocation87_spill]]  ;;  %s15304_s19 = smov 96  }
 0x213   :  { %857 = vmatprep.subr.bf16.mxu0 %v13532_v4  ;;  %v13537_v14 = vld [vmem:[#allocation7] ss:$12 sps:$4 sm:$0xff]   ;;  %v678_v19 = vld [vmem:[#allocation38 + $0x10] sm:$0xff]  ;;  %v714_v25 = vld [vmem:[#allocation40 + $0x10] sm:$0xff]  ;;  %s18801_s22 = sld [smem:[#allocation88_spill]]  ;;  %s15305_s10 = smov 32  }
 0x214   :  { %v679_v20 = vld [vmem:[#allocation38 + $0x18] sm:$0xff]  ;;  %v715_v26 = vld [vmem:[#allocation40 + $0x18] sm:$0xff]  ;;  %v13538_v27 = vld [vmem:[#allocation7 + $0x38] ss:$12 sps:$4 sm:$0xff]   ;;  %s18831_s16 = sld [smem:[#allocation92_spill]]  ;;  %vm11017_vm3 = vcmask 1045504  }
 0x215   :  { %v658_v7 = vld [vmem:[%s18741_s30] sm:$0xff]  ;;  %v659_v8 = vld [vmem:[%s18741_s30 + $0x8] sm:$0xff]  ;;  %v660_v16 = vld [vmem:[%s18741_s30 + $0x10] sm:$0xff]  ;;  %12732 = vmatpush3.bf16.msra.mxu1 %v13538_v27  ;;  %s18880_s21 = sld [smem:[#allocation94_spill]]  ;;  %vm11013_vm4 = vcmask 97280   ;;  %vm11135_vm5 = vcmask 261120  }
 0x216   :  { %v694_v11 = vmul.f32 %v676_v9, %v658_v7  ;;  %v695_v15 = vmul.f32 %v677_v10, %v659_v8  ;;  %858 = vmatpush1.bf16.msra.mxu0 %v13534_v5  ;;  %v661_v18 = vld [vmem:[%s18741_s30 + $0x18] sm:$0xff]  ;;  %v696_v23 = vmul.f32 %v678_v19, %v660_v16  ;;  %v662_v30 = vld [vmem:[%s18741_s30 + $0x20] sm:$0xff]  ;;  %v663_v32 = vld [vmem:[%s18741_s30 + $0x28] sm:$0xff]  ;;  %12733 = vmatprep.subr.bf16.mxu1 %v18638_v1  ;;  %vm11534_vm6 = vcmask 254976  }
 0x217   :  { %859 = vmatprep.subr.bf16.mxu0 %v13535_v6  ;;  %v697_v24 = vmul.f32 %v679_v20, %v661_v18  ;;  %v13539_v31 = vld [vmem:[#allocation7 + $0x20] ss:$12 sps:$4 sm:$0xff]   ;;  %v680_v33 = vld [vmem:[#allocation38 + $0x20] sm:$0xff]  ;;  %v716_v39 = vld [vmem:[#allocation40 + $0x20] sm:$0xff] }
 0x218   :  { %v730_v17 = vadd.f32 %v712_v12, %v694_v11  ;;  %v731_v21 = vadd.f32 %v713_v13, %v695_v15  ;;  %v732_v28 = vadd.f32 %v714_v25, %v696_v23  ;;  %v681_v34 = vld [vmem:[#allocation38 + $0x28] sm:$0xff]  ;;  %v698_v36 = vmul.f32 %v680_v33, %v662_v30  ;;  %v13540_v38 = vld [vmem:[#allocation7 + $0x8] ss:$12 sps:$4 sm:$0xff]   ;;  %v717_v40 = vld [vmem:[#allocation40 + $0x28] sm:$0xff] }
 0x219   :  { %v733_v29 = vadd.f32 %v715_v26, %v697_v24  ;;  %v699_v37 = vmul.f32 %v681_v34, %v663_v32  ;;  %12734 = vmatpush3.bf16.msra.mxu1 %v13539_v31  ;;  %v664_v43 = vld [vmem:[%s18741_s30 + $0x30] sm:$0xff]  ;;  %v665_v44 = vld [vmem:[%s18741_s30 + $0x38] sm:$0xff]  ;;  %v682_v45 = vld [vmem:[#allocation38 + $0x30] sm:$0xff] }
 0x21a   :  { %v748_v22 = vpack.c.bf16 %v731_v21, %v730_v17  ;;  %860 = vmatpush1.bf16.msra.mxu0 %v13537_v14  ;;  %12735 = vmatprep.subr.bf16.mxu1 %v18638_v1  ;;  %v734_v41 = vadd.f32 %v716_v39, %v698_v36  ;;  %v683_v46 = vld [vmem:[#allocation38 + $0x38] sm:$0xff]  ;;  %v718_v47 = vld [vmem:[#allocation40 + $0x30] sm:$0xff]  ;;  %v719_v48 = vld [vmem:[#allocation40 + $0x38] sm:$0xff]  ;;  %v700_v50 = vmul.f32 %v682_v45, %v664_v43 }
 0x21b   :  { %1227 = vmatprep.subr.bf16.mxu0 %v18640_v0  ;;  %v749_v35 = vpack.c.bf16 %v733_v29, %v732_v28  ;;  %v735_v42 = vadd.f32 %v717_v40, %v699_v37  ;;  %v701_v51 = vmul.f32 %v683_v46, %v665_v44  ;;  %v666_v52 = vld [vmem:[%s18741_s30 + $0x40] sm:$0xff]  ;;  %v667_v53 = vld [vmem:[%s18741_s30 + $0x48] sm:$0xff]  ;;  %v684_v54 = vld [vmem:[#allocation38 + $0x40] sm:$0xff] }
 0x21c   :  { %v685_v55 = vld [vmem:[#allocation38 + $0x48] sm:$0xff]  ;;  %v736_v56 = vadd.f32 %v718_v47, %v700_v50  ;;  %v720_v58 = vld [vmem:[#allocation40 + $0x40] sm:$0xff]  ;;  %v721_v59 = vld [vmem:[#allocation40 + $0x48] sm:$0xff]  ;;  %v702_v61 = vmul.f32 %v684_v54, %v666_v52 }
 0x21d   :  { %11620 = vmatmul.mubr.msk.bf16.vlgmr.msra.gmra.mxu0 %vm817_vm1, %v748_v22  ;;  %12736 = vmatpush3.bf16.msra.mxu1 %v13540_v38  ;;  %v750_v49 = vpack.c.bf16 %v735_v42, %v734_v41  ;;  %v737_v57 = vadd.f32 %v719_v48, %v701_v51  ;;  %v703_v62 = vmul.f32 %v685_v55, %v667_v53  ;;  %v668_v63 = vld [vmem:[%s18741_s30 + $0x50] sm:$0xff]  ;;  %v669_v2 = vld [vmem:[%s18741_s30 + $0x58] sm:$0xff]  ;;  %v686_v3 = vld [vmem:[#allocation38 + $0x50] sm:$0xff] }
 0x21e   :  { %887 = vmatprep.mubr.bf16.mxu0 %v18640_v0  ;;  %1486 = vmatprep.subr.bf16.mxu1 %v18640_v0  ;;  %v687_v4 = vld [vmem:[#allocation38 + $0x58] sm:$0xff]  ;;  %v738_v5 = vadd.f32 %v720_v58, %v702_v61  ;;  %v722_v7 = vld [vmem:[#allocation40 + $0x50] sm:$0xff]  ;;  %v723_v8 = vld [vmem:[#allocation40 + $0x58] sm:$0xff]  ;;  %v704_v10 = vmul.f32 %v686_v3, %v668_v63 }
 0x21f   :  { %v751_v60 = vpack.c.bf16 %v737_v57, %v736_v56  ;;  %v739_v6 = vadd.f32 %v721_v59, %v703_v62  ;;  %v705_v11 = vmul.f32 %v687_v4, %v669_v2  ;;  %v670_v12 = vld [vmem:[%s18741_s30 + $0x60] sm:$0xff]  ;;  %v671_v13 = vld [vmem:[%s18741_s30 + $0x68] sm:$0xff]  ;;  %v688_v14 = vld [vmem:[#allocation38 + $0x60] sm:$0xff] }
 0x220   :  { %12738 = vmatmul.mubr.msk.bf16.vlgmr.msra.gmra.mxu1 %vm817_vm1, %v748_v22  ;;  %v689_v15 = vld [vmem:[#allocation38 + $0x68] sm:$0xff]  ;;  %v740_v16 = vadd.f32 %v722_v7, %v704_v10  ;;  %v724_v18 = vld [vmem:[#allocation40 + $0x60] sm:$0xff]  ;;  %v725_v19 = vld [vmem:[#allocation40 + $0x68] sm:$0xff]  ;;  %v706_v21 = vmul.f32 %v688_v14, %v670_v12 }
 0x221   :  { %12741 = vmatprep.mubr.msk.bf16.mxu1 %vm15303_vm0, %v18638_v1  ;;  %v752_v9 = vpack.c.bf16 %v739_v6, %v738_v5  ;;  %v741_v17 = vadd.f32 %v723_v8, %v705_v11  ;;  %v707_v22 = vmul.f32 %v689_v15, %v671_v13  ;;  %v672_v23 = vld [vmem:[%s18741_s30 + $0x70] sm:$0xff]  ;;  %v673_v24 = vld [vmem:[%s18741_s30 + $0x78] sm:$0xff]  ;;  %v690_v25 = vld [vmem:[#allocation38 + $0x70] sm:$0xff] }
 0x222   :  { %v691_v26 = vld [vmem:[#allocation38 + $0x78] sm:$0xff]  ;;  %v742_v27 = vadd.f32 %v724_v18, %v706_v21  ;;  %v726_v29 = vld [vmem:[#allocation40 + $0x70] sm:$0xff]  ;;  %v727_v30 = vld [vmem:[#allocation40 + $0x78] sm:$0xff]  ;;  %v708_v32 = vmul.f32 %v690_v25, %v672_v23 }
 0x223   :  { %v753_v20 = vpack.c.bf16 %v741_v17, %v740_v16  ;;  %v743_v28 = vadd.f32 %v725_v19, %v707_v22  ;;  %v709_v33 = vmul.f32 %v691_v26, %v673_v24  ;;  %v674_v34 = vld [vmem:[%s18741_s30 + $0x80] sm:$0xff]  ;;  %v692_v36 = vld [vmem:[#allocation38 + $0x80] sm:$0xff]  ;;  %v729_v41 = vld [vmem:[#allocation40 + $0x88] sm:$0xff] }
 0x224   :  { %v693_v37 = vld [vmem:[#allocation38 + $0x88] sm:$0xff]  ;;  %v744_v38 = vadd.f32 %v726_v29, %v708_v32  ;;  %v728_v40 = vld [vmem:[#allocation40 + $0x80] sm:$0xff]  ;;  %v710_v43 = vmul.f32 %v692_v36, %v674_v34 }
 0x225   :  { %11621 = vmatmul.mubr.msk.bf16.gmra.mxu0 %vm817_vm1, %v749_v35  ;;  %v754_v31 = vpack.c.bf16 %v743_v28, %v742_v27  ;;  %v745_v39 = vadd.f32 %v727_v30, %v709_v33  ;;  %v13543_v48 = vld [vmem:[#allocation2 + $0x4] ss:$8 sps:$4 sm:$0xff]  }
 0x226   :  { %897 = vmatprep.mubr.bf16.mxu0 %v18640_v0  ;;  %v746_v45 = vadd.f32 %v728_v40, %v710_v43 }
 0x227   :  { %v755_v42 = vpack.c.bf16 %v745_v39, %v744_v38 }
 0x228   :  { %12742 = vmatmul.mubr.msk.bf16.gmra.mxu1 %vm817_vm1, %v749_v35  ;;  %v675_v35 = vld [vmem:[%s18741_s30 + $0x88] sm:$0xff] }
 0x229   :  { %12745 = vmatprep.mubr.msk.bf16.mxu1 %vm15303_vm0, %v18638_v1  ;;  %v711_v44 = vmul.f32 %v693_v37, %v675_v35 }
 0x22b   :  { %v747_v46 = vadd.f32 %v729_v41, %v711_v44 }
 0x22d   :  { %11622 = vmatmul.mubr.msk.bf16.gmra.mxu0 %vm817_vm1, %v750_v49  ;;  %v756_v47 = vpack.c.bf16 %v747_v46, %v746_v45 }
 0x22e   :  { %907 = vmatprep.mubr.bf16.mxu0 %v18640_v0 }
 0x230   :  { %12746 = vmatmul.mubr.msk.bf16.gmra.mxu1 %vm817_vm1, %v750_v49  ;;  %v13546_v49 = vld [vmem:[#allocation2 + $0x94] ss:$8 sps:$4 sm:$0xff]  }
 0x231   :  { %12749 = vmatprep.mubr.msk.bf16.mxu1 %vm15303_vm0, %v18638_v1 }
 0x235   :  { %11623 = vmatmul.mubr.msk.bf16.gmra.mxu0 %vm817_vm1, %v751_v60 }
 0x236   :  { %917 = vmatprep.mubr.bf16.mxu0 %v18640_v0 }
 0x238   :  { %12750 = vmatmul.mubr.msk.bf16.gmra.mxu1 %vm817_vm1, %v751_v60 }
 0x239   :  { %12753 = vmatprep.mubr.msk.bf16.mxu1 %vm15303_vm0, %v18638_v1 }
 0x23d   :  { %11624 = vmatmul.mubr.msk.bf16.gmra.mxu0 %vm817_vm1, %v752_v9 }
 0x23e   :  { %927 = vmatprep.mubr.bf16.mxu0 %v18640_v0 }
 0x240   :  { %12754 = vmatmul.mubr.msk.bf16.gmra.mxu1 %vm817_vm1, %v752_v9 }
 0x241   :  { %12757 = vmatprep.mubr.msk.bf16.mxu1 %vm15303_vm0, %v18638_v1 }
 0x245   :  { %11625 = vmatmul.mubr.msk.bf16.gmra.mxu0 %vm817_vm1, %v753_v20 }
 0x246   :  { %937 = vmatprep.mubr.bf16.mxu0 %v18640_v0 }
 0x248   :  { %12758 = vmatmul.mubr.msk.bf16.gmra.mxu1 %vm817_vm1, %v753_v20 }
 0x249   :  { %12761 = vmatprep.mubr.msk.bf16.mxu1 %vm15303_vm0, %v18638_v1 }
 0x24d   :  { %11626 = vmatmul.mubr.msk.bf16.gmra.mxu0 %vm817_vm1, %v754_v31 }
 0x24e   :  { %947 = vmatprep.mubr.bf16.mxu0 %v18640_v0 }
 0x250   :  { %12762 = vmatmul.mubr.msk.bf16.gmra.mxu1 %vm817_vm1, %v754_v31 }
 0x251   :  { %12765 = vmatprep.mubr.msk.bf16.mxu1 %vm15303_vm0, %v18638_v1 }
 0x255   :  { %11627 = vmatmul.mubr.msk.bf16.gmra.mxu0 %vm817_vm1, %v755_v42 }
 0x256   :  { %957 = vmatprep.mubr.bf16.mxu0 %v18640_v0 }
 0x258   :  { %12766 = vmatmul.mubr.msk.bf16.gmra.mxu1 %vm817_vm1, %v755_v42 }
 0x259   :  { %12769 = vmatprep.mubr.msk.bf16.mxu1 %vm15303_vm0, %v18638_v1 }
 0x25d   :  { %11628 = vmatmul.mubr.msk.bf16.gmra.mxu0 %vm817_vm1, %v756_v47 }
 0x25e   :  { %11656 = vmatprep.mubr.msk.bf16.mxu0 %vm1199_vm2, %v13543_v48 }
 0x260   :  { %12770 = vmatmul.mubr.msk.bf16.gmra.mxu1 %vm817_vm1, %v756_v47 }
 0x261   :  { %11683 = vmatprep.mubr.msk.bf16.mxu1 %vm1199_vm2, %v13546_v49 }
 0x2dd   :  { %v15718_v50 = vpop.f32.mrf.mxu0 }
 0x2df   :  { %v15720_v51 = vpop.f32.mrf.mxu0 }
 0x2e0   :  { %v15732_v57 = vpop.f32.mrf.mxu1 }
 0x2e1   :  { %v15722_v52 = vpop.f32.mrf.mxu0 }
 0x2e2   :  { %v1091_v53 = vpack.c.bf16 %v15722_v52, %v15718_v50  ;;  %v12739_v60 = vpop.f32.mrf.mxu1  ;;  %v13549_v52 = vld [vmem:[#allocation2 + $0x10] ss:$8 sps:$4 sm:$0xff]  }
 0x2e3   :  { %v15726_v54 = vpop.f32.mrf.mxu0 }
 0x2e4   :  { %v15740_v62 = vpop.f32.mrf.mxu1 }
 0x2e5   :  { %v15728_v55 = vpop.f32.mrf.mxu0  ;;  %v1609_v2 = vpack.c.bf16 %v15740_v62, %v15732_v57  ;;  %v13580_v57 = vld [vmem:[#allocation2 + $0xf4] ss:$8 sps:$4 sm:$0xff]   ;;  %v13579_v62 = vld [vmem:[#allocation2 + $0x60] ss:$8 sps:$4 sm:$0xff]  }
 0x2e6   :  { %v12740_v3 = vpop.f32.mrf.mxu1 }
 0x2e7   :  { %v15730_v56 = vpop.f32.mrf.mxu0 }
 0x2e8   :  { %v15748_v5 = vpop.f32.mrf.mxu1 }
 0x2e9   :  { %v15734_v58 = vpop.f32.mrf.mxu0 }
 0x2ea   :  { %v1092_v59 = vpack.c.bf16 %v15734_v58, %v15728_v55  ;;  %v12743_v7 = vpop.f32.mrf.mxu1  ;;  %v13541_v55 = vld [vmem:[#allocation2] ss:$8 sps:$4 sm:$0xff]  }
 0x2eb   :  { %v15738_v61 = vpop.f32.mrf.mxu0 }
 0x2ec   :  { %v15754_v9 = vpop.f32.mrf.mxu1 }
 0x2ed   :  { %v15742_v63 = vpop.f32.mrf.mxu0  ;;  %v1610_v11 = vpack.c.bf16 %v15754_v9, %v15748_v5  ;;  %v13574_v5 = vld [vmem:[#allocation2 + $0xe4] ss:$8 sps:$4 sm:$0xff]   ;;  %v13573_v9 = vld [vmem:[#allocation2 + $0x50] ss:$8 sps:$4 sm:$0xff]  }
 0x2ee   :  { %v12744_v12 = vpop.f32.mrf.mxu1 }
 0x2ef   :  { %v15746_v4 = vpop.f32.mrf.mxu0 }
 0x2f0   :  { %v15762_v14 = vpop.f32.mrf.mxu1 }
 0x2f1   :  { %v15750_v6 = vpop.f32.mrf.mxu0 }
 0x2f2   :  { %v12747_v16 = vpop.f32.mrf.mxu1 }
 0x2f3   :  { %v15752_v8 = vpop.f32.mrf.mxu0 }
 0x2f4   :  { %v15768_v18 = vpop.f32.mrf.mxu1 }
 0x2f5   :  { %v15756_v10 = vpop.f32.mrf.mxu0  ;;  %v1611_v20 = vpack.c.bf16 %v15768_v18, %v15762_v14  ;;  %v13571_v14 = vld [vmem:[#allocation2 + $0x54] ss:$8 sps:$4 sm:$0xff]  }
 0x2f6   :  { %v12748_v21 = vpop.f32.mrf.mxu1 }
 0x2f7   :  { %v15760_v13 = vpop.f32.mrf.mxu0 }
 0x2f8   :  { %v15772_v23 = vpop.f32.mrf.mxu1 }
 0x2f9   :  { %v15764_v15 = vpop.f32.mrf.mxu0 }
 0x2fa   :  { %v12751_v25 = vpop.f32.mrf.mxu1 }
 0x2fb   :  { %v15766_v17 = vpop.f32.mrf.mxu0 }
 0x2fc   :  { %v15774_v27 = vpop.f32.mrf.mxu1 }
 0x2fd   :  { %v919_v19 = vpop.f32.mrf.mxu0  ;;  %v1612_v29 = vpack.c.bf16 %v15774_v27, %v15772_v23  ;;  %v13567_v23 = vld [vmem:[#allocation2 + $0x40] ss:$8 sps:$4 sm:$0xff]  }
 0x2fe   :  { %v12752_v30 = vpop.f32.mrf.mxu1  ;;  %v13576_v27 = vld [vmem:[#allocation2 + $0xe0] ss:$8 sps:$4 sm:$0xff]  }
 0x2ff   :  { %v921_v22 = vpop.f32.mrf.mxu0 }
 0x300   :  { %v15778_v32 = vpop.f32.mrf.mxu1 }
 0x301   :  { %v923_v24 = vpop.f32.mrf.mxu0 }
 0x302   :  { %v12755_v34 = vpop.f32.mrf.mxu1 }
 0x303   :  { %v925_v26 = vpop.f32.mrf.mxu0 }
 0x304   :  { %v15780_v36 = vpop.f32.mrf.mxu1 }
 0x305   :  { %v929_v28 = vpop.f32.mrf.mxu0 }
 0x306   :  { %v12756_v38 = vpop.f32.mrf.mxu1 }
 0x307   :  { %v931_v31 = vpop.f32.mrf.mxu0 }
 0x308   :  { %v15782_v40 = vpop.f32.mrf.mxu1 }
 0x309   :  { %v933_v33 = vpop.f32.mrf.mxu0 }
 0x30a   :  { %v12759_v42 = vpop.f32.mrf.mxu1  ;;  %v1096_v38 = vpack.c.bf16 %v933_v33, %v929_v28  ;;  %v1094_v28 = vpack.c.bf16 %v15764_v15, %v15756_v10  ;;  %v1352_v10 = vpack.c.bf16 %v15752_v8, %v15746_v4  ;;  %v1350_v4 = vpack.c.bf16 %v15726_v54, %v15720_v51  ;;  %v13544_v8 = vld [vmem:[#allocation2 + $0x90] ss:$8 sps:$4 sm:$0xff]   ;;  %v13550_v51 = vld [vmem:[#allocation2 + $0xa4] ss:$8 sps:$4 sm:$0xff]  }
 0x30b   :  { %v935_v35 = vpop.f32.mrf.mxu0  ;;  %v13553_v54 = vld [vmem:[#allocation2 + $0x24] ss:$8 sps:$4 sm:$0xff]  }
 0x30c   :  { %v15784_v44 = vpop.f32.mrf.mxu1 }
 0x30d   :  { %v939_v37 = vpop.f32.mrf.mxu0 }
 0x30e   :  { %v12760_v46 = vpop.f32.mrf.mxu1 }
 0x30f   :  { %v941_v39 = vpop.f32.mrf.mxu0 }
 0x310   :  { %v15786_v48 = vpop.f32.mrf.mxu1 }
 0x311   :  { %v943_v41 = vpop.f32.mrf.mxu0 }
 0x312   :  { %v12763_v3 = vpop.f32.mrf.mxu1  ;;  %v1097_v21 = vpack.c.bf16 %v943_v41, %v939_v37  ;;  %v1095_v37 = vpack.c.bf16 %v923_v24, %v919_v19  ;;  %v1353_v19 = vpack.c.bf16 %v15766_v17, %v15760_v13  ;;  %v1351_v13 = vpack.c.bf16 %v15738_v61, %v15730_v56  ;;  %v13547_v61 = vld [vmem:[#allocation2 + $0x14] ss:$8 sps:$4 sm:$0xff]   ;;  %v13552_v17 = vld [vmem:[#allocation2 + $0xa0] ss:$8 sps:$4 sm:$0xff]  }
 0x313   :  { %v945_v43 = vpop.f32.mrf.mxu0  ;;  %v13568_v3 = vld [vmem:[#allocation2 + $0xd4] ss:$8 sps:$4 sm:$0xff]  }
 0x314   :  { %v15788_v16 = vpop.f32.mrf.mxu1  ;;  %v1356_v30 = vpack.c.bf16 %v945_v43, %v941_v39  ;;  %v1354_v39 = vpack.c.bf16 %v925_v26, %v921_v22  ;;  %v1093_v22 = vpack.c.bf16 %v15750_v6, %v15742_v63 }
 0x315   :  { %v949_v45 = vpop.f32.mrf.mxu0  ;;  %v1615_v50 = vpack.c.bf16 %v15788_v16, %v15786_v48  ;;  %v13555_v48 = vld [vmem:[#allocation2 + $0x20] ss:$8 sps:$4 sm:$0xff]   ;;  %v13589_v16 = vld [vmem:[#allocation2 + $0x84] ss:$8 sps:$4 sm:$0xff]  }
 0x316   :  { %v12764_v25 = vpop.f32.mrf.mxu1 }
 0x317   :  { %v951_v47 = vpop.f32.mrf.mxu0  ;;  %v13592_v25 = vld [vmem:[#allocation2 + $0x114] ss:$8 sps:$4 sm:$0xff]  }
 0x318   :  { %v1058_v34 = vpop.f32.mrf.mxu1 }
 0x319   :  { %v953_v49 = vpop.f32.mrf.mxu0 }
 0x31a   :  { %v1098_v60 = vpack.c.bf16 %v953_v49, %v949_v45  ;;  %v12767_v42 = vpop.f32.mrf.mxu1  ;;  %v1355_v45 = vpack.c.bf16 %v935_v35, %v931_v31  ;;  %v13556_v35 = vld [vmem:[#allocation2 + $0xb4] ss:$8 sps:$4 sm:$0xff]   ;;  %v13562_v49 = vld [vmem:[#allocation2 + $0xc4] ss:$8 sps:$4 sm:$0xff]  }
 0x31b   :  { %v955_v7 = vpop.f32.mrf.mxu0  ;;  %v13595_v42 = vld [vmem:[#allocation2 + $0x120] ss:$8 sps:$4 sm:$0xff]  }
 0x31c   :  { %v1357_v12 = vpack.c.bf16 %v955_v7, %v951_v47  ;;  %1228 = vmatpush1.bf16.msra.mxu0 %v1098_v60  ;;  %v1061_v46 = vpop.f32.mrf.mxu1  ;;  %v1613_v47 = vpack.c.bf16 %v15780_v36, %v15778_v32  ;;  %v13561_v32 = vld [vmem:[#allocation2 + $0x30] ss:$8 sps:$4 sm:$0xff]   ;;  %v13565_v36 = vld [vmem:[#allocation2 + $0x44] ss:$8 sps:$4 sm:$0xff]   ;;  %v13564_v60 = vld [vmem:[#allocation2 + $0xc0] ss:$8 sps:$4 sm:$0xff]  }
 0x31d   :  { %1229 = vmatprep.subr.bf16.mxu0 %v18640_v0  ;;  %v959_v33 = vpop.f32.mrf.mxu0  ;;  %v13586_v7 = vld [vmem:[#allocation2 + $0x104] ss:$8 sps:$4 sm:$0xff]  }
 0x31e   :  { %1487 = vmatpush1.bf16.msra.mxu1 %v1357_v12  ;;  %v12768_v41 = vpop.f32.mrf.mxu1  ;;  %v13585_v12 = vld [vmem:[#allocation2 + $0x70] ss:$8 sps:$4 sm:$0xff]  }
 0x31f   :  { %1488 = vmatprep.subr.bf16.mxu1 %v18640_v0  ;;  %v961_v15 = vpop.f32.mrf.mxu0  ;;  %v13603_v41 = vld [vmem:[#allocation2 + $0x140] ss:$8 sps:$4 sm:$0xff]  }
 0x320   :  { %1230 = vmatpush1.bf16.msra.mxu0 %v1097_v21  ;;  %v15796_v43 = vpop.f32.mrf.mxu1  ;;  %v13588_v21 = vld [vmem:[#allocation2 + $0x100] ss:$8 sps:$4 sm:$0xff]  }
 0x321   :  { %1231 = vmatprep.subr.bf16.mxu0 %v18640_v0  ;;  %v963_v63 = vpop.f32.mrf.mxu0 }
 0x322   :  { %1489 = vmatpush1.bf16.msra.mxu1 %v1356_v30  ;;  %v12771_v31 = vpop.f32.mrf.mxu1  ;;  %v1099_v56 = vpack.c.bf16 %v963_v63, %v959_v33  ;;  %v13591_v30 = vld [vmem:[#allocation2 + $0x80] ss:$8 sps:$4 sm:$0xff]   ;;  %v13613_v33 = vld [vmem:[#allocation2 + $0x184] ss:$8 sps:$4 sm:$0xff]   ;;  %v13618_v63 = vld [vmem:[#allocation2 + $0x190] ss:$8 sps:$4 sm:$0xff]  }
 0x323   :  { %1490 = vmatprep.subr.bf16.mxu1 %v18640_v0  ;;  %v965_v6 = vpop.f32.mrf.mxu0  ;;  %v13609_v31 = vld [vmem:[#allocation2 + $0x160] ss:$8 sps:$4 sm:$0xff]  }
 0x324   :  { %1232 = vmatpush1.bf16.msra.mxu0 %v1096_v38  ;;  %v15804_v24 = vpop.f32.mrf.mxu1  ;;  %v1358_v58 = vpack.c.bf16 %v965_v6, %v961_v15  ;;  %v13594_v38 = vld [vmem:[#allocation2 + $0x110] ss:$8 sps:$4 sm:$0xff]   ;;  %v13625_v6 = vld [vmem:[#allocation5 + $0x20] sm:$0xff]  }
 0x325   :  { %1233 = vmatprep.subr.bf16.mxu0 %v18640_v0  ;;  %v1617_v18 = vpack.c.bf16 %v15804_v24, %v15796_v43  ;;  %v13606_v43 = vld [vmem:[#allocation2 + $0x150] ss:$8 sps:$4 sm:$0xff]  }
 0x326   :  { %1491 = vmatpush1.bf16.msra.mxu1 %v1355_v45  ;;  %v12772_v26 = vpop.f32.mrf.mxu1  ;;  %v13598_v45 = vld [vmem:[#allocation2 + $0x134] ss:$8 sps:$4 sm:$0xff]   ;;  %v13612_v24 = vld [vmem:[#allocation2 + $0x170] ss:$8 sps:$4 sm:$0xff]  }
 0x327   :  { %1492 = vmatprep.subr.bf16.mxu1 %v18640_v0  ;;  %v13615_v26 = vld [vmem:[#allocation2 + $0x180] ss:$8 sps:$4 sm:$0xff]   ;;  %v13623_v15 = vld [vmem:[#allocation5 + $0x30] sm:$0xff]  }
 0x328   :  { %1234 = vmatpush1.bf16.msra.mxu0 %v1095_v37  ;;  %v13601_v37 = vld [vmem:[#allocation2 + $0x144] ss:$8 sps:$4 sm:$0xff]  }
 0x329   :  { %1235 = vmatprep.subr.bf16.mxu0 %v18640_v0 }
 0x32a   :  { %1493 = vmatpush1.bf16.msra.mxu1 %v1354_v39  ;;  %v13604_v39 = vld [vmem:[#allocation2 + $0x154] ss:$8 sps:$4 sm:$0xff]  }
 0x32b   :  { %1494 = vmatprep.subr.bf16.mxu1 %v18640_v0 }
 0x32c   :  { %1236 = vmatpush1.bf16.msra.mxu0 %v1094_v28  ;;  %v13607_v28 = vld [vmem:[#allocation2 + $0x164] ss:$8 sps:$4 sm:$0xff]  }
 0x32d   :  { %1237 = vmatprep.subr.bf16.mxu0 %v18640_v0 }
 0x32e   :  { %1495 = vmatpush1.bf16.msra.mxu1 %v1353_v19  ;;  %v13610_v19 = vld [vmem:[#allocation2 + $0x174] ss:$8 sps:$4 sm:$0xff]  }
 0x32f   :  { %1496 = vmatprep.subr.bf16.mxu1 %v18640_v0 }
 0x330   :  { %1238 = vmatpush1.bf16.msra.mxu0 %v1093_v22  ;;  %v13622_v22 = vld [vmem:[#allocation5 + $0x38] sm:$0xff]  }
 0x331   :  { %1239 = vmatprep.subr.bf16.mxu0 %v18640_v0 }
 0x332   :  { %1497 = vmatpush1.bf16.msra.mxu1 %v1352_v10  ;;  %v13616_v10 = vld [vmem:[#allocation2 + $0x194] ss:$8 sps:$4 sm:$0xff]  }
 0x333   :  { %1498 = vmatprep.subr.bf16.mxu1 %v18640_v0 }
 0x334   :  { %1240 = vmatpush1.bf16.msra.mxu0 %v1092_v59  ;;  %v1616_v59 = vpack.c.bf16 %v1061_v46, %v1058_v34  ;;  %v13597_v34 = vld [vmem:[#allocation2 + $0x124] ss:$8 sps:$4 sm:$0xff]   ;;  %v13600_v46 = vld [vmem:[#allocation2 + $0x130] ss:$8 sps:$4 sm:$0xff]  }
 0x335   :  { %1241 = vmatprep.subr.bf16.mxu0 %v18640_v0 }
 0x336   :  { %1499 = vmatpush1.bf16.msra.mxu1 %v1351_v13  ;;  %v13624_v13 = vld [vmem:[#allocation5 + $0x28] sm:$0xff]  }
 0x337   :  { %1500 = vmatprep.subr.bf16.mxu1 %v18640_v0 }
 0x338   :  { %1242 = vmatpush1.bf16.msra.mxu0 %v1091_v53  ;;  %v1614_v53 = vpack.c.bf16 %v15784_v44, %v15782_v40  ;;  %v13559_v40 = vld [vmem:[#allocation2 + $0x34] ss:$8 sps:$4 sm:$0xff]   ;;  %v13558_v44 = vld [vmem:[#allocation2 + $0xb0] ss:$8 sps:$4 sm:$0xff]  }
 0x339   :  { %1257 = vmatprep.subr.bf16.mxu0 %v18640_v0 }
 0x33a   :  { %1501 = vmatpush1.bf16.msra.mxu1 %v1350_v4  ;;  %v13619_v4 = vld [vmem:[#allocation2 + $0x1a4] ss:$8 sps:$4 sm:$0xff]  }
 0x33b   :  { %1516 = vmatprep.subr.bf16.mxu1 %v18640_v0 }
 0x33c   :  { %1258 = vmatpush2.bf16.msra.mxu0 %v1099_v56  ;;  %v13626_v56 = vld [vmem:[#allocation5 + $0x18] sm:$0xff]  }
 0x33d   :  { %1745 = vmatprep.subr.bf16.mxu0 %v18640_v0 }
 0x33e   :  { %1517 = vmatpush2.bf16.msra.mxu1 %v1358_v58  ;;  %v13627_v58 = vld [vmem:[#allocation5 + $0x10] sm:$0xff]  }
 0x33f   :  { %1260 = vmatmul.mubr.bf16.vlgmr.msra.gmra.mxu0 %v13541_v55  ;;  %12773 = vmatprep.subr.bf16.mxu1 %v18638_v1  ;;  %v13621_v55 = vld [vmem:[#allocation2 + $0x1a0] ss:$8 sps:$4 sm:$0xff]  }
 0x340   :  { %1746 = vmatpush1.bf16.msra.mxu0 %v1616_v59  ;;  %11657 = vmatprep.mubr.msk.bf16.mxu0 %vm1199_vm2, %v13547_v61  ;;  %v13628_v59 = vld [vmem:[#allocation5 + $0x8] sm:$0xff]   ;;  %v13629_v61 = vld [vmem:[#allocation5] sm:$0xff]  }
 0x341   :  { %1519 = vmatmul.mubr.bf16.vlgmr.msra.gmra.mxu1 %v13544_v8  ;;  %1747 = vmatprep.subr.bf16.mxu0 %v18640_v0  ;;  %v1073_v8 = vld [vmem:[#allocation10] sm:$0xff] }
 0x342   :  { %11684 = vmatprep.mubr.msk.bf16.mxu1 %vm1199_vm2, %v13550_v51  ;;  %12774 = vmatpush3.bf16.msra.mxu1 %v13622_v22 }
 0x343   :  { %12775 = vmatprep.subr.bf16.mxu1 %v18638_v1 }
 0x344   :  { %1748 = vmatpush1.bf16.msra.mxu0 %v1615_v50 }
 0x345   :  { %1749 = vmatprep.subr.bf16.mxu0 %v18640_v0 }
 0x346   :  { %12776 = vmatpush3.bf16.msra.mxu1 %v13623_v15  ;;  %v1080_v15 = vld [vmem:[#allocation10 + $0x38] sm:$0xff] }
 0x347   :  { %1268 = vmatmul.mubr.bf16.gmra.mxu0 %v13549_v52  ;;  %12777 = vmatprep.subr.bf16.mxu1 %v18638_v1 }
 0x348   :  { %1750 = vmatpush1.bf16.msra.mxu0 %v1614_v53  ;;  %11658 = vmatprep.mubr.msk.bf16.mxu0 %vm1199_vm2, %v13553_v54  ;;  %v1074_v54 = vld [vmem:[#allocation10 + $0x8] sm:$0xff] }
 0x349   :  { %1527 = vmatmul.mubr.bf16.gmra.mxu1 %v13552_v17  ;;  %1751 = vmatprep.subr.bf16.mxu0 %v18640_v0 }
 0x34a   :  { %11685 = vmatprep.mubr.msk.bf16.mxu1 %vm1199_vm2, %v13556_v35  ;;  %12778 = vmatpush3.bf16.msra.mxu1 %v13624_v13  ;;  %v13638_v13 = vld [vmem:[#allocation13 + $0x78] ss:$12 sps:$4 sm:$0xff]  }
 0x34b   :  { %12779 = vmatprep.subr.bf16.mxu1 %v18638_v1 }
 0x34c   :  { %1752 = vmatpush1.bf16.msra.mxu0 %v1613_v47 }
 0x34d   :  { %1753 = vmatprep.subr.bf16.mxu0 %v18640_v0 }
 0x34e   :  { %12780 = vmatpush3.bf16.msra.mxu1 %v13625_v6 }
 0x34f   :  { %1276 = vmatmul.mubr.bf16.gmra.mxu0 %v13555_v48  ;;  %12781 = vmatprep.subr.bf16.mxu1 %v18638_v1 }
 0x350   :  { %1754 = vmatpush1.bf16.msra.mxu0 %v1612_v29  ;;  %11659 = vmatprep.mubr.msk.bf16.mxu0 %vm1199_vm2, %v13559_v40  ;;  %v13582_v29 = vld [vmem:[#allocation2 + $0xf0] ss:$8 sps:$4 sm:$0xff]  }
 0x351   :  { %1535 = vmatmul.mubr.bf16.gmra.mxu1 %v13558_v44  ;;  %1755 = vmatprep.subr.bf16.mxu0 %v18640_v0 }
 0x352   :  { %11686 = vmatprep.mubr.msk.bf16.mxu1 %vm1199_vm2, %v13562_v49  ;;  %12782 = vmatpush3.bf16.msra.mxu1 %v13626_v56  ;;  %v1075_v49 = vld [vmem:[#allocation10 + $0x10] sm:$0xff] }
 0x353   :  { %12783 = vmatprep.subr.bf16.mxu1 %v18638_v1 }
 0x354   :  { %1756 = vmatpush1.bf16.msra.mxu0 %v1611_v20  ;;  %v13570_v20 = vld [vmem:[#allocation2 + $0xd0] ss:$8 sps:$4 sm:$0xff]  }
 0x355   :  { %1757 = vmatprep.subr.bf16.mxu0 %v18640_v0 }
 0x356   :  { %12784 = vmatpush3.bf16.msra.mxu1 %v13627_v58 }
 0x357   :  { %1284 = vmatmul.mubr.bf16.gmra.mxu0 %v13561_v32  ;;  %12785 = vmatprep.subr.bf16.mxu1 %v18638_v1 }
 0x358   :  { %1758 = vmatpush1.bf16.msra.mxu0 %v1610_v11  ;;  %11660 = vmatprep.mubr.msk.bf16.mxu0 %vm1199_vm2, %v13565_v36  ;;  %v13577_v11 = vld [vmem:[#allocation2 + $0x64] ss:$8 sps:$4 sm:$0xff]  }
 0x359   :  { %1543 = vmatmul.mubr.bf16.gmra.mxu1 %v13564_v60  ;;  %1759 = vmatprep.subr.bf16.mxu0 %v18640_v0 }
 0x35a   :  { %11687 = vmatprep.mubr.msk.bf16.mxu1 %vm1199_vm2, %v13568_v3  ;;  %12786 = vmatpush3.bf16.msra.mxu1 %v13628_v59 }
 0x35b   :  { %12787 = vmatprep.subr.bf16.mxu1 %v18638_v1 }
 0x35c   :  { %1760 = vmatpush1.bf16.msra.mxu0 %v1609_v2  ;;  %v13583_v2 = vld [vmem:[#allocation2 + $0x74] ss:$8 sps:$4 sm:$0xff]  }
 0x35d   :  { %1775 = vmatprep.subr.bf16.mxu0 %v18640_v0 }
 0x35e   :  { %12788 = vmatpush3.bf16.msra.mxu1 %v13629_v61  ;;  %v1081_v61 = vld [vmem:[#allocation10 + $0x40] sm:$0xff] }
 0x35f   :  { %1292 = vmatmul.mubr.bf16.gmra.mxu0 %v13567_v23  ;;  %12825 = vmatprep.subr.bf16.mxu1 %v18638_v1 }
 0x360   :  { %11661 = vmatprep.mubr.msk.bf16.mxu0 %vm1199_vm2, %v13571_v14  ;;  %1776 = vmatpush2.bf16.msra.mxu0 %v1617_v18  ;;  %v1076_v18 = vld [vmem:[#allocation10 + $0x18] sm:$0xff] }
 0x361   :  { %1551 = vmatmul.mubr.bf16.gmra.mxu1 %v13570_v20 }
 0x362   :  { %11688 = vmatprep.mubr.msk.bf16.mxu1 %vm1199_vm2, %v13574_v5 }
 0x367   :  { %1300 = vmatmul.mubr.bf16.gmra.mxu0 %v13573_v9 }
 0x368   :  { %11662 = vmatprep.mubr.msk.bf16.mxu0 %vm1199_vm2, %v13577_v11 }
 0x369   :  { %1559 = vmatmul.mubr.bf16.gmra.mxu1 %v13576_v27 }
 0x36a   :  { %11689 = vmatprep.mubr.msk.bf16.mxu1 %vm1199_vm2, %v13580_v57 }
 0x36f   :  { %1308 = vmatmul.mubr.bf16.gmra.mxu0 %v13579_v62  ;;  %v1077_v62 = vld [vmem:[#allocation10 + $0x20] sm:$0xff] }
 0x370   :  { %11663 = vmatprep.mubr.msk.bf16.mxu0 %vm1199_vm2, %v13583_v2 }
 0x371   :  { %1567 = vmatmul.mubr.bf16.gmra.mxu1 %v13582_v29 }
 0x372   :  { %11690 = vmatprep.mubr.msk.bf16.mxu1 %vm1199_vm2, %v13586_v7 }
 0x377   :  { %1316 = vmatmul.mubr.bf16.gmra.mxu0 %v13585_v12 }
 0x378   :  { %11664 = vmatprep.mubr.msk.bf16.mxu0 %vm1199_vm2, %v13589_v16 }
 0x379   :  { %1575 = vmatmul.mubr.bf16.gmra.mxu1 %v13588_v21 }
 0x37a   :  { %11691 = vmatprep.mubr.msk.bf16.mxu1 %vm1199_vm2, %v13592_v25  ;;  %v1078_v25 = vld [vmem:[#allocation10 + $0x28] sm:$0xff] }
 0x37f   :  { %1324 = vmatmul.mubr.bf16.gmra.mxu0 %v13591_v30 }
 0x380   :  { %11710 = vmatprep.mubr.msk.bf16.mxu0 %vm1199_vm2, %v13597_v34  ;;  %v13630_v34 = vld [vmem:[#allocation13 + $0xa8] ss:$12 sps:$4 sm:$0xff]  }
 0x381   :  { %1583 = vmatmul.mubr.bf16.gmra.mxu1 %v13594_v38  ;;  %v13632_v38 = vld [vmem:[#allocation13 + $0xac] ss:$12 sps:$4 sm:$0xff]  }
 0x382   :  { %12789 = vmatprep.mubr.msk.bf16.mxu1 %vm15303_vm0, %v18638_v1  ;;  %2258 = vmatprep.subr.bf16.mxu0 %v13632_v38 }
 0x387   :  { %1778 = vmatmul.mubr.bf16.vlgmr.msra.gmra.mxu0 %v13595_v42 }
 0x388   :  { %11711 = vmatprep.mubr.msk.bf16.mxu0 %vm1199_vm2, %v13598_v45  ;;  %2259 = vmatpush1.bf16.msra.mxu0 %v13630_v34 }
 0x38f   :  { %1786 = vmatmul.mubr.bf16.gmra.mxu0 %v13600_v46  ;;  %v13636_v46 = vld [vmem:[#allocation13 + $0x94] ss:$12 sps:$4 sm:$0xff]  }
 0x390   :  { %11712 = vmatprep.mubr.msk.bf16.mxu0 %vm1199_vm2, %v13601_v37  ;;  %2260 = vmatprep.subr.bf16.mxu0 %v13636_v46 }
 0x397   :  { %1794 = vmatmul.mubr.bf16.gmra.mxu0 %v13603_v41 }
 0x398   :  { %11713 = vmatprep.mubr.msk.bf16.mxu0 %vm1199_vm2, %v13604_v39 }
 0x39f   :  { %1802 = vmatmul.mubr.bf16.gmra.mxu0 %v13606_v43  ;;  %v1079_v43 = vld [vmem:[#allocation10 + $0x30] sm:$0xff] }
 0x3a0   :  { %11714 = vmatprep.mubr.msk.bf16.mxu0 %vm1199_vm2, %v13607_v28  ;;  %v13634_v28 = vld [vmem:[#allocation13 + $0x90] ss:$12 sps:$4 sm:$0xff]  }
 0x3a1   :  { %2261 = vmatpush1.bf16.msra.mxu0 %v13634_v28  ;;  %v1086_v28 = vld [vmem:[#allocation10 + $0x68] sm:$0xff] }
 0x3a7   :  { %1810 = vmatmul.mubr.bf16.gmra.mxu0 %v13609_v31 }
 0x3a8   :  { %11715 = vmatprep.mubr.msk.bf16.mxu0 %vm1199_vm2, %v13610_v19  ;;  %v13640_v19 = vld [vmem:[#allocation13 + $0x7c] ss:$12 sps:$4 sm:$0xff]  }
 0x3a9   :  { %2262 = vmatprep.subr.bf16.mxu0 %v13640_v19 }
 0x3aa   :  { %2263 = vmatpush1.bf16.msra.mxu0 %v13638_v13 }
 0x3af   :  { %1818 = vmatmul.mubr.bf16.gmra.mxu0 %v13612_v24 }
 0x3b0   :  { %11716 = vmatprep.mubr.msk.bf16.mxu0 %vm1199_vm2, %v13613_v33 }
 0x3b7   :  { %1826 = vmatmul.mubr.bf16.gmra.mxu0 %v13615_v26 }
 0x3b8   :  { %11717 = vmatprep.mubr.msk.bf16.mxu0 %vm1199_vm2, %v13616_v10 }
 0x3bf   :  { %1834 = vmatmul.mubr.bf16.gmra.mxu0 %v13618_v63 }
 0x3c0   :  { %11718 = vmatprep.mubr.msk.bf16.mxu0 %vm1199_vm2, %v13619_v4  ;;  %v13644_v4 = vld [vmem:[#allocation13 + $0x64] ss:$12 sps:$4 sm:$0xff]  }
 0x3c1   :  { %2264 = vmatprep.subr.bf16.mxu0 %v13644_v4 }
 0x3c7   :  { %1842 = vmatmul.mubr.bf16.gmra.mxu0 %v13621_v55 }
 0x3c8   :  { %2290 = vmatprep.mubr.bf16.mxu0 %v18640_v0 }
 0x3ff   :  { %v1261_v51 = vpop.f32.mrf.mxu0 }
 0x400   :  { %v1332_v50 = vadd.f32 %v1261_v51, %v1073_v8  ;;  %v13642_v8 = vld [vmem:[#allocation13 + $0x60] ss:$12 sps:$4 sm:$0xff]  }
 0x401   :  { %v1263_v52 = vpop.f32.mrf.mxu0  ;;  %v1520_v53 = vpop.f32.mrf.mxu1  ;;  %2265 = vmatpush1.bf16.msra.mxu0 %v13642_v8 }
 0x402   :  { %v15894_v17 = vadd.f32 %v1520_v53, %v1332_v50  ;;  %v13648_v50 = vld [vmem:[#allocation13 + $0x4c] ss:$12 sps:$4 sm:$0xff]  }
 0x403   :  { %v1264_v35 = vpop.f32.mrf.mxu0  ;;  %v1522_v47 = vpop.f32.mrf.mxu1  ;;  %2266 = vmatprep.subr.bf16.mxu0 %v13648_v50 }
 0x404   :  { %v1333_v48 = vadd.f32 %v1264_v35, %v1074_v54 }
 0x405   :  { %v1266_v40 = vpop.f32.mrf.mxu0  ;;  %v1523_v44 = vpop.f32.mrf.mxu1 }
 0x406   :  { %v15896_v32 = vadd.f32 %v1523_v44, %v1333_v48  ;;  %v1082_v48 = vld [vmem:[#allocation10 + $0x48] sm:$0xff]  ;;  %v13646_v40 = vld [vmem:[#allocation13 + $0x48] ss:$12 sps:$4 sm:$0xff]  }
 0x407   :  { %v1269_v36 = vpop.f32.mrf.mxu0  ;;  %v1525_v60 = vpop.f32.mrf.mxu1  ;;  %2267 = vmatpush1.bf16.msra.mxu0 %v13646_v40 }
 0x408   :  { %v1334_v3 = vadd.f32 %v1269_v36, %v1075_v49  ;;  %v13652_v49 = vld [vmem:[#allocation13 + $0x34] ss:$12 sps:$4 sm:$0xff]  }
 0x409   :  { %v1271_v23 = vpop.f32.mrf.mxu0  ;;  %v1528_v14 = vpop.f32.mrf.mxu1  ;;  %2268 = vmatprep.subr.bf16.mxu0 %v13652_v49 }
 0x40a   :  { %v15898_v20 = vadd.f32 %v1528_v14, %v1334_v3 }
 0x40b   :  { %v1272_v5 = vpop.f32.mrf.mxu0  ;;  %v1530_v9 = vpop.f32.mrf.mxu1 }
 0x40c   :  { %v1335_v11 = vadd.f32 %v1272_v5, %v1076_v18  ;;  %v1083_v18 = vld [vmem:[#allocation10 + $0x50] sm:$0xff]  ;;  %v13650_v5 = vld [vmem:[#allocation13 + $0x30] ss:$12 sps:$4 sm:$0xff]  }
 0x40d   :  { %v1274_v27 = vpop.f32.mrf.mxu0  ;;  %v1531_v57 = vpop.f32.mrf.mxu1  ;;  %2269 = vmatpush1.bf16.msra.mxu0 %v13650_v5 }
 0x40e   :  { %v15900_v2 = vadd.f32 %v1531_v57, %v1335_v11 }
 0x40f   :  { %v1277_v29 = vpop.f32.mrf.mxu0  ;;  %v1533_v7 = vpop.f32.mrf.mxu1 }
 0x410   :  { %v1336_v12 = vadd.f32 %v1277_v29, %v1077_v62  ;;  %v1084_v7 = vld [vmem:[#allocation10 + $0x58] sm:$0xff] }
 0x411   :  { %v1279_v16 = vpop.f32.mrf.mxu0  ;;  %v1536_v21 = vpop.f32.mrf.mxu1 }
 0x412   :  { %v15902_v30 = vadd.f32 %v1536_v21, %v1336_v12 }
 0x413   :  { %v1280_v42 = vpop.f32.mrf.mxu0  ;;  %v1538_v45 = vpop.f32.mrf.mxu1 }
 0x414   :  { %v1337_v37 = vadd.f32 %v1280_v42, %v1078_v25  ;;  %v1085_v42 = vld [vmem:[#allocation10 + $0x60] sm:$0xff] }
 0x415   :  { %v1282_v41 = vpop.f32.mrf.mxu0  ;;  %v1539_v39 = vpop.f32.mrf.mxu1 }
 0x416   :  { %v15904_v31 = vadd.f32 %v1539_v39, %v1337_v37 }
 0x417   :  { %v1285_v24 = vpop.f32.mrf.mxu0  ;;  %v1541_v33 = vpop.f32.mrf.mxu1 }
 0x418   :  { %v1338_v22 = vadd.f32 %v1285_v24, %v1079_v43 }
 0x419   :  { %v1287_v26 = vpop.f32.mrf.mxu0  ;;  %v1544_v10 = vpop.f32.mrf.mxu1 }
 0x41a   :  { %v15906_v63 = vadd.f32 %v1544_v10, %v1338_v22 }
 0x41b   :  { %v1288_v6 = vpop.f32.mrf.mxu0  ;;  %v1546_v56 = vpop.f32.mrf.mxu1 }
 0x41c   :  { %v1339_v55 = vadd.f32 %v1288_v6, %v1080_v15  ;;  %v1087_v15 = vld [vmem:[#allocation10 + $0x70] sm:$0xff] }
 0x41d   :  { %v1290_v58 = vpop.f32.mrf.mxu0  ;;  %v1547_v59 = vpop.f32.mrf.mxu1 }
 0x41e   :  { %v15908_v51 = vadd.f32 %v1547_v59, %v1339_v55  ;;  %v1088_v59 = vld [vmem:[#allocation10 + $0x78] sm:$0xff] }
 0x41f   :  { %v1293_v52 = vpop.f32.mrf.mxu0  ;;  %v1549_v53 = vpop.f32.mrf.mxu1 }
 0x420   :  { %v1340_v54 = vadd.f32 %v1293_v52, %v1081_v61 }
 0x421   :  { %v1295_v35 = vpop.f32.mrf.mxu0  ;;  %v1552_v47 = vpop.f32.mrf.mxu1 }
 0x422   :  { %v15910_v44 = vadd.f32 %v1552_v47, %v1340_v54  ;;  %v1089_v35 = vld [vmem:[#allocation10 + $0x80] sm:$0xff] }
 0x423   :  { %v1296_v36 = vpop.f32.mrf.mxu0  ;;  %v1554_v60 = vpop.f32.mrf.mxu1 }
 0x424   :  { %v1341_v3 = vadd.f32 %v1296_v36, %v1082_v48 }
 0x425   :  { %v1298_v23 = vpop.f32.mrf.mxu0  ;;  %v1555_v14 = vpop.f32.mrf.mxu1 }
 0x426   :  { %v15912_v9 = vadd.f32 %v1555_v14, %v1341_v3  ;;  %v1090_v3 = vld [vmem:[#allocation10 + $0x88] sm:$0xff] }
 0x427   :  { %v1301_v11 = vpop.f32.mrf.mxu0  ;;  %v1557_v27 = vpop.f32.mrf.mxu1 }
 0x428   :  { %v1342_v57 = vadd.f32 %v1301_v11, %v1083_v18 }
 0x429   :  { %v1303_v62 = vpop.f32.mrf.mxu0  ;;  %v1560_v29 = vpop.f32.mrf.mxu1 }
 0x42a   :  { %v15914_v12 = vadd.f32 %v1560_v29, %v1342_v57 }
 0x42b   :  { %v1304_v16 = vpop.f32.mrf.mxu0  ;;  %v1562_v21 = vpop.f32.mrf.mxu1 }
 0x42c   :  { %v1343_v25 = vadd.f32 %v1304_v16, %v1084_v7 }
 0x42d   :  { %v1306_v34 = vpop.f32.mrf.mxu0  ;;  %v1563_v38 = vpop.f32.mrf.mxu1 }
 0x42e   :  { %v15916_v45 = vadd.f32 %v1563_v38, %v1343_v25 }
 0x42f   :  { %v1309_v46 = vpop.f32.mrf.mxu0  ;;  %v1565_v37 = vpop.f32.mrf.mxu1 }
 0x430   :  { %v1344_v41 = vadd.f32 %v1309_v46, %v1085_v42  ;;  %v13633_v37 = vld [vmem:[#allocation13 + $0xb0] ss:$12 sps:$4 sm:$0xff]  }
 0x431   :  { %v1311_v39 = vpop.f32.mrf.mxu0  ;;  %v1568_v43 = vpop.f32.mrf.mxu1 }
 0x432   :  { %v15918_v19 = vadd.f32 %v1568_v43, %v1344_v41 }
 0x433   :  { %v1312_v24 = vpop.f32.mrf.mxu0  ;;  %v1570_v33 = vpop.f32.mrf.mxu1 }
 0x434   :  { %v1345_v22 = vadd.f32 %v1312_v24, %v1086_v28  ;;  %v13637_v24 = vld [vmem:[#allocation13 + $0x98] ss:$12 sps:$4 sm:$0xff]  }
 0x435   :  { %v1314_v26 = vpop.f32.mrf.mxu0  ;;  %v1571_v10 = vpop.f32.mrf.mxu1 }
 0x436   :  { %v15920_v13 = vadd.f32 %v1571_v10, %v1345_v22  ;;  %v13641_v10 = vld [vmem:[#allocation13 + $0x80] ss:$12 sps:$4 sm:$0xff]  }
 0x437   :  { %v1317_v4 = vpop.f32.mrf.mxu0  ;;  %v1573_v6 = vpop.f32.mrf.mxu1 }
 0x438   :  { %v1346_v56 = vadd.f32 %v1317_v4, %v1087_v15 }
 0x439   :  { %v1319_v55 = vpop.f32.mrf.mxu0  ;;  %v1576_v58 = vpop.f32.mrf.mxu1 }
 0x43a   :  { %v15922_v61 = vadd.f32 %v1576_v58, %v1346_v56 }
 0x43b   :  { %v1320_v8 = vpop.f32.mrf.mxu0  ;;  %v1578_v50 = vpop.f32.mrf.mxu1 }
 0x43c   :  { %v1347_v52 = vadd.f32 %v1320_v8, %v1088_v59  ;;  %v13649_v50 = vld [vmem:[#allocation13 + $0x50] ss:$12 sps:$4 sm:$0xff]  }
 0x43d   :  { %v1322_v53 = vpop.f32.mrf.mxu0  ;;  %v1579_v54 = vpop.f32.mrf.mxu1 }
 0x43e   :  { %v15924_v47 = vadd.f32 %v1579_v54, %v1347_v52 }
 0x43f   :  { %v1325_v48 = vpop.f32.mrf.mxu0  ;;  %v1581_v40 = vpop.f32.mrf.mxu1 }
 0x440   :  { %v1348_v49 = vadd.f32 %v1325_v48, %v1089_v35 }
 0x441   :  { %v1327_v36 = vpop.f32.mrf.mxu0  ;;  %v1584_v60 = vpop.f32.mrf.mxu1 }
 0x442   :  { %v15926_v23 = vadd.f32 %v1584_v60, %v1348_v49 }
 0x443   :  { %v1328_v14 = vpop.f32.mrf.mxu0  ;;  %v1586_v18 = vpop.f32.mrf.mxu1 }
 0x444   :  { %v1349_v5 = vadd.f32 %v1328_v14, %v1090_v3 }
 0x445   :  { %v1330_v11 = vpop.f32.mrf.mxu0  ;;  %v1587_v27 = vpop.f32.mrf.mxu1 }
 0x446   :  { %v15928_v57 = vadd.f32 %v1587_v27, %v1349_v5 }
 0x447   :  { %v1779_v62 = vpop.f32.mrf.mxu0  ;;  %v1589_v29 = vpop.f32.mrf.mxu1 }
 0x448   :  { %v1850_v16 = vadd.f32 %v1779_v62, %v15894_v17 }
 0x449   :  { %v1781_v7 = vpop.f32.mrf.mxu0 }
 0x44a   :  { %v1868_v38 = vmax.f32 %v1850_v16, 0.0 }
 0x44b   :  { %v1782_v21 = vpop.f32.mrf.mxu0 }
 0x44c   :  { %v1851_v25 = vadd.f32 %v1782_v21, %v15896_v32 }
 0x44d   :  { %v1784_v34 = vpop.f32.mrf.mxu0 }
 0x44e   :  { %v1869_v42 = vmax.f32 %v1851_v25, 0.0 }
 0x44f   :  { %v1787_v46 = vpop.f32.mrf.mxu0 }
 0x450   :  { %v1886_v41 = vpack.c.bf16 %v1869_v42, %v1868_v38  ;;  %v1852_v43 = vadd.f32 %v1787_v46, %v15898_v20 }
 0x451   :  { %v1789_v39 = vpop.f32.mrf.mxu0 }
 0x452   :  { %12790 = vmatmul.mubr.bf16.vlgmr.msra.gmra.mxu1 %v1886_v41  ;;  %v1870_v33 = vmax.f32 %v1852_v43, 0.0 }
 0x453   :  { %v1790_v28 = vpop.f32.mrf.mxu0  ;;  %12793 = vmatprep.mubr.msk.bf16.mxu1 %vm15303_vm0, %v18638_v1  ;;  %12826 = vmatpush3.bf16.msra.mxu1 %v13633_v37 }
 0x454   :  { %v1853_v17 = vadd.f32 %v1790_v28, %v15900_v2  ;;  %12827 = vmatprep.subr.bf16.mxu1 %v18638_v1  ;;  %v13645_v2 = vld [vmem:[#allocation13 + $0x68] ss:$12 sps:$4 sm:$0xff]  }
 0x455   :  { %v1792_v32 = vpop.f32.mrf.mxu0 }
 0x456   :  { %v1871_v22 = vmax.f32 %v1853_v17, 0.0 }
 0x457   :  { %v1795_v26 = vpop.f32.mrf.mxu0  ;;  %12828 = vmatpush3.bf16.msra.mxu1 %v13637_v24 }
 0x458   :  { %v1887_v15 = vpack.c.bf16 %v1871_v22, %v1870_v33  ;;  %12829 = vmatprep.subr.bf16.mxu1 %v18638_v1  ;;  %v1854_v4 = vadd.f32 %v1795_v26, %v15902_v30 }
 0x459   :  { %v1797_v20 = vpop.f32.mrf.mxu0 }
 0x45a   :  { %12794 = vmatmul.mubr.bf16.gmra.mxu1 %v1887_v15  ;;  %v1872_v58 = vmax.f32 %v1854_v4, 0.0 }
 0x45b   :  { %v1798_v6 = vpop.f32.mrf.mxu0  ;;  %12797 = vmatprep.mubr.msk.bf16.mxu1 %vm15303_vm0, %v18638_v1  ;;  %12830 = vmatpush3.bf16.msra.mxu1 %v13641_v10 }
 0x45c   :  { %v1855_v56 = vadd.f32 %v1798_v6, %v15904_v31  ;;  %12831 = vmatprep.subr.bf16.mxu1 %v18638_v1 }
 0x45d   :  { %v1800_v55 = vpop.f32.mrf.mxu0 }
 0x45e   :  { %v1873_v59 = vmax.f32 %v1855_v56, 0.0  ;;  %v13656_v55 = vld [vmem:[#allocation13 + $0x1c] ss:$12 sps:$4 sm:$0xff]  }
 0x45f   :  { %v1803_v8 = vpop.f32.mrf.mxu0  ;;  %12832 = vmatpush3.bf16.msra.mxu1 %v13645_v2  ;;  %2270 = vmatprep.subr.bf16.mxu0 %v13656_v55 }
 0x460   :  { %v1888_v52 = vpack.c.bf16 %v1873_v59, %v1872_v58  ;;  %12833 = vmatprep.subr.bf16.mxu1 %v18638_v1  ;;  %v1856_v53 = vadd.f32 %v1803_v8, %v15906_v63  ;;  %v13654_v58 = vld [vmem:[#allocation13 + $0x18] ss:$12 sps:$4 sm:$0xff]   ;;  %v13661_v8 = vld [vmem:[#allocation13 + $0x8] ss:$12 sps:$4 sm:$0xff]  }
 0x461   :  { %v1805_v30 = vpop.f32.mrf.mxu0  ;;  %2271 = vmatpush1.bf16.msra.mxu0 %v13654_v58  ;;  %v13660_v59 = vld [vmem:[#allocation13 + $0x4] ss:$12 sps:$4 sm:$0xff]  }
 0x462   :  { %12798 = vmatmul.mubr.bf16.gmra.mxu1 %v1888_v52  ;;  %v1874_v48 = vmax.f32 %v1856_v53, 0.0  ;;  %2272 = vmatprep.subr.bf16.mxu0 %v13660_v59 }
 0x463   :  { %v1806_v54 = vpop.f32.mrf.mxu0  ;;  %12801 = vmatprep.mubr.msk.bf16.mxu1 %vm15303_vm0, %v18638_v1  ;;  %12834 = vmatpush3.bf16.msra.mxu1 %v13649_v50  ;;  %v15975_v50 = vld [vmem:[#allocation8] ss:$0 sm:$0xff] }
 0x464   :  { %v1857_v31 = vadd.f32 %v1806_v54, %v15908_v51  ;;  %12835 = vmatprep.subr.bf16.mxu1 %v18638_v1 }
 0x465   :  { %v1808_v35 = vpop.f32.mrf.mxu0 }
 0x466   :  { %v1875_v40 = vmax.f32 %v1857_v31, 0.0 }
 0x467   :  { %v1811_v49 = vpop.f32.mrf.mxu0 }
 0x468   :  { %v1889_v36 = vpack.c.bf16 %v1875_v40, %v1874_v48  ;;  %v1858_v3 = vadd.f32 %v1811_v49, %v15910_v44 }
 0x469   :  { %v1813_v60 = vpop.f32.mrf.mxu0 }
 0x46a   :  { %12802 = vmatmul.mubr.bf16.gmra.mxu1 %v1889_v36  ;;  %v1876_v5 = vmax.f32 %v1858_v3, 0.0 }
 0x46b   :  { %v1814_v63 = vpop.f32.mrf.mxu0  ;;  %12805 = vmatprep.mubr.msk.bf16.mxu1 %vm15303_vm0, %v18638_v1 }
 0x46c   :  { %v1859_v14 = vadd.f32 %v1814_v63, %v15912_v9 }
 0x46d   :  { %v1816_v18 = vpop.f32.mrf.mxu0 }
 0x46e   :  { %v1877_v51 = vmax.f32 %v1859_v14, 0.0 }
 0x46f   :  { %v1819_v11 = vpop.f32.mrf.mxu0 }
 0x470   :  { %v1890_v27 = vpack.c.bf16 %v1877_v51, %v1876_v5  ;;  %v1860_v29 = vadd.f32 %v1819_v11, %v15914_v12 }
 0x471   :  { %v1821_v62 = vpop.f32.mrf.mxu0 }
 0x472   :  { %12806 = vmatmul.mubr.bf16.gmra.mxu1 %v1890_v27  ;;  %v1878_v21 = vmax.f32 %v1860_v29, 0.0 }
 0x473   :  { %v1822_v7 = vpop.f32.mrf.mxu0  ;;  %12809 = vmatprep.mubr.msk.bf16.mxu1 %vm15303_vm0, %v18638_v1 }
 0x474   :  { %v1861_v44 = vadd.f32 %v1822_v7, %v15916_v45 }
 0x475   :  { %v1824_v16 = vpop.f32.mrf.mxu0 }
 0x476   :  { %v1879_v25 = vmax.f32 %v1861_v44, 0.0 }
 0x477   :  { %v1827_v34 = vpop.f32.mrf.mxu0 }
 0x478   :  { %v1891_v9 = vpack.c.bf16 %v1879_v25, %v1878_v21  ;;  %v1862_v42 = vadd.f32 %v1827_v34, %v15918_v19 }
 0x479   :  { %v1829_v38 = vpop.f32.mrf.mxu0 }
 0x47a   :  { %12810 = vmatmul.mubr.bf16.gmra.mxu1 %v1891_v9  ;;  %v1880_v41 = vmax.f32 %v1862_v42, 0.0 }
 0x47b   :  { %v1830_v46 = vpop.f32.mrf.mxu0  ;;  %12813 = vmatprep.mubr.msk.bf16.mxu1 %vm15303_vm0, %v18638_v1 }
 0x47c   :  { %v1863_v12 = vadd.f32 %v1830_v46, %v15920_v13 }
 0x47d   :  { %v1832_v37 = vpop.f32.mrf.mxu0 }
 0x47e   :  { %v1881_v39 = vmax.f32 %v1863_v12, 0.0 }
 0x47f   :  { %v1835_v43 = vpop.f32.mrf.mxu0 }
 0x480   :  { %v1892_v45 = vpack.c.bf16 %v1881_v39, %v1880_v41  ;;  %v1864_v24 = vadd.f32 %v1835_v43, %v15922_v61 }
 0x481   :  { %v1837_v28 = vpop.f32.mrf.mxu0 }
 0x482   :  { %12814 = vmatmul.mubr.bf16.gmra.mxu1 %v1892_v45  ;;  %v1882_v33 = vmax.f32 %v1864_v24, 0.0 }
 0x483   :  { %v1838_v17 = vpop.f32.mrf.mxu0  ;;  %12817 = vmatprep.mubr.msk.bf16.mxu1 %vm15303_vm0, %v18638_v1 }
 0x484   :  { %v1865_v19 = vadd.f32 %v1838_v17, %v15924_v47  ;;  %v13653_v47 = vld [vmem:[#allocation13 + $0x38] ss:$12 sps:$4 sm:$0xff]  }
 0x485   :  { %v1840_v32 = vpop.f32.mrf.mxu0  ;;  %12836 = vmatpush3.bf16.msra.mxu1 %v13653_v47 }
 0x486   :  { %v1883_v22 = vmax.f32 %v1865_v19, 0.0  ;;  %12837 = vmatprep.subr.bf16.mxu1 %v18638_v1 }
 0x487   :  { %v1843_v26 = vpop.f32.mrf.mxu0 }
 0x488   :  { %v1893_v13 = vpack.c.bf16 %v1883_v22, %v1882_v33  ;;  %v1866_v15 = vadd.f32 %v1843_v26, %v15926_v23  ;;  %v13657_v23 = vld [vmem:[#allocation13 + $0x20] ss:$12 sps:$4 sm:$0xff]  }
 0x489   :  { %v1845_v10 = vpop.f32.mrf.mxu0  ;;  %12838 = vmatpush3.bf16.msra.mxu1 %v13657_v23 }
 0x48a   :  { %12818 = vmatmul.mubr.bf16.gmra.mxu1 %v1893_v13  ;;  %v1884_v6 = vmax.f32 %v1866_v15, 0.0  ;;  %12839 = vmatprep.subr.bf16.mxu1 %v18638_v1 }
 0x48b   :  { %v1846_v20 = vpop.f32.mrf.mxu0  ;;  %12821 = vmatprep.mubr.msk.bf16.mxu1 %vm15303_vm0, %v18638_v1 }
 0x48c   :  { %v1867_v61 = vadd.f32 %v1846_v20, %v15928_v57  ;;  %v13658_v57 = vld [vmem:[#allocation13] ss:$12 sps:$4 sm:$0xff]  }
 0x48d   :  { %v1848_v4 = vpop.f32.mrf.mxu0  ;;  %2273 = vmatpush1.bf16.msra.mxu0 %v13658_v57  ;;  %12840 = vmatpush3.bf16.msra.mxu1 %v13661_v8 }
 0x48e   :  { %v1885_v2 = vmax.f32 %v1867_v61, 0.0  ;;  %2640 = vmatprep.subr.bf16.mxu0 %v18640_v0  ;;  %2899 = vmatprep.subr.bf16.mxu1 %v18640_v0 }
 0x490   :  { %v1894_v56 = vpack.c.bf16 %v1885_v2, %v1884_v6 }
 0x492   :  { %12822 = vmatmul.mubr.bf16.gmra.mxu1 %v1894_v56 }
 0x493   :  { %12841 = vmatprep.mubr.msk.bf16.mxu1 %vm15303_vm0, %v18638_v1 }
 0x512   :  { %v2000_v52 = vpop.f32.mrf.mxu1 }
 0x513   :  { %v2001_v53 = vadd.f32 %v15975_v50, %v2000_v52 }
 0x514   :  { %v12791_v30 = vpop.f32.mrf.mxu1 }
 0x515   :  { %v2071_v48 = vmax.f32 %v2001_v53, 0.0 }
 0x516   :  { %v2003_v54 = vpop.f32.mrf.mxu1 }
 0x517   :  { %v2004_v31 = vadd.f32 %v15975_v50, %v2003_v54 }
 0x518   :  { %v12792_v35 = vpop.f32.mrf.mxu1 }
 0x519   :  { %v2072_v40 = vmax.f32 %v2004_v31, 0.0 }
 0x51a   :  { %v2008_v49 = vpop.f32.mrf.mxu1 }
 0x51b   :  { %v15979_v36 = vpack.c.bf16 %v2072_v40, %v2071_v48  ;;  %v2009_v3 = vadd.f32 %v15975_v50, %v2008_v49 }
 0x51c   :  { %v12795_v60 = vpop.f32.mrf.mxu1 }
 0x51d   :  { %2291 = vmatmul.mubr.bf16.vlgmr.msra.gmra.mxu0 %v15979_v36  ;;  %12842 = vmatmul.mubr.bf16.vlgmr.msra.gmra.mxu1 %v15979_v36  ;;  %v2073_v5 = vmax.f32 %v2009_v3, 0.0 }
 0x51e   :  { %v2011_v63 = vpop.f32.mrf.mxu1  ;;  %2300 = vmatprep.mubr.bf16.mxu0 %v18640_v0  ;;  %12845 = vmatprep.mubr.msk.bf16.mxu1 %vm15303_vm0, %v18638_v1 }
 0x51f   :  { %v2012_v14 = vadd.f32 %v15975_v50, %v2011_v63 }
 0x520   :  { %v12796_v18 = vpop.f32.mrf.mxu1 }
 0x521   :  { %v2074_v51 = vmax.f32 %v2012_v14, 0.0 }
 0x522   :  { %v2016_v11 = vpop.f32.mrf.mxu1 }
 0x523   :  { %v15988_v27 = vpack.c.bf16 %v2074_v51, %v2073_v5  ;;  %v2017_v29 = vadd.f32 %v15975_v50, %v2016_v11 }
 0x524   :  { %v12799_v62 = vpop.f32.mrf.mxu1 }
 0x525   :  { %2301 = vmatmul.mubr.bf16.gmra.mxu0 %v15988_v27  ;;  %12846 = vmatmul.mubr.bf16.gmra.mxu1 %v15988_v27  ;;  %v2075_v21 = vmax.f32 %v2017_v29, 0.0 }
 0x526   :  { %v2019_v7 = vpop.f32.mrf.mxu1  ;;  %2310 = vmatprep.mubr.bf16.mxu0 %v18640_v0  ;;  %12849 = vmatprep.mubr.msk.bf16.mxu1 %vm15303_vm0, %v18638_v1 }
 0x527   :  { %v2020_v44 = vadd.f32 %v15975_v50, %v2019_v7 }
 0x528   :  { %v12800_v16 = vpop.f32.mrf.mxu1 }
 0x529   :  { %v2076_v25 = vmax.f32 %v2020_v44, 0.0  ;;  %v13664_v44 = vld [vmem:[#allocation2 + $0x1b4] ss:$8 sps:$4 sm:$0xff]   ;;  %v13667_v16 = vld [vmem:[#allocation2 + $0x244] ss:$8 sps:$4 sm:$0xff]  }
 0x52a   :  { %v2024_v34 = vpop.f32.mrf.mxu1 }
 0x52b   :  { %v15997_v9 = vpack.c.bf16 %v2076_v25, %v2075_v21  ;;  %v2025_v42 = vadd.f32 %v15975_v50, %v2024_v34 }
 0x52c   :  { %v12803_v38 = vpop.f32.mrf.mxu1 }
 0x52d   :  { %2311 = vmatmul.mubr.bf16.gmra.mxu0 %v15997_v9  ;;  %12850 = vmatmul.mubr.bf16.gmra.mxu1 %v15997_v9  ;;  %v2077_v41 = vmax.f32 %v2025_v42, 0.0 }
 0x52e   :  { %v2027_v46 = vpop.f32.mrf.mxu1  ;;  %2320 = vmatprep.mubr.bf16.mxu0 %v18640_v0  ;;  %12853 = vmatprep.mubr.msk.bf16.mxu1 %vm15303_vm0, %v18638_v1 }
 0x52f   :  { %v2028_v12 = vadd.f32 %v15975_v50, %v2027_v46 }
 0x530   :  { %v12804_v37 = vpop.f32.mrf.mxu1 }
 0x531   :  { %v2078_v39 = vmax.f32 %v2028_v12, 0.0 }
 0x532   :  { %v2032_v43 = vpop.f32.mrf.mxu1 }
 0x533   :  { %v16006_v45 = vpack.c.bf16 %v2078_v39, %v2077_v41  ;;  %v2033_v24 = vadd.f32 %v15975_v50, %v2032_v43 }
 0x534   :  { %v12807_v28 = vpop.f32.mrf.mxu1 }
 0x535   :  { %2321 = vmatmul.mubr.bf16.gmra.mxu0 %v16006_v45  ;;  %12854 = vmatmul.mubr.bf16.gmra.mxu1 %v16006_v45  ;;  %v2079_v33 = vmax.f32 %v2033_v24, 0.0 }
 0x536   :  { %v2035_v17 = vpop.f32.mrf.mxu1  ;;  %2330 = vmatprep.mubr.bf16.mxu0 %v18640_v0  ;;  %12857 = vmatprep.mubr.msk.bf16.mxu1 %vm15303_vm0, %v18638_v1 }
 0x537   :  { %v2036_v19 = vadd.f32 %v15975_v50, %v2035_v17 }
 0x538   :  { %v12808_v32 = vpop.f32.mrf.mxu1 }
 0x539   :  { %v2080_v22 = vmax.f32 %v2036_v19, 0.0 }
 0x53a   :  { %v2040_v26 = vpop.f32.mrf.mxu1 }
 0x53b   :  { %v16015_v13 = vpack.c.bf16 %v2080_v22, %v2079_v33  ;;  %v2041_v15 = vadd.f32 %v15975_v50, %v2040_v26 }
 0x53c   :  { %v12811_v10 = vpop.f32.mrf.mxu1 }
 0x53d   :  { %2331 = vmatmul.mubr.bf16.gmra.mxu0 %v16015_v13  ;;  %12858 = vmatmul.mubr.bf16.gmra.mxu1 %v16015_v13  ;;  %v2081_v6 = vmax.f32 %v2041_v15, 0.0 }
 0x53e   :  { %v2043_v20 = vpop.f32.mrf.mxu1  ;;  %2340 = vmatprep.mubr.bf16.mxu0 %v18640_v0  ;;  %12861 = vmatprep.mubr.msk.bf16.mxu1 %vm15303_vm0, %v18638_v1 }
 0x53f   :  { %v2044_v61 = vadd.f32 %v15975_v50, %v2043_v20 }
 0x540   :  { %v12812_v4 = vpop.f32.mrf.mxu1 }
 0x541   :  { %v2082_v2 = vmax.f32 %v2044_v61, 0.0 }
 0x542   :  { %v2048_v56 = vpop.f32.mrf.mxu1 }
 0x543   :  { %v16024_v47 = vpack.c.bf16 %v2082_v2, %v2081_v6  ;;  %v2049_v58 = vadd.f32 %v15975_v50, %v2048_v56 }
 0x544   :  { %v12815_v55 = vpop.f32.mrf.mxu1 }
 0x545   :  { %2341 = vmatmul.mubr.bf16.gmra.mxu0 %v16024_v47  ;;  %12862 = vmatmul.mubr.bf16.gmra.mxu1 %v16024_v47  ;;  %v2083_v8 = vmax.f32 %v2049_v58, 0.0 }
 0x546   :  { %v2051_v23 = vpop.f32.mrf.mxu1  ;;  %2350 = vmatprep.mubr.bf16.mxu0 %v18640_v0  ;;  %12865 = vmatprep.mubr.msk.bf16.mxu1 %vm15303_vm0, %v18638_v1 }
 0x547   :  { %v2052_v59 = vadd.f32 %v15975_v50, %v2051_v23 }
 0x548   :  { %v12816_v57 = vpop.f32.mrf.mxu1 }
 0x549   :  { %v2084_v52 = vmax.f32 %v2052_v59, 0.0 }
 0x54a   :  { %v2056_v30 = vpop.f32.mrf.mxu1 }
 0x54b   :  { %v16033_v53 = vpack.c.bf16 %v2084_v52, %v2083_v8  ;;  %v2057_v31 = vadd.f32 %v15975_v50, %v2056_v30 }
 0x54c   :  { %v12819_v54 = vpop.f32.mrf.mxu1 }
 0x54d   :  { %2351 = vmatmul.mubr.bf16.gmra.mxu0 %v16033_v53  ;;  %12866 = vmatmul.mubr.bf16.gmra.mxu1 %v16033_v53  ;;  %v2085_v49 = vmax.f32 %v2057_v31, 0.0 }
 0x54e   :  { %v2059_v35 = vpop.f32.mrf.mxu1  ;;  %2360 = vmatprep.mubr.bf16.mxu0 %v18640_v0  ;;  %12869 = vmatprep.mubr.msk.bf16.mxu1 %vm15303_vm0, %v18638_v1 }
 0x54f   :  { %v2060_v48 = vadd.f32 %v15975_v50, %v2059_v35 }
 0x550   :  { %v12820_v40 = vpop.f32.mrf.mxu1 }
 0x551   :  { %v2086_v60 = vmax.f32 %v2060_v48, 0.0 }
 0x552   :  { %v2064_v3 = vpop.f32.mrf.mxu1 }
 0x553   :  { %v16042_v63 = vpack.c.bf16 %v2086_v60, %v2085_v49  ;;  %v2065_v18 = vadd.f32 %v15975_v50, %v2064_v3 }
 0x554   :  { %v12823_v14 = vpop.f32.mrf.mxu1 }
 0x555   :  { %18742 = vst [vmem:[#allocation105_spill] sm:$0xff] %v16042_v63  ;;  %2361 = vmatmul.mubr.bf16.gmra.mxu0 %v16042_v63  ;;  %12870 = vmatmul.mubr.bf16.gmra.mxu1 %v16042_v63  ;;  %v2087_v62 = vmax.f32 %v2065_v18, 0.0 }
 0x556   :  { %v2067_v5 = vpop.f32.mrf.mxu1  ;;  %2370 = vmatprep.mubr.bf16.mxu0 %v18640_v0  ;;  %12873 = vmatprep.mubr.msk.bf16.mxu1 %vm15303_vm0, %v18638_v1 }
 0x557   :  { %v2068_v51 = vadd.f32 %v15975_v50, %v2067_v5 }
 0x558   :  { %v12824_v11 = vpop.f32.mrf.mxu1 }
 0x559   :  { %v2088_v29 = vmax.f32 %v2068_v51, 0.0 }
 0x55b   :  { %v16051_v7 = vpack.c.bf16 %v2088_v29, %v2087_v62 }
 0x55d   :  { %18743 = vst [vmem:[#allocation106_spill] sm:$0xff] %v16051_v7  ;;  %2371 = vmatmul.mubr.bf16.gmra.mxu0 %v16051_v7  ;;  %12874 = vmatmul.mubr.bf16.gmra.mxu1 %v16051_v7 }
 0x55e   :  { %11770 = vmatprep.mubr.msk.bf16.mxu0 %vm1199_vm2, %v13664_v44  ;;  %11797 = vmatprep.mubr.msk.bf16.mxu1 %vm1199_vm2, %v13667_v16 }
 0x5dd   :  { %v16057_v21 = vpop.f32.mrf.mxu0  ;;  %v16059_v25 = vpop.f32.mrf.mxu1 }
 0x5df   :  { %v16061_v50 = vpop.f32.mrf.mxu0  ;;  %v12843_v34 = vpop.f32.mrf.mxu1 }
 0x5e1   :  { %v16063_v38 = vpop.f32.mrf.mxu0  ;;  %v16065_v42 = vpop.f32.mrf.mxu1 }
 0x5e3   :  { %v16071_v37 = vpop.f32.mrf.mxu0  ;;  %v12844_v41 = vpop.f32.mrf.mxu1 }
 0x5e5   :  { %v16073_v39 = vpop.f32.mrf.mxu0  ;;  %v16075_v43 = vpop.f32.mrf.mxu1 }
 0x5e7   :  { %v16077_v28 = vpop.f32.mrf.mxu0  ;;  %v12847_v24 = vpop.f32.mrf.mxu1 }
 0x5e9   :  { %v16079_v17 = vpop.f32.mrf.mxu0  ;;  %v16081_v19 = vpop.f32.mrf.mxu1 }
 0x5eb   :  { %v16087_v22 = vpop.f32.mrf.mxu0  ;;  %v12848_v26 = vpop.f32.mrf.mxu1 }
 0x5ed   :  { %v16089_v10 = vpop.f32.mrf.mxu0  ;;  %v16091_v15 = vpop.f32.mrf.mxu1 }
 0x5ef   :  { %v16093_v20 = vpop.f32.mrf.mxu0  ;;  %v12851_v61 = vpop.f32.mrf.mxu1 }
 0x5f1   :  { %v16095_v4 = vpop.f32.mrf.mxu0  ;;  %v16097_v6 = vpop.f32.mrf.mxu1 }
 0x5f3   :  { %v16101_v56 = vpop.f32.mrf.mxu0  ;;  %v12852_v55 = vpop.f32.mrf.mxu1 }
 0x5f5   :  { %v16103_v58 = vpop.f32.mrf.mxu0  ;;  %v16105_v23 = vpop.f32.mrf.mxu1 }
 0x5f7   :  { %v16107_v59 = vpop.f32.mrf.mxu0  ;;  %v12855_v57 = vpop.f32.mrf.mxu1 }
 0x5f9   :  { %v16109_v8 = vpop.f32.mrf.mxu0  ;;  %v16111_v52 = vpop.f32.mrf.mxu1 }
 0x5fb   :  { %v16115_v54 = vpop.f32.mrf.mxu0  ;;  %v12856_v31 = vpop.f32.mrf.mxu1 }
 0x5fd   :  { %v2332_v35 = vpop.f32.mrf.mxu0  ;;  %v16117_v48 = vpop.f32.mrf.mxu1 }
 0x5ff   :  { %v2334_v40 = vpop.f32.mrf.mxu0  ;;  %v12859_v49 = vpop.f32.mrf.mxu1 }
 0x601   :  { %v2336_v60 = vpop.f32.mrf.mxu0  ;;  %v16119_v3 = vpop.f32.mrf.mxu1 }
 0x603   :  { %v2338_v18 = vpop.f32.mrf.mxu0  ;;  %v12860_v5 = vpop.f32.mrf.mxu1 }
 0x605   :  { %v2342_v51 = vpop.f32.mrf.mxu0  ;;  %v16123_v11 = vpop.f32.mrf.mxu1 }
 0x607   :  { %v2344_v62 = vpop.f32.mrf.mxu0  ;;  %v12863_v29 = vpop.f32.mrf.mxu1 }
 0x609   :  { %v2346_v44 = vpop.f32.mrf.mxu0  ;;  %v16125_v16 = vpop.f32.mrf.mxu1 }
 0x60b   :  { %v2348_v34 = vpop.f32.mrf.mxu0  ;;  %v12864_v41 = vpop.f32.mrf.mxu1 }
 0x60d   :  { %v2352_v24 = vpop.f32.mrf.mxu0  ;;  %v16127_v26 = vpop.f32.mrf.mxu1 }
 0x60f   :  { %v2354_v61 = vpop.f32.mrf.mxu0  ;;  %v12867_v55 = vpop.f32.mrf.mxu1 }
 0x610   :  { %v18744_v55 = vmov 0  }
 0x611   :  { %v2356_v57 = vpop.f32.mrf.mxu0  ;;  %v16129_v31 = vpop.f32.mrf.mxu1 }
 0x612   :  { %v2510_v7 = vpack.c.bf16 %v2356_v57, %v2352_v24  ;;  %v13679_v24 = vld [vmem:[#allocation2 + $0x260] ss:$8 sps:$4 sm:$0xff]   ;;  %v13689_v57 = vld [vmem:[#allocation2 + $0x284] ss:$8 sps:$4 sm:$0xff]  }
 0x613   :  { %v2358_v49 = vpop.f32.mrf.mxu0  ;;  %v12868_v5 = vpop.f32.mrf.mxu1 }
 0x614   :  { %v2769_v63 = vpack.c.bf16 %v2358_v49, %v2354_v61  ;;  %v13685_v61 = vld [vmem:[#allocation2 + $0x270] ss:$8 sps:$4 sm:$0xff]   ;;  %v13694_v49 = vld [vmem:[#allocation2 + $0x200] ss:$8 sps:$4 sm:$0xff]  }
 0x615   :  { %v2362_v12 = vpop.f32.mrf.mxu0  ;;  %v16131_v33 = vpop.f32.mrf.mxu1 }
 0x617   :  { %v2364_v2 = vpop.f32.mrf.mxu0  ;;  %v12871_v29 = vpop.f32.mrf.mxu1 }
 0x619   :  { %v2366_v30 = vpop.f32.mrf.mxu0  ;;  %v16133_v14 = vpop.f32.mrf.mxu1 }
 0x61a   :  { %v2511_v1 = vpack.c.bf16 %v2366_v30, %v2362_v12  ;;  %v2509_v12 = vpack.c.bf16 %v2346_v44, %v2342_v51  ;;  %v13677_v51 = vld [vmem:[#allocation2 + $0x264] ss:$8 sps:$4 sm:$0xff]   ;;  %v18748_v44 = vpack.c.bf16 %v16119_v3, %v16117_v48  ;;  %v18750_v48 = vpack.c.bf16 %v16097_v6, %v16091_v15  ;;  %v13686_v3 = vld [vmem:[#allocation2 + $0x1f4] ss:$8 sps:$4 sm:$0xff]  }
 0x61b   :  { %v2368_v41 = vpop.f32.mrf.mxu0  ;;  %v12872_v46 = vpop.f32.mrf.mxu1  ;;  %v18752_v15 = vpack.c.bf16 %v16065_v42, %v16059_v25  ;;  %v13692_v6 = vld [vmem:[#allocation2 + $0x204] ss:$8 sps:$4 sm:$0xff]   ;;  %v13700_v42 = vld [vmem:[#allocation2 + $0x210] ss:$8 sps:$4 sm:$0xff]  }
 0x61c   :  { %v2770_v32 = vpack.c.bf16 %v2368_v41, %v2364_v2  ;;  %2641 = vmatpush1.bf16.msra.mxu0 %v2511_v1  ;;  %v2768_v1 = vpack.c.bf16 %v2348_v34, %v2344_v62  ;;  %v2508_v2 = vpack.c.bf16 %v2336_v60, %v2332_v35  ;;  %v2506_v35 = vpack.c.bf16 %v16095_v4, %v16089_v10  ;;  %v13670_v60 = vld [vmem:[#allocation2 + $0x1c0] ss:$8 sps:$4 sm:$0xff]   ;;  %v13676_v62 = vld [vmem:[#allocation2 + $0x1d0] ss:$8 sps:$4 sm:$0xff]   ;;  %v13680_v34 = vld [vmem:[#allocation2 + $0x1e4] ss:$8 sps:$4 sm:$0xff]  }
 0x61d   :  { %v16135_v0 = vpop.f32.mrf.mxu1  ;;  %2642 = vmatprep.subr.bf16.mxu0 %v18744_v55  ;;  %v2372_v30 = vpop.f32.mrf.mxu0  ;;  %v18746_v4 = vpack.c.bf16 %v16063_v38, %v16057_v21  ;;  %v13671_v21 = vld [vmem:[#allocation2 + $0x254] ss:$8 sps:$4 sm:$0xff]   ;;  %v18747_v38 = vmov 0.0   ;;  %v13701_v25 = vld [vmem:[#allocation2 + $0x2a4] ss:$8 sps:$4 sm:$0xff]  }
 0x61e   :  { %2900 = vmatpush1.bf16.msra.mxu1 %v2770_v32  ;;  %v2767_v32 = vpack.c.bf16 %v2338_v18, %v2334_v40  ;;  %v2765_v40 = vpack.c.bf16 %v16101_v56, %v16093_v20  ;;  %v2763_v20 = vpack.c.bf16 %v16071_v37, %v16061_v50  ;;  %v3029_v50 = vpack.c.bf16 %v16133_v14, %v16131_v33  ;;  %v13674_v18 = vld [vmem:[#allocation2 + $0x1d4] ss:$8 sps:$4 sm:$0xff]   ;;  %v13673_v33 = vld [vmem:[#allocation2 + $0x250] ss:$8 sps:$4 sm:$0xff]  }
 0x61f   :  { %v12875_v5 = vpop.f32.mrf.mxu1  ;;  %2901 = vmatprep.subr.bf16.mxu1 %v18744_v55  ;;  %v3028_v37 = vpack.c.bf16 %v16129_v31, %v16127_v26  ;;  %v3027_v14 = vpack.c.bf16 %v16125_v16, %v16123_v11  ;;  %v13683_v11 = vld [vmem:[#allocation2 + $0x274] ss:$8 sps:$4 sm:$0xff]   ;;  %v18749_v16 = vpack.c.bf16 %v16111_v52, %v16105_v23  ;;  %v13682_v26 = vld [vmem:[#allocation2 + $0x1e0] ss:$8 sps:$4 sm:$0xff]   ;;  %v18751_v23 = vpack.c.bf16 %v16081_v19, %v16075_v43  ;;  %v13688_v52 = vld [vmem:[#allocation2 + $0x1f0] ss:$8 sps:$4 sm:$0xff]  }
 0x620   :  { %2643 = vmatpush1.bf16.msra.mxu0 %v2510_v7  ;;  %v2507_v7 = vpack.c.bf16 %v16109_v8, %v16103_v58  ;;  %v2374_v58 = vpop.f32.mrf.mxu0  ;;  %v18745_v8 = vpack.c.bf16 %v16079_v17, %v16073_v39  ;;  %v13662_v39 = vld [vmem:[#allocation2 + $0x1b0] ss:$8 sps:$4 sm:$0xff]   ;;  %v13691_v31 = vld [vmem:[#allocation2 + $0x280] ss:$8 sps:$4 sm:$0xff]   ;;  %v13695_v19 = vld [vmem:[#allocation2 + $0x294] ss:$8 sps:$4 sm:$0xff]  }
 0x621   :  { %v16139_v29 = vpop.f32.mrf.mxu1  ;;  %2644 = vmatprep.subr.bf16.mxu0 %v18744_v55  ;;  %v13698_v41 = vld [vmem:[#allocation2 + $0x214] ss:$8 sps:$4 sm:$0xff]   ;;  %v13697_v5 = vld [vmem:[#allocation2 + $0x290] ss:$8 sps:$4 sm:$0xff]  }
 0x622   :  { %2902 = vmatpush1.bf16.msra.mxu1 %v2769_v63  ;;  %v2766_v63 = vpack.c.bf16 %v16115_v54, %v16107_v59  ;;  %v2764_v59 = vpack.c.bf16 %v16087_v22, %v16077_v28  ;;  %v2376_v10 = vpop.f32.mrf.mxu0  ;;  %v13668_v22 = vld [vmem:[#allocation2 + $0x1c4] ss:$8 sps:$4 sm:$0xff]   ;;  %v13665_v54 = vld [vmem:[#allocation2 + $0x240] ss:$8 sps:$4 sm:$0xff]   ;;  %v3030_v43 = vpack.c.bf16 %v16139_v29, %v16135_v0 }
 0x623   :  { %v12876_v46 = vpop.f32.mrf.mxu1  ;;  %2903 = vmatprep.subr.bf16.mxu1 %v18744_v55  ;;  %v2512_v28 = vpack.c.bf16 %v2376_v10, %v2372_v30  ;;  %v13704_v0 = vld [vmem:[#allocation2 + $0x224] ss:$8 sps:$4 sm:$0xff]   ;;  %v13703_v29 = vld [vmem:[#allocation2 + $0x2a0] ss:$8 sps:$4 sm:$0xff]  }
 0x624   :  { %2645 = vmatpush1.bf16.msra.mxu0 %v2509_v12  ;;  %v2378_v56 = vpop.f32.mrf.mxu0  ;;  %v13707_v12 = vld [vmem:[#allocation2 + $0x2b4] ss:$8 sps:$4 sm:$0xff]   ;;  %v13706_v46 = vld [vmem:[#allocation2 + $0x220] ss:$8 sps:$4 sm:$0xff]   ;;  %v13725_v10 = vld [vmem:[#allocation2 + $0x304] ss:$8 sps:$4 sm:$0xff]  }
 0x625   :  { %2646 = vmatprep.subr.bf16.mxu0 %v18744_v55  ;;  %v2771_v17 = vpack.c.bf16 %v2378_v56, %v2374_v58  ;;  %v13715_v30 = vld [vmem:[#allocation2 + $0x2c0] ss:$8 sps:$4 sm:$0xff]   ;;  %v13730_v56 = vld [vmem:[#allocation2 + $0x310] ss:$8 sps:$4 sm:$0xff]  }
 0x626   :  { %2904 = vmatpush1.bf16.msra.mxu1 %v2768_v1  ;;  %v13710_v1 = vld [vmem:[#allocation2 + $0x234] ss:$8 sps:$4 sm:$0xff]   ;;  %v13721_v58 = vld [vmem:[#allocation2 + $0x2e0] ss:$8 sps:$4 sm:$0xff]  }
 0x627   :  { %2905 = vmatprep.subr.bf16.mxu1 %v18744_v55 }
 0x628   :  { %2647 = vmatpush1.bf16.msra.mxu0 %v2508_v2  ;;  %v13709_v2 = vld [vmem:[#allocation2 + $0x2b0] ss:$8 sps:$4 sm:$0xff]  }
 0x629   :  { %2648 = vmatprep.subr.bf16.mxu0 %v18744_v55 }
 0x62a   :  { %2906 = vmatpush1.bf16.msra.mxu1 %v2767_v32  ;;  %v13713_v32 = vld [vmem:[#allocation2 + $0x2c4] ss:$8 sps:$4 sm:$0xff]  }
 0x62b   :  { %2907 = vmatprep.subr.bf16.mxu1 %v18744_v55 }
 0x62c   :  { %2649 = vmatpush1.bf16.msra.mxu0 %v2507_v7  ;;  %v13712_v7 = vld [vmem:[#allocation2 + $0x230] ss:$8 sps:$4 sm:$0xff]  }
 0x62d   :  { %2650 = vmatprep.subr.bf16.mxu0 %v18744_v55 }
 0x62e   :  { %2908 = vmatpush1.bf16.msra.mxu1 %v2766_v63  ;;  %v13718_v63 = vld [vmem:[#allocation2 + $0x2d4] ss:$8 sps:$4 sm:$0xff]  }
 0x62f   :  { %2909 = vmatprep.subr.bf16.mxu1 %v18744_v55 }
 0x630   :  { %2651 = vmatpush1.bf16.msra.mxu0 %v2506_v35  ;;  %v13716_v35 = vld [vmem:[#allocation2 + $0x2d0] ss:$8 sps:$4 sm:$0xff]  }
 0x631   :  { %2652 = vmatprep.subr.bf16.mxu0 %v18744_v55 }
 0x632   :  { %2910 = vmatpush1.bf16.msra.mxu1 %v2765_v40  ;;  %v13719_v40 = vld [vmem:[#allocation2 + $0x2e4] ss:$8 sps:$4 sm:$0xff]  }
 0x633   :  { %2911 = vmatprep.subr.bf16.mxu1 %v18744_v55 }
 0x634   :  { %2653 = vmatpush1.bf16.msra.mxu0 %v18745_v8  ;;  %v13724_v8 = vld [vmem:[#allocation2 + $0x2f0] ss:$8 sps:$4 sm:$0xff]  }
 0x635   :  { %2654 = vmatprep.subr.bf16.mxu0 %v18744_v55 }
 0x636   :  { %2912 = vmatpush1.bf16.msra.mxu1 %v2764_v59  ;;  %v13722_v59 = vld [vmem:[#allocation2 + $0x2f4] ss:$8 sps:$4 sm:$0xff]  }
 0x637   :  { %2913 = vmatprep.subr.bf16.mxu1 %v18744_v55 }
 0x638   :  { %2655 = vmatpush1.bf16.msra.mxu0 %v18746_v4  ;;  %v13728_v4 = vld [vmem:[#allocation2 + $0x314] ss:$8 sps:$4 sm:$0xff]  }
 0x639   :  { %2670 = vmatprep.subr.bf16.mxu0 %v18744_v55 }
 0x63a   :  { %2914 = vmatpush1.bf16.msra.mxu1 %v2763_v20  ;;  %v13727_v20 = vld [vmem:[#allocation2 + $0x300] ss:$8 sps:$4 sm:$0xff]  }
 0x63b   :  { %2929 = vmatprep.subr.bf16.mxu1 %v18744_v55 }
 0x63c   :  { %2671 = vmatpush2.bf16.msra.mxu0 %v2512_v28  ;;  %v13731_v28 = vld [vmem:[#allocation2 + $0x324] ss:$8 sps:$4 sm:$0xff]  }
 0x63d   :  { %3158 = vmatprep.subr.bf16.mxu0 %v18744_v55 }
 0x63e   :  { %2930 = vmatpush2.bf16.msra.mxu1 %v2771_v17  ;;  %v13734_v17 = vld [vmem:[#allocation2 + $0x334] ss:$8 sps:$4 sm:$0xff]  }
 0x63f   :  { %2673 = vmatmul.mubr.bf16.vlgmr.msra.gmra.mxu0 %v13662_v39  ;;  %12877 = vmatprep.subr.bf16.mxu1 %v18747_v38  ;;  %v13733_v39 = vld [vmem:[#allocation2 + $0x320] ss:$8 sps:$4 sm:$0xff]  }
 0x640   :  { %3159 = vmatpush1.bf16.msra.mxu0 %v3029_v50  ;;  %11771 = vmatprep.mubr.msk.bf16.mxu0 %vm1199_vm2, %v13668_v22  ;;  %v13743_v22 = vld [vmem:[#allocation11 + $0x38] sm:$0xff]   ;;  %v13737_v50 = vld [vmem:[#allocation2 + $0x344] ss:$8 sps:$4 sm:$0xff]  }
 0x641   :  { %2932 = vmatmul.mubr.bf16.vlgmr.msra.gmra.mxu1 %v13665_v54  ;;  %3160 = vmatprep.subr.bf16.mxu0 %v18744_v55  ;;  %v13736_v54 = vld [vmem:[#allocation2 + $0x330] ss:$8 sps:$4 sm:$0xff]  }
 0x642   :  { %11798 = vmatprep.mubr.msk.bf16.mxu1 %vm1199_vm2, %v13671_v21  ;;  %12878 = vmatpush3.bf16.msra.mxu1 %v13743_v22  ;;  %v13744_v21 = vld [vmem:[#allocation11 + $0x30] sm:$0xff]  }
 0x643   :  { %12879 = vmatprep.subr.bf16.mxu1 %v18747_v38 }
 0x644   :  { %3161 = vmatpush1.bf16.msra.mxu0 %v3028_v37  ;;  %v13745_v37 = vld [vmem:[#allocation11 + $0x28] sm:$0xff]  }
 0x645   :  { %3162 = vmatprep.subr.bf16.mxu0 %v18744_v55 }
 0x646   :  { %12880 = vmatpush3.bf16.msra.mxu1 %v13744_v21  ;;  %v13757_v21 = vld [vmem:[%s18753_s4 + $0x120] ss:$24 sps:$4 sm:$0xff]  }
 0x647   :  { %2681 = vmatmul.mubr.bf16.gmra.mxu0 %v13670_v60  ;;  %12881 = vmatprep.subr.bf16.mxu1 %v18747_v38  ;;  %v13739_v60 = vld [vmem:[#allocation2 + $0x340] ss:$8 sps:$4 sm:$0xff]  }
 0x648   :  { %3163 = vmatpush1.bf16.msra.mxu0 %v3027_v14  ;;  %11772 = vmatprep.mubr.msk.bf16.mxu0 %vm1199_vm2, %v13674_v18  ;;  %v13740_v18 = vld [vmem:[#allocation2 + $0x354] ss:$8 sps:$4 sm:$0xff]  }
 0x649   :  { %2940 = vmatmul.mubr.bf16.gmra.mxu1 %v13673_v33  ;;  %3164 = vmatprep.subr.bf16.mxu0 %v18744_v55  ;;  %v13746_v33 = vld [vmem:[#allocation11 + $0x20] sm:$0xff]   ;;  %v13747_v14 = vld [vmem:[#allocation11 + $0x18] sm:$0xff]  }
 0x64a   :  { %11799 = vmatprep.mubr.msk.bf16.mxu1 %vm1199_vm2, %v13677_v51  ;;  %12882 = vmatpush3.bf16.msra.mxu1 %v13745_v37  ;;  %v13742_v51 = vld [vmem:[#allocation2 + $0x350] ss:$8 sps:$4 sm:$0xff]  }
 0x64b   :  { %12883 = vmatprep.subr.bf16.mxu1 %v18747_v38 }
 0x64c   :  { %3165 = vmatpush1.bf16.msra.mxu0 %v18748_v44  ;;  %v13749_v44 = vld [vmem:[#allocation11 + $0x8] sm:$0xff]  }
 0x64d   :  { %3166 = vmatprep.subr.bf16.mxu0 %v18744_v55 }
 0x64e   :  { %12884 = vmatpush3.bf16.msra.mxu1 %v13746_v33 }
 0x64f   :  { %2689 = vmatmul.mubr.bf16.gmra.mxu0 %v13676_v62  ;;  %12885 = vmatprep.subr.bf16.mxu1 %v18747_v38  ;;  %v13748_v62 = vld [vmem:[#allocation11 + $0x10] sm:$0xff]  }
 0x650   :  { %3167 = vmatpush1.bf16.msra.mxu0 %v18749_v16  ;;  %11773 = vmatprep.mubr.msk.bf16.mxu0 %vm1199_vm2, %v13680_v34  ;;  %v13750_v34 = vld [vmem:[#allocation11] sm:$0xff]  }
 0x651   :  { %2948 = vmatmul.mubr.bf16.gmra.mxu1 %v13679_v24  ;;  %3168 = vmatprep.subr.bf16.mxu0 %v18744_v55  ;;  %v2486_v24 = vld [vmem:[#allocation16] sm:$0xff] }
 0x652   :  { %11800 = vmatprep.mubr.msk.bf16.mxu1 %vm1199_vm2, %v13683_v11  ;;  %12886 = vmatpush3.bf16.msra.mxu1 %v13747_v14 }
 0x653   :  { %12887 = vmatprep.subr.bf16.mxu1 %v18747_v38 }
 0x654   :  { %3169 = vmatpush1.bf16.msra.mxu0 %v18750_v48 }
 0x655   :  { %3170 = vmatprep.subr.bf16.mxu0 %v18744_v55 }
 0x656   :  { %12888 = vmatpush3.bf16.msra.mxu1 %v13748_v62 }
 0x657   :  { %2697 = vmatmul.mubr.bf16.gmra.mxu0 %v13682_v26  ;;  %12889 = vmatprep.subr.bf16.mxu1 %v18747_v38 }
 0x658   :  { %3171 = vmatpush1.bf16.msra.mxu0 %v18751_v23  ;;  %11774 = vmatprep.mubr.msk.bf16.mxu0 %vm1199_vm2, %v13686_v3  ;;  %v2487_v3 = vld [vmem:[#allocation16 + $0x8] sm:$0xff] }
 0x659   :  { %2956 = vmatmul.mubr.bf16.gmra.mxu1 %v13685_v61  ;;  %3172 = vmatprep.subr.bf16.mxu0 %v18744_v55 }
 0x65a   :  { %11801 = vmatprep.mubr.msk.bf16.mxu1 %vm1199_vm2, %v13689_v57  ;;  %12890 = vmatpush3.bf16.msra.mxu1 %v13749_v44  ;;  %v2493_v44 = vld [vmem:[#allocation16 + $0x38] sm:$0xff] }
 0x65b   :  { %12891 = vmatprep.subr.bf16.mxu1 %v18747_v38 }
 0x65c   :  { %3173 = vmatpush1.bf16.msra.mxu0 %v18752_v15 }
 0x65d   :  { %3188 = vmatprep.subr.bf16.mxu0 %v18744_v55 }
 0x65e   :  { %12892 = vmatpush3.bf16.msra.mxu1 %v13750_v34  ;;  %v13763_v34 = vld [vmem:[%s18753_s4 + $0xf0] ss:$24 sps:$4 sm:$0xff]  }
 0x65f   :  { %2705 = vmatmul.mubr.bf16.gmra.mxu0 %v13688_v52 }
 0x660   :  { %3189 = vmatpush2.bf16.msra.mxu0 %v3030_v43  ;;  %11775 = vmatprep.mubr.msk.bf16.mxu0 %vm1199_vm2, %v13692_v6 }
 0x661   :  { %2964 = vmatmul.mubr.bf16.gmra.mxu1 %v13691_v31  ;;  %v2488_v31 = vld [vmem:[#allocation16 + $0x10] sm:$0xff] }
 0x662   :  { %11802 = vmatprep.mubr.msk.bf16.mxu1 %vm1199_vm2, %v13695_v19 }
 0x667   :  { %2713 = vmatmul.mubr.bf16.gmra.mxu0 %v13694_v49 }
 0x668   :  { %11776 = vmatprep.mubr.msk.bf16.mxu0 %vm1199_vm2, %v13698_v41 }
 0x669   :  { %2972 = vmatmul.mubr.bf16.gmra.mxu1 %v13697_v5 }
 0x66a   :  { %11803 = vmatprep.mubr.msk.bf16.mxu1 %vm1199_vm2, %v13701_v25 }
 0x66f   :  { %2721 = vmatmul.mubr.bf16.gmra.mxu0 %v13700_v42  ;;  %v2489_v42 = vld [vmem:[#allocation16 + $0x18] sm:$0xff] }
 0x670   :  { %11777 = vmatprep.mubr.msk.bf16.mxu0 %vm1199_vm2, %v13704_v0 }
 0x671   :  { %2980 = vmatmul.mubr.bf16.gmra.mxu1 %v13703_v29 }
 0x672   :  { %11804 = vmatprep.mubr.msk.bf16.mxu1 %vm1199_vm2, %v13707_v12 }
 0x677   :  { %2729 = vmatmul.mubr.bf16.gmra.mxu0 %v13706_v46 }
 0x678   :  { %11778 = vmatprep.mubr.msk.bf16.mxu0 %vm1199_vm2, %v13710_v1 }
 0x679   :  { %2988 = vmatmul.mubr.bf16.gmra.mxu1 %v13709_v2 }
 0x67a   :  { %11805 = vmatprep.mubr.msk.bf16.mxu1 %vm1199_vm2, %v13713_v32  ;;  %v2490_v32 = vld [vmem:[#allocation16 + $0x20] sm:$0xff] }
 0x67f   :  { %2737 = vmatmul.mubr.bf16.gmra.mxu0 %v13712_v7 }
 0x680   :  { %11824 = vmatprep.mubr.msk.bf16.mxu0 %vm1199_vm2, %v13718_v63 }
 0x681   :  { %2996 = vmatmul.mubr.bf16.gmra.mxu1 %v13715_v30 }
 0x682   :  { %12893 = vmatprep.mubr.msk.bf16.mxu1 %vm15303_vm0, %v18747_v38 }
 0x687   :  { %3191 = vmatmul.mubr.bf16.vlgmr.msra.gmra.mxu0 %v13716_v35 }
 0x688   :  { %11825 = vmatprep.mubr.msk.bf16.mxu0 %vm1199_vm2, %v13719_v40 }
 0x68f   :  { %3199 = vmatmul.mubr.bf16.gmra.mxu0 %v13721_v58 }
 0x690   :  { %11826 = vmatprep.mubr.msk.bf16.mxu0 %vm1199_vm2, %v13722_v59  ;;  %v2491_v59 = vld [vmem:[#allocation16 + $0x28] sm:$0xff] }
 0x697   :  { %3207 = vmatmul.mubr.bf16.gmra.mxu0 %v13724_v8 }
 0x698   :  { %11827 = vmatprep.mubr.msk.bf16.mxu0 %vm1199_vm2, %v13725_v10  ;;  %v13751_v10 = vld [vmem:[%s18753_s4 + $0x150] ss:$24 sps:$4 sm:$0xff]  }
 0x69f   :  { %3215 = vmatmul.mubr.bf16.gmra.mxu0 %v13727_v20  ;;  %v13753_v20 = vld [vmem:[%s18753_s4 + $0x154] ss:$24 sps:$4 sm:$0xff]  }
 0x6a0   :  { %11828 = vmatprep.mubr.msk.bf16.mxu0 %vm1199_vm2, %v13728_v4  ;;  %3835 = vmatprep.subr.bf16.mxu0 %v13753_v20  ;;  %v2497_v20 = vld [vmem:[#allocation16 + $0x58] sm:$0xff] }
 0x6a1   :  { %3836 = vmatpush1.bf16.msra.mxu0 %v13751_v10 }
 0x6a7   :  { %3223 = vmatmul.mubr.bf16.gmra.mxu0 %v13730_v56 }
 0x6a8   :  { %11829 = vmatprep.mubr.msk.bf16.mxu0 %vm1199_vm2, %v13731_v28  ;;  %v13756_v28 = vld [vmem:[%s18753_s4 + $0x15c] ss:$24 sps:$4 sm:$0xff]  }
 0x6a9   :  { %3958 = vmatprep.subr.bf16.mxu1 %v13756_v28 }
 0x6af   :  { %3231 = vmatmul.mubr.bf16.gmra.mxu0 %v13733_v39  ;;  %v13759_v39 = vld [vmem:[%s18753_s4 + $0x124] ss:$24 sps:$4 sm:$0xff]  }
 0x6b0   :  { %11830 = vmatprep.mubr.msk.bf16.mxu0 %vm1199_vm2, %v13734_v17  ;;  %3837 = vmatprep.subr.bf16.mxu0 %v13759_v39 }
 0x6b1   :  { %3838 = vmatpush1.bf16.msra.mxu0 %v13757_v21 }
 0x6b7   :  { %3239 = vmatmul.mubr.bf16.gmra.mxu0 %v13736_v54 }
 0x6b8   :  { %11831 = vmatprep.mubr.msk.bf16.mxu0 %vm1199_vm2, %v13737_v50  ;;  %v2492_v50 = vld [vmem:[#allocation16 + $0x30] sm:$0xff] }
 0x6bf   :  { %3247 = vmatmul.mubr.bf16.gmra.mxu0 %v13739_v60  ;;  %v13765_v60 = vld [vmem:[%s18753_s4 + $0xf4] ss:$24 sps:$4 sm:$0xff]  }
 0x6c0   :  { %11832 = vmatprep.mubr.msk.bf16.mxu0 %vm1199_vm2, %v13740_v18  ;;  %3839 = vmatprep.subr.bf16.mxu0 %v13765_v60 }
 0x6c1   :  { %3840 = vmatpush1.bf16.msra.mxu0 %v13763_v34 }
 0x6c7   :  { %3255 = vmatmul.mubr.bf16.gmra.mxu0 %v13742_v51 }
 0x6c8   :  { %3867 = vmatprep.mubr.bf16.mxu0 %v18744_v55 }
 0x6ff   :  { %v2674_v11 = vpop.f32.mrf.mxu0 }
 0x700   :  { %v2745_v16 = vadd.f32 %v2674_v11, %v2486_v24  ;;  %v13771_v11 = vld [vmem:[%s18753_s4 + $0xc4] ss:$24 sps:$4 sm:$0xff]  }
 0x701   :  { %v2676_v26 = vpop.f32.mrf.mxu0  ;;  %v2933_v48 = vpop.f32.mrf.mxu1  ;;  %3841 = vmatprep.subr.bf16.mxu0 %v13771_v11 }
 0x702   :  { %v16241_v61 = vadd.f32 %v2933_v48, %v2745_v16 }
 0x703   :  { %v2677_v57 = vpop.f32.mrf.mxu0  ;;  %v2935_v23 = vpop.f32.mrf.mxu1 }
 0x704   :  { %v2746_v52 = vadd.f32 %v2677_v57, %v2487_v3  ;;  %v2494_v23 = vld [vmem:[#allocation16 + $0x40] sm:$0xff] }
 0x705   :  { %v2679_v15 = vpop.f32.mrf.mxu0  ;;  %v2936_v6 = vpop.f32.mrf.mxu1 }
 0x706   :  { %v16243_v43 = vadd.f32 %v2936_v6, %v2746_v52  ;;  %v13769_v52 = vld [vmem:[%s18753_s4 + $0xc0] ss:$24 sps:$4 sm:$0xff]   ;;  %v13777_v6 = vld [vmem:[%s18753_s4 + $0x94] ss:$24 sps:$4 sm:$0xff]  }
 0x707   :  { %v2682_v19 = vpop.f32.mrf.mxu0  ;;  %v2938_v49 = vpop.f32.mrf.mxu1  ;;  %3842 = vmatpush1.bf16.msra.mxu0 %v13769_v52 }
 0x708   :  { %v2747_v41 = vadd.f32 %v2682_v19, %v2488_v31  ;;  %3843 = vmatprep.subr.bf16.mxu0 %v13777_v6 }
 0x709   :  { %v2684_v5 = vpop.f32.mrf.mxu0  ;;  %v2941_v25 = vpop.f32.mrf.mxu1 }
 0x70a   :  { %v16245_v0 = vadd.f32 %v2941_v25, %v2747_v41  ;;  %v2495_v25 = vld [vmem:[#allocation16 + $0x48] sm:$0xff] }
 0x70b   :  { %v2685_v29 = vpop.f32.mrf.mxu0  ;;  %v2943_v12 = vpop.f32.mrf.mxu1 }
 0x70c   :  { %v2748_v46 = vadd.f32 %v2685_v29, %v2489_v42  ;;  %v13775_v42 = vld [vmem:[%s18753_s4 + $0x90] ss:$24 sps:$4 sm:$0xff]  }
 0x70d   :  { %v2687_v1 = vpop.f32.mrf.mxu0  ;;  %v2944_v2 = vpop.f32.mrf.mxu1  ;;  %3844 = vmatpush1.bf16.msra.mxu0 %v13775_v42 }
 0x70e   :  { %v16247_v7 = vadd.f32 %v2944_v2, %v2748_v46 }
 0x70f   :  { %v2690_v63 = vpop.f32.mrf.mxu0  ;;  %v2946_v30 = vpop.f32.mrf.mxu1 }
 0x710   :  { %v2749_v35 = vadd.f32 %v2690_v63, %v2490_v32  ;;  %v2496_v63 = vld [vmem:[#allocation16 + $0x50] sm:$0xff] }
 0x711   :  { %v2692_v40 = vpop.f32.mrf.mxu0  ;;  %v2949_v58 = vpop.f32.mrf.mxu1 }
 0x712   :  { %v16249_v8 = vadd.f32 %v2949_v58, %v2749_v35 }
 0x713   :  { %v2693_v4 = vpop.f32.mrf.mxu0  ;;  %v2951_v56 = vpop.f32.mrf.mxu1 }
 0x714   :  { %v2750_v17 = vadd.f32 %v2693_v4, %v2491_v59 }
 0x715   :  { %v2695_v22 = vpop.f32.mrf.mxu0  ;;  %v2952_v54 = vpop.f32.mrf.mxu1 }
 0x716   :  { %v16256_v37 = vadd.f32 %v2952_v54, %v2750_v17  ;;  %v2498_v54 = vld [vmem:[#allocation16 + $0x60] sm:$0xff] }
 0x717   :  { %v2698_v18 = vpop.f32.mrf.mxu0  ;;  %v2954_v33 = vpop.f32.mrf.mxu1 }
 0x718   :  { %v2751_v14 = vadd.f32 %v2698_v18, %v2492_v50 }
 0x719   :  { %v2700_v51 = vpop.f32.mrf.mxu0  ;;  %v2957_v62 = vpop.f32.mrf.mxu1 }
 0x71a   :  { %v16260_v24 = vadd.f32 %v2957_v62, %v2751_v14  ;;  %v2499_v51 = vld [vmem:[#allocation16 + $0x68] sm:$0xff] }
 0x71b   :  { %v2701_v16 = vpop.f32.mrf.mxu0  ;;  %v2959_v26 = vpop.f32.mrf.mxu1 }
 0x71c   :  { %v2752_v48 = vadd.f32 %v2701_v16, %v2493_v44 }
 0x71d   :  { %v2703_v3 = vpop.f32.mrf.mxu0  ;;  %v2960_v57 = vpop.f32.mrf.mxu1 }
 0x71e   :  { %v16264_v15 = vadd.f32 %v2960_v57, %v2752_v48  ;;  %v2500_v48 = vld [vmem:[#allocation16 + $0x70] sm:$0xff] }
 0x71f   :  { %v2706_v31 = vpop.f32.mrf.mxu0  ;;  %v2962_v19 = vpop.f32.mrf.mxu1 }
 0x720   :  { %v2753_v49 = vadd.f32 %v2706_v31, %v2494_v23  ;;  %v2501_v19 = vld [vmem:[#allocation16 + $0x78] sm:$0xff] }
 0x721   :  { %v2708_v41 = vpop.f32.mrf.mxu0  ;;  %v2965_v5 = vpop.f32.mrf.mxu1 }
 0x722   :  { %v16268_v29 = vadd.f32 %v2965_v5, %v2753_v49 }
 0x723   :  { %v2709_v12 = vpop.f32.mrf.mxu0  ;;  %v2967_v46 = vpop.f32.mrf.mxu1 }
 0x724   :  { %v2754_v1 = vadd.f32 %v2709_v12, %v2495_v25  ;;  %v2502_v46 = vld [vmem:[#allocation16 + $0x80] sm:$0xff] }
 0x725   :  { %v2711_v2 = vpop.f32.mrf.mxu0  ;;  %v2968_v32 = vpop.f32.mrf.mxu1 }
 0x726   :  { %v16270_v30 = vadd.f32 %v2968_v32, %v2754_v1 }
 0x727   :  { %v2714_v35 = vpop.f32.mrf.mxu0  ;;  %v2970_v40 = vpop.f32.mrf.mxu1 }
 0x728   :  { %v2755_v58 = vadd.f32 %v2714_v35, %v2496_v63 }
 0x729   :  { %v2716_v59 = vpop.f32.mrf.mxu0  ;;  %v2973_v10 = vpop.f32.mrf.mxu1 }
 0x72a   :  { %v16272_v4 = vadd.f32 %v2973_v10, %v2755_v58  ;;  %v2503_v58 = vld [vmem:[#allocation16 + $0x88] sm:$0xff] }
 0x72b   :  { %v2717_v56 = vpop.f32.mrf.mxu0  ;;  %v2975_v28 = vpop.f32.mrf.mxu1 }
 0x72c   :  { %v2756_v39 = vadd.f32 %v2717_v56, %v2497_v20 }
 0x72d   :  { %v2719_v17 = vpop.f32.mrf.mxu0  ;;  %v2976_v22 = vpop.f32.mrf.mxu1 }
 0x72e   :  { %v16274_v50 = vadd.f32 %v2976_v22, %v2756_v39 }
 0x72f   :  { %v2722_v21 = vpop.f32.mrf.mxu0  ;;  %v2978_v60 = vpop.f32.mrf.mxu1 }
 0x730   :  { %v2757_v18 = vadd.f32 %v2722_v21, %v2498_v54 }
 0x731   :  { %v2724_v33 = vpop.f32.mrf.mxu0  ;;  %v2981_v14 = vpop.f32.mrf.mxu1 }
 0x732   :  { %v16276_v62 = vadd.f32 %v2981_v14, %v2757_v18 }
 0x733   :  { %v2725_v44 = vpop.f32.mrf.mxu0  ;;  %v2983_v34 = vpop.f32.mrf.mxu1 }
 0x734   :  { %v2758_v11 = vadd.f32 %v2725_v44, %v2499_v51 }
 0x735   :  { %v2727_v16 = vpop.f32.mrf.mxu0  ;;  %v2984_v26 = vpop.f32.mrf.mxu1 }
 0x736   :  { %v16278_v3 = vadd.f32 %v2984_v26, %v2758_v11  ;;  %v13754_v11 = vld [vmem:[%s18753_s4 + $0x158] ss:$24 sps:$4 sm:$0xff]   ;;  %v13762_v26 = vld [vmem:[%s18753_s4 + $0x12c] ss:$24 sps:$4 sm:$0xff]  }
 0x737   :  { %v2730_v57 = vpop.f32.mrf.mxu0  ;;  %v2986_v23 = vpop.f32.mrf.mxu1 }
 0x738   :  { %v2759_v52 = vadd.f32 %v2730_v57, %v2500_v48 }
 0x739   :  { %v2732_v6 = vpop.f32.mrf.mxu0  ;;  %v2989_v31 = vpop.f32.mrf.mxu1 }
 0x73a   :  { %v16280_v49 = vadd.f32 %v2989_v31, %v2759_v52  ;;  %v13768_v52 = vld [vmem:[%s18753_s4 + $0xfc] ss:$24 sps:$4 sm:$0xff]  }
 0x73b   :  { %v2733_v41 = vpop.f32.mrf.mxu0  ;;  %v2991_v5 = vpop.f32.mrf.mxu1 }
 0x73c   :  { %v2760_v25 = vadd.f32 %v2733_v41, %v2501_v19 }
 0x73d   :  { %v2735_v42 = vpop.f32.mrf.mxu0  ;;  %v2992_v12 = vpop.f32.mrf.mxu1 }
 0x73e   :  { %v16282_v1 = vadd.f32 %v2992_v12, %v2760_v25  ;;  %v13774_v25 = vld [vmem:[%s18753_s4 + $0xcc] ss:$24 sps:$4 sm:$0xff]  }
 0x73f   :  { %v2738_v2 = vpop.f32.mrf.mxu0  ;;  %v2994_v32 = vpop.f32.mrf.mxu1 }
 0x740   :  { %v2761_v63 = vadd.f32 %v2738_v2, %v2502_v46  ;;  %v13780_v32 = vld [vmem:[%s18753_s4 + $0x9c] ss:$24 sps:$4 sm:$0xff]  }
 0x741   :  { %v2740_v35 = vpop.f32.mrf.mxu0  ;;  %v2997_v40 = vpop.f32.mrf.mxu1 }
 0x742   :  { %v16284_v59 = vadd.f32 %v2997_v40, %v2761_v63 }
 0x743   :  { %v2741_v10 = vpop.f32.mrf.mxu0  ;;  %v2999_v20 = vpop.f32.mrf.mxu1 }
 0x744   :  { %v2762_v56 = vadd.f32 %v2741_v10, %v2503_v58  ;;  %v13778_v10 = vld [vmem:[%s18753_s4 + $0x98] ss:$24 sps:$4 sm:$0xff]  }
 0x745   :  { %v2743_v28 = vpop.f32.mrf.mxu0  ;;  %v3000_v39 = vpop.f32.mrf.mxu1 }
 0x746   :  { %v16286_v17 = vadd.f32 %v3000_v39, %v2762_v56 }
 0x747   :  { %v3192_v22 = vpop.f32.mrf.mxu0  ;;  %v3002_v54 = vpop.f32.mrf.mxu1 }
 0x748   :  { %v3263_v60 = vadd.f32 %v3192_v22, %v16241_v61  ;;  %v13760_v61 = vld [vmem:[%s18753_s4 + $0x128] ss:$24 sps:$4 sm:$0xff]  }
 0x749   :  { %v3194_v21 = vpop.f32.mrf.mxu0 }
 0x74a   :  { %v3281_v51 = vmax.f32 %v3263_v60, 0.0 }
 0x74b   :  { %v3195_v18 = vpop.f32.mrf.mxu0 }
 0x74c   :  { %v3264_v33 = vadd.f32 %v3195_v18, %v16243_v43 }
 0x74d   :  { %v3197_v14 = vpop.f32.mrf.mxu0 }
 0x74e   :  { %v3282_v44 = vmax.f32 %v3264_v33, 0.0 }
 0x74f   :  { %v3200_v34 = vpop.f32.mrf.mxu0 }
 0x750   :  { %v3299_v16 = vpack.c.bf16 %v3282_v44, %v3281_v51  ;;  %v3265_v57 = vadd.f32 %v3200_v34, %v16245_v0  ;;  %v13766_v0 = vld [vmem:[%s18753_s4 + $0xf8] ss:$24 sps:$4 sm:$0xff]  }
 0x751   :  { %v3202_v48 = vpop.f32.mrf.mxu0 }
 0x752   :  { %12894 = vmatmul.mubr.bf16.vlgmr.msra.gmra.mxu1 %v3299_v16  ;;  %v3283_v31 = vmax.f32 %v3265_v57, 0.0 }
 0x753   :  { %v3203_v23 = vpop.f32.mrf.mxu0  ;;  %12897 = vmatprep.mubr.msk.bf16.mxu1 %vm15303_vm0, %v18747_v38  ;;  %3959 = vmatpush1.bf16.msra.mxu1 %v13754_v11 }
 0x754   :  { %v3266_v43 = vadd.f32 %v3203_v23, %v16247_v7  ;;  %3960 = vmatprep.subr.bf16.mxu1 %v13762_v26  ;;  %v13772_v7 = vld [vmem:[%s18753_s4 + $0xc8] ss:$24 sps:$4 sm:$0xff]  }
 0x755   :  { %v3205_v6 = vpop.f32.mrf.mxu0 }
 0x756   :  { %v3284_v19 = vmax.f32 %v3266_v43, 0.0 }
 0x757   :  { %v3208_v41 = vpop.f32.mrf.mxu0  ;;  %3961 = vmatpush1.bf16.msra.mxu1 %v13760_v61 }
 0x758   :  { %v3300_v5 = vpack.c.bf16 %v3284_v19, %v3283_v31  ;;  %3962 = vmatprep.subr.bf16.mxu1 %v13768_v52  ;;  %v3267_v12 = vadd.f32 %v3208_v41, %v16249_v8 }
 0x759   :  { %v3210_v42 = vpop.f32.mrf.mxu0 }
 0x75a   :  { %12898 = vmatmul.mubr.bf16.gmra.mxu1 %v3300_v5  ;;  %v3285_v35 = vmax.f32 %v3267_v12, 0.0 }
 0x75b   :  { %v3211_v46 = vpop.f32.mrf.mxu0  ;;  %12901 = vmatprep.mubr.msk.bf16.mxu1 %vm15303_vm0, %v18747_v38  ;;  %3963 = vmatpush1.bf16.msra.mxu1 %v13766_v0 }
 0x75c   :  { %v3268_v2 = vadd.f32 %v3211_v46, %v16256_v37  ;;  %3964 = vmatprep.subr.bf16.mxu1 %v13774_v25 }
 0x75d   :  { %v3213_v63 = vpop.f32.mrf.mxu0 }
 0x75e   :  { %v3286_v40 = vmax.f32 %v3268_v2, 0.0 }
 0x75f   :  { %v3216_v58 = vpop.f32.mrf.mxu0  ;;  %3965 = vmatpush1.bf16.msra.mxu1 %v13772_v7 }
 0x760   :  { %v3301_v20 = vpack.c.bf16 %v3286_v40, %v3285_v35  ;;  %3966 = vmatprep.subr.bf16.mxu1 %v13780_v32  ;;  %v3269_v56 = vadd.f32 %v3216_v58, %v16260_v24 }
 0x761   :  { %v3218_v8 = vpop.f32.mrf.mxu0 }
 0x762   :  { %12902 = vmatmul.mubr.bf16.gmra.mxu1 %v3301_v20  ;;  %v3287_v22 = vmax.f32 %v3269_v56, 0.0  ;;  %v13783_v8 = vld [vmem:[%s18753_s4 + $0x64] ss:$24 sps:$4 sm:$0xff]  }
 0x763   :  { %v3219_v28 = vpop.f32.mrf.mxu0  ;;  %12905 = vmatprep.mubr.msk.bf16.mxu1 %vm15303_vm0, %v18747_v38  ;;  %3967 = vmatpush1.bf16.msra.mxu1 %v13778_v10  ;;  %v13786_v56 = vld [vmem:[%s18753_s4 + $0x6c] ss:$24 sps:$4 sm:$0xff]  }
 0x764   :  { %v3270_v37 = vadd.f32 %v3219_v28, %v16264_v15  ;;  %v13784_v28 = vld [vmem:[%s18753_s4 + $0x68] ss:$24 sps:$4 sm:$0xff]   ;;  %3845 = vmatprep.subr.bf16.mxu0 %v13783_v8  ;;  %3968 = vmatprep.subr.bf16.mxu1 %v13786_v56  ;;  %v13813_v56 = vld [vmem:[%s18753_s4 + $0xa4] ss:$24 sps:$4 sm:$0xff]  }
 0x765   :  { %v3221_v39 = vpop.f32.mrf.mxu0 }
 0x766   :  { %v3288_v54 = vmax.f32 %v3270_v37, 0.0  ;;  %v13792_v37 = vld [vmem:[%s18753_s4 + $0x3c] ss:$24 sps:$4 sm:$0xff]   ;;  %v13787_v39 = vld [vmem:[%s18753_s4 + $0x30] ss:$24 sps:$4 sm:$0xff]  }
 0x767   :  { %v3224_v21 = vpop.f32.mrf.mxu0  ;;  %3969 = vmatpush1.bf16.msra.mxu1 %v13784_v28 }
 0x768   :  { %v3302_v60 = vpack.c.bf16 %v3288_v54, %v3287_v22  ;;  %v3271_v33 = vadd.f32 %v3224_v21, %v16268_v29  ;;  %v13790_v22 = vld [vmem:[%s18753_s4 + $0x38] ss:$24 sps:$4 sm:$0xff]   ;;  %3970 = vmatprep.subr.bf16.mxu1 %v13792_v37  ;;  %v13795_v54 = vld [vmem:[%s18753_s4 + $0x4] ss:$24 sps:$4 sm:$0xff]  }
 0x769   :  { %v3226_v18 = vpop.f32.mrf.mxu0  ;;  %v13798_v21 = vld [vmem:[%s18753_s4 + $0xc] ss:$24 sps:$4 sm:$0xff]  }
 0x76a   :  { %12906 = vmatmul.mubr.bf16.gmra.mxu1 %v3302_v60  ;;  %v3289_v44 = vmax.f32 %v3271_v33, 0.0  ;;  %v13793_v60 = vld [vmem:[%s18753_s4] ss:$24 sps:$4 sm:$0xff]   ;;  %v13801_v33 = vld [vmem:[%s18753_s4 + $0x164] ss:$24 sps:$4 sm:$0xff]  }
 0x76b   :  { %v3227_v14 = vpop.f32.mrf.mxu0  ;;  %12909 = vmatprep.mubr.msk.bf16.mxu1 %vm15303_vm0, %v18747_v38  ;;  %3971 = vmatpush1.bf16.msra.mxu1 %v13790_v22  ;;  %v13796_v18 = vld [vmem:[%s18753_s4 + $0x8] ss:$24 sps:$4 sm:$0xff]  }
 0x76c   :  { %v3272_v24 = vadd.f32 %v3227_v14, %v16270_v30  ;;  %3972 = vmatprep.subr.bf16.mxu1 %v13798_v21  ;;  %v16345_v14 = vld [vmem:[#allocation14] ss:$0 sm:$0xff]  ;;  %v13816_v21 = vld [vmem:[%s18753_s4 + $0x74] ss:$24 sps:$4 sm:$0xff]  }
 0x76d   :  { %v3229_v51 = vpop.f32.mrf.mxu0  ;;  %v13811_v22 = vld [vmem:[%s18753_s4 + $0xa0] ss:$24 sps:$4 sm:$0xff]  }
 0x76e   :  { %v3290_v34 = vmax.f32 %v3272_v24, 0.0 }
 0x76f   :  { %v3232_v11 = vpop.f32.mrf.mxu0  ;;  %3973 = vmatpush1.bf16.msra.mxu1 %v13796_v18 }
 0x770   :  { %v3303_v15 = vpack.c.bf16 %v3290_v34, %v3289_v44  ;;  %v3273_v26 = vadd.f32 %v3232_v11, %v16272_v4  ;;  %v3484_v34 = vunpack.c.l.bf16 %v15979_v36 }
 0x771   :  { %v3234_v16 = vpop.f32.mrf.mxu0 }
 0x772   :  { %12910 = vmatmul.mubr.bf16.gmra.mxu1 %v3303_v15  ;;  %v3291_v23 = vmax.f32 %v3273_v26, 0.0  ;;  %v3485_v26 = vunpack.c.h.bf16 %v15979_v36 }
 0x773   :  { %v3235_v48 = vpop.f32.mrf.mxu0  ;;  %12913 = vmatprep.mubr.msk.bf16.mxu1 %vm15303_vm0, %v18747_v38 }
 0x774   :  { %v3274_v29 = vadd.f32 %v3235_v48, %v16274_v50 }
 0x775   :  { %v3237_v57 = vpop.f32.mrf.mxu0 }
 0x776   :  { %v3292_v61 = vmax.f32 %v3274_v29, 0.0 }
 0x777   :  { %v3240_v43 = vpop.f32.mrf.mxu0 }
 0x778   :  { %v3304_v30 = vpack.c.bf16 %v3292_v61, %v3291_v23  ;;  %v3275_v6 = vadd.f32 %v3240_v43, %v16276_v62 }
 0x779   :  { %v3242_v52 = vpop.f32.mrf.mxu0 }
 0x77a   :  { %12914 = vmatmul.mubr.bf16.gmra.mxu1 %v3304_v30  ;;  %v3293_v41 = vmax.f32 %v3275_v6, 0.0  ;;  %v3486_v6 = vunpack.c.l.bf16 %v15988_v27 }
 0x77b   :  { %v3243_v31 = vpop.f32.mrf.mxu0  ;;  %12917 = vmatprep.mubr.msk.bf16.mxu1 %vm15303_vm0, %v18747_v38 }
 0x77c   :  { %v3276_v4 = vadd.f32 %v3243_v31, %v16278_v3  ;;  %v13799_v31 = vld [vmem:[%s18753_s4 + $0x160] ss:$24 sps:$4 sm:$0xff]  }
 0x77d   :  { %v3245_v19 = vpop.f32.mrf.mxu0 }
 0x77e   :  { %v3294_v0 = vmax.f32 %v3276_v4, 0.0  ;;  %v13804_v19 = vld [vmem:[%s18753_s4 + $0x134] ss:$24 sps:$4 sm:$0xff]  }
 0x77f   :  { %v3248_v5 = vpop.f32.mrf.mxu0 }
 0x780   :  { %v3305_v50 = vpack.c.bf16 %v3294_v0, %v3293_v41  ;;  %v3277_v42 = vadd.f32 %v3248_v5, %v16280_v49  ;;  %v3487_v0 = vunpack.c.h.bf16 %v15988_v27 }
 0x781   :  { %v3250_v25 = vpop.f32.mrf.mxu0 }
 0x782   :  { %12918 = vmatmul.mubr.bf16.gmra.mxu1 %v3305_v50  ;;  %v3295_v7 = vmax.f32 %v3277_v42, 0.0  ;;  %v13802_v25 = vld [vmem:[%s18753_s4 + $0x130] ss:$24 sps:$4 sm:$0xff]  }
 0x783   :  { %v3251_v12 = vpop.f32.mrf.mxu0  ;;  %12921 = vmatprep.mubr.msk.bf16.mxu1 %vm15303_vm0, %v18747_v38 }
 0x784   :  { %v3278_v62 = vadd.f32 %v3251_v12, %v16282_v1  ;;  %v13807_v12 = vld [vmem:[%s18753_s4 + $0x104] ss:$24 sps:$4 sm:$0xff]  }
 0x785   :  { %v3253_v46 = vpop.f32.mrf.mxu0 }
 0x786   :  { %v3296_v3 = vmax.f32 %v3278_v62, 0.0 }
 0x787   :  { %v3256_v2 = vpop.f32.mrf.mxu0 }
 0x788   :  { %v3306_v32 = vpack.c.bf16 %v3296_v3, %v3295_v7  ;;  %v3279_v35 = vadd.f32 %v3256_v2, %v16284_v59  ;;  %v13781_v59 = vld [vmem:[%s18753_s4 + $0x60] ss:$24 sps:$4 sm:$0xff]   ;;  %v3488_v2 = vunpack.c.l.bf16 %v15997_v9 }
 0x789   :  { %v3258_v63 = vpop.f32.mrf.mxu0  ;;  %3846 = vmatpush1.bf16.msra.mxu0 %v13781_v59 }
 0x78a   :  { %12922 = vmatmul.mubr.bf16.gmra.mxu1 %v3306_v32  ;;  %v3297_v58 = vmax.f32 %v3279_v35, 0.0  ;;  %v13805_v32 = vld [vmem:[%s18753_s4 + $0x100] ss:$24 sps:$4 sm:$0xff]   ;;  %v13810_v35 = vld [vmem:[%s18753_s4 + $0xd4] ss:$24 sps:$4 sm:$0xff]  }
 0x78b   :  { %v3259_v49 = vpop.f32.mrf.mxu0  ;;  %12925 = vmatprep.mubr.msk.bf16.mxu1 %vm15303_vm0, %v18747_v38 }
 0x78c   :  { %v3280_v1 = vadd.f32 %v3259_v49, %v16286_v17  ;;  %v13789_v17 = vld [vmem:[%s18753_s4 + $0x34] ss:$24 sps:$4 sm:$0xff]  }
 0x78d   :  { %v3261_v40 = vpop.f32.mrf.mxu0  ;;  %3847 = vmatprep.subr.bf16.mxu0 %v13789_v17 }
 0x78e   :  { %v3298_v10 = vmax.f32 %v3280_v1, 0.0  ;;  %3848 = vmatpush1.bf16.msra.mxu0 %v13787_v39  ;;  %v3489_v40 = vunpack.c.h.bf16 %v15997_v9  ;;  %v3490_v39 = vunpack.c.l.bf16 %v16006_v45 }
 0x78f   :  { %3849 = vmatprep.subr.bf16.mxu0 %v13795_v54 }
 0x790   :  { %v3307_v20 = vpack.c.bf16 %v3298_v10, %v3297_v58 }
 0x792   :  { %12926 = vmatmul.mubr.bf16.gmra.mxu1 %v3307_v20  ;;  %3850 = vmatpush1.bf16.msra.mxu0 %v13793_v60  ;;  %v13808_v20 = vld [vmem:[%s18753_s4 + $0xd0] ss:$24 sps:$4 sm:$0xff]  }
 0x793   :  { %3990 = vmatprep.mubr.bf16.mxu1 %v18744_v55  ;;  %4081 = vmatprep.subr.bf16.mxu0 %v13801_v33  ;;  %v3491_v33 = vunpack.c.h.bf16 %v16006_v45 }
 0x812   :  { %v3413_v24 = vpop.f32.mrf.mxu1 }
 0x813   :  { %v3414_v51 = vadd.f32 %v16345_v14, %v3413_v24 }
 0x814   :  { %v12895_v44 = vpop.f32.mrf.mxu1 }
 0x815   :  { %v3502_v15 = vadd.f32 %v3484_v34, %v3414_v51  ;;  %v13814_v44 = vld [vmem:[%s18753_s4 + $0x70] ss:$24 sps:$4 sm:$0xff]  }
 0x816   :  { %v3416_v11 = vpop.f32.mrf.mxu1 }
 0x817   :  { %v3417_v16 = vadd.f32 %v16345_v14, %v3416_v11  ;;  %v3520_v23 = vmax.f32 %v3502_v15, 0.0  ;;  %v13819_v11 = vld [vmem:[%s18753_s4 + $0x44] ss:$24 sps:$4 sm:$0xff]  }
 0x818   :  { %v12896_v48 = vpop.f32.mrf.mxu1 }
 0x819   :  { %v3503_v29 = vadd.f32 %v3485_v26, %v3417_v16 }
 0x81a   :  { %v3421_v57 = vpop.f32.mrf.mxu1 }
 0x81b   :  { %v3521_v61 = vmax.f32 %v3503_v29, 0.0  ;;  %v3422_v43 = vadd.f32 %v16345_v14, %v3421_v57  ;;  %v3492_v29 = vunpack.c.l.bf16 %v16015_v13  ;;  %v13817_v57 = vld [vmem:[%s18753_s4 + $0x40] ss:$24 sps:$4 sm:$0xff]  }
 0x81c   :  { %v12899_v30 = vpop.f32.mrf.mxu1 }
 0x81d   :  { %v16352_v52 = vpack.c.bf16 %v3521_v61, %v3520_v23  ;;  %v3504_v41 = vadd.f32 %v3486_v6, %v3422_v43  ;;  %v13822_v61 = vld [vmem:[%s18753_s4 + $0x14] ss:$24 sps:$4 sm:$0xff]   ;;  %v3493_v6 = vunpack.c.h.bf16 %v16015_v13 }
 0x81e   :  { %v3424_v4 = vpop.f32.mrf.mxu1 }
 0x81f   :  { %18754 = vst [vmem:[#allocation107_spill] sm:$0xff] %v16352_v52  ;;  %v3425_v36 = vadd.f32 %v16345_v14, %v3424_v4  ;;  %3868 = vmatmul.mubr.bf16.vlgmr.msra.gmra.mxu0 %v16352_v52  ;;  %3991 = vmatmul.mubr.bf16.vlgmr.msra.gmra.mxu1 %v16352_v52  ;;  %v3522_v62 = vmax.f32 %v3504_v41, 0.0 }
 0x820   :  { %v12900_v5 = vpop.f32.mrf.mxu1  ;;  %3877 = vmatprep.mubr.bf16.mxu0 %v18744_v55  ;;  %4000 = vmatprep.mubr.bf16.mxu1 %v18744_v55 }
 0x821   :  { %v3505_v50 = vadd.f32 %v3487_v0, %v3425_v36  ;;  %4082 = vmatpush1.bf16.msra.mxu0 %v13799_v31 }
 0x822   :  { %v3429_v42 = vpop.f32.mrf.mxu1  ;;  %4083 = vmatprep.subr.bf16.mxu0 %v13804_v19  ;;  %v13820_v19 = vld [vmem:[%s18753_s4 + $0x10] ss:$24 sps:$4 sm:$0xff]  }
 0x823   :  { %v3523_v46 = vmax.f32 %v3505_v50, 0.0  ;;  %v3430_v27 = vadd.f32 %v16345_v14, %v3429_v42 }
 0x824   :  { %v12903_v7 = vpop.f32.mrf.mxu1 }
 0x825   :  { %v16366_v3 = vpack.c.bf16 %v3523_v46, %v3522_v62  ;;  %4084 = vmatpush1.bf16.msra.mxu0 %v13802_v25  ;;  %v3506_v49 = vadd.f32 %v3488_v2, %v3430_v27  ;;  %v3494_v25 = vunpack.c.l.bf16 %v16024_v47  ;;  %v3495_v46 = vunpack.c.h.bf16 %v16024_v47 }
 0x826   :  { %v3432_v63 = vpop.f32.mrf.mxu1  ;;  %4085 = vmatprep.subr.bf16.mxu0 %v13807_v12  ;;  %v3496_v47 = vunpack.c.l.bf16 %v16033_v53 }
 0x827   :  { %18755 = vst [vmem:[#allocation108_spill] sm:$0xff] %v16366_v3  ;;  %v3433_v1 = vadd.f32 %v16345_v14, %v3432_v63  ;;  %3878 = vmatmul.mubr.bf16.gmra.mxu0 %v16366_v3  ;;  %4001 = vmatmul.mubr.bf16.gmra.mxu1 %v16366_v3  ;;  %v3524_v59 = vmax.f32 %v3506_v49, 0.0 }
 0x828   :  { %v12904_v58 = vpop.f32.mrf.mxu1  ;;  %3887 = vmatprep.mubr.bf16.mxu0 %v18744_v55  ;;  %4010 = vmatprep.mubr.bf16.mxu1 %v18744_v55 }
 0x829   :  { %v3507_v10 = vadd.f32 %v3489_v40, %v3433_v1  ;;  %4086 = vmatpush1.bf16.msra.mxu0 %v13805_v32 }
 0x82a   :  { %v3437_v8 = vpop.f32.mrf.mxu1  ;;  %4087 = vmatprep.subr.bf16.mxu0 %v13810_v35 }
 0x82b   :  { %v3525_v28 = vmax.f32 %v3507_v10, 0.0  ;;  %v3438_v9 = vadd.f32 %v16345_v14, %v3437_v8 }
 0x82c   :  { %v12907_v17 = vpop.f32.mrf.mxu1 }
 0x82d   :  { %v16380_v37 = vpack.c.bf16 %v3525_v28, %v3524_v59  ;;  %4088 = vmatpush1.bf16.msra.mxu0 %v13808_v20  ;;  %v3508_v60 = vadd.f32 %v3490_v39, %v3438_v9  ;;  %v3497_v20 = vunpack.c.h.bf16 %v16033_v53 }
 0x82e   :  { %v3440_v54 = vpop.f32.mrf.mxu1  ;;  %4089 = vmatprep.subr.bf16.mxu0 %v13813_v56 }
 0x82f   :  { %18756 = vst [vmem:[#allocation109_spill] sm:$0xff] %v16380_v37  ;;  %v3441_v18 = vadd.f32 %v16345_v14, %v3440_v54  ;;  %3888 = vmatmul.mubr.bf16.gmra.mxu0 %v16380_v37  ;;  %4011 = vmatmul.mubr.bf16.gmra.mxu1 %v16380_v37  ;;  %v3526_v15 = vmax.f32 %v3508_v60, 0.0  ;;  %v18761_v54 = vld [vmem:[#allocation105_spill] sm:$0xff] }
 0x830   :  { %v12908_v24 = vpop.f32.mrf.mxu1  ;;  %3897 = vmatprep.mubr.bf16.mxu0 %v18744_v55  ;;  %4020 = vmatprep.mubr.bf16.mxu1 %v18744_v55  ;;  %v3498_v53 = vunpack.c.l.bf16 %v18761_v54 }
 0x831   :  { %v3509_v51 = vadd.f32 %v3491_v33, %v3441_v18  ;;  %4090 = vmatpush1.bf16.msra.mxu0 %v13811_v22  ;;  %v3499_v33 = vunpack.c.h.bf16 %v18761_v54 }
 0x832   :  { %v3445_v34 = vpop.f32.mrf.mxu1  ;;  %4091 = vmatprep.subr.bf16.mxu0 %v13816_v21 }
 0x833   :  { %v3527_v16 = vmax.f32 %v3509_v51, 0.0  ;;  %v3446_v45 = vadd.f32 %v16345_v14, %v3445_v34 }
 0x834   :  { %v12911_v26 = vpop.f32.mrf.mxu1 }
 0x835   :  { %v16394_v48 = vpack.c.bf16 %v3527_v16, %v3526_v15  ;;  %4092 = vmatpush1.bf16.msra.mxu0 %v13814_v44  ;;  %v3510_v43 = vadd.f32 %v3492_v29, %v3446_v45  ;;  %v18762_v16 = vld [vmem:[#allocation106_spill] sm:$0xff] }
 0x836   :  { %v3448_v23 = vpop.f32.mrf.mxu1  ;;  %4093 = vmatprep.subr.bf16.mxu0 %v13819_v11  ;;  %v3500_v45 = vunpack.c.l.bf16 %v18762_v16 }
 0x837   :  { %18757 = vst [vmem:[#allocation110_spill] sm:$0xff] %v16394_v48  ;;  %v3449_v30 = vadd.f32 %v16345_v14, %v3448_v23  ;;  %3898 = vmatmul.mubr.bf16.gmra.mxu0 %v16394_v48  ;;  %4021 = vmatmul.mubr.bf16.gmra.mxu1 %v16394_v48  ;;  %v3528_v36 = vmax.f32 %v3510_v43, 0.0  ;;  %v3501_v43 = vunpack.c.h.bf16 %v18762_v16 }
 0x838   :  { %v12912_v31 = vpop.f32.mrf.mxu1  ;;  %3907 = vmatprep.mubr.bf16.mxu0 %v18744_v55  ;;  %4030 = vmatprep.mubr.bf16.mxu1 %v18744_v55 }
 0x839   :  { %v3511_v4 = vadd.f32 %v3493_v6, %v3449_v30  ;;  %4094 = vmatpush1.bf16.msra.mxu0 %v13817_v57 }
 0x83a   :  { %v3453_v41 = vpop.f32.mrf.mxu1  ;;  %4095 = vmatprep.subr.bf16.mxu0 %v13822_v61 }
 0x83b   :  { %v3529_v0 = vmax.f32 %v3511_v4, 0.0  ;;  %v3454_v5 = vadd.f32 %v16345_v14, %v3453_v41  ;;  %v13828_v41 = vld [vmem:[#allocation2 + $0x3f4] ss:$8 sps:$4 sm:$0xff]  }
 0x83c   :  { %v12915_v50 = vpop.f32.mrf.mxu1 }
 0x83d   :  { %v16407_v13 = vpack.c.bf16 %v3529_v0, %v3528_v36  ;;  %4096 = vmatpush1.bf16.msra.mxu0 %v13820_v19  ;;  %v3512_v12 = vadd.f32 %v3494_v25, %v3454_v5 }
 0x83e   :  { %v3456_v42 = vpop.f32.mrf.mxu1 }
 0x83f   :  { %18758 = vst [vmem:[#allocation111_spill] sm:$0xff] %v16407_v13  ;;  %v3457_v62 = vadd.f32 %v16345_v14, %v3456_v42  ;;  %3908 = vmatmul.mubr.bf16.gmra.mxu0 %v16407_v13  ;;  %4031 = vmatmul.mubr.bf16.gmra.mxu1 %v16407_v13  ;;  %v3530_v32 = vmax.f32 %v3512_v12, 0.0 }
 0x840   :  { %v12916_v27 = vpop.f32.mrf.mxu1  ;;  %3917 = vmatprep.mubr.bf16.mxu0 %v18744_v55  ;;  %4040 = vmatprep.mubr.bf16.mxu1 %v18744_v55 }
 0x841   :  { %v3513_v7 = vadd.f32 %v3495_v46, %v3457_v62 }
 0x842   :  { %v3461_v2 = vpop.f32.mrf.mxu1 }
 0x843   :  { %v3531_v63 = vmax.f32 %v3513_v7, 0.0  ;;  %v3462_v35 = vadd.f32 %v16345_v14, %v3461_v2 }
 0x844   :  { %v12919_v49 = vpop.f32.mrf.mxu1 }
 0x845   :  { %v16417_v1 = vpack.c.bf16 %v3531_v63, %v3530_v32  ;;  %v3514_v58 = vadd.f32 %v3496_v47, %v3462_v35 }
 0x846   :  { %v3464_v40 = vpop.f32.mrf.mxu1 }
 0x847   :  { %18759 = vst [vmem:[#allocation112_spill] sm:$0xff] %v16417_v1  ;;  %v3465_v10 = vadd.f32 %v16345_v14, %v3464_v40  ;;  %3918 = vmatmul.mubr.bf16.gmra.mxu0 %v16417_v1  ;;  %4041 = vmatmul.mubr.bf16.gmra.mxu1 %v16417_v1  ;;  %v3532_v28 = vmax.f32 %v3514_v58, 0.0 }
 0x848   :  { %v12920_v8 = vpop.f32.mrf.mxu1  ;;  %3927 = vmatprep.mubr.bf16.mxu0 %v18744_v55  ;;  %4050 = vmatprep.mubr.bf16.mxu1 %v18744_v55 }
 0x849   :  { %v3515_v56 = vadd.f32 %v3497_v20, %v3465_v10 }
 0x84a   :  { %v3469_v59 = vpop.f32.mrf.mxu1 }
 0x84b   :  { %v3533_v9 = vmax.f32 %v3515_v56, 0.0  ;;  %v3470_v17 = vadd.f32 %v16345_v14, %v3469_v59 }
 0x84c   :  { %v12923_v39 = vpop.f32.mrf.mxu1 }
 0x84d   :  { %v16427_v22 = vpack.c.bf16 %v3533_v9, %v3532_v28  ;;  %v3516_v60 = vadd.f32 %v3498_v53, %v3470_v17 }
 0x84e   :  { %v3472_v21 = vpop.f32.mrf.mxu1 }
 0x84f   :  { %18760 = vst [vmem:[#allocation113_spill] sm:$0xff] %v16427_v22  ;;  %v3473_v18 = vadd.f32 %v16345_v14, %v3472_v21  ;;  %3928 = vmatmul.mubr.bf16.gmra.mxu0 %v16427_v22  ;;  %4051 = vmatmul.mubr.bf16.gmra.mxu1 %v16427_v22  ;;  %v3534_v34 = vmax.f32 %v3516_v60, 0.0 }
 0x850   :  { %v12924_v24 = vpop.f32.mrf.mxu1  ;;  %3937 = vmatprep.mubr.bf16.mxu0 %v18744_v55  ;;  %4060 = vmatprep.mubr.bf16.mxu1 %v18744_v55 }
 0x851   :  { %v3517_v51 = vadd.f32 %v3499_v33, %v3473_v18 }
 0x852   :  { %v3477_v44 = vpop.f32.mrf.mxu1 }
 0x853   :  { %v3535_v11 = vmax.f32 %v3517_v51, 0.0  ;;  %v3478_v15 = vadd.f32 %v16345_v14, %v3477_v44 }
 0x854   :  { %v12927_v26 = vpop.f32.mrf.mxu1 }
 0x855   :  { %v16438_v29 = vpack.c.bf16 %v3535_v11, %v3534_v34  ;;  %v3518_v57 = vadd.f32 %v3500_v45, %v3478_v15 }
 0x856   :  { %v3480_v23 = vpop.f32.mrf.mxu1 }
 0x857   :  { %18763 = vst [vmem:[#allocation105_spill] sm:$0xff] %v16438_v29  ;;  %v3481_v61 = vadd.f32 %v16345_v14, %v3480_v23  ;;  %3938 = vmatmul.mubr.bf16.gmra.mxu0 %v16438_v29  ;;  %4061 = vmatmul.mubr.bf16.gmra.mxu1 %v16438_v29  ;;  %v3536_v31 = vmax.f32 %v3518_v57, 0.0  ;;  %v13825_v14 = vld [vmem:[#allocation2 + $0x364] ss:$8 sps:$4 sm:$0xff]  }
 0x858   :  { %v12928_v30 = vpop.f32.mrf.mxu1  ;;  %3947 = vmatprep.mubr.bf16.mxu0 %v18744_v55  ;;  %4070 = vmatprep.mubr.bf16.mxu1 %v18744_v55 }
 0x859   :  { %v3519_v6 = vadd.f32 %v3501_v43, %v3481_v61 }
 0x85b   :  { %v3537_v4 = vmax.f32 %v3519_v6, 0.0 }
 0x85d   :  { %v16446_v19 = vpack.c.bf16 %v3537_v4, %v3536_v31 }
 0x85f   :  { %18764 = vst [vmem:[#allocation106_spill] sm:$0xff] %v16446_v19  ;;  %3948 = vmatmul.mubr.bf16.gmra.mxu0 %v16446_v19  ;;  %4071 = vmatmul.mubr.bf16.gmra.mxu1 %v16446_v19 }
 0x860   :  { %4113 = vmatprep.mubr.bf16.mxu0 %v18744_v55  ;;  %11908 = vmatprep.mubr.msk.bf16.mxu1 %vm1199_vm2, %v13825_v14 }
 0x867   :  { %4114 = vmatmul.mubr.bf16.vlgmr.msra.gmra.mxu0 %v16352_v52 }
 0x868   :  { %4123 = vmatprep.mubr.bf16.mxu0 %v18744_v55 }
 0x86f   :  { %4124 = vmatmul.mubr.bf16.gmra.mxu0 %v16366_v3 }
 0x870   :  { %4133 = vmatprep.mubr.bf16.mxu0 %v18744_v55 }
 0x877   :  { %4134 = vmatmul.mubr.bf16.gmra.mxu0 %v16380_v37 }
 0x878   :  { %4143 = vmatprep.mubr.bf16.mxu0 %v18744_v55 }
 0x87f   :  { %4144 = vmatmul.mubr.bf16.gmra.mxu0 %v16394_v48 }
 0x880   :  { %4153 = vmatprep.mubr.bf16.mxu0 %v18744_v55 }
 0x887   :  { %4154 = vmatmul.mubr.bf16.gmra.mxu0 %v16407_v13 }
 0x888   :  { %4163 = vmatprep.mubr.bf16.mxu0 %v18744_v55 }
 0x88f   :  { %4164 = vmatmul.mubr.bf16.gmra.mxu0 %v16417_v1 }
 0x890   :  { %4173 = vmatprep.mubr.bf16.mxu0 %v18744_v55 }
 0x897   :  { %4174 = vmatmul.mubr.bf16.gmra.mxu0 %v16427_v22 }
 0x898   :  { %4183 = vmatprep.mubr.bf16.mxu0 %v18744_v55 }
 0x89f   :  { %4184 = vmatmul.mubr.bf16.gmra.mxu0 %v16438_v29 }
 0x8a0   :  { %4193 = vmatprep.mubr.bf16.mxu0 %v18744_v55 }
 0x8a7   :  { %4194 = vmatmul.mubr.bf16.gmra.mxu0 %v16446_v19 }
 0x8a8   :  { %11935 = vmatprep.mubr.msk.bf16.mxu0 %vm1199_vm2, %v13828_v41 }
 0x8df   :  { %v16470_v36 = vpop.f32.mrf.mxu0  ;;  %v16472_v0 = vpop.f32.mrf.mxu1 }
 0x8e0   :  { %18765 = vst [vmem:[#allocation114_spill] sm:$0xff] %v16470_v36  ;;  %18766 = vst [vmem:[#allocation115_spill] sm:$0xff] %v16472_v0 }
 0x8e1   :  { %v16474_v5 = vpop.f32.mrf.mxu0  ;;  %v16476_v50 = vpop.f32.mrf.mxu1 }
 0x8e2   :  { %18767 = vst [vmem:[#allocation116_spill] sm:$0xff] %v16476_v50 }
 0x8e3   :  { %v16478_v25 = vpop.f32.mrf.mxu0  ;;  %v16480_v42 = vpop.f32.mrf.mxu1 }
 0x8e4   :  { %18768 = vst [vmem:[#allocation117_spill] sm:$0xff] %v16478_v25  ;;  %18769 = vst [vmem:[#allocation118_spill] sm:$0xff] %v16480_v42 }
 0x8e5   :  { %v16486_v46 = vpop.f32.mrf.mxu0  ;;  %v16488_v27 = vpop.f32.mrf.mxu1 }
 0x8e6   :  { %18770 = vst [vmem:[#allocation119_spill] sm:$0xff] %v16486_v46  ;;  %18771 = vst [vmem:[#allocation120_spill] sm:$0xff] %v16488_v27 }
 0x8e7   :  { %v16490_v7 = vpop.f32.mrf.mxu0  ;;  %v16492_v2 = vpop.f32.mrf.mxu1 }
 0x8e8   :  { %18772 = vst [vmem:[#allocation121_spill] sm:$0xff] %v16490_v7  ;;  %18773 = vst [vmem:[#allocation122_spill] sm:$0xff] %v16492_v2 }
 0x8e9   :  { %v16494_v32 = vpop.f32.mrf.mxu0  ;;  %v16496_v63 = vpop.f32.mrf.mxu1 }
 0x8eb   :  { %v16498_v35 = vpop.f32.mrf.mxu0  ;;  %v16500_v49 = vpop.f32.mrf.mxu1 }
 0x8ec   :  { %18774 = vst [vmem:[#allocation123_spill] sm:$0xff] %v16498_v35  ;;  %18775 = vst [vmem:[#allocation124_spill] sm:$0xff] %v16500_v49 }
 0x8ed   :  { %v16506_v58 = vpop.f32.mrf.mxu0  ;;  %v16508_v10 = vpop.f32.mrf.mxu1 }
 0x8ef   :  { %v16510_v20 = vpop.f32.mrf.mxu0  ;;  %v16512_v8 = vpop.f32.mrf.mxu1 }
 0x8f1   :  { %v16514_v56 = vpop.f32.mrf.mxu0  ;;  %v16516_v59 = vpop.f32.mrf.mxu1 }
 0x8f3   :  { %v16518_v28 = vpop.f32.mrf.mxu0  ;;  %v16520_v9 = vpop.f32.mrf.mxu1 }
 0x8f5   :  { %v16522_v17 = vpop.f32.mrf.mxu0  ;;  %v16524_v39 = vpop.f32.mrf.mxu1 }
 0x8f7   :  { %v16526_v54 = vpop.f32.mrf.mxu0  ;;  %v16528_v53 = vpop.f32.mrf.mxu1 }
 0x8f9   :  { %v16530_v21 = vpop.f32.mrf.mxu0  ;;  %v16532_v60 = vpop.f32.mrf.mxu1 }
 0x8fb   :  { %v16534_v18 = vpop.f32.mrf.mxu0  ;;  %v16536_v33 = vpop.f32.mrf.mxu1 }
 0x8fd   :  { %v16538_v24 = vpop.f32.mrf.mxu0  ;;  %v16540_v51 = vpop.f32.mrf.mxu1 }
 0x8ff   :  { %v16542_v44 = vpop.f32.mrf.mxu0  ;;  %v16544_v34 = vpop.f32.mrf.mxu1 }
 0x901   :  { %v3911_v11 = vpop.f32.mrf.mxu0  ;;  %v4034_v15 = vpop.f32.mrf.mxu1 }
 0x903   :  { %v16546_v16 = vpop.f32.mrf.mxu0  ;;  %v16548_v45 = vpop.f32.mrf.mxu1 }
 0x905   :  { %v3915_v26 = vpop.f32.mrf.mxu0  ;;  %v4038_v57 = vpop.f32.mrf.mxu1 }
 0x907   :  { %v3919_v23 = vpop.f32.mrf.mxu0  ;;  %v4042_v61 = vpop.f32.mrf.mxu1 }
 0x909   :  { %v3921_v43 = vpop.f32.mrf.mxu0  ;;  %v4044_v30 = vpop.f32.mrf.mxu1 }
 0x90b   :  { %v3923_v6 = vpop.f32.mrf.mxu0  ;;  %v4046_v31 = vpop.f32.mrf.mxu1 }
 0x90d   :  { %v3925_v4 = vpop.f32.mrf.mxu0  ;;  %v4048_v14 = vpop.f32.mrf.mxu1 }
 0x90f   :  { %v3929_v41 = vpop.f32.mrf.mxu0  ;;  %v4052_v62 = vpop.f32.mrf.mxu1 }
 0x911   :  { %v3931_v12 = vpop.f32.mrf.mxu0  ;;  %v4054_v40 = vpop.f32.mrf.mxu1 }
 0x913   :  { %v3933_v47 = vpop.f32.mrf.mxu0  ;;  %v4056_v55 = vpop.f32.mrf.mxu1 }
 0x914   :  { %v4252_v27 = vpack.c.bf16 %v3933_v47, %v3929_v41  ;;  %v4556_v50 = vpack.c.bf16 %v4056_v55, %v4052_v62  ;;  %v4248_v55 = vpack.c.bf16 %v16546_v16, %v16542_v44  ;;  %v4246_v62 = vpack.c.bf16 %v16534_v18, %v16526_v54  ;;  %v18782_v44 = vld [vmem:[#allocation124_spill] sm:$0xff] }
 0x915   :  { %v3935_v19 = vpop.f32.mrf.mxu0  ;;  %v4058_v29 = vpop.f32.mrf.mxu1  ;;  %v4549_v47 = vpack.c.bf16 %v16524_v39, %v16516_v59  ;;  %v4244_v54 = vpack.c.bf16 %v16518_v28, %v16510_v20  ;;  %v4547_v59 = vpack.c.bf16 %v16508_v10, %v16496_v63  ;;  %v18779_v10 = vld [vmem:[#allocation123_spill] sm:$0xff] }
 0x916   :  { %v4253_v49 = vpack.c.bf16 %v3935_v19, %v3931_v12  ;;  %v4557_v7 = vpack.c.bf16 %v4058_v29, %v4054_v40  ;;  %v4552_v19 = vpack.c.bf16 %v16548_v45, %v16544_v34  ;;  %v18783_v34 = vld [vmem:[#allocation122_spill] sm:$0xff] }
 0x917   :  { %v3939_v22 = vpop.f32.mrf.mxu0  ;;  %v4062_v1 = vpop.f32.mrf.mxu1 }
 0x919   :  { %v3941_v13 = vpop.f32.mrf.mxu0  ;;  %v4064_v48 = vpop.f32.mrf.mxu1 }
 0x91b   :  { %v3943_v37 = vpop.f32.mrf.mxu0  ;;  %v4066_v3 = vpop.f32.mrf.mxu1 }
 0x91c   :  { %v4254_v36 = vpack.c.bf16 %v3943_v37, %v3939_v22  ;;  %v4558_v25 = vpack.c.bf16 %v4066_v3, %v4062_v1  ;;  %v4250_v3 = vpack.c.bf16 %v3923_v6, %v3919_v23  ;;  %v4249_v1 = vpack.c.bf16 %v3915_v26, %v3911_v11  ;;  %v18785_v26 = vld [vmem:[#allocation117_spill] sm:$0xff] }
 0x91d   :  { %v3945_v52 = vpop.f32.mrf.mxu0  ;;  %v4068_v38 = vpop.f32.mrf.mxu1  ;;  %v4553_v22 = vpack.c.bf16 %v4038_v57, %v4034_v15  ;;  %v18784_v11 = vpack.c.bf16 %v18782_v44, %v18783_v34  ;;  %v18786_v57 = vld [vmem:[#allocation114_spill] sm:$0xff]  ;;  %v13856_v44 = vld [vmem:[#allocation2 + $0x444] ss:$8 sps:$4 sm:$0xff]  }
 0x91e   :  { %v4255_v0 = vpack.c.bf16 %v3945_v52, %v3941_v13  ;;  %v4559_v42 = vpack.c.bf16 %v4068_v38, %v4064_v48  ;;  %v4251_v52 = vpack.c.bf16 %v3925_v4, %v3921_v43  ;;  %v4555_v38 = vpack.c.bf16 %v4048_v14, %v4044_v30  ;;  %v18789_v43 = vld [vmem:[#allocation115_spill] sm:$0xff]  ;;  %v13826_v14 = vld [vmem:[#allocation2 + $0x3f0] ss:$8 sps:$4 sm:$0xff]  }
 0x91f   :  { %v16550_v2 = vpop.f32.mrf.mxu0  ;;  %v4554_v48 = vpack.c.bf16 %v4046_v31, %v4042_v61  ;;  %v18787_v23 = vpack.c.bf16 %v18785_v26, %v18786_v57  ;;  %v18788_v61 = vld [vmem:[#allocation118_spill] sm:$0xff] }
 0x920   :  { %4385 = vmatprep.subr.bf16.mxu1 %v4255_v0  ;;  %4689 = vmatprep.subr.bf16.mxu0 %v4559_v42  ;;  %v4247_v0 = vpack.c.bf16 %v16538_v24, %v16530_v21  ;;  %v4072_v42 = vpop.f32.mrf.mxu1  ;;  %v18780_v24 = vld [vmem:[#allocation121_spill] sm:$0xff]  ;;  %v18790_v30 = vpack.c.bf16 %v18788_v61, %v18789_v43  ;;  %v13862_v43 = vld [vmem:[#allocation2 + $0x454] ss:$8 sps:$4 sm:$0xff]  }
 0x921   :  { %v16552_v35 = vpop.f32.mrf.mxu0  ;;  %4386 = vmatpush1.bf16.msra.mxu1 %v4254_v36  ;;  %4690 = vmatpush1.bf16.msra.mxu0 %v4558_v25  ;;  %v13855_v57 = vld [vmem:[#allocation2 + $0x3b0] ss:$8 sps:$4 sm:$0xff]   ;;  %v13859_v61 = vld [vmem:[#allocation2 + $0x3c4] ss:$8 sps:$4 sm:$0xff]  }
 0x922   :  { %4387 = vmatprep.subr.bf16.mxu1 %v4253_v49  ;;  %4691 = vmatprep.subr.bf16.mxu0 %v4557_v7  ;;  %v4245_v49 = vpack.c.bf16 %v16522_v17, %v16514_v56  ;;  %v4074_v40 = vpop.f32.mrf.mxu1  ;;  %v4243_v56 = vpack.c.bf16 %v16506_v58, %v16494_v32  ;;  %v18778_v32 = vld [vmem:[#allocation120_spill] sm:$0xff] }
 0x923   :  { %v16554_v46 = vpop.f32.mrf.mxu0 }
 0x924   :  { %v4076_v39 = vpop.f32.mrf.mxu1  ;;  %v4256_v6 = vpack.c.bf16 %v16554_v46, %v16550_v2  ;;  %v13831_v2 = vld [vmem:[#allocation2 + $0x370] ss:$8 sps:$4 sm:$0xff]  }
 0x925   :  { %v16556_v37 = vpop.f32.mrf.mxu0  ;;  %4388 = vmatpush1.bf16.msra.mxu1 %v4252_v27  ;;  %4692 = vmatpush1.bf16.msra.mxu0 %v4556_v50  ;;  %v4551_v50 = vpack.c.bf16 %v16540_v51, %v16532_v60  ;;  %v4550_v27 = vpack.c.bf16 %v16536_v33, %v16528_v53  ;;  %v4548_v53 = vpack.c.bf16 %v16520_v9, %v16512_v8  ;;  %v18776_v8 = vld [vmem:[#allocation119_spill] sm:$0xff]  ;;  %v18777_v9 = vld [vmem:[#allocation116_spill] sm:$0xff] }
 0x926   :  { %4389 = vmatprep.subr.bf16.mxu1 %v4251_v52  ;;  %4693 = vmatprep.subr.bf16.mxu0 %v4555_v38  ;;  %v4241_v28 = vpack.c.bf16 %v18776_v8, %v16474_v5  ;;  %v4545_v58 = vpack.c.bf16 %v18778_v32, %v18777_v9  ;;  %v4078_v33 = vpop.f32.mrf.mxu1  ;;  %v18781_v51 = vpack.c.bf16 %v18779_v10, %v18780_v24  ;;  %v13829_v52 = vld [vmem:[#allocation2 + $0x374] ss:$8 sps:$4 sm:$0xff]   ;;  %v13832_v38 = vld [vmem:[#allocation2 + $0x404] ss:$8 sps:$4 sm:$0xff]   ;;  %v13852_v10 = vld [vmem:[#allocation2 + $0x430] ss:$8 sps:$4 sm:$0xff]  }
 0x927   :  { %v16558_v13 = vpop.f32.mrf.mxu0  ;;  %v4257_v5 = vpack.c.bf16 %v16556_v37, %v16552_v35  ;;  %v4561_v16 = vpack.c.bf16 %v4078_v33, %v4074_v40  ;;  %v4560_v31 = vpack.c.bf16 %v4076_v39, %v4072_v42  ;;  %v13823_v35 = vld [vmem:[#allocation2 + $0x360] ss:$8 sps:$4 sm:$0xff]   ;;  %v13847_v8 = vld [vmem:[#allocation2 + $0x3a4] ss:$8 sps:$4 sm:$0xff]  }
 0x928   :  { %v13837_v42 = vld [vmem:[#allocation2 + $0x380] ss:$8 sps:$4 sm:$0xff]  }
 0x929   :  { %v16560_v29 = vpop.f32.mrf.mxu0  ;;  %4390 = vmatpush1.bf16.msra.mxu1 %v4250_v3  ;;  %4694 = vmatpush1.bf16.msra.mxu0 %v4554_v48  ;;  %v13834_v48 = vld [vmem:[#allocation2 + $0x400] ss:$8 sps:$4 sm:$0xff]  }
 0x92a   :  { %4391 = vmatprep.subr.bf16.mxu1 %v4249_v1  ;;  %4695 = vmatprep.subr.bf16.mxu0 %v4553_v22  ;;  %v13835_v22 = vld [vmem:[#allocation2 + $0x384] ss:$8 sps:$4 sm:$0xff]   ;;  %v13849_v33 = vld [vmem:[#allocation2 + $0x3a0] ss:$8 sps:$4 sm:$0xff]  }
 0x92b   :  { %v16566_v36 = vpop.f32.mrf.mxu0 }
 0x92c   :  { %v4848_v25 = vpack.c.bf16 %v16566_v36, %v16558_v13  ;;  %v13883_v13 = vld [vmem:[#allocation2 + $0x4a4] ss:$8 sps:$4 sm:$0xff]   ;;  %v13900_v36 = vld [vmem:[#allocation17 + $0x28] sm:$0xff]  }
 0x92d   :  { %v16574_v12 = vpop.f32.mrf.mxu0  ;;  %4392 = vmatpush1.bf16.msra.mxu1 %v4248_v55  ;;  %4696 = vmatpush1.bf16.msra.mxu0 %v4552_v19  ;;  %v13838_v55 = vld [vmem:[#allocation2 + $0x414] ss:$8 sps:$4 sm:$0xff]  }
 0x92e   :  { %4393 = vmatprep.subr.bf16.mxu1 %v4247_v0  ;;  %4697 = vmatprep.subr.bf16.mxu0 %v4551_v50 }
 0x92f   :  { %v16580_v7 = vpop.f32.mrf.mxu0 }
 0x931   :  { %v16586_v21 = vpop.f32.mrf.mxu0  ;;  %4394 = vmatpush1.bf16.msra.mxu1 %v4246_v62  ;;  %4698 = vmatpush1.bf16.msra.mxu0 %v4550_v27  ;;  %v13840_v62 = vld [vmem:[#allocation2 + $0x410] ss:$8 sps:$4 sm:$0xff]  }
 0x932   :  { %4395 = vmatprep.subr.bf16.mxu1 %v4245_v49  ;;  %4699 = vmatprep.subr.bf16.mxu0 %v4549_v47  ;;  %v13841_v49 = vld [vmem:[#allocation2 + $0x394] ss:$8 sps:$4 sm:$0xff]   ;;  %v13844_v47 = vld [vmem:[#allocation2 + $0x424] ss:$8 sps:$4 sm:$0xff]  }
 0x933   :  { %v16592_v60 = vpop.f32.mrf.mxu0 }
 0x934   :  { %v4850_v17 = vpack.c.bf16 %v16592_v60, %v16580_v7  ;;  %v13896_v7 = vld [vmem:[#allocation17 + $0x30] sm:$0xff]   ;;  %v13882_v60 = vld [vmem:[#allocation2 + $0x490] ss:$8 sps:$4 sm:$0xff]  }
 0x935   :  { %v16600_v18 = vpop.f32.mrf.mxu0  ;;  %4396 = vmatpush1.bf16.msra.mxu1 %v4244_v54  ;;  %4700 = vmatpush1.bf16.msra.mxu0 %v4548_v53 }
 0x936   :  { %4397 = vmatprep.subr.bf16.mxu1 %v4243_v56  ;;  %4701 = vmatprep.subr.bf16.mxu0 %v4547_v59  ;;  %v13843_v56 = vld [vmem:[#allocation2 + $0x390] ss:$8 sps:$4 sm:$0xff]   ;;  %v13846_v59 = vld [vmem:[#allocation2 + $0x420] ss:$8 sps:$4 sm:$0xff]  }
 0x937   :  { %v16602_v20 = vpop.f32.mrf.mxu0 }
 0x939   :  { %v16608_v63 = vpop.f32.mrf.mxu0  ;;  %4398 = vmatpush1.bf16.msra.mxu1 %v18781_v51  ;;  %4702 = vmatpush1.bf16.msra.mxu0 %v18784_v11  ;;  %v13853_v51 = vld [vmem:[#allocation2 + $0x3b4] ss:$8 sps:$4 sm:$0xff]  }
 0x93a   :  { %4399 = vmatprep.subr.bf16.mxu1 %v4241_v28  ;;  %4703 = vmatprep.subr.bf16.mxu0 %v4545_v58  ;;  %v13850_v28 = vld [vmem:[#allocation2 + $0x434] ss:$8 sps:$4 sm:$0xff]  }
 0x93b   :  { %v16616_v15 = vpop.f32.mrf.mxu0 }
 0x93d   :  { %v16620_v45 = vpop.f32.mrf.mxu0  ;;  %4400 = vmatpush1.bf16.msra.mxu1 %v18787_v23  ;;  %4704 = vmatpush1.bf16.msra.mxu0 %v18790_v30  ;;  %v13858_v23 = vld [vmem:[#allocation2 + $0x440] ss:$8 sps:$4 sm:$0xff]  }
 0x93e   :  { %4415 = vmatprep.subr.bf16.mxu1 %v4257_v5  ;;  %4719 = vmatprep.subr.bf16.mxu0 %v4561_v16 }
 0x93f   :  { %v16630_v4 = vpop.f32.mrf.mxu0 }
 0x941   :  { %v16632_v41 = vpop.f32.mrf.mxu0  ;;  %4416 = vmatpush2.bf16.msra.mxu1 %v4256_v6  ;;  %4720 = vmatpush2.bf16.msra.mxu0 %v4560_v31 }
 0x943   :  { %v16634_v37 = vpop.f32.mrf.mxu0 }
 0x944   :  { %4418 = vmatmul.mubr.bf16.vlgmr.msra.gmra.mxu1 %v13823_v35  ;;  %4722 = vmatmul.mubr.bf16.vlgmr.msra.gmra.mxu0 %v13826_v14  ;;  %v13861_v14 = vld [vmem:[#allocation2 + $0x3c0] ss:$8 sps:$4 sm:$0xff]  }
 0x945   :  { %v16636_v3 = vpop.f32.mrf.mxu0  ;;  %11909 = vmatprep.mubr.msk.bf16.mxu1 %vm1199_vm2, %v13829_v52  ;;  %11936 = vmatprep.mubr.msk.bf16.mxu0 %vm1199_vm2, %v13832_v38  ;;  %v13864_v52 = vld [vmem:[#allocation2 + $0x450] ss:$8 sps:$4 sm:$0xff]   ;;  %v13865_v38 = vld [vmem:[#allocation2 + $0x3d4] ss:$8 sps:$4 sm:$0xff]  }
 0x947   :  { %v16640_v46 = vpop.f32.mrf.mxu0 }
 0x949   :  { %v16642_v1 = vpop.f32.mrf.mxu0 }
 0x94b   :  { %v16644_v19 = vpop.f32.mrf.mxu0 }
 0x94c   :  { %4428 = vmatmul.mubr.bf16.gmra.mxu1 %v13831_v2  ;;  %4732 = vmatmul.mubr.bf16.gmra.mxu0 %v13834_v48  ;;  %v13868_v2 = vld [vmem:[#allocation2 + $0x464] ss:$8 sps:$4 sm:$0xff]   ;;  %v4856_v48 = vpack.c.bf16 %v16644_v19, %v16640_v46  ;;  %v13870_v46 = vld [vmem:[#allocation2 + $0x460] ss:$8 sps:$4 sm:$0xff]  }
 0x94d   :  { %v16646_v0 = vpop.f32.mrf.mxu0  ;;  %11910 = vmatprep.mubr.msk.bf16.mxu1 %vm1199_vm2, %v13835_v22  ;;  %11937 = vmatprep.mubr.msk.bf16.mxu0 %vm1199_vm2, %v13838_v55  ;;  %v4855_v22 = vpack.c.bf16 %v16636_v3, %v16632_v41  ;;  %v13871_v41 = vld [vmem:[#allocation2 + $0x3e4] ss:$8 sps:$4 sm:$0xff]   ;;  %v13874_v3 = vld [vmem:[#allocation2 + $0x474] ss:$8 sps:$4 sm:$0xff]  }
 0x94e   :  { %v4857_v35 = vpack.c.bf16 %v16646_v0, %v16642_v1  ;;  %v4854_v1 = vpack.c.bf16 %v16634_v37, %v16630_v4  ;;  %v4853_v0 = vpack.c.bf16 %v16620_v45, %v16608_v63  ;;  %v4849_v63 = vpack.c.bf16 %v16574_v12, %v16560_v29  ;;  %v13873_v45 = vld [vmem:[#allocation2 + $0x3e0] ss:$8 sps:$4 sm:$0xff]   ;;  %v13876_v4 = vld [vmem:[#allocation2 + $0x470] ss:$8 sps:$4 sm:$0xff]  }
 0x94f   :  { %v4165_v50 = vpop.f32.mrf.mxu0  ;;  %v13877_v12 = vld [vmem:[#allocation2 + $0x480] ss:$8 sps:$4 sm:$0xff]  }
 0x951   :  { %v4167_v27 = vpop.f32.mrf.mxu0 }
 0x953   :  { %v4169_v40 = vpop.f32.mrf.mxu0 }
 0x954   :  { %4438 = vmatmul.mubr.bf16.gmra.mxu1 %v13837_v42  ;;  %4742 = vmatmul.mubr.bf16.gmra.mxu0 %v13840_v62  ;;  %v4858_v31 = vpack.c.bf16 %v4169_v40, %v4165_v50  ;;  %v13867_v50 = vld [vmem:[#allocation2 + $0x3d0] ss:$8 sps:$4 sm:$0xff]   ;;  %v4852_v42 = vpack.c.bf16 %v16616_v15, %v16602_v20  ;;  %v4851_v62 = vpack.c.bf16 %v16600_v18, %v16586_v21  ;;  %v13879_v21 = vld [vmem:[#allocation2 + $0x484] ss:$8 sps:$4 sm:$0xff]   ;;  %v13880_v20 = vld [vmem:[#allocation2 + $0x494] ss:$8 sps:$4 sm:$0xff]  }
 0x955   :  { %v4171_v54 = vpop.f32.mrf.mxu0  ;;  %11911 = vmatprep.mubr.msk.bf16.mxu1 %vm1199_vm2, %v13841_v49  ;;  %11938 = vmatprep.mubr.msk.bf16.mxu0 %vm1199_vm2, %v13844_v47  ;;  %v13895_v15 = vld [vmem:[#allocation17 + $0x38] sm:$0xff]   ;;  %v18791_v49 = vmov 0.0   ;;  %v13886_v47 = vld [vmem:[#allocation2 + $0x4b4] ss:$8 sps:$4 sm:$0xff]  }
 0x956   :  { %v4859_v6 = vpack.c.bf16 %v4171_v54, %v4167_v27  ;;  %v13905_v40 = vld [vmem:[#allocation17 + $0x18] sm:$0xff]   ;;  %v13906_v54 = vld [vmem:[#allocation17 + $0x10] sm:$0xff]  }
 0x957   :  { %v4175_v53 = vpop.f32.mrf.mxu0 }
 0x959   :  { %v4177_v39 = vpop.f32.mrf.mxu0 }
 0x95b   :  { %v4179_v9 = vpop.f32.mrf.mxu0 }
 0x95c   :  { %4448 = vmatmul.mubr.bf16.gmra.mxu1 %v13843_v56  ;;  %4752 = vmatmul.mubr.bf16.gmra.mxu0 %v13846_v59  ;;  %v4860_v30 = vpack.c.bf16 %v4179_v9, %v4175_v53  ;;  %v13888_v53 = vld [vmem:[#allocation2 + $0x4b0] ss:$8 sps:$4 sm:$0xff]   ;;  %v13889_v56 = vld [vmem:[#allocation2 + $0x4c4] ss:$8 sps:$4 sm:$0xff]  }
 0x95d   :  { %v4181_v32 = vpop.f32.mrf.mxu0  ;;  %11912 = vmatprep.mubr.msk.bf16.mxu1 %vm1199_vm2, %v13847_v8  ;;  %11939 = vmatprep.mubr.msk.bf16.mxu0 %vm1199_vm2, %v13850_v28  ;;  %v13910_v59 = vld [vmem:[#allocation17 + $0x8] sm:$0xff]   ;;  %v13891_v8 = vld [vmem:[#allocation2 + $0x4c0] ss:$8 sps:$4 sm:$0xff]  }
 0x95e   :  { %v4861_v26 = vpack.c.bf16 %v4181_v32, %v4177_v39  ;;  %v13911_v39 = vld [vmem:[#allocation17] sm:$0xff]   ;;  %v13892_v28 = vld [vmem:[#allocation2 + $0x4d4] ss:$8 sps:$4 sm:$0xff]  }
 0x95f   :  { %v4185_v58 = vpop.f32.mrf.mxu0  ;;  %v13894_v9 = vld [vmem:[#allocation2 + $0x4d0] ss:$8 sps:$4 sm:$0xff]   ;;  %v13897_v32 = vld [vmem:[#allocation2 + $0x4e4] ss:$8 sps:$4 sm:$0xff]  }
 0x961   :  { %v4187_v24 = vpop.f32.mrf.mxu0 }
 0x963   :  { %v4189_v34 = vpop.f32.mrf.mxu0 }
 0x964   :  { %4458 = vmatmul.mubr.bf16.gmra.mxu1 %v13849_v33  ;;  %4762 = vmatmul.mubr.bf16.gmra.mxu0 %v13852_v10  ;;  %v4862_v16 = vpack.c.bf16 %v4189_v34, %v4185_v58  ;;  %v13899_v58 = vld [vmem:[#allocation2 + $0x4e0] ss:$8 sps:$4 sm:$0xff]   ;;  %v13902_v10 = vld [vmem:[#allocation2 + $0x4f4] ss:$8 sps:$4 sm:$0xff]   ;;  %v13904_v34 = vld [vmem:[#allocation2 + $0x4f0] ss:$8 sps:$4 sm:$0xff]  }
 0x965   :  { %v4191_v11 = vpop.f32.mrf.mxu0  ;;  %11913 = vmatprep.mubr.msk.bf16.mxu1 %vm1199_vm2, %v13853_v51  ;;  %11940 = vmatprep.mubr.msk.bf16.mxu0 %vm1199_vm2, %v13856_v44  ;;  %v13912_v33 = vld [vmem:[#allocation19 + $0x78] sm:$0xff]   ;;  %v13914_v51 = vld [vmem:[#allocation19 + $0x70] sm:$0xff]  }
 0x966   :  { %v4863_v5 = vpack.c.bf16 %v4191_v11, %v4187_v24  ;;  %v13913_v24 = vld [vmem:[#allocation19 + $0x38] sm:$0xff]   ;;  %12467 = vmatprep.subr.bf16.mxu0 %v13912_v33  ;;  %v13915_v44 = vld [vmem:[#allocation19 + $0x30] sm:$0xff]   ;;  %v13916_v11 = vld [vmem:[#allocation19 + $0x68] sm:$0xff]  }
 0x967   :  { %v4195_v55 = vpop.f32.mrf.mxu0  ;;  %12468 = vmatpush3.bf16.msra.mxu0 %v13913_v24 }
 0x968   :  { %4993 = vmatprep.subr.bf16.mxu1 %v4863_v5  ;;  %12469 = vmatprep.subr.bf16.mxu0 %v13914_v51  ;;  %v13907_v5 = vld [vmem:[#allocation2 + $0x504] ss:$8 sps:$4 sm:$0xff]  }
 0x969   :  { %4994 = vmatpush1.bf16.msra.mxu1 %v4862_v16  ;;  %v4197_v19 = vpop.f32.mrf.mxu0  ;;  %v13917_v16 = vld [vmem:[#allocation19 + $0x28] sm:$0xff]  }
 0x96a   :  { %4995 = vmatprep.subr.bf16.mxu1 %v4861_v26  ;;  %v13918_v26 = vld [vmem:[#allocation19 + $0x60] sm:$0xff]  }
 0x96b   :  { %v4199_v27 = vpop.f32.mrf.mxu0  ;;  %12470 = vmatpush3.bf16.msra.mxu0 %v13915_v44 }
 0x96c   :  { %4468 = vmatmul.mubr.bf16.gmra.mxu1 %v13855_v57  ;;  %4772 = vmatmul.mubr.bf16.gmra.mxu0 %v13858_v23  ;;  %v4864_v29 = vpack.c.bf16 %v4199_v27, %v4195_v55  ;;  %v13919_v57 = vld [vmem:[#allocation19 + $0x20] sm:$0xff]   ;;  %v13909_v23 = vld [vmem:[#allocation2 + $0x500] ss:$8 sps:$4 sm:$0xff]  }
 0x96d   :  { %4996 = vmatpush1.bf16.msra.mxu1 %v4860_v30  ;;  %11914 = vmatprep.mubr.msk.bf16.mxu1 %vm1199_vm2, %v13859_v61  ;;  %v4201_v37 = vpop.f32.mrf.mxu0  ;;  %v13920_v61 = vld [vmem:[#allocation19 + $0x58] sm:$0xff]   ;;  %v13922_v30 = vld [vmem:[#allocation19 + $0x50] sm:$0xff]  }
 0x96e   :  { %4997 = vmatprep.subr.bf16.mxu1 %v4859_v6  ;;  %11941 = vmatprep.mubr.msk.bf16.mxu0 %vm1199_vm2, %v13862_v43  ;;  %v4865_v18 = vpack.c.bf16 %v4201_v37, %v4197_v19  ;;  %v13921_v43 = vld [vmem:[#allocation19 + $0x18] sm:$0xff]   ;;  %v13923_v6 = vld [vmem:[#allocation19 + $0x10] sm:$0xff]  }
 0x96f   :  { %12471 = vmatprep.subr.bf16.mxu0 %v13916_v11  ;;  %v18796_v55 = vld [vmem:[#allocation111_spill] sm:$0xff] }
 0x970   :  { %12472 = vmatpush3.bf16.msra.mxu0 %v13917_v16 }
 0x971   :  { %4998 = vmatpush1.bf16.msra.mxu1 %v4858_v31  ;;  %12473 = vmatprep.subr.bf16.mxu0 %v13918_v26  ;;  %v13924_v31 = vld [vmem:[#allocation19 + $0x48] sm:$0xff]  }
 0x972   :  { %4999 = vmatprep.subr.bf16.mxu1 %v4857_v35  ;;  %v13925_v35 = vld [vmem:[#allocation19 + $0x8] sm:$0xff]  }
 0x974   :  { %4478 = vmatmul.mubr.bf16.gmra.mxu1 %v13861_v14  ;;  %4782 = vmatmul.mubr.bf16.gmra.mxu0 %v13864_v52  ;;  %v18792_v14 = vld [vmem:[#allocation107_spill] sm:$0xff]  ;;  %v13926_v52 = vld [vmem:[#allocation19 + $0x40] sm:$0xff]  }
 0x975   :  { %5000 = vmatpush1.bf16.msra.mxu1 %v4856_v48  ;;  %11915 = vmatprep.mubr.msk.bf16.mxu1 %vm1199_vm2, %v13865_v38  ;;  %v13927_v38 = vld [vmem:[#allocation19] sm:$0xff]  }
 0x976   :  { %5001 = vmatprep.subr.bf16.mxu1 %v4855_v22  ;;  %11942 = vmatprep.mubr.msk.bf16.mxu0 %vm1199_vm2, %v13868_v2  ;;  %v18793_v2 = vld [vmem:[#allocation108_spill] sm:$0xff]  ;;  %v18794_v48 = vld [vmem:[#allocation109_spill] sm:$0xff]  ;;  %v18795_v22 = vld [vmem:[#allocation110_spill] sm:$0xff] }
 0x977   :  { %12474 = vmatpush3.bf16.msra.mxu0 %v13919_v57 }
 0x978   :  { %12475 = vmatprep.subr.bf16.mxu0 %v13920_v61 }
 0x979   :  { %5002 = vmatpush1.bf16.msra.mxu1 %v4854_v1  ;;  %v18797_v1 = vld [vmem:[#allocation112_spill] sm:$0xff] }
 0x97a   :  { %5003 = vmatprep.subr.bf16.mxu1 %v4853_v0 }
 0x97b   :  { %12476 = vmatpush3.bf16.msra.mxu0 %v13921_v43 }
 0x97c   :  { %4488 = vmatmul.mubr.bf16.gmra.mxu1 %v13867_v50  ;;  %4792 = vmatmul.mubr.bf16.gmra.mxu0 %v13870_v46  ;;  %v18798_v50 = vld [vmem:[#allocation113_spill] sm:$0xff] }
 0x97d   :  { %5004 = vmatpush1.bf16.msra.mxu1 %v4852_v42  ;;  %11916 = vmatprep.mubr.msk.bf16.mxu1 %vm1199_vm2, %v13871_v41 }
 0x97e   :  { %5005 = vmatprep.subr.bf16.mxu1 %v4851_v62  ;;  %11943 = vmatprep.mubr.msk.bf16.mxu0 %vm1199_vm2, %v13874_v3 }
 0x97f   :  { %12477 = vmatprep.subr.bf16.mxu0 %v13922_v30 }
 0x980   :  { %12478 = vmatpush3.bf16.msra.mxu0 %v13923_v6 }
 0x981   :  { %5006 = vmatpush1.bf16.msra.mxu1 %v4850_v17  ;;  %v13885_v17 = vld [vmem:[#allocation2 + $0x4a0] ss:$8 sps:$4 sm:$0xff]   ;;  %12479 = vmatprep.subr.bf16.mxu0 %v13924_v31 }
 0x982   :  { %5007 = vmatprep.subr.bf16.mxu1 %v4849_v63  ;;  %v18799_v63 = vld [vmem:[#allocation105_spill] sm:$0xff]  ;;  %v4204_v31 = vld [vmem:[%s18801_s22] sm:$0xff] }
 0x984   :  { %4498 = vmatmul.mubr.bf16.gmra.mxu1 %v13873_v45  ;;  %4802 = vmatmul.mubr.bf16.gmra.mxu0 %v13876_v4 }
 0x985   :  { %5008 = vmatpush1.bf16.msra.mxu1 %v4848_v25  ;;  %11962 = vmatprep.mubr.msk.bf16.mxu1 %vm1199_vm2, %v13879_v21  ;;  %v13901_v25 = vld [vmem:[#allocation17 + $0x20] sm:$0xff]  }
 0x986   :  { %5023 = vmatprep.subr.bf16.mxu1 %v4865_v18  ;;  %12480 = vmatpush3.bf16.msra.mxu0 %v13925_v35 }
 0x987   :  { %12481 = vmatprep.subr.bf16.mxu0 %v13926_v52  ;;  %v4205_v52 = vld [vmem:[%s18801_s22 + $0x8] sm:$0xff] }
 0x989   :  { %5024 = vmatpush2.bf16.msra.mxu1 %v4864_v29 }
 0x98a   :  { %12929 = vmatprep.subr.bf16.mxu1 %v18791_v49  ;;  %12482 = vmatpush3.bf16.msra.mxu0 %v13927_v38  ;;  %v4206_v38 = vld [vmem:[%s18801_s22 + $0x10] sm:$0xff] }
 0x98c   :  { %5026 = vmatmul.mubr.bf16.vlgmr.msra.gmra.mxu1 %v13877_v12  ;;  %v18800_v12 = vld [vmem:[#allocation106_spill] sm:$0xff] }
 0x98d   :  { %11963 = vmatprep.mubr.msk.bf16.mxu1 %vm1199_vm2, %v13880_v20  ;;  %12930 = vmatpush3.bf16.msra.mxu1 %v13895_v15 }
 0x98e   :  { %12931 = vmatprep.subr.bf16.mxu1 %v18791_v49 }
 0x991   :  { %12932 = vmatpush3.bf16.msra.mxu1 %v13896_v7 }
 0x992   :  { %12933 = vmatprep.subr.bf16.mxu1 %v18791_v49 }
 0x994   :  { %5036 = vmatmul.mubr.bf16.gmra.mxu1 %v13882_v60 }
 0x995   :  { %11964 = vmatprep.mubr.msk.bf16.mxu1 %vm1199_vm2, %v13883_v13  ;;  %12934 = vmatpush3.bf16.msra.mxu1 %v13900_v36 }
 0x996   :  { %12935 = vmatprep.subr.bf16.mxu1 %v18791_v49 }
 0x999   :  { %12936 = vmatpush3.bf16.msra.mxu1 %v13901_v25 }
 0x99a   :  { %12937 = vmatprep.subr.bf16.mxu1 %v18791_v49 }
 0x99c   :  { %5046 = vmatmul.mubr.bf16.gmra.mxu1 %v13885_v17 }
 0x99d   :  { %11965 = vmatprep.mubr.msk.bf16.mxu1 %vm1199_vm2, %v13886_v47  ;;  %12938 = vmatpush3.bf16.msra.mxu1 %v13905_v40 }
 0x99e   :  { %12939 = vmatprep.subr.bf16.mxu1 %v18791_v49 }
 0x9a1   :  { %12940 = vmatpush3.bf16.msra.mxu1 %v13906_v54 }
 0x9a2   :  { %12941 = vmatprep.subr.bf16.mxu1 %v18791_v49 }
 0x9a4   :  { %5056 = vmatmul.mubr.bf16.gmra.mxu1 %v13888_v53 }
 0x9a5   :  { %11966 = vmatprep.mubr.msk.bf16.mxu1 %vm1199_vm2, %v13889_v56  ;;  %12942 = vmatpush3.bf16.msra.mxu1 %v13910_v59 }
 0x9a6   :  { %12943 = vmatprep.subr.bf16.mxu1 %v18791_v49 }
 0x9a9   :  { %12944 = vmatpush3.bf16.msra.mxu1 %v13911_v39 }
 0x9aa   :  { %12981 = vmatprep.subr.bf16.mxu1 %v18791_v49 }
 0x9ac   :  { %5066 = vmatmul.mubr.bf16.gmra.mxu1 %v13891_v8 }
 0x9ad   :  { %11967 = vmatprep.mubr.msk.bf16.mxu1 %vm1199_vm2, %v13892_v28 }
 0x9b4   :  { %5076 = vmatmul.mubr.bf16.gmra.mxu1 %v13894_v9 }
 0x9b5   :  { %11968 = vmatprep.mubr.msk.bf16.mxu1 %vm1199_vm2, %v13897_v32 }
 0x9bc   :  { %5086 = vmatmul.mubr.bf16.gmra.mxu1 %v13899_v58 }
 0x9bd   :  { %11969 = vmatprep.mubr.msk.bf16.mxu1 %vm1199_vm2, %v13902_v10 }
 0x9c4   :  { %5096 = vmatmul.mubr.bf16.gmra.mxu1 %v13904_v34 }
 0x9c5   :  { %11970 = vmatprep.mubr.msk.bf16.mxu1 %vm1199_vm2, %v13907_v5 }
 0x9cc   :  { %5106 = vmatmul.mubr.bf16.gmra.mxu1 %v13909_v23 }
 0x9cd   :  { %12945 = vmatprep.mubr.msk.bf16.mxu1 %vm15303_vm0, %v18791_v49 }
 0x9d4   :  { %12946 = vmatmul.mubr.bf16.vlgmr.msra.gmra.mxu1 %v18792_v14 }
 0x9d5   :  { %12949 = vmatprep.mubr.msk.bf16.mxu1 %vm15303_vm0, %v18791_v49 }
 0x9dc   :  { %12950 = vmatmul.mubr.bf16.gmra.mxu1 %v18793_v2 }
 0x9dd   :  { %12953 = vmatprep.mubr.msk.bf16.mxu1 %vm15303_vm0, %v18791_v49 }
 0x9e4   :  { %12954 = vmatmul.mubr.bf16.gmra.mxu1 %v18794_v48 }
 0x9e5   :  { %12957 = vmatprep.mubr.msk.bf16.mxu1 %vm15303_vm0, %v18791_v49 }
 0x9ec   :  { %12958 = vmatmul.mubr.bf16.gmra.mxu1 %v18795_v22  ;;  %v4207_v22 = vld [vmem:[%s18801_s22 + $0x18] sm:$0xff] }
 0x9ed   :  { %12961 = vmatprep.mubr.msk.bf16.mxu1 %vm15303_vm0, %v18791_v49 }
 0x9f4   :  { %12962 = vmatmul.mubr.bf16.gmra.mxu1 %v18796_v55 }
 0x9f5   :  { %12965 = vmatprep.mubr.msk.bf16.mxu1 %vm15303_vm0, %v18791_v49 }
 0x9fc   :  { %12966 = vmatmul.mubr.bf16.gmra.mxu1 %v18797_v1 }
 0x9fd   :  { %12969 = vmatprep.mubr.msk.bf16.mxu1 %vm15303_vm0, %v18791_v49 }
 0xa04   :  { %v4419_v0 = vpop.f32.mrf.mxu1  ;;  %12970 = vmatmul.mubr.bf16.gmra.mxu1 %v18798_v50  ;;  %v16723_v46 = vpop.f32.mrf.mxu0 }
 0xa05   :  { %12973 = vmatprep.mubr.msk.bf16.mxu1 %vm15303_vm0, %v18791_v49  ;;  %v4508_v48 = vadd.f32 %v4419_v0, %v4204_v31 }
 0xa06   :  { %v4421_v19 = vpop.f32.mrf.mxu1  ;;  %v16727_v41 = vpop.f32.mrf.mxu0 }
 0xa07   :  { %v4509_v50 = vadd.f32 %v4421_v19, %v4205_v52  ;;  %v4210_v19 = vld [vmem:[%s18801_s22 + $0x30] sm:$0xff] }
 0xa08   :  { %v4423_v3 = vpop.f32.mrf.mxu1  ;;  %v16731_v62 = vpop.f32.mrf.mxu0 }
 0xa09   :  { %v4813_v0 = vadd.f32 %v16727_v41, %v4509_v50 }
 0xa0a   :  { %v16729_v42 = vpop.f32.mrf.mxu1  ;;  %v16738_v45 = vpop.f32.mrf.mxu0 }
 0xa0c   :  { %v16733_v27 = vpop.f32.mrf.mxu1  ;;  %12974 = vmatmul.mubr.bf16.gmra.mxu1 %v18799_v63  ;;  %v16744_v21 = vpop.f32.mrf.mxu0  ;;  %v4510_v63 = vadd.f32 %v4423_v3, %v4206_v38 }
 0xa0d   :  { %12977 = vmatprep.mubr.msk.bf16.mxu1 %vm15303_vm0, %v18791_v49 }
 0xa0e   :  { %v16740_v4 = vpop.f32.mrf.mxu1  ;;  %v16753_v20 = vpop.f32.mrf.mxu0  ;;  %v4814_v31 = vadd.f32 %v16731_v62, %v4510_v63 }
 0xa10   :  { %v16742_v37 = vpop.f32.mrf.mxu1  ;;  %v16759_v60 = vpop.f32.mrf.mxu0 }
 0xa11   :  { %v4514_v41 = vadd.f32 %v16742_v37, %v4210_v19 }
 0xa12   :  { %v16746_v18 = vpop.f32.mrf.mxu1  ;;  %v16765_v25 = vpop.f32.mrf.mxu0 }
 0xa13   :  { %v4818_v37 = vadd.f32 %v16759_v60, %v4514_v41  ;;  %v13928_v60 = vld [vmem:[#allocation23 + $0xa8] ss:$12 sps:$4 sm:$0xff]   ;;  %v13931_v41 = vld [vmem:[#allocation23 + $0xb0] ss:$12 sps:$4 sm:$0xff]  }
 0xa14   :  { %v16748_v29 = vpop.f32.mrf.mxu1  ;;  %12978 = vmatmul.mubr.bf16.gmra.mxu1 %v18800_v12  ;;  %v16771_v40 = vpop.f32.mrf.mxu0 }
 0xa15   :  { %12997 = vmatprep.mubr.msk.bf16.mxu1 %vm15303_vm0, %v18791_v49  ;;  %12982 = vmatpush3.bf16.msra.mxu1 %v13931_v41 }
 0xa16   :  { %v16755_v15 = vpop.f32.mrf.mxu1  ;;  %v16777_v56 = vpop.f32.mrf.mxu0  ;;  %12983 = vmatprep.subr.bf16.mxu1 %v18791_v49 }
 0xa18   :  { %v16757_v7 = vpop.f32.mrf.mxu1  ;;  %v16783_v8 = vpop.f32.mrf.mxu0 }
 0xa1a   :  { %v16761_v13 = vpop.f32.mrf.mxu1  ;;  %v16789_v32 = vpop.f32.mrf.mxu0 }
 0xa1c   :  { %v16763_v36 = vpop.f32.mrf.mxu1  ;;  %v16795_v10 = vpop.f32.mrf.mxu0 }
 0xa1e   :  { %v16767_v17 = vpop.f32.mrf.mxu1  ;;  %v16801_v44 = vpop.f32.mrf.mxu0 }
 0xa20   :  { %v16769_v47 = vpop.f32.mrf.mxu1  ;;  %v16807_v5 = vpop.f32.mrf.mxu0 }
 0xa22   :  { %v16773_v54 = vpop.f32.mrf.mxu1  ;;  %v16813_v57 = vpop.f32.mrf.mxu0 }
 0xa24   :  { %v16775_v53 = vpop.f32.mrf.mxu1  ;;  %v16819_v43 = vpop.f32.mrf.mxu0 }
 0xa26   :  { %v16779_v59 = vpop.f32.mrf.mxu1  ;;  %v16826_v35 = vpop.f32.mrf.mxu0 }
 0xa28   :  { %v16781_v39 = vpop.f32.mrf.mxu1  ;;  %v16835_v55 = vpop.f32.mrf.mxu0 }
 0xa2a   :  { %v16785_v28 = vpop.f32.mrf.mxu1 }
 0xa2c   :  { %v16787_v9 = vpop.f32.mrf.mxu1 }
 0xa2e   :  { %v16791_v58 = vpop.f32.mrf.mxu1 }
 0xa30   :  { %v16793_v33 = vpop.f32.mrf.mxu1 }
 0xa32   :  { %v16797_v24 = vpop.f32.mrf.mxu1 }
 0xa34   :  { %v16799_v51 = vpop.f32.mrf.mxu1 }
 0xa36   :  { %v16803_v34 = vpop.f32.mrf.mxu1 }
 0xa38   :  { %v16805_v11 = vpop.f32.mrf.mxu1 }
 0xa3a   :  { %v16809_v16 = vpop.f32.mrf.mxu1 }
 0xa3b   :  { %18802 = vst [vmem:[#allocation119_spill] sm:$0xff] %v16809_v16 }
 0xa3c   :  { %v16811_v26 = vpop.f32.mrf.mxu1 }
 0xa3d   :  { %18803 = vst [vmem:[#allocation116_spill] sm:$0xff] %v16811_v26 }
 0xa3e   :  { %v16815_v23 = vpop.f32.mrf.mxu1 }
 0xa3f   :  { %18804 = vst [vmem:[#allocation120_spill] sm:$0xff] %v16815_v23 }
 0xa40   :  { %v16817_v61 = vpop.f32.mrf.mxu1 }
 0xa41   :  { %18805 = vst [vmem:[#allocation123_spill] sm:$0xff] %v16817_v61  ;;  %v16842_v61 = vpop.f32.mrf.mxu0 }
 0xa42   :  { %v16821_v30 = vpop.f32.mrf.mxu1 }
 0xa43   :  { %18806 = vst [vmem:[#allocation121_spill] sm:$0xff] %v16821_v30  ;;  %v4208_v30 = vld [vmem:[%s18801_s22 + $0x20] sm:$0xff] }
 0xa44   :  { %v16823_v6 = vpop.f32.mrf.mxu1 }
 0xa45   :  { %18807 = vst [vmem:[#allocation124_spill] sm:$0xff] %v16823_v6  ;;  %v4812_v6 = vadd.f32 %v16723_v46, %v4508_v48  ;;  %v4211_v48 = vld [vmem:[%s18801_s22 + $0x38] sm:$0xff] }
 0xa46   :  { %v16828_v14 = vpop.f32.mrf.mxu1 }
 0xa47   :  { %18808 = vst [vmem:[#allocation122_spill] sm:$0xff] %v16828_v14  ;;  %v4511_v14 = vadd.f32 %v16729_v42, %v4207_v22  ;;  %v16852_v22 = vpop.f32.mrf.mxu0 }
 0xa48   :  { %v16832_v2 = vpop.f32.mrf.mxu1 }
 0xa49   :  { %18809 = vst [vmem:[#allocation117_spill] sm:$0xff] %v16832_v2  ;;  %v4209_v2 = vld [vmem:[%s18801_s22 + $0x28] sm:$0xff]  ;;  %v4815_v46 = vadd.f32 %v16738_v45, %v4511_v14  ;;  %v4515_v45 = vadd.f32 %v16746_v18, %v4211_v48  ;;  %v16858_v63 = vpop.f32.mrf.mxu0 }
 0xa4a   :  { %v16837_v1 = vpop.f32.mrf.mxu1  ;;  %v4513_v42 = vadd.f32 %v16740_v4, %v4209_v2 }
 0xa4b   :  { %18810 = vst [vmem:[#allocation114_spill] sm:$0xff] %v16837_v1  ;;  %v4512_v1 = vadd.f32 %v16733_v27, %v4208_v30  ;;  %v4819_v18 = vadd.f32 %v16765_v25, %v4515_v45  ;;  %v16868_v48 = vpop.f32.mrf.mxu0  ;;  %v13934_v25 = vld [vmem:[#allocation23 + $0x94] ss:$12 sps:$4 sm:$0xff]  }
 0xa4c   :  { %v5027_v12 = vpop.f32.mrf.mxu1 }
 0xa4d   :  { %v5116_v26 = vadd.f32 %v5027_v12, %v4812_v6  ;;  %v4816_v27 = vadd.f32 %v16744_v21, %v4512_v1  ;;  %v4214_v1 = vld [vmem:[%s18801_s22 + $0x50] sm:$0xff] }
 0xa4e   :  { %v5029_v23 = vpop.f32.mrf.mxu1 }
 0xa4f   :  { %v5117_v52 = vadd.f32 %v5029_v23, %v4813_v0  ;;  %v5152_v62 = vmax.f32 %v5116_v26, 0.0  ;;  %v4212_v23 = vld [vmem:[%s18801_s22 + $0x40] sm:$0xff]  ;;  %v4817_v0 = vadd.f32 %v16753_v20, %v4513_v42  ;;  %v4213_v26 = vld [vmem:[%s18801_s22 + $0x48] sm:$0xff] }
 0xa50   :  { %v5031_v3 = vpop.f32.mrf.mxu1  ;;  %v4516_v21 = vadd.f32 %v16748_v29, %v4212_v23  ;;  %v13930_v42 = vld [vmem:[#allocation23 + $0xac] ss:$12 sps:$4 sm:$0xff]   ;;  %v4518_v29 = vadd.f32 %v16757_v7, %v4214_v1  ;;  %v13932_v7 = vld [vmem:[#allocation23 + $0x90] ss:$12 sps:$4 sm:$0xff]   ;;  %v4218_v1 = vld [vmem:[%s18801_s22 + $0x70] sm:$0xff] }
 0xa51   :  { %v5118_v38 = vadd.f32 %v5031_v3, %v4814_v31  ;;  %v5153_v14 = vmax.f32 %v5117_v52, 0.0  ;;  %v4215_v3 = vld [vmem:[%s18801_s22 + $0x58] sm:$0xff]  ;;  %5820 = vmatprep.subr.bf16.mxu0 %v13930_v42  ;;  %v4216_v23 = vld [vmem:[%s18801_s22 + $0x60] sm:$0xff]  ;;  %v4522_v42 = vadd.f32 %v16769_v47, %v4218_v1 }
 0xa52   :  { %v5033_v16 = vpop.f32.mrf.mxu1  ;;  %v4519_v45 = vadd.f32 %v16761_v13, %v4215_v3  ;;  %v4217_v13 = vld [vmem:[%s18801_s22 + $0x68] sm:$0xff] }
 0xa53   :  { %v5154_v6 = vmax.f32 %v5118_v38, 0.0  ;;  %v5119_v50 = vadd.f32 %v5033_v16, %v4815_v46  ;;  %v4517_v38 = vadd.f32 %v16755_v15, %v4213_v26  ;;  %v13935_v15 = vld [vmem:[#allocation23 + $0x98] ss:$12 sps:$4 sm:$0xff]   ;;  %v4822_v26 = vadd.f32 %v16783_v8, %v4518_v29  ;;  %v4219_v8 = vld [vmem:[%s18801_s22 + $0x78] sm:$0xff] }
 0xa54   :  { %v5037_v30 = vpop.f32.mrf.mxu1  ;;  %12984 = vmatpush3.bf16.msra.mxu1 %v13935_v15  ;;  %v4823_v3 = vadd.f32 %v16789_v32, %v4519_v45  ;;  %v13940_v47 = vld [vmem:[#allocation23 + $0x60] ss:$12 sps:$4 sm:$0xff]  }
 0xa55   :  { %v5188_v4 = vpack.c.bf16 %v5154_v6, %v5152_v62  ;;  %v5155_v2 = vmax.f32 %v5119_v50, 0.0  ;;  %v5120_v16 = vadd.f32 %v5037_v30, %v4816_v27  ;;  %v4820_v27 = vadd.f32 %v16771_v40, %v4516_v21  ;;  %v13938_v40 = vld [vmem:[#allocation23 + $0x7c] ss:$12 sps:$4 sm:$0xff]   ;;  %12985 = vmatprep.subr.bf16.mxu1 %v18791_v49 }
 0xa56   :  { %v5039_v12 = vpop.f32.mrf.mxu1  ;;  %v4520_v21 = vadd.f32 %v16763_v36, %v4216_v23  ;;  %v13942_v36 = vld [vmem:[#allocation23 + $0x64] ss:$12 sps:$4 sm:$0xff]  }
 0xa57   :  { %v5189_v31 = vpack.c.bf16 %v5155_v2, %v5153_v14  ;;  %v5121_v46 = vadd.f32 %v5039_v12, %v4817_v0  ;;  %v5156_v62 = vmax.f32 %v5120_v16, 0.0  ;;  %v16875_v12 = vpop.f32.mrf.mxu0 }
 0xa58   :  { %v5041_v19 = vpop.f32.mrf.mxu1 }
 0xa59   :  { %v5122_v52 = vadd.f32 %v5041_v19, %v4818_v37  ;;  %5373 = vmatprep.mubr.bf16.mxu0 %v5189_v31  ;;  %v5157_v14 = vmax.f32 %v5121_v46, 0.0  ;;  %v4821_v37 = vadd.f32 %v16777_v56, %v4517_v38  ;;  %v4521_v56 = vadd.f32 %v16767_v17, %v4217_v13  ;;  %v16885_v38 = vpop.f32.mrf.mxu0  ;;  %v13943_v17 = vld [vmem:[#allocation23 + $0x68] ss:$12 sps:$4 sm:$0xff]  }
 0xa5a   :  { %v5043_v20 = vpop.f32.mrf.mxu1  ;;  %5374 = vmatmul.mubr.bf16.vlgmr.msra.gmra.mxu0 %v5188_v4 }
 0xa5b   :  { %v5158_v6 = vmax.f32 %v5122_v52, 0.0  ;;  %v5123_v50 = vadd.f32 %v5043_v20, %v4819_v18  ;;  %5821 = vmatpush1.bf16.msra.mxu0 %v13928_v60  ;;  %v13939_v18 = vld [vmem:[#allocation23 + $0x80] ss:$12 sps:$4 sm:$0xff]   ;;  %v13936_v20 = vld [vmem:[#allocation23 + $0x78] ss:$12 sps:$4 sm:$0xff]   ;;  %v16893_v45 = vpop.f32.mrf.mxu0 }
 0xa5c   :  { %v5047_v30 = vpop.f32.mrf.mxu1  ;;  %5822 = vmatprep.subr.bf16.mxu0 %v13934_v25  ;;  %12986 = vmatpush3.bf16.msra.mxu1 %v13939_v18  ;;  %v4220_v25 = vld [vmem:[%s18801_s22 + $0x80] sm:$0xff] }
 0xa5d   :  { %v5190_v4 = vpack.c.bf16 %v5158_v6, %v5156_v62  ;;  %v5159_v2 = vmax.f32 %v5123_v50, 0.0  ;;  %v5124_v16 = vadd.f32 %v5047_v30, %v4820_v27  ;;  %v4824_v62 = vadd.f32 %v16795_v10, %v4520_v21  ;;  %12987 = vmatprep.subr.bf16.mxu1 %v18791_v49 }
 0xa5e   :  { %v5049_v0 = vpop.f32.mrf.mxu1  ;;  %v4523_v50 = vadd.f32 %v16773_v54, %v4219_v8  ;;  %v4825_v10 = vadd.f32 %v16801_v44, %v4521_v56  ;;  %v4223_v44 = vld [vmem:[%s18801_s22 + $0x98] sm:$0xff] }
 0xa5f   :  { %v5191_v31 = vpack.c.bf16 %v5159_v2, %v5157_v14  ;;  %v5125_v46 = vadd.f32 %v5049_v0, %v4821_v37  ;;  %5823 = vmatpush1.bf16.msra.mxu0 %v13932_v7  ;;  %v5160_v41 = vmax.f32 %v5124_v16, 0.0  ;;  %v4826_v14 = vadd.f32 %v16807_v5, %v4522_v42  ;;  %v4222_v0 = vld [vmem:[%s18801_s22 + $0x90] sm:$0xff] }
 0xa60   :  { %v5051_v19 = vpop.f32.mrf.mxu1  ;;  %5824 = vmatprep.subr.bf16.mxu0 %v13938_v40  ;;  %v4524_v7 = vadd.f32 %v16775_v53, %v4220_v25  ;;  %12988 = vmatpush3.bf16.msra.mxu1 %v13943_v17  ;;  %v4827_v37 = vadd.f32 %v16813_v57, %v4523_v50  ;;  %v4526_v53 = vadd.f32 %v16781_v39, %v4222_v0  ;;  %v4227_v50 = vld [vmem:[%s18801_s22 + $0xb8] sm:$0xff] }
 0xa61   :  { %v5126_v52 = vadd.f32 %v5051_v19, %v4822_v26  ;;  %5381 = vmatprep.mubr.bf16.mxu0 %v5191_v31  ;;  %v5161_v27 = vmax.f32 %v5125_v46, 0.0  ;;  %v16903_v31 = vpop.f32.mrf.mxu0  ;;  %12989 = vmatprep.subr.bf16.mxu1 %v18791_v49 }
 0xa62   :  { %v5053_v60 = vpop.f32.mrf.mxu1  ;;  %5382 = vmatmul.mubr.bf16.gmra.mxu0 %v5190_v4  ;;  %v4221_v4 = vld [vmem:[%s18801_s22 + $0x88] sm:$0xff]  ;;  %v4828_v19 = vadd.f32 %v16819_v43, %v4524_v7  ;;  %v4830_v39 = vadd.f32 %v16835_v55, %v4526_v53 }
 0xa63   :  { %v5162_v29 = vmax.f32 %v5126_v52, 0.0  ;;  %v5127_v32 = vadd.f32 %v5053_v60, %v4823_v3  ;;  %5825 = vmatpush1.bf16.msra.mxu0 %v13936_v20  ;;  %v4525_v16 = vadd.f32 %v16779_v59, %v4221_v4  ;;  %v4527_v3 = vadd.f32 %v16785_v28, %v4223_v44  ;;  %v4224_v59 = vld [vmem:[%s18801_s22 + $0xa0] sm:$0xff]  ;;  %v16910_v56 = vpop.f32.mrf.mxu0  ;;  %v4229_v7 = vld [vmem:[%s18801_s22 + $0xc8] sm:$0xff] }
 0xa64   :  { %v5057_v6 = vpop.f32.mrf.mxu1  ;;  %5826 = vmatprep.subr.bf16.mxu0 %v13942_v36  ;;  %v4225_v36 = vld [vmem:[%s18801_s22 + $0xa8] sm:$0xff]  ;;  %v4528_v43 = vadd.f32 %v16787_v9, %v4224_v59  ;;  %v4533_v44 = vadd.f32 %v16803_v34, %v4229_v7 }
 0xa65   :  { %v5192_v30 = vpack.c.bf16 %v5162_v29, %v5160_v41  ;;  %v5163_v15 = vmax.f32 %v5127_v32, 0.0  ;;  %v5128_v54 = vadd.f32 %v5057_v6, %v4824_v62  ;;  %v4829_v60 = vadd.f32 %v16826_v35, %v4525_v16  ;;  %v4226_v29 = vld [vmem:[%s18801_s22 + $0xb0] sm:$0xff]  ;;  %v16920_v25 = vpop.f32.mrf.mxu0  ;;  %v4237_v7 = vld [vmem:[%s18801_s22 + $0x108] sm:$0xff] }
 0xa66   :  { %v5059_v23 = vpop.f32.mrf.mxu1  ;;  %v4831_v28 = vadd.f32 %v16842_v61, %v4527_v3  ;;  %v4529_v17 = vadd.f32 %v16791_v58, %v4225_v36  ;;  %v4530_v55 = vadd.f32 %v16793_v33, %v4226_v29  ;;  %v4832_v61 = vadd.f32 %v16852_v22, %v4528_v43  ;;  %v4230_v22 = vld [vmem:[%s18801_s22 + $0xd0] sm:$0xff]  ;;  %v4232_v3 = vld [vmem:[%s18801_s22 + $0xe0] sm:$0xff] }
 0xa67   :  { %v5193_v2 = vpack.c.bf16 %v5163_v15, %v5161_v27  ;;  %v5129_v26 = vadd.f32 %v5059_v23, %v4825_v10  ;;  %5827 = vmatpush1.bf16.msra.mxu0 %v13940_v47  ;;  %v5164_v21 = vmax.f32 %v5128_v54, 0.0  ;;  %v4531_v47 = vadd.f32 %v16797_v24, %v4227_v50  ;;  %v4228_v23 = vld [vmem:[%s18801_s22 + $0xc0] sm:$0xff]  ;;  %v4795_v4 = vpop.f32.mrf.mxu0 }
 0xa68   :  { %v5061_v40 = vpop.f32.mrf.mxu1  ;;  %v4834_v33 = vadd.f32 %v16868_v48, %v4530_v55  ;;  %v4534_v48 = vadd.f32 %v16805_v11, %v4230_v22 }
 0xa69   :  { %v5130_v13 = vadd.f32 %v5061_v40, %v4826_v14  ;;  %5389 = vmatprep.mubr.bf16.mxu0 %v5193_v2  ;;  %v5165_v46 = vmax.f32 %v5129_v26, 0.0  ;;  %v4833_v2 = vadd.f32 %v16858_v63, %v4529_v17  ;;  %v4835_v24 = vadd.f32 %v16875_v12, %v4531_v47  ;;  %v4797_v53 = vpop.f32.mrf.mxu0  ;;  %v4235_v17 = vld [vmem:[%s18801_s22 + $0xf8] sm:$0xff]  ;;  %v4236_v47 = vld [vmem:[%s18801_s22 + $0x100] sm:$0xff] }
 0xa6a   :  { %v5063_v5 = vpop.f32.mrf.mxu1  ;;  %5390 = vmatmul.mubr.bf16.gmra.mxu0 %v5192_v30  ;;  %v4838_v11 = vadd.f32 %v16903_v31, %v4534_v48  ;;  %v18814_v31 = vld [vmem:[#allocation123_spill] sm:$0xff] }
 0xa6b   :  { %v5166_v1 = vmax.f32 %v5130_v13, 0.0  ;;  %v5131_v57 = vadd.f32 %v5063_v5, %v4827_v37  ;;  %v4532_v37 = vadd.f32 %v16799_v51, %v4228_v23  ;;  %v4231_v5 = vld [vmem:[%s18801_s22 + $0xd8] sm:$0xff] }
 0xa6c   :  { %v5067_v18 = vpop.f32.mrf.mxu1 }
 0xa6d   :  { %v5194_v52 = vpack.c.bf16 %v5166_v1, %v5164_v21  ;;  %v5167_v20 = vmax.f32 %v5131_v57, 0.0  ;;  %v5132_v42 = vadd.f32 %v5067_v18, %v4828_v19  ;;  %v4836_v57 = vadd.f32 %v16885_v38, %v4532_v37  ;;  %v18811_v19 = vld [vmem:[#allocation119_spill] sm:$0xff]  ;;  %v4234_v38 = vld [vmem:[%s18801_s22 + $0xf0] sm:$0xff]  ;;  %v18816_v37 = vld [vmem:[#allocation124_spill] sm:$0xff] }
 0xa6e   :  { %v5069_v8 = vpop.f32.mrf.mxu1  ;;  %v4535_v18 = vadd.f32 %v18811_v19, %v4231_v5  ;;  %v4540_v22 = vadd.f32 %v18816_v37, %v4236_v47  ;;  %v13956_v37 = vld [vmem:[#allocation23] ss:$12 sps:$4 sm:$0xff]  }
 0xa6f   :  { %v5195_v41 = vpack.c.bf16 %v5167_v20, %v5165_v46  ;;  %v5133_v62 = vadd.f32 %v5069_v8, %v4829_v60  ;;  %v5168_v27 = vmax.f32 %v5132_v42, 0.0  ;;  %v4837_v8 = vadd.f32 %v16893_v45, %v4533_v44  ;;  %v4233_v60 = vld [vmem:[%s18801_s22 + $0xe8] sm:$0xff]  ;;  %v18817_v44 = vld [vmem:[#allocation122_spill] sm:$0xff] }
 0xa70   :  { %v5071_v32 = vpop.f32.mrf.mxu1  ;;  %v18812_v42 = vld [vmem:[#allocation116_spill] sm:$0xff]  ;;  %v4839_v29 = vadd.f32 %v16910_v56, %v4535_v18  ;;  %v4541_v5 = vadd.f32 %v18817_v44, %v4237_v7  ;;  %v18819_v18 = vld [vmem:[#allocation114_spill] sm:$0xff] }
 0xa71   :  { %v5134_v6 = vadd.f32 %v5071_v32, %v4830_v39  ;;  %5397 = vmatprep.mubr.bf16.mxu0 %v5195_v41  ;;  %v5169_v10 = vmax.f32 %v5133_v62, 0.0  ;;  %v4536_v41 = vadd.f32 %v18812_v42, %v4232_v3  ;;  %v18813_v62 = vld [vmem:[#allocation120_spill] sm:$0xff] }
 0xa72   :  { %v5073_v35 = vpop.f32.mrf.mxu1  ;;  %5398 = vmatmul.mubr.bf16.gmra.mxu0 %v5194_v52  ;;  %v4799_v52 = vpop.f32.mrf.mxu0 }
 0xa73   :  { %v5170_v9 = vmax.f32 %v5134_v6, 0.0  ;;  %v5135_v30 = vadd.f32 %v5073_v35, %v4831_v28  ;;  %v4537_v6 = vadd.f32 %v18813_v62, %v4233_v60  ;;  %v4538_v35 = vadd.f32 %v18814_v31, %v4234_v38 }
 0xa74   :  { %v5077_v15 = vpop.f32.mrf.mxu1  ;;  %v4803_v50 = vpop.f32.mrf.mxu0 }
 0xa75   :  { %v5196_v58 = vpack.c.bf16 %v5170_v9, %v5168_v27  ;;  %v5171_v14 = vmax.f32 %v5135_v30, 0.0  ;;  %v5136_v0 = vadd.f32 %v5077_v15, %v4832_v61  ;;  %v4840_v30 = vadd.f32 %v16920_v25, %v4536_v41  ;;  %v18815_v61 = vld [vmem:[#allocation121_spill] sm:$0xff] }
 0xa76   :  { %v5079_v54 = vpop.f32.mrf.mxu1  ;;  %v4539_v15 = vadd.f32 %v18815_v61, %v4235_v17 }
 0xa77   :  { %v5197_v40 = vpack.c.bf16 %v5171_v14, %v5169_v10  ;;  %v5137_v13 = vadd.f32 %v5079_v54, %v4833_v2  ;;  %v5172_v21 = vmax.f32 %v5136_v0, 0.0  ;;  %v4805_v14 = vpop.f32.mrf.mxu0  ;;  %v4841_v2 = vadd.f32 %v4795_v4, %v4537_v6 }
 0xa78   :  { %v5081_v26 = vpop.f32.mrf.mxu1  ;;  %v4843_v25 = vadd.f32 %v4799_v52, %v4539_v15  ;;  %v13950_v15 = vld [vmem:[#allocation23 + $0x34] ss:$12 sps:$4 sm:$0xff]  }
 0xa79   :  { %v5138_v16 = vadd.f32 %v5081_v26, %v4834_v33  ;;  %5405 = vmatprep.mubr.bf16.mxu0 %v5197_v40  ;;  %v5173_v59 = vmax.f32 %v5137_v13, 0.0  ;;  %v4842_v33 = vadd.f32 %v4797_v53, %v4538_v35  ;;  %v4238_v26 = vld [vmem:[%s18801_s22 + $0x110] sm:$0xff]  ;;  %v4807_v48 = vpop.f32.mrf.mxu0 }
 0xa7a   :  { %v5083_v63 = vpop.f32.mrf.mxu1  ;;  %5406 = vmatmul.mubr.bf16.gmra.mxu0 %v5196_v58 }
 0xa7b   :  { %v5174_v1 = vmax.f32 %v5138_v16, 0.0  ;;  %v5139_v51 = vadd.f32 %v5083_v63, %v4835_v24  ;;  %v4239_v63 = vld [vmem:[%s18801_s22 + $0x118] sm:$0xff]  ;;  %v4809_v52 = vpop.f32.mrf.mxu0 }
 0xa7c   :  { %v5087_v12 = vpop.f32.mrf.mxu1  ;;  %v4543_v3 = vadd.f32 %v18819_v18, %v4239_v63 }
 0xa7d   :  { %v5198_v46 = vpack.c.bf16 %v5174_v1, %v5172_v21  ;;  %v5175_v34 = vmax.f32 %v5139_v51, 0.0  ;;  %v5140_v39 = vadd.f32 %v5087_v12, %v4836_v57  ;;  %v18818_v1 = vld [vmem:[#allocation117_spill] sm:$0xff]  ;;  %v4844_v12 = vadd.f32 %v4803_v50, %v4540_v22  ;;  %v13959_v22 = vld [vmem:[#allocation23 + $0x8] ss:$12 sps:$4 sm:$0xff]  }
 0xa7e   :  { %v5089_v20 = vpop.f32.mrf.mxu1  ;;  %v4542_v4 = vadd.f32 %v18818_v1, %v4238_v26  ;;  %v4847_v42 = vadd.f32 %v4809_v52, %v4543_v3 }
 0xa7f   :  { %v5199_v36 = vpack.c.bf16 %v5175_v34, %v5173_v59  ;;  %v5141_v32 = vadd.f32 %v5089_v20, %v4837_v8  ;;  %v5176_v55 = vmax.f32 %v5140_v39, 0.0  ;;  %v4845_v8 = vadd.f32 %v4805_v14, %v4541_v5  ;;  %v13954_v14 = vld [vmem:[#allocation23 + $0x1c] ss:$12 sps:$4 sm:$0xff]  }
 0xa80   :  { %v5091_v43 = vpop.f32.mrf.mxu1 }
 0xa81   :  { %v5142_v28 = vadd.f32 %v5091_v43, %v4838_v11  ;;  %5413 = vmatprep.mubr.bf16.mxu0 %v5199_v36  ;;  %v5177_v23 = vmax.f32 %v5141_v32, 0.0  ;;  %v4846_v11 = vadd.f32 %v4807_v48, %v4542_v4 }
 0xa82   :  { %v5093_v45 = vpop.f32.mrf.mxu1  ;;  %5414 = vmatmul.mubr.bf16.gmra.mxu0 %v5198_v46 }
 0xa83   :  { %v5178_v27 = vmax.f32 %v5142_v28, 0.0  ;;  %v5143_v9 = vadd.f32 %v5093_v45, %v4839_v29 }
 0xa84   :  { %v5097_v56 = vpop.f32.mrf.mxu1 }
 0xa85   :  { %v5200_v10 = vpack.c.bf16 %v5178_v27, %v5176_v55  ;;  %v5179_v58 = vmax.f32 %v5143_v9, 0.0  ;;  %v5144_v0 = vadd.f32 %v5097_v56, %v4840_v30  ;;  %v13946_v55 = vld [vmem:[#allocation23 + $0x4c] ss:$12 sps:$4 sm:$0xff]   ;;  %v13944_v9 = vld [vmem:[#allocation23 + $0x48] ss:$12 sps:$4 sm:$0xff]   ;;  %v18820_v56 = vmov 0  }
 0xa86   :  { %v5099_v54 = vpop.f32.mrf.mxu1  ;;  %v13947_v30 = vld [vmem:[#allocation23 + $0x50] ss:$12 sps:$4 sm:$0xff]   ;;  %5828 = vmatprep.subr.bf16.mxu0 %v13946_v55 }
 0xa87   :  { %v5201_v40 = vpack.c.bf16 %v5179_v58, %v5177_v23  ;;  %v5145_v13 = vadd.f32 %v5099_v54, %v4841_v2  ;;  %v5180_v53 = vmax.f32 %v5144_v0, 0.0  ;;  %5829 = vmatpush1.bf16.msra.mxu0 %v13944_v9  ;;  %12990 = vmatpush3.bf16.msra.mxu1 %v13947_v30  ;;  %v13948_v23 = vld [vmem:[#allocation23 + $0x30] ss:$12 sps:$4 sm:$0xff]   ;;  %v13952_v2 = vld [vmem:[#allocation23 + $0x18] ss:$12 sps:$4 sm:$0xff]  }
 0xa88   :  { %v5101_v24 = vpop.f32.mrf.mxu1  ;;  %12991 = vmatprep.subr.bf16.mxu1 %v18791_v49  ;;  %5830 = vmatprep.subr.bf16.mxu0 %v13950_v15  ;;  %v13958_v0 = vld [vmem:[#allocation23 + $0x4] ss:$12 sps:$4 sm:$0xff]  }
 0xa89   :  { %v5146_v16 = vadd.f32 %v5101_v24, %v4842_v33  ;;  %5421 = vmatprep.mubr.bf16.mxu0 %v5201_v40  ;;  %v5181_v59 = vmax.f32 %v5145_v13, 0.0  ;;  %v13955_v33 = vld [vmem:[#allocation23 + $0x20] ss:$12 sps:$4 sm:$0xff]  }
 0xa8a   :  { %v5103_v21 = vpop.f32.mrf.mxu1  ;;  %5422 = vmatmul.mubr.bf16.gmra.mxu0 %v5200_v10  ;;  %v13951_v10 = vld [vmem:[#allocation23 + $0x38] ss:$12 sps:$4 sm:$0xff]  }
 0xa8b   :  { %v5182_v51 = vmax.f32 %v5146_v16, 0.0  ;;  %v5147_v57 = vadd.f32 %v5103_v21, %v4843_v25  ;;  %5831 = vmatpush1.bf16.msra.mxu0 %v13948_v23  ;;  %12992 = vmatpush3.bf16.msra.mxu1 %v13951_v10 }
 0xa8c   :  { %v5107_v19 = vpop.f32.mrf.mxu1  ;;  %12993 = vmatprep.subr.bf16.mxu1 %v18791_v49  ;;  %5832 = vmatprep.subr.bf16.mxu0 %v13954_v14 }
 0xa8d   :  { %v5202_v46 = vpack.c.bf16 %v5182_v51, %v5180_v53  ;;  %v5183_v34 = vmax.f32 %v5147_v57, 0.0  ;;  %v5148_v60 = vadd.f32 %v5107_v19, %v4844_v12 }
 0xa8e   :  { %v5109_v20 = vpop.f32.mrf.mxu1 }
 0xa8f   :  { %v5203_v39 = vpack.c.bf16 %v5183_v34, %v5181_v59  ;;  %v5149_v41 = vadd.f32 %v5109_v20, %v4845_v8  ;;  %v5184_v29 = vmax.f32 %v5148_v60, 0.0  ;;  %5833 = vmatpush1.bf16.msra.mxu0 %v13952_v2  ;;  %12994 = vmatpush3.bf16.msra.mxu1 %v13955_v33 }
 0xa90   :  { %v5111_v36 = vpop.f32.mrf.mxu1  ;;  %12995 = vmatprep.subr.bf16.mxu1 %v18791_v49  ;;  %5834 = vmatprep.subr.bf16.mxu0 %v13958_v0 }
 0xa91   :  { %v5150_v38 = vadd.f32 %v5111_v36, %v4846_v11  ;;  %5429 = vmatprep.mubr.bf16.mxu0 %v5203_v39  ;;  %v5185_v6 = vmax.f32 %v5149_v41, 0.0  ;;  %v16999_v39 = vld [vmem:[#allocation20] ss:$0 sm:$0xff] }
 0xa92   :  { %v5113_v43 = vpop.f32.mrf.mxu1  ;;  %5430 = vmatmul.mubr.bf16.gmra.mxu0 %v5202_v46 }
 0xa93   :  { %v5186_v32 = vmax.f32 %v5150_v38, 0.0  ;;  %v5151_v28 = vadd.f32 %v5113_v43, %v4847_v42  ;;  %5835 = vmatpush1.bf16.msra.mxu0 %v13956_v37  ;;  %12996 = vmatpush3.bf16.msra.mxu1 %v13959_v22 }
 0xa94   :  { %v16957_v62 = vpop.f32.mrf.mxu1  ;;  %6202 = vmatprep.subr.bf16.mxu0 %v18820_v56  ;;  %6461 = vmatprep.subr.bf16.mxu1 %v18820_v56 }
 0xa95   :  { %v5204_v17 = vpack.c.bf16 %v5186_v32, %v5184_v29  ;;  %v5187_v50 = vmax.f32 %v5151_v28, 0.0 }
 0xa96   :  { %v12947_v45 = vpop.f32.mrf.mxu1 }
 0xa97   :  { %v5205_v31 = vpack.c.bf16 %v5187_v50, %v5185_v6 }
 0xa98   :  { %v16959_v35 = vpop.f32.mrf.mxu1 }
 0xa99   :  { %5437 = vmatprep.mubr.bf16.mxu0 %v5205_v31 }
 0xa9a   :  { %5438 = vmatmul.mubr.bf16.gmra.mxu0 %v5204_v17  ;;  %v12948_v27 = vpop.f32.mrf.mxu1 }
 0xa9b   :  { %5852 = vmatprep.mubr.bf16.mxu0 %v18820_v56 }
 0xa9c   :  { %v16962_v61 = vpop.f32.mrf.mxu1 }
 0xa9e   :  { %v12951_v47 = vpop.f32.mrf.mxu1 }
 0xaa0   :  { %v16965_v58 = vpop.f32.mrf.mxu1 }
 0xaa2   :  { %v12952_v54 = vpop.f32.mrf.mxu1 }
 0xaa4   :  { %v16968_v7 = vpop.f32.mrf.mxu1 }
 0xaa6   :  { %v12955_v40 = vpop.f32.mrf.mxu1 }
 0xaa8   :  { %v16971_v26 = vpop.f32.mrf.mxu1 }
 0xaaa   :  { %v12956_v24 = vpop.f32.mrf.mxu1 }
 0xaac   :  { %v16975_v25 = vpop.f32.mrf.mxu1 }
 0xaae   :  { %v12959_v13 = vpop.f32.mrf.mxu1 }
 0xab0   :  { %v16977_v16 = vpop.f32.mrf.mxu1 }
 0xab2   :  { %v12960_v44 = vpop.f32.mrf.mxu1 }
 0xab4   :  { %v16979_v5 = vpop.f32.mrf.mxu1 }
 0xab6   :  { %v12963_v63 = vpop.f32.mrf.mxu1 }
 0xab8   :  { %v16981_v48 = vpop.f32.mrf.mxu1 }
 0xaba   :  { %v12964_v21 = vpop.f32.mrf.mxu1 }
 0xabc   :  { %v16983_v1 = vpop.f32.mrf.mxu1 }
 0xabe   :  { %v12967_v4 = vpop.f32.mrf.mxu1 }
 0xac0   :  { %v16985_v53 = vpop.f32.mrf.mxu1 }
 0xac2   :  { %v12968_v51 = vpop.f32.mrf.mxu1 }
 0xac4   :  { %v16987_v57 = vpop.f32.mrf.mxu1 }
 0xac6   :  { %v12971_v12 = vpop.f32.mrf.mxu1 }
 0xac8   :  { %v16989_v19 = vpop.f32.mrf.mxu1 }
 0xaca   :  { %v12972_v18 = vpop.f32.mrf.mxu1 }
 0xacc   :  { %v16991_v3 = vpop.f32.mrf.mxu1 }
 0xace   :  { %v12975_v59 = vpop.f32.mrf.mxu1 }
 0xad0   :  { %v16993_v46 = vpop.f32.mrf.mxu1 }
 0xad2   :  { %v12976_v34 = vpop.f32.mrf.mxu1 }
 0xad4   :  { %v16995_v52 = vpop.f32.mrf.mxu1 }
 0xad6   :  { %v12979_v20 = vpop.f32.mrf.mxu1 }
 0xad8   :  { %v16997_v8 = vpop.f32.mrf.mxu1 }
 0xada   :  { %v12980_v11 = vpop.f32.mrf.mxu1 }
 0xb1a   :  { %v12483_v60 = vpop.f32.mrf.mxu0 }
 0xb1c   :  { %v12484_v36 = vpop.f32.mrf.mxu0 }
 0xb1d   :  { %v12485_v42 = vadd.f32 %v12484_v36, %v12483_v60 }
 0xb1e   :  { %v12486_v41 = vpop.f32.mrf.mxu0 }
 0xb1f   :  { %v5376_v38 = vadd.f32 %v12485_v42, %v16999_v39 }
 0xb20   :  { %v12487_v43 = vpop.f32.mrf.mxu0 }
 0xb21   :  { %v12488_v29 = vadd.f32 %v12487_v43, %v12486_v41  ;;  %v5615_v28 = vadd.f32 %v16957_v62, %v5376_v38 }
 0xb22   :  { %v12489_v32 = vpop.f32.mrf.mxu0 }
 0xb23   :  { %v5379_v6 = vadd.f32 %v12488_v29, %v16999_v39  ;;  %v5633_v55 = vmax.f32 %v5615_v28, 0.0 }
 0xb24   :  { %v12490_v17 = vpop.f32.mrf.mxu0 }
 0xb25   :  { %v5616_v50 = vadd.f32 %v16959_v35, %v5379_v6  ;;  %v12491_v45 = vadd.f32 %v12490_v17, %v12489_v32 }
 0xb26   :  { %v12492_v31 = vpop.f32.mrf.mxu0 }
 0xb27   :  { %v5634_v27 = vmax.f32 %v5616_v50, 0.0  ;;  %v5384_v9 = vadd.f32 %v12491_v45, %v16999_v39 }
 0xb28   :  { %v12493_v30 = vpop.f32.mrf.mxu0 }
 0xb29   :  { %v17006_v15 = vpack.c.bf16 %v5634_v27, %v5633_v55  ;;  %v12494_v47 = vadd.f32 %v12493_v30, %v12492_v31  ;;  %v5617_v10 = vadd.f32 %v16962_v61, %v5384_v9 }
 0xb2a   :  { %v12495_v23 = vpop.f32.mrf.mxu0 }
 0xb2b   :  { %v5387_v62 = vadd.f32 %v12494_v47, %v16999_v39  ;;  %5853 = vmatmul.mubr.bf16.vlgmr.msra.gmra.mxu0 %v17006_v15  ;;  %12998 = vmatmul.mubr.bf16.vlgmr.msra.gmra.mxu1 %v17006_v15  ;;  %v5635_v33 = vmax.f32 %v5617_v10, 0.0 }
 0xb2c   :  { %v12496_v35 = vpop.f32.mrf.mxu0  ;;  %5862 = vmatprep.mubr.bf16.mxu0 %v18820_v56  ;;  %13001 = vmatprep.mubr.msk.bf16.mxu1 %vm15303_vm0, %v18791_v49 }
 0xb2d   :  { %v5618_v14 = vadd.f32 %v16965_v58, %v5387_v62  ;;  %v12497_v54 = vadd.f32 %v12496_v35, %v12495_v23 }
 0xb2e   :  { %v12498_v2 = vpop.f32.mrf.mxu0 }
 0xb2f   :  { %v5636_v0 = vmax.f32 %v5618_v14, 0.0  ;;  %v5392_v61 = vadd.f32 %v12497_v54, %v16999_v39 }
 0xb30   :  { %v12499_v40 = vpop.f32.mrf.mxu0 }
 0xb31   :  { %v12500_v37 = vadd.f32 %v12499_v40, %v12498_v2  ;;  %v17017_v22 = vpack.c.bf16 %v5636_v0, %v5635_v33  ;;  %v5619_v13 = vadd.f32 %v16968_v7, %v5392_v61 }
 0xb32   :  { %v12501_v24 = vpop.f32.mrf.mxu0 }
 0xb33   :  { %v5395_v44 = vadd.f32 %v12500_v37, %v16999_v39  ;;  %5863 = vmatmul.mubr.bf16.gmra.mxu0 %v17017_v22  ;;  %13002 = vmatmul.mubr.bf16.gmra.mxu1 %v17017_v22  ;;  %v5637_v51 = vmax.f32 %v5619_v13, 0.0 }
 0xb34   :  { %v12502_v58 = vpop.f32.mrf.mxu0  ;;  %5872 = vmatprep.mubr.bf16.mxu0 %v18820_v56  ;;  %13005 = vmatprep.mubr.msk.bf16.mxu1 %vm15303_vm0, %v18791_v49 }
 0xb35   :  { %v5620_v63 = vadd.f32 %v16971_v26, %v5395_v44  ;;  %v12503_v21 = vadd.f32 %v12502_v58, %v12501_v24 }
 0xb36   :  { %v12504_v4 = vpop.f32.mrf.mxu0 }
 0xb37   :  { %v5638_v12 = vmax.f32 %v5620_v63, 0.0  ;;  %v5400_v7 = vadd.f32 %v12503_v21, %v16999_v39 }
 0xb38   :  { %v12505_v18 = vpop.f32.mrf.mxu0 }
 0xb39   :  { %v12506_v59 = vadd.f32 %v12505_v18, %v12504_v4  ;;  %v17028_v34 = vpack.c.bf16 %v5638_v12, %v5637_v51  ;;  %v5621_v11 = vadd.f32 %v16975_v25, %v5400_v7 }
 0xb3a   :  { %v12507_v20 = vpop.f32.mrf.mxu0 }
 0xb3b   :  { %v5403_v60 = vadd.f32 %v12506_v59, %v16999_v39  ;;  %5873 = vmatmul.mubr.bf16.gmra.mxu0 %v17028_v34  ;;  %13006 = vmatmul.mubr.bf16.gmra.mxu1 %v17028_v34  ;;  %v5639_v38 = vmax.f32 %v5621_v11, 0.0 }
 0xb3c   :  { %v12508_v26 = vpop.f32.mrf.mxu0  ;;  %5882 = vmatprep.mubr.bf16.mxu0 %v18820_v56  ;;  %13009 = vmatprep.mubr.msk.bf16.mxu1 %vm15303_vm0, %v18791_v49 }
 0xb3d   :  { %v5622_v36 = vadd.f32 %v16977_v16, %v5403_v60  ;;  %v12509_v42 = vadd.f32 %v12508_v26, %v12507_v20 }
 0xb3e   :  { %v12510_v41 = vpop.f32.mrf.mxu0 }
 0xb3f   :  { %v5640_v43 = vmax.f32 %v5622_v36, 0.0  ;;  %v5408_v25 = vadd.f32 %v12509_v42, %v16999_v39 }
 0xb40   :  { %v12511_v29 = vpop.f32.mrf.mxu0 }
 0xb41   :  { %v12512_v32 = vadd.f32 %v12511_v29, %v12510_v41  ;;  %v17039_v28 = vpack.c.bf16 %v5640_v43, %v5639_v38  ;;  %v5623_v17 = vadd.f32 %v16979_v5, %v5408_v25 }
 0xb42   :  { %v12513_v6 = vpop.f32.mrf.mxu0 }
 0xb43   :  { %v5411_v50 = vadd.f32 %v12512_v32, %v16999_v39  ;;  %5883 = vmatmul.mubr.bf16.gmra.mxu0 %v17039_v28  ;;  %13010 = vmatmul.mubr.bf16.gmra.mxu1 %v17039_v28  ;;  %v5641_v27 = vmax.f32 %v5623_v17, 0.0 }
 0xb44   :  { %v12514_v16 = vpop.f32.mrf.mxu0  ;;  %5892 = vmatprep.mubr.bf16.mxu0 %v18820_v56  ;;  %13013 = vmatprep.mubr.msk.bf16.mxu1 %vm15303_vm0, %v18791_v49 }
 0xb45   :  { %v5624_v45 = vadd.f32 %v16981_v48, %v5411_v50  ;;  %v12515_v31 = vadd.f32 %v12514_v16, %v12513_v6 }
 0xb46   :  { %v12516_v55 = vpop.f32.mrf.mxu0 }
 0xb47   :  { %v5642_v9 = vmax.f32 %v5624_v45, 0.0  ;;  %v5416_v5 = vadd.f32 %v12515_v31, %v16999_v39 }
 0xb48   :  { %v12517_v30 = vpop.f32.mrf.mxu0 }
 0xb49   :  { %v12518_v47 = vadd.f32 %v12517_v30, %v12516_v55  ;;  %v17050_v23 = vpack.c.bf16 %v5642_v9, %v5641_v27  ;;  %v5625_v62 = vadd.f32 %v16983_v1, %v5416_v5 }
 0xb4a   :  { %v12519_v10 = vpop.f32.mrf.mxu0 }
 0xb4b   :  { %v5419_v35 = vadd.f32 %v12518_v47, %v16999_v39  ;;  %5893 = vmatmul.mubr.bf16.gmra.mxu0 %v17050_v23  ;;  %13014 = vmatmul.mubr.bf16.gmra.mxu1 %v17050_v23  ;;  %v5643_v33 = vmax.f32 %v5625_v62, 0.0 }
 0xb4c   :  { %v12520_v48 = vpop.f32.mrf.mxu0  ;;  %5902 = vmatprep.mubr.bf16.mxu0 %v18820_v56  ;;  %13017 = vmatprep.mubr.msk.bf16.mxu1 %vm15303_vm0, %v18791_v49 }
 0xb4d   :  { %v5626_v14 = vadd.f32 %v16985_v53, %v5419_v35  ;;  %v12521_v54 = vadd.f32 %v12520_v48, %v12519_v10 }
 0xb4e   :  { %v12522_v2 = vpop.f32.mrf.mxu0 }
 0xb4f   :  { %v5644_v0 = vmax.f32 %v5626_v14, 0.0  ;;  %v5424_v1 = vadd.f32 %v12521_v54, %v16999_v39 }
 0xb50   :  { %v12523_v61 = vpop.f32.mrf.mxu0 }
 0xb51   :  { %v12524_v40 = vadd.f32 %v12523_v61, %v12522_v2  ;;  %v17061_v37 = vpack.c.bf16 %v5644_v0, %v5643_v33  ;;  %v5627_v13 = vadd.f32 %v16987_v57, %v5424_v1 }
 0xb52   :  { %v12525_v24 = vpop.f32.mrf.mxu0 }
 0xb53   :  { %v5427_v44 = vadd.f32 %v12524_v40, %v16999_v39  ;;  %5903 = vmatmul.mubr.bf16.gmra.mxu0 %v17061_v37  ;;  %13018 = vmatmul.mubr.bf16.gmra.mxu1 %v17061_v37  ;;  %v5645_v4 = vmax.f32 %v5627_v13, 0.0 }
 0xb54   :  { %v12526_v53 = vpop.f32.mrf.mxu0  ;;  %5912 = vmatprep.mubr.bf16.mxu0 %v18820_v56  ;;  %13021 = vmatprep.mubr.msk.bf16.mxu1 %vm15303_vm0, %v18791_v49 }
 0xb55   :  { %v5628_v58 = vadd.f32 %v16989_v19, %v5427_v44  ;;  %v12527_v63 = vadd.f32 %v12526_v53, %v12525_v24 }
 0xb56   :  { %v12528_v21 = vpop.f32.mrf.mxu0 }
 0xb57   :  { %v5646_v51 = vmax.f32 %v5628_v58, 0.0  ;;  %v5432_v57 = vadd.f32 %v12527_v63, %v16999_v39 }
 0xb58   :  { %v12529_v12 = vpop.f32.mrf.mxu0 }
 0xb59   :  { %v12530_v7 = vadd.f32 %v12529_v12, %v12528_v21  ;;  %v17072_v18 = vpack.c.bf16 %v5646_v51, %v5645_v4  ;;  %v5629_v20 = vadd.f32 %v16991_v3, %v5432_v57 }
 0xb5a   :  { %v12531_v59 = vpop.f32.mrf.mxu0 }
 0xb5b   :  { %18821 = vst [vmem:[#allocation118_spill] sm:$0xff] %v17072_v18  ;;  %v5435_v11 = vadd.f32 %v12530_v7, %v16999_v39  ;;  %5913 = vmatmul.mubr.bf16.gmra.mxu0 %v17072_v18  ;;  %13022 = vmatmul.mubr.bf16.gmra.mxu1 %v17072_v18  ;;  %v5647_v42 = vmax.f32 %v5629_v20, 0.0 }
 0xb5c   :  { %v12532_v19 = vpop.f32.mrf.mxu0  ;;  %5922 = vmatprep.mubr.bf16.mxu0 %v18820_v56  ;;  %13025 = vmatprep.mubr.msk.bf16.mxu1 %vm15303_vm0, %v18791_v49 }
 0xb5d   :  { %v5630_v60 = vadd.f32 %v16993_v46, %v5435_v11  ;;  %v12533_v26 = vadd.f32 %v12532_v19, %v12531_v59 }
 0xb5e   :  { %v12534_v36 = vpop.f32.mrf.mxu0 }
 0xb5f   :  { %v5648_v41 = vmax.f32 %v5630_v60, 0.0  ;;  %v5440_v3 = vadd.f32 %v12533_v26, %v16999_v39 }
 0xb60   :  { %v12535_v38 = vpop.f32.mrf.mxu0 }
 0xb61   :  { %v12536_v43 = vadd.f32 %v12535_v38, %v12534_v36  ;;  %v17083_v25 = vpack.c.bf16 %v5648_v41, %v5647_v42  ;;  %v5631_v29 = vadd.f32 %v16995_v52, %v5440_v3  ;;  %v13962_v52 = vld [vmem:[#allocation2 + $0x514] ss:$8 sps:$4 sm:$0xff]  }
 0xb63   :  { %18822 = vst [vmem:[#allocation115_spill] sm:$0xff] %v17083_v25  ;;  %v5443_v32 = vadd.f32 %v12536_v43, %v16999_v39  ;;  %5923 = vmatmul.mubr.bf16.gmra.mxu0 %v17083_v25  ;;  %13026 = vmatmul.mubr.bf16.gmra.mxu1 %v17083_v25  ;;  %v5649_v6 = vmax.f32 %v5631_v29, 0.0  ;;  %v13965_v39 = vld [vmem:[#allocation2 + $0x5a4] ss:$8 sps:$4 sm:$0xff]  }
 0xb64   :  { %5932 = vmatprep.mubr.bf16.mxu0 %v18820_v56  ;;  %13029 = vmatprep.mubr.msk.bf16.mxu1 %vm15303_vm0, %v18791_v49 }
 0xb65   :  { %v5632_v46 = vadd.f32 %v16997_v8, %v5443_v32 }
 0xb67   :  { %v5650_v17 = vmax.f32 %v5632_v46, 0.0 }
 0xb69   :  { %v17093_v50 = vpack.c.bf16 %v5650_v17, %v5649_v6 }
 0xb6b   :  { %18823 = vst [vmem:[#allocation107_spill] sm:$0xff] %v17093_v50  ;;  %5933 = vmatmul.mubr.bf16.gmra.mxu0 %v17093_v50  ;;  %13030 = vmatmul.mubr.bf16.gmra.mxu1 %v17093_v50 }
 0xb6c   :  { %12038 = vmatprep.mubr.msk.bf16.mxu0 %vm1199_vm2, %v13962_v52  ;;  %12065 = vmatprep.mubr.msk.bf16.mxu1 %vm1199_vm2, %v13965_v39 }
 0xbeb   :  { %v17099_v16 = vpop.f32.mrf.mxu0  ;;  %v17101_v45 = vpop.f32.mrf.mxu1 }
 0xbed   :  { %v17103_v31 = vpop.f32.mrf.mxu0  ;;  %v12999_v8 = vpop.f32.mrf.mxu1 }
 0xbef   :  { %v17105_v55 = vpop.f32.mrf.mxu0  ;;  %v17107_v27 = vpop.f32.mrf.mxu1 }
 0xbf1   :  { %v17113_v30 = vpop.f32.mrf.mxu0  ;;  %v13000_v47 = vpop.f32.mrf.mxu1 }
 0xbf3   :  { %v17115_v10 = vpop.f32.mrf.mxu0  ;;  %v17117_v62 = vpop.f32.mrf.mxu1 }
 0xbf5   :  { %v17119_v35 = vpop.f32.mrf.mxu0  ;;  %v13003_v48 = vpop.f32.mrf.mxu1 }
 0xbf7   :  { %v17121_v14 = vpop.f32.mrf.mxu0  ;;  %v17123_v54 = vpop.f32.mrf.mxu1 }
 0xbf9   :  { %v17129_v0 = vpop.f32.mrf.mxu0  ;;  %v13004_v1 = vpop.f32.mrf.mxu1 }
 0xbfb   :  { %v17131_v61 = vpop.f32.mrf.mxu0  ;;  %v17133_v40 = vpop.f32.mrf.mxu1 }
 0xbfd   :  { %v17135_v24 = vpop.f32.mrf.mxu0  ;;  %v13007_v13 = vpop.f32.mrf.mxu1 }
 0xbff   :  { %v17137_v44 = vpop.f32.mrf.mxu0  ;;  %v17139_v53 = vpop.f32.mrf.mxu1 }
 0xc01   :  { %v17143_v63 = vpop.f32.mrf.mxu0  ;;  %v13008_v21 = vpop.f32.mrf.mxu1 }
 0xc03   :  { %v17145_v4 = vpop.f32.mrf.mxu0  ;;  %v17147_v51 = vpop.f32.mrf.mxu1 }
 0xc05   :  { %v17149_v57 = vpop.f32.mrf.mxu0  ;;  %v13011_v12 = vpop.f32.mrf.mxu1 }
 0xc07   :  { %v17151_v7 = vpop.f32.mrf.mxu0  ;;  %v17153_v59 = vpop.f32.mrf.mxu1 }
 0xc09   :  { %v17157_v11 = vpop.f32.mrf.mxu0  ;;  %v13012_v19 = vpop.f32.mrf.mxu1 }
 0xc0b   :  { %v5894_v60 = vpop.f32.mrf.mxu0  ;;  %v17159_v26 = vpop.f32.mrf.mxu1 }
 0xc0d   :  { %v5896_v36 = vpop.f32.mrf.mxu0  ;;  %v13015_v42 = vpop.f32.mrf.mxu1 }
 0xc0f   :  { %v5898_v41 = vpop.f32.mrf.mxu0  ;;  %v17161_v3 = vpop.f32.mrf.mxu1 }
 0xc11   :  { %v5900_v43 = vpop.f32.mrf.mxu0  ;;  %v13016_v29 = vpop.f32.mrf.mxu1 }
 0xc13   :  { %v5904_v32 = vpop.f32.mrf.mxu0  ;;  %v17165_v46 = vpop.f32.mrf.mxu1 }
 0xc15   :  { %v5906_v6 = vpop.f32.mrf.mxu0  ;;  %v13019_v17 = vpop.f32.mrf.mxu1 }
 0xc17   :  { %v5908_v52 = vpop.f32.mrf.mxu0  ;;  %v17167_v39 = vpop.f32.mrf.mxu1 }
 0xc19   :  { %v5910_v8 = vpop.f32.mrf.mxu0  ;;  %v13020_v47 = vpop.f32.mrf.mxu1 }
 0xc1b   :  { %v5914_v48 = vpop.f32.mrf.mxu0  ;;  %v17169_v1 = vpop.f32.mrf.mxu1 }
 0xc1d   :  { %v5916_v13 = vpop.f32.mrf.mxu0  ;;  %v13023_v21 = vpop.f32.mrf.mxu1 }
 0xc1f   :  { %v5918_v12 = vpop.f32.mrf.mxu0  ;;  %v17171_v19 = vpop.f32.mrf.mxu1 }
 0xc20   :  { %v6072_v21 = vpack.c.bf16 %v5918_v12, %v5914_v48  ;;  %v13977_v48 = vld [vmem:[#allocation2 + $0x5c0] ss:$8 sps:$4 sm:$0xff]   ;;  %v13987_v12 = vld [vmem:[#allocation2 + $0x5e4] ss:$8 sps:$4 sm:$0xff]  }
 0xc21   :  { %v5920_v42 = vpop.f32.mrf.mxu0  ;;  %v13024_v29 = vpop.f32.mrf.mxu1 }
 0xc22   :  { %v6331_v18 = vpack.c.bf16 %v5920_v42, %v5916_v13  ;;  %v13983_v13 = vld [vmem:[#allocation2 + $0x5d0] ss:$8 sps:$4 sm:$0xff]   ;;  %v13992_v42 = vld [vmem:[#allocation2 + $0x560] ss:$8 sps:$4 sm:$0xff]  }
 0xc23   :  { %v5924_v5 = vpop.f32.mrf.mxu0  ;;  %v17173_v33 = vpop.f32.mrf.mxu1 }
 0xc25   :  { %v5926_v58 = vpop.f32.mrf.mxu0  ;;  %v13027_v17 = vpop.f32.mrf.mxu1 }
 0xc27   :  { %v5928_v20 = vpop.f32.mrf.mxu0  ;;  %v17175_v38 = vpop.f32.mrf.mxu1 }
 0xc28   :  { %v6073_v9 = vpack.c.bf16 %v5928_v20, %v5924_v5  ;;  %v6071_v5 = vpack.c.bf16 %v5908_v52, %v5904_v32  ;;  %v6069_v20 = vpack.c.bf16 %v17151_v7, %v17145_v4  ;;  %v18824_v7 = vpack.c.bf16 %v17121_v14, %v17115_v10  ;;  %v13960_v10 = vld [vmem:[#allocation2 + $0x510] ss:$8 sps:$4 sm:$0xff]  }
 0xc29   :  { %v5930_v47 = vpop.f32.mrf.mxu0  ;;  %v13028_v2 = vpop.f32.mrf.mxu1  ;;  %v18826_v52 = vpack.c.bf16 %v17161_v3, %v17159_v26  ;;  %v18828_v26 = vpack.c.bf16 %v17139_v53, %v17133_v40  ;;  %v13984_v3 = vld [vmem:[#allocation2 + $0x554] ss:$8 sps:$4 sm:$0xff]   ;;  %v18830_v40 = vpack.c.bf16 %v17107_v27, %v17101_v45  ;;  %v13990_v53 = vld [vmem:[#allocation2 + $0x564] ss:$8 sps:$4 sm:$0xff]   ;;  %v13998_v27 = vld [vmem:[#allocation2 + $0x570] ss:$8 sps:$4 sm:$0xff]  }
 0xc2a   :  { %v6332_v50 = vpack.c.bf16 %v5930_v47, %v5926_v58  ;;  %6203 = vmatpush1.bf16.msra.mxu0 %v6073_v9  ;;  %v6330_v9 = vpack.c.bf16 %v5910_v8, %v5906_v6  ;;  %v6070_v58 = vpack.c.bf16 %v5898_v41, %v5894_v60  ;;  %v6068_v60 = vpack.c.bf16 %v17137_v44, %v17131_v61  ;;  %v13972_v41 = vld [vmem:[#allocation2 + $0x534] ss:$8 sps:$4 sm:$0xff]   ;;  %v13974_v6 = vld [vmem:[#allocation2 + $0x530] ss:$8 sps:$4 sm:$0xff]   ;;  %v13978_v8 = vld [vmem:[#allocation2 + $0x544] ss:$8 sps:$4 sm:$0xff]  }
 0xc2b   :  { %v17177_v25 = vpop.f32.mrf.mxu1  ;;  %6204 = vmatprep.subr.bf16.mxu0 %v18820_v56  ;;  %v5934_v32 = vpop.f32.mrf.mxu0  ;;  %v18825_v44 = vpack.c.bf16 %v17105_v55, %v17099_v16  ;;  %v13969_v16 = vld [vmem:[#allocation2 + $0x5b4] ss:$8 sps:$4 sm:$0xff]   ;;  %v6590_v55 = vpack.c.bf16 %v17171_v19, %v17169_v1  ;;  %v13980_v1 = vld [vmem:[#allocation2 + $0x540] ss:$8 sps:$4 sm:$0xff]   ;;  %v13999_v45 = vld [vmem:[#allocation2 + $0x604] ss:$8 sps:$4 sm:$0xff]  }
 0xc2c   :  { %6462 = vmatpush1.bf16.msra.mxu1 %v6332_v50  ;;  %v6329_v50 = vpack.c.bf16 %v5900_v43, %v5896_v36  ;;  %v6327_v36 = vpack.c.bf16 %v17143_v63, %v17135_v24  ;;  %v6325_v24 = vpack.c.bf16 %v17113_v30, %v17103_v31  ;;  %v6591_v31 = vpack.c.bf16 %v17175_v38, %v17173_v33  ;;  %v13968_v30 = vld [vmem:[#allocation2 + $0x520] ss:$8 sps:$4 sm:$0xff]   ;;  %v13971_v33 = vld [vmem:[#allocation2 + $0x5b0] ss:$8 sps:$4 sm:$0xff]   ;;  %v13975_v43 = vld [vmem:[#allocation2 + $0x5c4] ss:$8 sps:$4 sm:$0xff]  }
 0xc2d   :  { %v13031_v29 = vpop.f32.mrf.mxu1  ;;  %6463 = vmatprep.subr.bf16.mxu1 %v18820_v56  ;;  %v5936_v4 = vpop.f32.mrf.mxu0  ;;  %v6589_v38 = vpack.c.bf16 %v17167_v39, %v17165_v46  ;;  %v13981_v46 = vld [vmem:[#allocation2 + $0x5d4] ss:$8 sps:$4 sm:$0xff]   ;;  %v18827_v39 = vpack.c.bf16 %v17153_v59, %v17147_v51  ;;  %v18829_v51 = vpack.c.bf16 %v17123_v54, %v17117_v62  ;;  %v13986_v59 = vld [vmem:[#allocation2 + $0x550] ss:$8 sps:$4 sm:$0xff]   ;;  %v13989_v19 = vld [vmem:[#allocation2 + $0x5e0] ss:$8 sps:$4 sm:$0xff]  }
 0xc2e   :  { %6205 = vmatpush1.bf16.msra.mxu0 %v6072_v21  ;;  %v13993_v54 = vld [vmem:[#allocation2 + $0x5f4] ss:$8 sps:$4 sm:$0xff]   ;;  %v13995_v21 = vld [vmem:[#allocation2 + $0x5f0] ss:$8 sps:$4 sm:$0xff]   ;;  %v14001_v29 = vld [vmem:[#allocation2 + $0x600] ss:$8 sps:$4 sm:$0xff]  }
 0xc2f   :  { %v17181_v17 = vpop.f32.mrf.mxu1  ;;  %6206 = vmatprep.subr.bf16.mxu0 %v18820_v56  ;;  %v5938_v61 = vpop.f32.mrf.mxu0  ;;  %v13996_v47 = vld [vmem:[#allocation2 + $0x574] ss:$8 sps:$4 sm:$0xff]  }
 0xc30   :  { %6464 = vmatpush1.bf16.msra.mxu1 %v6331_v18  ;;  %v6328_v18 = vpack.c.bf16 %v17157_v11, %v17149_v57  ;;  %v6326_v57 = vpack.c.bf16 %v17129_v0, %v17119_v35  ;;  %v6074_v35 = vpack.c.bf16 %v5938_v61, %v5934_v32  ;;  %v13966_v0 = vld [vmem:[#allocation2 + $0x524] ss:$8 sps:$4 sm:$0xff]   ;;  %v13963_v11 = vld [vmem:[#allocation2 + $0x5a0] ss:$8 sps:$4 sm:$0xff]   ;;  %v6592_v62 = vpack.c.bf16 %v17181_v17, %v17177_v25  ;;  %v14005_v17 = vld [vmem:[#allocation2 + $0x614] ss:$8 sps:$4 sm:$0xff]  }
 0xc31   :  { %v13032_v2 = vpop.f32.mrf.mxu1  ;;  %6465 = vmatprep.subr.bf16.mxu1 %v18820_v56  ;;  %v5940_v63 = vpop.f32.mrf.mxu0  ;;  %v14002_v25 = vld [vmem:[#allocation2 + $0x584] ss:$8 sps:$4 sm:$0xff]   ;;  %v14014_v32 = vld [vmem:[#allocation2 + $0x630] ss:$8 sps:$4 sm:$0xff]   ;;  %v14025_v61 = vld [vmem:[#allocation2 + $0x660] ss:$8 sps:$4 sm:$0xff]  }
 0xc32   :  { %6207 = vmatpush1.bf16.msra.mxu0 %v6071_v5  ;;  %v6333_v14 = vpack.c.bf16 %v5940_v63, %v5936_v4  ;;  %v14004_v5 = vld [vmem:[#allocation2 + $0x580] ss:$8 sps:$4 sm:$0xff]   ;;  %v14008_v2 = vld [vmem:[#allocation2 + $0x594] ss:$8 sps:$4 sm:$0xff]   ;;  %v14029_v63 = vld [vmem:[#allocation2 + $0x684] ss:$8 sps:$4 sm:$0xff]  }
 0xc33   :  { %6208 = vmatprep.subr.bf16.mxu0 %v18820_v56  ;;  %v14020_v4 = vld [vmem:[#allocation2 + $0x654] ss:$8 sps:$4 sm:$0xff]  }
 0xc34   :  { %6466 = vmatpush1.bf16.msra.mxu1 %v6330_v9  ;;  %v14007_v9 = vld [vmem:[#allocation2 + $0x610] ss:$8 sps:$4 sm:$0xff]  }
 0xc35   :  { %6467 = vmatprep.subr.bf16.mxu1 %v18820_v56 }
 0xc36   :  { %6209 = vmatpush1.bf16.msra.mxu0 %v6070_v58  ;;  %v14011_v58 = vld [vmem:[#allocation2 + $0x624] ss:$8 sps:$4 sm:$0xff]  }
 0xc37   :  { %6210 = vmatprep.subr.bf16.mxu0 %v18820_v56 }
 0xc38   :  { %6468 = vmatpush1.bf16.msra.mxu1 %v6329_v50  ;;  %v14010_v50 = vld [vmem:[#allocation2 + $0x590] ss:$8 sps:$4 sm:$0xff]  }
 0xc39   :  { %6469 = vmatprep.subr.bf16.mxu1 %v18820_v56 }
 0xc3a   :  { %6211 = vmatpush1.bf16.msra.mxu0 %v6069_v20  ;;  %v14016_v20 = vld [vmem:[#allocation2 + $0x634] ss:$8 sps:$4 sm:$0xff]  }
 0xc3b   :  { %6212 = vmatprep.subr.bf16.mxu0 %v18820_v56 }
 0xc3c   :  { %6470 = vmatpush1.bf16.msra.mxu1 %v6328_v18  ;;  %v14013_v18 = vld [vmem:[#allocation2 + $0x620] ss:$8 sps:$4 sm:$0xff]  }
 0xc3d   :  { %6471 = vmatprep.subr.bf16.mxu1 %v18820_v56 }
 0xc3e   :  { %6213 = vmatpush1.bf16.msra.mxu0 %v6068_v60  ;;  %v14017_v60 = vld [vmem:[#allocation2 + $0x644] ss:$8 sps:$4 sm:$0xff]  }
 0xc3f   :  { %6214 = vmatprep.subr.bf16.mxu0 %v18820_v56 }
 0xc40   :  { %6472 = vmatpush1.bf16.msra.mxu1 %v6327_v36  ;;  %v14019_v36 = vld [vmem:[#allocation2 + $0x640] ss:$8 sps:$4 sm:$0xff]  }
 0xc41   :  { %6473 = vmatprep.subr.bf16.mxu1 %v18820_v56 }
 0xc42   :  { %6215 = vmatpush1.bf16.msra.mxu0 %v18824_v7  ;;  %v14023_v7 = vld [vmem:[#allocation2 + $0x664] ss:$8 sps:$4 sm:$0xff]  }
 0xc43   :  { %6216 = vmatprep.subr.bf16.mxu0 %v18820_v56 }
 0xc44   :  { %6474 = vmatpush1.bf16.msra.mxu1 %v6326_v57  ;;  %v14022_v57 = vld [vmem:[#allocation2 + $0x650] ss:$8 sps:$4 sm:$0xff]  }
 0xc45   :  { %6475 = vmatprep.subr.bf16.mxu1 %v18820_v56 }
 0xc46   :  { %6217 = vmatpush1.bf16.msra.mxu0 %v18825_v44  ;;  %v14028_v44 = vld [vmem:[#allocation2 + $0x670] ss:$8 sps:$4 sm:$0xff]  }
 0xc47   :  { %6232 = vmatprep.subr.bf16.mxu0 %v18820_v56 }
 0xc48   :  { %6476 = vmatpush1.bf16.msra.mxu1 %v6325_v24  ;;  %v14026_v24 = vld [vmem:[#allocation2 + $0x674] ss:$8 sps:$4 sm:$0xff]  }
 0xc49   :  { %6491 = vmatprep.subr.bf16.mxu1 %v18820_v56 }
 0xc4a   :  { %6233 = vmatpush2.bf16.msra.mxu0 %v6074_v35  ;;  %v14031_v35 = vld [vmem:[#allocation2 + $0x680] ss:$8 sps:$4 sm:$0xff]  }
 0xc4b   :  { %6720 = vmatprep.subr.bf16.mxu0 %v18820_v56 }
 0xc4c   :  { %6492 = vmatpush2.bf16.msra.mxu1 %v6333_v14  ;;  %v14041_v14 = vld [vmem:[#allocation22 + $0x38] sm:$0xff]  }
 0xc4d   :  { %6235 = vmatmul.mubr.bf16.vlgmr.msra.gmra.mxu0 %v13960_v10  ;;  %13033 = vmatprep.subr.bf16.mxu1 %v18791_v49  ;;  %v14032_v10 = vld [vmem:[#allocation2 + $0x694] ss:$8 sps:$4 sm:$0xff]  }
 0xc4e   :  { %6721 = vmatpush1.bf16.msra.mxu0 %v6591_v31  ;;  %12039 = vmatprep.mubr.msk.bf16.mxu0 %vm1199_vm2, %v13966_v0  ;;  %v14034_v0 = vld [vmem:[#allocation2 + $0x690] ss:$8 sps:$4 sm:$0xff]   ;;  %v14042_v31 = vld [vmem:[#allocation22 + $0x30] sm:$0xff]  }
 0xc4f   :  { %6494 = vmatmul.mubr.bf16.vlgmr.msra.gmra.mxu1 %v13963_v11  ;;  %6722 = vmatprep.subr.bf16.mxu0 %v18820_v56  ;;  %v14035_v11 = vld [vmem:[#allocation2 + $0x6a4] ss:$8 sps:$4 sm:$0xff]  }
 0xc50   :  { %12066 = vmatprep.mubr.msk.bf16.mxu1 %vm1199_vm2, %v13969_v16  ;;  %13034 = vmatpush3.bf16.msra.mxu1 %v14041_v14  ;;  %v14043_v16 = vld [vmem:[#allocation22 + $0x28] sm:$0xff]  }
 0xc51   :  { %13035 = vmatprep.subr.bf16.mxu1 %v18791_v49 }
 0xc52   :  { %6723 = vmatpush1.bf16.msra.mxu0 %v6590_v55  ;;  %v14037_v55 = vld [vmem:[#allocation2 + $0x6a0] ss:$8 sps:$4 sm:$0xff]  }
 0xc53   :  { %6724 = vmatprep.subr.bf16.mxu0 %v18820_v56 }
 0xc54   :  { %13036 = vmatpush3.bf16.msra.mxu1 %v14042_v31 }
 0xc55   :  { %6243 = vmatmul.mubr.bf16.gmra.mxu0 %v13968_v30  ;;  %13037 = vmatprep.subr.bf16.mxu1 %v18791_v49  ;;  %v14038_v30 = vld [vmem:[#allocation2 + $0x6b4] ss:$8 sps:$4 sm:$0xff]  }
 0xc56   :  { %6725 = vmatpush1.bf16.msra.mxu0 %v6589_v38  ;;  %12040 = vmatprep.mubr.msk.bf16.mxu0 %vm1199_vm2, %v13972_v41  ;;  %v14044_v41 = vld [vmem:[#allocation22 + $0x20] sm:$0xff]  }
 0xc57   :  { %6502 = vmatmul.mubr.bf16.gmra.mxu1 %v13971_v33  ;;  %6726 = vmatprep.subr.bf16.mxu0 %v18820_v56  ;;  %v14045_v33 = vld [vmem:[#allocation22 + $0x18] sm:$0xff]   ;;  %v14040_v38 = vld [vmem:[#allocation2 + $0x6b0] ss:$8 sps:$4 sm:$0xff]  }
 0xc58   :  { %12067 = vmatprep.mubr.msk.bf16.mxu1 %vm1199_vm2, %v13975_v43  ;;  %13038 = vmatpush3.bf16.msra.mxu1 %v14043_v16  ;;  %v14046_v43 = vld [vmem:[#allocation22 + $0x10] sm:$0xff]   ;;  %v14063_v16 = vld [vmem:[%s18831_s16 + $0xf4] ss:$24 sps:$4 sm:$0xff]  }
 0xc59   :  { %13039 = vmatprep.subr.bf16.mxu1 %v18791_v49 }
 0xc5a   :  { %6727 = vmatpush1.bf16.msra.mxu0 %v18826_v52  ;;  %v14048_v52 = vld [vmem:[#allocation22] sm:$0xff]  }
 0xc5b   :  { %6728 = vmatprep.subr.bf16.mxu0 %v18820_v56 }
 0xc5c   :  { %13040 = vmatpush3.bf16.msra.mxu1 %v14044_v41 }
 0xc5d   :  { %6251 = vmatmul.mubr.bf16.gmra.mxu0 %v13974_v6  ;;  %13041 = vmatprep.subr.bf16.mxu1 %v18791_v49  ;;  %v14047_v6 = vld [vmem:[#allocation22 + $0x8] sm:$0xff]  }
 0xc5e   :  { %6729 = vmatpush1.bf16.msra.mxu0 %v18827_v39  ;;  %12041 = vmatprep.mubr.msk.bf16.mxu0 %vm1199_vm2, %v13978_v8  ;;  %v6048_v8 = vld [vmem:[#allocation26] sm:$0xff] }
 0xc5f   :  { %6510 = vmatmul.mubr.bf16.gmra.mxu1 %v13977_v48  ;;  %6730 = vmatprep.subr.bf16.mxu0 %v18820_v56 }
 0xc60   :  { %12068 = vmatprep.mubr.msk.bf16.mxu1 %vm1199_vm2, %v13981_v46  ;;  %13042 = vmatpush3.bf16.msra.mxu1 %v14045_v33 }
 0xc61   :  { %13043 = vmatprep.subr.bf16.mxu1 %v18791_v49 }
 0xc62   :  { %6731 = vmatpush1.bf16.msra.mxu0 %v18828_v26  ;;  %v6049_v26 = vld [vmem:[#allocation26 + $0x8] sm:$0xff] }
 0xc63   :  { %6732 = vmatprep.subr.bf16.mxu0 %v18820_v56 }
 0xc64   :  { %13044 = vmatpush3.bf16.msra.mxu1 %v14046_v43  ;;  %v6055_v43 = vld [vmem:[#allocation26 + $0x38] sm:$0xff] }
 0xc65   :  { %6259 = vmatmul.mubr.bf16.gmra.mxu0 %v13980_v1  ;;  %13045 = vmatprep.subr.bf16.mxu1 %v18791_v49 }
 0xc66   :  { %6733 = vmatpush1.bf16.msra.mxu0 %v18829_v51  ;;  %12042 = vmatprep.mubr.msk.bf16.mxu0 %vm1199_vm2, %v13984_v3 }
 0xc67   :  { %6518 = vmatmul.mubr.bf16.gmra.mxu1 %v13983_v13  ;;  %6734 = vmatprep.subr.bf16.mxu0 %v18820_v56 }
 0xc68   :  { %12069 = vmatprep.mubr.msk.bf16.mxu1 %vm1199_vm2, %v13987_v12  ;;  %13046 = vmatpush3.bf16.msra.mxu1 %v14047_v6  ;;  %v14061_v6 = vld [vmem:[%s18831_s16 + $0xf0] ss:$24 sps:$4 sm:$0xff]  }
 0xc69   :  { %13047 = vmatprep.subr.bf16.mxu1 %v18791_v49 }
 0xc6a   :  { %6735 = vmatpush1.bf16.msra.mxu0 %v18830_v40 }
 0xc6b   :  { %6750 = vmatprep.subr.bf16.mxu0 %v18820_v56 }
 0xc6c   :  { %13048 = vmatpush3.bf16.msra.mxu1 %v14048_v52 }
 0xc6d   :  { %6267 = vmatmul.mubr.bf16.gmra.mxu0 %v13986_v59 }
 0xc6e   :  { %6751 = vmatpush2.bf16.msra.mxu0 %v6592_v62  ;;  %12043 = vmatprep.mubr.msk.bf16.mxu0 %vm1199_vm2, %v13990_v53  ;;  %v6050_v53 = vld [vmem:[#allocation26 + $0x10] sm:$0xff] }
 0xc6f   :  { %6526 = vmatmul.mubr.bf16.gmra.mxu1 %v13989_v19 }
 0xc70   :  { %12070 = vmatprep.mubr.msk.bf16.mxu1 %vm1199_vm2, %v13993_v54 }
 0xc75   :  { %6275 = vmatmul.mubr.bf16.gmra.mxu0 %v13992_v42 }
 0xc76   :  { %12044 = vmatprep.mubr.msk.bf16.mxu0 %vm1199_vm2, %v13996_v47 }
 0xc77   :  { %6534 = vmatmul.mubr.bf16.gmra.mxu1 %v13995_v21 }
 0xc78   :  { %12071 = vmatprep.mubr.msk.bf16.mxu1 %vm1199_vm2, %v13999_v45  ;;  %v6051_v45 = vld [vmem:[#allocation26 + $0x18] sm:$0xff] }
 0xc7d   :  { %6283 = vmatmul.mubr.bf16.gmra.mxu0 %v13998_v27 }
 0xc7e   :  { %12045 = vmatprep.mubr.msk.bf16.mxu0 %vm1199_vm2, %v14002_v25 }
 0xc7f   :  { %6542 = vmatmul.mubr.bf16.gmra.mxu1 %v14001_v29 }
 0xc80   :  { %12072 = vmatprep.mubr.msk.bf16.mxu1 %vm1199_vm2, %v14005_v17 }
 0xc85   :  { %6291 = vmatmul.mubr.bf16.gmra.mxu0 %v14004_v5 }
 0xc86   :  { %12046 = vmatprep.mubr.msk.bf16.mxu0 %vm1199_vm2, %v14008_v2 }
 0xc87   :  { %6550 = vmatmul.mubr.bf16.gmra.mxu1 %v14007_v9  ;;  %v6052_v9 = vld [vmem:[#allocation26 + $0x20] sm:$0xff] }
 0xc88   :  { %12073 = vmatprep.mubr.msk.bf16.mxu1 %vm1199_vm2, %v14011_v58 }
 0xc8d   :  { %6299 = vmatmul.mubr.bf16.gmra.mxu0 %v14010_v50 }
 0xc8e   :  { %12092 = vmatprep.mubr.msk.bf16.mxu0 %vm1199_vm2, %v14016_v20 }
 0xc8f   :  { %6558 = vmatmul.mubr.bf16.gmra.mxu1 %v14013_v18 }
 0xc90   :  { %13049 = vmatprep.mubr.msk.bf16.mxu1 %vm15303_vm0, %v18791_v49 }
 0xc95   :  { %6753 = vmatmul.mubr.bf16.vlgmr.msra.gmra.mxu0 %v14014_v32 }
 0xc96   :  { %12093 = vmatprep.mubr.msk.bf16.mxu0 %vm1199_vm2, %v14017_v60 }
 0xc9d   :  { %6761 = vmatmul.mubr.bf16.gmra.mxu0 %v14019_v36  ;;  %v6053_v36 = vld [vmem:[#allocation26 + $0x28] sm:$0xff] }
 0xc9e   :  { %12094 = vmatprep.mubr.msk.bf16.mxu0 %vm1199_vm2, %v14020_v4 }
 0xca5   :  { %6769 = vmatmul.mubr.bf16.gmra.mxu0 %v14022_v57  ;;  %v14049_v57 = vld [vmem:[%s18831_s16 + $0x150] ss:$24 sps:$4 sm:$0xff]  }
 0xca6   :  { %12095 = vmatprep.mubr.msk.bf16.mxu0 %vm1199_vm2, %v14023_v7  ;;  %v14051_v7 = vld [vmem:[%s18831_s16 + $0x154] ss:$24 sps:$4 sm:$0xff]  }
 0xca7   :  { %7397 = vmatprep.subr.bf16.mxu0 %v14051_v7 }
 0xca8   :  { %7398 = vmatpush1.bf16.msra.mxu0 %v14049_v57  ;;  %v6059_v57 = vld [vmem:[#allocation26 + $0x58] sm:$0xff] }
 0xcad   :  { %6777 = vmatmul.mubr.bf16.gmra.mxu0 %v14025_v61 }
 0xcae   :  { %12096 = vmatprep.mubr.msk.bf16.mxu0 %vm1199_vm2, %v14026_v24 }
 0xcb5   :  { %6785 = vmatmul.mubr.bf16.gmra.mxu0 %v14028_v44  ;;  %v14054_v44 = vld [vmem:[%s18831_s16 + $0x15c] ss:$24 sps:$4 sm:$0xff]  }
 0xcb6   :  { %12097 = vmatprep.mubr.msk.bf16.mxu0 %vm1199_vm2, %v14029_v63  ;;  %v14057_v63 = vld [vmem:[%s18831_s16 + $0x124] ss:$24 sps:$4 sm:$0xff]   ;;  %7520 = vmatprep.subr.bf16.mxu1 %v14054_v44 }
 0xcb7   :  { %7399 = vmatprep.subr.bf16.mxu0 %v14057_v63 }
 0xcbd   :  { %6793 = vmatmul.mubr.bf16.gmra.mxu0 %v14031_v35 }
 0xcbe   :  { %12098 = vmatprep.mubr.msk.bf16.mxu0 %vm1199_vm2, %v14032_v10 }
 0xcc5   :  { %6801 = vmatmul.mubr.bf16.gmra.mxu0 %v14034_v0  ;;  %v6054_v0 = vld [vmem:[#allocation26 + $0x30] sm:$0xff] }
 0xcc6   :  { %12099 = vmatprep.mubr.msk.bf16.mxu0 %vm1199_vm2, %v14035_v11  ;;  %v14055_v11 = vld [vmem:[%s18831_s16 + $0x120] ss:$24 sps:$4 sm:$0xff]  }
 0xcc7   :  { %7400 = vmatpush1.bf16.msra.mxu0 %v14055_v11 }
 0xcc8   :  { %7401 = vmatprep.subr.bf16.mxu0 %v14063_v16 }
 0xccb   :  { %7402 = vmatpush1.bf16.msra.mxu0 %v14061_v6 }
 0xccd   :  { %6809 = vmatmul.mubr.bf16.gmra.mxu0 %v14037_v55 }
 0xcce   :  { %12100 = vmatprep.mubr.msk.bf16.mxu0 %vm1199_vm2, %v14038_v30 }
 0xcd5   :  { %6817 = vmatmul.mubr.bf16.gmra.mxu0 %v14040_v38 }
 0xcd6   :  { %7429 = vmatprep.mubr.bf16.mxu0 %v18820_v56 }
 0xd0d   :  { %v6236_v48 = vpop.f32.mrf.mxu0 }
 0xd0e   :  { %v6307_v46 = vadd.f32 %v6236_v48, %v6048_v8  ;;  %v14069_v8 = vld [vmem:[%s18831_s16 + $0xc4] ss:$24 sps:$4 sm:$0xff]  }
 0xd0f   :  { %v6238_v39 = vpop.f32.mrf.mxu0  ;;  %v6495_v1 = vpop.f32.mrf.mxu1  ;;  %7403 = vmatprep.subr.bf16.mxu0 %v14069_v8 }
 0xd10   :  { %v17283_v3 = vadd.f32 %v6495_v1, %v6307_v46 }
 0xd11   :  { %v6239_v13 = vpop.f32.mrf.mxu0  ;;  %v6497_v12 = vpop.f32.mrf.mxu1 }
 0xd12   :  { %v6308_v51 = vadd.f32 %v6239_v13, %v6049_v26  ;;  %v6056_v13 = vld [vmem:[#allocation26 + $0x40] sm:$0xff]  ;;  %v14067_v12 = vld [vmem:[%s18831_s16 + $0xc0] ss:$24 sps:$4 sm:$0xff]  }
 0xd13   :  { %v6241_v59 = vpop.f32.mrf.mxu0  ;;  %v6498_v40 = vpop.f32.mrf.mxu1  ;;  %7404 = vmatpush1.bf16.msra.mxu0 %v14067_v12 }
 0xd14   :  { %v17285_v19 = vadd.f32 %v6498_v40, %v6308_v51  ;;  %v14075_v59 = vld [vmem:[%s18831_s16 + $0x94] ss:$24 sps:$4 sm:$0xff]  }
 0xd15   :  { %v6244_v62 = vpop.f32.mrf.mxu0  ;;  %v6500_v54 = vpop.f32.mrf.mxu1  ;;  %7405 = vmatprep.subr.bf16.mxu0 %v14075_v59 }
 0xd16   :  { %v6309_v42 = vadd.f32 %v6244_v62, %v6050_v53 }
 0xd17   :  { %v6246_v47 = vpop.f32.mrf.mxu0  ;;  %v6503_v21 = vpop.f32.mrf.mxu1 }
 0xd18   :  { %v17287_v27 = vadd.f32 %v6503_v21, %v6309_v42  ;;  %v6057_v47 = vld [vmem:[#allocation26 + $0x48] sm:$0xff]  ;;  %v14073_v21 = vld [vmem:[%s18831_s16 + $0x90] ss:$24 sps:$4 sm:$0xff]  }
 0xd19   :  { %v6247_v25 = vpop.f32.mrf.mxu0  ;;  %v6505_v29 = vpop.f32.mrf.mxu1  ;;  %7406 = vmatpush1.bf16.msra.mxu0 %v14073_v21 }
 0xd1a   :  { %v6310_v17 = vadd.f32 %v6247_v25, %v6051_v45 }
 0xd1b   :  { %v6249_v5 = vpop.f32.mrf.mxu0  ;;  %v6506_v2 = vpop.f32.mrf.mxu1 }
 0xd1c   :  { %v17289_v58 = vadd.f32 %v6506_v2, %v6310_v17 }
 0xd1d   :  { %v6252_v50 = vpop.f32.mrf.mxu0  ;;  %v6508_v20 = vpop.f32.mrf.mxu1 }
 0xd1e   :  { %v6311_v18 = vadd.f32 %v6252_v50, %v6052_v9  ;;  %v6058_v9 = vld [vmem:[#allocation26 + $0x50] sm:$0xff] }
 0xd1f   :  { %v6254_v32 = vpop.f32.mrf.mxu0  ;;  %v6511_v60 = vpop.f32.mrf.mxu1 }
 0xd20   :  { %v17291_v4 = vadd.f32 %v6511_v60, %v6311_v18 }
 0xd21   :  { %v6255_v61 = vpop.f32.mrf.mxu0  ;;  %v6513_v24 = vpop.f32.mrf.mxu1 }
 0xd22   :  { %v6312_v35 = vadd.f32 %v6255_v61, %v6053_v36 }
 0xd23   :  { %v6257_v10 = vpop.f32.mrf.mxu0  ;;  %v6514_v14 = vpop.f32.mrf.mxu1 }
 0xd24   :  { %v17298_v31 = vadd.f32 %v6514_v14, %v6312_v35  ;;  %v6060_v10 = vld [vmem:[#allocation26 + $0x60] sm:$0xff] }
 0xd25   :  { %v6260_v55 = vpop.f32.mrf.mxu0  ;;  %v6516_v30 = vpop.f32.mrf.mxu1 }
 0xd26   :  { %v6313_v41 = vadd.f32 %v6260_v55, %v6054_v0 }
 0xd27   :  { %v6262_v33 = vpop.f32.mrf.mxu0  ;;  %v6519_v38 = vpop.f32.mrf.mxu1 }
 0xd28   :  { %v17302_v52 = vadd.f32 %v6519_v38, %v6313_v41  ;;  %v6061_v41 = vld [vmem:[#allocation26 + $0x68] sm:$0xff] }
 0xd29   :  { %v6263_v48 = vpop.f32.mrf.mxu0  ;;  %v6521_v46 = vpop.f32.mrf.mxu1 }
 0xd2a   :  { %v6314_v39 = vadd.f32 %v6263_v48, %v6055_v43  ;;  %v6062_v46 = vld [vmem:[#allocation26 + $0x70] sm:$0xff] }
 0xd2b   :  { %v6265_v1 = vpop.f32.mrf.mxu0  ;;  %v6522_v26 = vpop.f32.mrf.mxu1 }
 0xd2c   :  { %v17306_v51 = vadd.f32 %v6522_v26, %v6314_v39 }
 0xd2d   :  { %v6268_v40 = vpop.f32.mrf.mxu0  ;;  %v6524_v53 = vpop.f32.mrf.mxu1 }
 0xd2e   :  { %v6315_v62 = vadd.f32 %v6268_v40, %v6056_v13  ;;  %v6063_v40 = vld [vmem:[#allocation26 + $0x78] sm:$0xff] }
 0xd2f   :  { %v6270_v54 = vpop.f32.mrf.mxu0  ;;  %v6527_v42 = vpop.f32.mrf.mxu1 }
 0xd30   :  { %v17310_v45 = vadd.f32 %v6527_v42, %v6315_v62 }
 0xd31   :  { %v6271_v25 = vpop.f32.mrf.mxu0  ;;  %v6529_v29 = vpop.f32.mrf.mxu1 }
 0xd32   :  { %v6316_v17 = vadd.f32 %v6271_v25, %v6057_v47  ;;  %v6064_v25 = vld [vmem:[#allocation26 + $0x80] sm:$0xff] }
 0xd33   :  { %v6273_v5 = vpop.f32.mrf.mxu0  ;;  %v6530_v2 = vpop.f32.mrf.mxu1 }
 0xd34   :  { %v17312_v50 = vadd.f32 %v6530_v2, %v6316_v17 }
 0xd35   :  { %v6276_v20 = vpop.f32.mrf.mxu0  ;;  %v6532_v18 = vpop.f32.mrf.mxu1 }
 0xd36   :  { %v6317_v32 = vadd.f32 %v6276_v20, %v6058_v9  ;;  %v6065_v18 = vld [vmem:[#allocation26 + $0x88] sm:$0xff] }
 0xd37   :  { %v6278_v60 = vpop.f32.mrf.mxu0  ;;  %v6535_v36 = vpop.f32.mrf.mxu1 }
 0xd38   :  { %v17314_v7 = vadd.f32 %v6535_v36, %v6317_v32 }
 0xd39   :  { %v6279_v61 = vpop.f32.mrf.mxu0  ;;  %v6537_v24 = vpop.f32.mrf.mxu1 }
 0xd3a   :  { %v6318_v44 = vadd.f32 %v6279_v61, %v6059_v57 }
 0xd3b   :  { %v6281_v63 = vpop.f32.mrf.mxu0  ;;  %v6538_v35 = vpop.f32.mrf.mxu1 }
 0xd3c   :  { %v17316_v14 = vadd.f32 %v6538_v35, %v6318_v44 }
 0xd3d   :  { %v6284_v0 = vpop.f32.mrf.mxu0  ;;  %v6540_v11 = vpop.f32.mrf.mxu1 }
 0xd3e   :  { %v6319_v16 = vadd.f32 %v6284_v0, %v6060_v10 }
 0xd3f   :  { %v6286_v55 = vpop.f32.mrf.mxu0  ;;  %v6543_v30 = vpop.f32.mrf.mxu1 }
 0xd40   :  { %v17318_v33 = vadd.f32 %v6543_v30, %v6319_v16 }
 0xd41   :  { %v6287_v38 = vpop.f32.mrf.mxu0  ;;  %v6545_v43 = vpop.f32.mrf.mxu1 }
 0xd42   :  { %v6320_v6 = vadd.f32 %v6287_v38, %v6061_v41  ;;  %v14052_v43 = vld [vmem:[%s18831_s16 + $0x158] ss:$24 sps:$4 sm:$0xff]  }
 0xd43   :  { %v6289_v8 = vpop.f32.mrf.mxu0  ;;  %v6546_v48 = vpop.f32.mrf.mxu1 }
 0xd44   :  { %v17320_v39 = vadd.f32 %v6546_v48, %v6320_v6  ;;  %v14060_v8 = vld [vmem:[%s18831_s16 + $0x12c] ss:$24 sps:$4 sm:$0xff]  }
 0xd45   :  { %v6292_v1 = vpop.f32.mrf.mxu0  ;;  %v6548_v26 = vpop.f32.mrf.mxu1 }
 0xd46   :  { %v6321_v13 = vadd.f32 %v6292_v1, %v6062_v46  ;;  %v14066_v26 = vld [vmem:[%s18831_s16 + $0xfc] ss:$24 sps:$4 sm:$0xff]  }
 0xd47   :  { %v6294_v12 = vpop.f32.mrf.mxu0  ;;  %v6551_v59 = vpop.f32.mrf.mxu1 }
 0xd48   :  { %v17322_v53 = vadd.f32 %v6551_v59, %v6321_v13 }
 0xd49   :  { %v6295_v62 = vpop.f32.mrf.mxu0  ;;  %v6553_v54 = vpop.f32.mrf.mxu1 }
 0xd4a   :  { %v6322_v42 = vadd.f32 %v6295_v62, %v6063_v40  ;;  %v14072_v54 = vld [vmem:[%s18831_s16 + $0xcc] ss:$24 sps:$4 sm:$0xff]  }
 0xd4b   :  { %v6297_v47 = vpop.f32.mrf.mxu0  ;;  %v6554_v21 = vpop.f32.mrf.mxu1 }
 0xd4c   :  { %v17324_v29 = vadd.f32 %v6554_v21, %v6322_v42 }
 0xd4d   :  { %v6300_v17 = vpop.f32.mrf.mxu0  ;;  %v6556_v5 = vpop.f32.mrf.mxu1 }
 0xd4e   :  { %v6323_v2 = vadd.f32 %v6300_v17, %v6064_v25  ;;  %v14078_v17 = vld [vmem:[%s18831_s16 + $0x9c] ss:$24 sps:$4 sm:$0xff]  }
 0xd4f   :  { %v6302_v9 = vpop.f32.mrf.mxu0  ;;  %v6559_v20 = vpop.f32.mrf.mxu1 }
 0xd50   :  { %v17326_v32 = vadd.f32 %v6559_v20, %v6323_v2 }
 0xd51   :  { %v6303_v60 = vpop.f32.mrf.mxu0  ;;  %v6561_v36 = vpop.f32.mrf.mxu1 }
 0xd52   :  { %v6324_v57 = vadd.f32 %v6303_v60, %v6065_v18  ;;  %v14076_v18 = vld [vmem:[%s18831_s16 + $0x98] ss:$24 sps:$4 sm:$0xff]  }
 0xd53   :  { %v6305_v61 = vpop.f32.mrf.mxu0  ;;  %v6562_v24 = vpop.f32.mrf.mxu1 }
 0xd54   :  { %v17328_v44 = vadd.f32 %v6562_v24, %v6324_v57 }
 0xd55   :  { %v6754_v63 = vpop.f32.mrf.mxu0  ;;  %v6564_v35 = vpop.f32.mrf.mxu1 }
 0xd56   :  { %v6825_v0 = vadd.f32 %v6754_v63, %v17283_v3  ;;  %v14058_v3 = vld [vmem:[%s18831_s16 + $0x128] ss:$24 sps:$4 sm:$0xff]  }
 0xd57   :  { %v6756_v10 = vpop.f32.mrf.mxu0 }
 0xd58   :  { %v6843_v30 = vmax.f32 %v6825_v0, 0.0 }
 0xd59   :  { %v6757_v11 = vpop.f32.mrf.mxu0 }
 0xd5a   :  { %v6826_v16 = vadd.f32 %v6757_v11, %v17285_v19 }
 0xd5b   :  { %v6759_v55 = vpop.f32.mrf.mxu0 }
 0xd5c   :  { %v6844_v41 = vmax.f32 %v6826_v16, 0.0 }
 0xd5d   :  { %v6762_v38 = vpop.f32.mrf.mxu0 }
 0xd5e   :  { %v6861_v6 = vpack.c.bf16 %v6844_v41, %v6843_v30  ;;  %v6827_v46 = vadd.f32 %v6762_v38, %v17287_v27  ;;  %v14064_v27 = vld [vmem:[%s18831_s16 + $0xf8] ss:$24 sps:$4 sm:$0xff]  }
 0xd5f   :  { %v6764_v48 = vpop.f32.mrf.mxu0 }
 0xd60   :  { %13050 = vmatmul.mubr.bf16.vlgmr.msra.gmra.mxu1 %v6861_v6  ;;  %v6845_v12 = vmax.f32 %v6827_v46, 0.0 }
 0xd61   :  { %v6765_v1 = vpop.f32.mrf.mxu0  ;;  %13053 = vmatprep.mubr.msk.bf16.mxu1 %vm15303_vm0, %v18791_v49  ;;  %7521 = vmatpush1.bf16.msra.mxu1 %v14052_v43 }
 0xd62   :  { %v6828_v19 = vadd.f32 %v6765_v1, %v17289_v58  ;;  %7522 = vmatprep.subr.bf16.mxu1 %v14060_v8  ;;  %v14070_v58 = vld [vmem:[%s18831_s16 + $0xc8] ss:$24 sps:$4 sm:$0xff]  }
 0xd63   :  { %v6767_v13 = vpop.f32.mrf.mxu0 }
 0xd64   :  { %v6846_v59 = vmax.f32 %v6828_v19, 0.0 }
 0xd65   :  { %v6770_v40 = vpop.f32.mrf.mxu0  ;;  %7523 = vmatpush1.bf16.msra.mxu1 %v14058_v3 }
 0xd66   :  { %v6862_v62 = vpack.c.bf16 %v6846_v59, %v6845_v12  ;;  %7524 = vmatprep.subr.bf16.mxu1 %v14066_v26  ;;  %v6829_v47 = vadd.f32 %v6770_v40, %v17291_v4 }
 0xd67   :  { %v6772_v42 = vpop.f32.mrf.mxu0 }
 0xd68   :  { %13054 = vmatmul.mubr.bf16.gmra.mxu1 %v6862_v62  ;;  %v6847_v2 = vmax.f32 %v6829_v47, 0.0 }
 0xd69   :  { %v6773_v21 = vpop.f32.mrf.mxu0  ;;  %13057 = vmatprep.mubr.msk.bf16.mxu1 %vm15303_vm0, %v18791_v49  ;;  %7525 = vmatpush1.bf16.msra.mxu1 %v14064_v27 }
 0xd6a   :  { %v6830_v25 = vadd.f32 %v6773_v21, %v17298_v31  ;;  %7526 = vmatprep.subr.bf16.mxu1 %v14072_v54 }
 0xd6b   :  { %v6775_v5 = vpop.f32.mrf.mxu0 }
 0xd6c   :  { %v6848_v9 = vmax.f32 %v6830_v25, 0.0 }
 0xd6d   :  { %v6778_v20 = vpop.f32.mrf.mxu0  ;;  %7527 = vmatpush1.bf16.msra.mxu1 %v14070_v58 }
 0xd6e   :  { %v6863_v60 = vpack.c.bf16 %v6848_v9, %v6847_v2  ;;  %7528 = vmatprep.subr.bf16.mxu1 %v14078_v17  ;;  %v6831_v36 = vadd.f32 %v6778_v20, %v17302_v52 }
 0xd6f   :  { %v6780_v4 = vpop.f32.mrf.mxu0 }
 0xd70   :  { %13058 = vmatmul.mubr.bf16.gmra.mxu1 %v6863_v60  ;;  %v6849_v24 = vmax.f32 %v6831_v36, 0.0  ;;  %v14081_v60 = vld [vmem:[%s18831_s16 + $0x64] ss:$24 sps:$4 sm:$0xff]   ;;  %v14082_v36 = vld [vmem:[%s18831_s16 + $0x68] ss:$24 sps:$4 sm:$0xff]  }
 0xd71   :  { %v6781_v57 = vpop.f32.mrf.mxu0  ;;  %13061 = vmatprep.mubr.msk.bf16.mxu1 %vm15303_vm0, %v18791_v49  ;;  %7529 = vmatpush1.bf16.msra.mxu1 %v14076_v18  ;;  %v14084_v4 = vld [vmem:[%s18831_s16 + $0x6c] ss:$24 sps:$4 sm:$0xff]  }
 0xd72   :  { %v6832_v31 = vadd.f32 %v6781_v57, %v17306_v51  ;;  %7407 = vmatprep.subr.bf16.mxu0 %v14081_v60  ;;  %7530 = vmatprep.subr.bf16.mxu1 %v14084_v4  ;;  %v14090_v57 = vld [vmem:[%s18831_s16 + $0x3c] ss:$24 sps:$4 sm:$0xff]  }
 0xd73   :  { %v6783_v61 = vpop.f32.mrf.mxu0  ;;  %v14111_v60 = vld [vmem:[%s18831_s16 + $0xa4] ss:$24 sps:$4 sm:$0xff]  }
 0xd74   :  { %v6850_v63 = vmax.f32 %v6832_v31, 0.0  ;;  %v14085_v31 = vld [vmem:[%s18831_s16 + $0x30] ss:$24 sps:$4 sm:$0xff]  }
 0xd75   :  { %v6786_v35 = vpop.f32.mrf.mxu0  ;;  %7531 = vmatpush1.bf16.msra.mxu1 %v14082_v36  ;;  %v14088_v61 = vld [vmem:[%s18831_s16 + $0x38] ss:$24 sps:$4 sm:$0xff]  }
 0xd76   :  { %v6864_v10 = vpack.c.bf16 %v6850_v63, %v6849_v24  ;;  %v6833_v11 = vadd.f32 %v6786_v35, %v17310_v45  ;;  %7532 = vmatprep.subr.bf16.mxu1 %v14090_v57  ;;  %v14093_v24 = vld [vmem:[%s18831_s16 + $0x4] ss:$24 sps:$4 sm:$0xff]   ;;  %v14091_v35 = vld [vmem:[%s18831_s16] ss:$24 sps:$4 sm:$0xff]   ;;  %v7052_v57 = vunpack.c.l.bf16 %v17039_v28 }
 0xd77   :  { %v6788_v0 = vpop.f32.mrf.mxu0  ;;  %v14096_v63 = vld [vmem:[%s18831_s16 + $0xc] ss:$24 sps:$4 sm:$0xff]  }
 0xd78   :  { %13062 = vmatmul.mubr.bf16.gmra.mxu1 %v6864_v10  ;;  %v6851_v30 = vmax.f32 %v6833_v11, 0.0  ;;  %v14094_v10 = vld [vmem:[%s18831_s16 + $0x8] ss:$24 sps:$4 sm:$0xff]   ;;  %v14099_v0 = vld [vmem:[%s18831_s16 + $0x164] ss:$24 sps:$4 sm:$0xff]  }
 0xd79   :  { %v6789_v16 = vpop.f32.mrf.mxu0  ;;  %13065 = vmatprep.mubr.msk.bf16.mxu1 %vm15303_vm0, %v18791_v49  ;;  %7533 = vmatpush1.bf16.msra.mxu1 %v14088_v61  ;;  %v17387_v11 = vld [vmem:[#allocation25] ss:$0 sm:$0xff] }
 0xd7a   :  { %v6834_v52 = vadd.f32 %v6789_v16, %v17312_v50  ;;  %7534 = vmatprep.subr.bf16.mxu1 %v14096_v63 }
 0xd7b   :  { %v6791_v55 = vpop.f32.mrf.mxu0 }
 0xd7c   :  { %v6852_v41 = vmax.f32 %v6834_v52, 0.0 }
 0xd7d   :  { %v6794_v38 = vpop.f32.mrf.mxu0  ;;  %7535 = vmatpush1.bf16.msra.mxu1 %v14094_v10  ;;  %v7053_v10 = vunpack.c.h.bf16 %v17039_v28 }
 0xd7e   :  { %v6865_v51 = vpack.c.bf16 %v6852_v41, %v6851_v30  ;;  %v6835_v6 = vadd.f32 %v6794_v38, %v17314_v7  ;;  %v7046_v30 = vunpack.c.l.bf16 %v17006_v15 }
 0xd7f   :  { %v6796_v43 = vpop.f32.mrf.mxu0 }
 0xd80   :  { %13066 = vmatmul.mubr.bf16.gmra.mxu1 %v6865_v51  ;;  %v6853_v46 = vmax.f32 %v6835_v6, 0.0  ;;  %v7047_v43 = vunpack.c.h.bf16 %v17006_v15 }
 0xd81   :  { %v6797_v8 = vpop.f32.mrf.mxu0  ;;  %13069 = vmatprep.mubr.msk.bf16.mxu1 %vm15303_vm0, %v18791_v49 }
 0xd82   :  { %v6836_v45 = vadd.f32 %v6797_v8, %v17316_v14 }
 0xd83   :  { %v6799_v48 = vpop.f32.mrf.mxu0 }
 0xd84   :  { %v6854_v1 = vmax.f32 %v6836_v45, 0.0 }
 0xd85   :  { %v6802_v3 = vpop.f32.mrf.mxu0 }
 0xd86   :  { %v6866_v50 = vpack.c.bf16 %v6854_v1, %v6853_v46  ;;  %v6837_v26 = vadd.f32 %v6802_v3, %v17318_v33 }
 0xd87   :  { %v6804_v19 = vpop.f32.mrf.mxu0 }
 0xd88   :  { %13070 = vmatmul.mubr.bf16.gmra.mxu1 %v6866_v50  ;;  %v6855_v59 = vmax.f32 %v6837_v26, 0.0  ;;  %v7048_v19 = vunpack.c.l.bf16 %v17017_v22  ;;  %v14097_v26 = vld [vmem:[%s18831_s16 + $0x160] ss:$24 sps:$4 sm:$0xff]  }
 0xd89   :  { %v6805_v13 = vpop.f32.mrf.mxu0  ;;  %13073 = vmatprep.mubr.msk.bf16.mxu1 %vm15303_vm0, %v18791_v49 }
 0xd8a   :  { %v6838_v7 = vadd.f32 %v6805_v13, %v17320_v39 }
 0xd8b   :  { %v6807_v12 = vpop.f32.mrf.mxu0 }
 0xd8c   :  { %v6856_v40 = vmax.f32 %v6838_v7, 0.0  ;;  %v14102_v7 = vld [vmem:[%s18831_s16 + $0x134] ss:$24 sps:$4 sm:$0xff]  }
 0xd8d   :  { %v6810_v27 = vpop.f32.mrf.mxu0 }
 0xd8e   :  { %v6867_v14 = vpack.c.bf16 %v6856_v40, %v6855_v59  ;;  %v6839_v54 = vadd.f32 %v6810_v27, %v17322_v53  ;;  %v7049_v59 = vunpack.c.h.bf16 %v17017_v22 }
 0xd8f   :  { %v6812_v62 = vpop.f32.mrf.mxu0 }
 0xd90   :  { %13074 = vmatmul.mubr.bf16.gmra.mxu1 %v6867_v14  ;;  %v6857_v21 = vmax.f32 %v6839_v54, 0.0  ;;  %v14100_v14 = vld [vmem:[%s18831_s16 + $0x130] ss:$24 sps:$4 sm:$0xff]   ;;  %v14105_v54 = vld [vmem:[%s18831_s16 + $0x104] ss:$24 sps:$4 sm:$0xff]  }
 0xd91   :  { %v6813_v42 = vpop.f32.mrf.mxu0  ;;  %13077 = vmatprep.mubr.msk.bf16.mxu1 %vm15303_vm0, %v18791_v49 }
 0xd92   :  { %v6840_v33 = vadd.f32 %v6813_v42, %v17324_v29 }
 0xd93   :  { %v6815_v47 = vpop.f32.mrf.mxu0 }
 0xd94   :  { %v6858_v39 = vmax.f32 %v6840_v33, 0.0 }
 0xd95   :  { %v6818_v58 = vpop.f32.mrf.mxu0 }
 0xd96   :  { %v6868_v25 = vpack.c.bf16 %v6858_v39, %v6857_v21  ;;  %v6841_v5 = vadd.f32 %v6818_v58, %v17326_v32  ;;  %v14079_v32 = vld [vmem:[%s18831_s16 + $0x60] ss:$24 sps:$4 sm:$0xff]   ;;  %v7050_v39 = vunpack.c.l.bf16 %v17028_v34 }
 0xd97   :  { %v6820_v17 = vpop.f32.mrf.mxu0  ;;  %7408 = vmatpush1.bf16.msra.mxu0 %v14079_v32  ;;  %v14103_v58 = vld [vmem:[%s18831_s16 + $0x100] ss:$24 sps:$4 sm:$0xff]  }
 0xd98   :  { %13078 = vmatmul.mubr.bf16.gmra.mxu1 %v6868_v25  ;;  %v6859_v9 = vmax.f32 %v6841_v5, 0.0  ;;  %v14108_v17 = vld [vmem:[%s18831_s16 + $0xd4] ss:$24 sps:$4 sm:$0xff]  }
 0xd99   :  { %v6821_v53 = vpop.f32.mrf.mxu0  ;;  %13081 = vmatprep.mubr.msk.bf16.mxu1 %vm15303_vm0, %v18791_v49 }
 0xd9a   :  { %v6842_v29 = vadd.f32 %v6821_v53, %v17328_v44  ;;  %v14087_v44 = vld [vmem:[%s18831_s16 + $0x34] ss:$24 sps:$4 sm:$0xff]  }
 0xd9b   :  { %v6823_v2 = vpop.f32.mrf.mxu0  ;;  %7409 = vmatprep.subr.bf16.mxu0 %v14087_v44 }
 0xd9c   :  { %v6860_v20 = vmax.f32 %v6842_v29, 0.0  ;;  %7410 = vmatpush1.bf16.msra.mxu0 %v14085_v31  ;;  %v7051_v29 = vunpack.c.h.bf16 %v17028_v34  ;;  %v14109_v31 = vld [vmem:[%s18831_s16 + $0xa0] ss:$24 sps:$4 sm:$0xff]  }
 0xd9d   :  { %7411 = vmatprep.subr.bf16.mxu0 %v14093_v24  ;;  %v14114_v24 = vld [vmem:[%s18831_s16 + $0x74] ss:$24 sps:$4 sm:$0xff]  }
 0xd9e   :  { %v6869_v18 = vpack.c.bf16 %v6860_v20, %v6859_v9  ;;  %v14106_v20 = vld [vmem:[%s18831_s16 + $0xd0] ss:$24 sps:$4 sm:$0xff]  }
 0xda0   :  { %13082 = vmatmul.mubr.bf16.gmra.mxu1 %v6869_v18  ;;  %7412 = vmatpush1.bf16.msra.mxu0 %v14091_v35 }
 0xda1   :  { %7552 = vmatprep.mubr.bf16.mxu1 %v18820_v56  ;;  %7643 = vmatprep.subr.bf16.mxu0 %v14099_v0 }
 0xe20   :  { %v6975_v16 = vpop.f32.mrf.mxu1 }
 0xe21   :  { %v6976_v52 = vadd.f32 %v17387_v11, %v6975_v16 }
 0xe22   :  { %v13051_v55 = vpop.f32.mrf.mxu1 }
 0xe23   :  { %v7064_v38 = vadd.f32 %v7046_v30, %v6976_v52  ;;  %v14112_v52 = vld [vmem:[%s18831_s16 + $0x70] ss:$24 sps:$4 sm:$0xff]   ;;  %v14117_v30 = vld [vmem:[%s18831_s16 + $0x44] ss:$24 sps:$4 sm:$0xff]  }
 0xe24   :  { %v6978_v41 = vpop.f32.mrf.mxu1 }
 0xe25   :  { %v6979_v51 = vadd.f32 %v17387_v11, %v6978_v41  ;;  %v7082_v48 = vmax.f32 %v7064_v38, 0.0 }
 0xe26   :  { %v13052_v6 = vpop.f32.mrf.mxu1 }
 0xe27   :  { %v7065_v8 = vadd.f32 %v7047_v43, %v6979_v51  ;;  %v7054_v6 = vunpack.c.l.bf16 %v17050_v23 }
 0xe28   :  { %v6983_v45 = vpop.f32.mrf.mxu1 }
 0xe29   :  { %v7083_v46 = vmax.f32 %v7065_v8, 0.0  ;;  %v6984_v1 = vadd.f32 %v17387_v11, %v6983_v45  ;;  %v14115_v8 = vld [vmem:[%s18831_s16 + $0x40] ss:$24 sps:$4 sm:$0xff]  }
 0xe2a   :  { %v13055_v3 = vpop.f32.mrf.mxu1 }
 0xe2b   :  { %v17394_v50 = vpack.c.bf16 %v7083_v46, %v7082_v48  ;;  %v7066_v12 = vadd.f32 %v7048_v19, %v6984_v1  ;;  %v14120_v48 = vld [vmem:[%s18831_s16 + $0x14] ss:$24 sps:$4 sm:$0xff]   ;;  %v7055_v3 = vunpack.c.h.bf16 %v17050_v23 }
 0xe2c   :  { %v6986_v13 = vpop.f32.mrf.mxu1 }
 0xe2d   :  { %18832 = vst [vmem:[#allocation108_spill] sm:$0xff] %v17394_v50  ;;  %v6987_v15 = vadd.f32 %v17387_v11, %v6986_v13  ;;  %7430 = vmatmul.mubr.bf16.vlgmr.msra.gmra.mxu0 %v17394_v50  ;;  %7553 = vmatmul.mubr.bf16.vlgmr.msra.gmra.mxu1 %v17394_v50  ;;  %v7084_v42 = vmax.f32 %v7066_v12, 0.0  ;;  %v14118_v13 = vld [vmem:[%s18831_s16 + $0x10] ss:$24 sps:$4 sm:$0xff]  }
 0xe2e   :  { %v13056_v40 = vpop.f32.mrf.mxu1  ;;  %7439 = vmatprep.mubr.bf16.mxu0 %v18820_v56  ;;  %7562 = vmatprep.mubr.bf16.mxu1 %v18820_v56 }
 0xe2f   :  { %v7067_v27 = vadd.f32 %v7049_v59, %v6987_v15  ;;  %7644 = vmatpush1.bf16.msra.mxu0 %v14097_v26 }
 0xe30   :  { %v6991_v62 = vpop.f32.mrf.mxu1  ;;  %7645 = vmatprep.subr.bf16.mxu0 %v14102_v7 }
 0xe31   :  { %v7085_v33 = vmax.f32 %v7067_v27, 0.0  ;;  %v6992_v22 = vadd.f32 %v17387_v11, %v6991_v62  ;;  %v7056_v27 = vunpack.c.l.bf16 %v17061_v37 }
 0xe32   :  { %v13059_v47 = vpop.f32.mrf.mxu1 }
 0xe33   :  { %v17408_v21 = vpack.c.bf16 %v7085_v33, %v7084_v42  ;;  %7646 = vmatpush1.bf16.msra.mxu0 %v14100_v14  ;;  %v7068_v5 = vadd.f32 %v7050_v39, %v6992_v22  ;;  %v7057_v42 = vunpack.c.h.bf16 %v17061_v37 }
 0xe34   :  { %v6994_v25 = vpop.f32.mrf.mxu1  ;;  %7647 = vmatprep.subr.bf16.mxu0 %v14105_v54 }
 0xe35   :  { %18833 = vst [vmem:[#allocation109_spill] sm:$0xff] %v17408_v21  ;;  %v6995_v53 = vadd.f32 %v17387_v11, %v6994_v25  ;;  %7440 = vmatmul.mubr.bf16.gmra.mxu0 %v17408_v21  ;;  %7563 = vmatmul.mubr.bf16.gmra.mxu1 %v17408_v21  ;;  %v7086_v4 = vmax.f32 %v7068_v5, 0.0 }
 0xe36   :  { %v13060_v2 = vpop.f32.mrf.mxu1  ;;  %7449 = vmatprep.mubr.bf16.mxu0 %v18820_v56  ;;  %7572 = vmatprep.mubr.bf16.mxu1 %v18820_v56 }
 0xe37   :  { %v7069_v9 = vadd.f32 %v7051_v29, %v6995_v53  ;;  %7648 = vmatpush1.bf16.msra.mxu0 %v14103_v58  ;;  %v18838_v53 = vld [vmem:[#allocation118_spill] sm:$0xff] }
 0xe38   :  { %v6999_v18 = vpop.f32.mrf.mxu1  ;;  %7649 = vmatprep.subr.bf16.mxu0 %v14108_v17  ;;  %v7058_v37 = vunpack.c.l.bf16 %v18838_v53 }
 0xe39   :  { %v7087_v32 = vmax.f32 %v7069_v9, 0.0  ;;  %v7000_v34 = vadd.f32 %v17387_v11, %v6999_v18 }
 0xe3a   :  { %v13063_v36 = vpop.f32.mrf.mxu1 }
 0xe3b   :  { %v17422_v44 = vpack.c.bf16 %v7087_v32, %v7086_v4  ;;  %7650 = vmatpush1.bf16.msra.mxu0 %v14106_v20  ;;  %v7070_v63 = vadd.f32 %v7052_v57, %v7000_v34  ;;  %v7059_v20 = vunpack.c.h.bf16 %v18838_v53 }
 0xe3c   :  { %v7002_v61 = vpop.f32.mrf.mxu1  ;;  %7651 = vmatprep.subr.bf16.mxu0 %v14111_v60 }
 0xe3d   :  { %18834 = vst [vmem:[#allocation110_spill] sm:$0xff] %v17422_v44  ;;  %v7003_v35 = vadd.f32 %v17387_v11, %v7002_v61  ;;  %7450 = vmatmul.mubr.bf16.gmra.mxu0 %v17422_v44  ;;  %7573 = vmatmul.mubr.bf16.gmra.mxu1 %v17422_v44  ;;  %v7088_v41 = vmax.f32 %v7070_v63, 0.0  ;;  %v18840_v61 = vld [vmem:[#allocation115_spill] sm:$0xff] }
 0xe3e   :  { %v13064_v0 = vpop.f32.mrf.mxu1  ;;  %7459 = vmatprep.mubr.bf16.mxu0 %v18820_v56  ;;  %7582 = vmatprep.mubr.bf16.mxu1 %v18820_v56 }
 0xe3f   :  { %v7071_v16 = vadd.f32 %v7053_v10, %v7003_v35  ;;  %7652 = vmatpush1.bf16.msra.mxu0 %v14109_v31  ;;  %v7061_v0 = vunpack.c.h.bf16 %v18840_v61 }
 0xe40   :  { %v7007_v55 = vpop.f32.mrf.mxu1  ;;  %7653 = vmatprep.subr.bf16.mxu0 %v14114_v24  ;;  %v7060_v24 = vunpack.c.l.bf16 %v18840_v61 }
 0xe41   :  { %v7089_v38 = vmax.f32 %v7071_v16, 0.0  ;;  %v7008_v28 = vadd.f32 %v17387_v11, %v7007_v55 }
 0xe42   :  { %v13067_v51 = vpop.f32.mrf.mxu1 }
 0xe43   :  { %v17436_v43 = vpack.c.bf16 %v7089_v38, %v7088_v41  ;;  %7654 = vmatpush1.bf16.msra.mxu0 %v14112_v52  ;;  %v7072_v46 = vadd.f32 %v7054_v6, %v7008_v28  ;;  %v18841_v28 = vld [vmem:[#allocation107_spill] sm:$0xff] }
 0xe44   :  { %v7010_v45 = vpop.f32.mrf.mxu1  ;;  %7655 = vmatprep.subr.bf16.mxu0 %v14117_v30  ;;  %v7062_v51 = vunpack.c.l.bf16 %v18841_v28 }
 0xe45   :  { %18835 = vst [vmem:[#allocation111_spill] sm:$0xff] %v17436_v43  ;;  %v7011_v1 = vadd.f32 %v17387_v11, %v7010_v45  ;;  %7460 = vmatmul.mubr.bf16.gmra.mxu0 %v17436_v43  ;;  %7583 = vmatmul.mubr.bf16.gmra.mxu1 %v17436_v43  ;;  %v7090_v12 = vmax.f32 %v7072_v46, 0.0 }
 0xe46   :  { %v13068_v19 = vpop.f32.mrf.mxu1  ;;  %7469 = vmatprep.mubr.bf16.mxu0 %v18820_v56  ;;  %7592 = vmatprep.mubr.bf16.mxu1 %v18820_v56 }
 0xe47   :  { %v7073_v26 = vadd.f32 %v7055_v3, %v7011_v1  ;;  %7656 = vmatpush1.bf16.msra.mxu0 %v14115_v8  ;;  %v7063_v1 = vunpack.c.h.bf16 %v18841_v28 }
 0xe48   :  { %v7015_v7 = vpop.f32.mrf.mxu1  ;;  %7657 = vmatprep.subr.bf16.mxu0 %v14120_v48 }
 0xe49   :  { %v7091_v15 = vmax.f32 %v7073_v26, 0.0  ;;  %v7016_v59 = vadd.f32 %v17387_v11, %v7015_v7 }
 0xe4a   :  { %v13071_v40 = vpop.f32.mrf.mxu1 }
 0xe4b   :  { %v17449_v23 = vpack.c.bf16 %v7091_v15, %v7090_v12  ;;  %7658 = vmatpush1.bf16.msra.mxu0 %v14118_v13  ;;  %v7074_v62 = vadd.f32 %v7056_v27, %v7016_v59  ;;  %v14126_v12 = vld [vmem:[#allocation2 + $0x754] ss:$8 sps:$4 sm:$0xff]  }
 0xe4c   :  { %v7018_v14 = vpop.f32.mrf.mxu1 }
 0xe4d   :  { %18836 = vst [vmem:[#allocation112_spill] sm:$0xff] %v17449_v23  ;;  %v7019_v54 = vadd.f32 %v17387_v11, %v7018_v14  ;;  %7470 = vmatmul.mubr.bf16.gmra.mxu0 %v17449_v23  ;;  %7593 = vmatmul.mubr.bf16.gmra.mxu1 %v17449_v23  ;;  %v7092_v39 = vmax.f32 %v7074_v62, 0.0 }
 0xe4e   :  { %v13072_v33 = vpop.f32.mrf.mxu1  ;;  %7479 = vmatprep.mubr.bf16.mxu0 %v18820_v56  ;;  %7602 = vmatprep.mubr.bf16.mxu1 %v18820_v56 }
 0xe4f   :  { %v7075_v22 = vadd.f32 %v7057_v42, %v7019_v54 }
 0xe50   :  { %v7023_v47 = vpop.f32.mrf.mxu1 }
 0xe51   :  { %v7093_v58 = vmax.f32 %v7075_v22, 0.0  ;;  %v7024_v25 = vadd.f32 %v17387_v11, %v7023_v47 }
 0xe52   :  { %v13075_v17 = vpop.f32.mrf.mxu1 }
 0xe53   :  { %v17459_v5 = vpack.c.bf16 %v7093_v58, %v7092_v39  ;;  %v7076_v2 = vadd.f32 %v7058_v37, %v7024_v25 }
 0xe54   :  { %v7026_v29 = vpop.f32.mrf.mxu1 }
 0xe55   :  { %18837 = vst [vmem:[#allocation113_spill] sm:$0xff] %v17459_v5  ;;  %v7027_v9 = vadd.f32 %v17387_v11, %v7026_v29  ;;  %7480 = vmatmul.mubr.bf16.gmra.mxu0 %v17459_v5  ;;  %7603 = vmatmul.mubr.bf16.gmra.mxu1 %v17459_v5  ;;  %v7094_v32 = vmax.f32 %v7076_v2, 0.0 }
 0xe56   :  { %v13076_v18 = vpop.f32.mrf.mxu1  ;;  %7489 = vmatprep.mubr.bf16.mxu0 %v18820_v56  ;;  %7612 = vmatprep.mubr.bf16.mxu1 %v18820_v56 }
 0xe57   :  { %v7077_v60 = vadd.f32 %v7059_v20, %v7027_v9 }
 0xe58   :  { %v7031_v4 = vpop.f32.mrf.mxu1 }
 0xe59   :  { %v7095_v34 = vmax.f32 %v7077_v60, 0.0  ;;  %v7032_v36 = vadd.f32 %v17387_v11, %v7031_v4 }
 0xe5a   :  { %v13079_v57 = vpop.f32.mrf.mxu1 }
 0xe5b   :  { %v17469_v31 = vpack.c.bf16 %v7095_v34, %v7094_v32  ;;  %v7078_v35 = vadd.f32 %v7060_v24, %v7032_v36 }
 0xe5c   :  { %v7034_v63 = vpop.f32.mrf.mxu1 }
 0xe5d   :  { %18839 = vst [vmem:[#allocation105_spill] sm:$0xff] %v17469_v31  ;;  %v7035_v10 = vadd.f32 %v17387_v11, %v7034_v63  ;;  %7490 = vmatmul.mubr.bf16.gmra.mxu0 %v17469_v31  ;;  %7613 = vmatmul.mubr.bf16.gmra.mxu1 %v17469_v31  ;;  %v7096_v30 = vmax.f32 %v7078_v35, 0.0 }
 0xe5e   :  { %v13080_v16 = vpop.f32.mrf.mxu1  ;;  %7499 = vmatprep.mubr.bf16.mxu0 %v18820_v56  ;;  %7622 = vmatprep.mubr.bf16.mxu1 %v18820_v56 }
 0xe5f   :  { %v7079_v52 = vadd.f32 %v7061_v0, %v7035_v10 }
 0xe60   :  { %v7039_v55 = vpop.f32.mrf.mxu1 }
 0xe61   :  { %v7097_v41 = vmax.f32 %v7079_v52, 0.0  ;;  %v7040_v38 = vadd.f32 %v17387_v11, %v7039_v55 }
 0xe62   :  { %v13083_v6 = vpop.f32.mrf.mxu1 }
 0xe63   :  { %v17480_v8 = vpack.c.bf16 %v7097_v41, %v7096_v30  ;;  %v7080_v45 = vadd.f32 %v7062_v51, %v7040_v38 }
 0xe64   :  { %v7042_v48 = vpop.f32.mrf.mxu1 }
 0xe65   :  { %18842 = vst [vmem:[#allocation106_spill] sm:$0xff] %v17480_v8  ;;  %v7043_v46 = vadd.f32 %v17387_v11, %v7042_v48  ;;  %7500 = vmatmul.mubr.bf16.gmra.mxu0 %v17480_v8  ;;  %7623 = vmatmul.mubr.bf16.gmra.mxu1 %v17480_v8  ;;  %v7098_v26 = vmax.f32 %v7080_v45, 0.0  ;;  %v14123_v11 = vld [vmem:[#allocation2 + $0x6c4] ss:$8 sps:$4 sm:$0xff]  }
 0xe66   :  { %v13084_v3 = vpop.f32.mrf.mxu1  ;;  %7509 = vmatprep.mubr.bf16.mxu0 %v18820_v56  ;;  %7632 = vmatprep.mubr.bf16.mxu1 %v18820_v56 }
 0xe67   :  { %v7081_v19 = vadd.f32 %v7063_v1, %v7043_v46 }
 0xe69   :  { %v7099_v13 = vmax.f32 %v7081_v19, 0.0 }
 0xe6b   :  { %v17488_v7 = vpack.c.bf16 %v7099_v13, %v7098_v26 }
 0xe6d   :  { %18843 = vst [vmem:[#allocation119_spill] sm:$0xff] %v17488_v7  ;;  %7510 = vmatmul.mubr.bf16.gmra.mxu0 %v17488_v7  ;;  %7633 = vmatmul.mubr.bf16.gmra.mxu1 %v17488_v7 }
 0xe6e   :  { %7675 = vmatprep.mubr.bf16.mxu0 %v18820_v56  ;;  %12176 = vmatprep.mubr.msk.bf16.mxu1 %vm1199_vm2, %v14123_v11 }
 0xe75   :  { %7676 = vmatmul.mubr.bf16.vlgmr.msra.gmra.mxu0 %v17394_v50 }
 0xe76   :  { %7685 = vmatprep.mubr.bf16.mxu0 %v18820_v56 }
 0xe7d   :  { %7686 = vmatmul.mubr.bf16.gmra.mxu0 %v17408_v21 }
 0xe7e   :  { %7695 = vmatprep.mubr.bf16.mxu0 %v18820_v56 }
 0xe85   :  { %7696 = vmatmul.mubr.bf16.gmra.mxu0 %v17422_v44 }
 0xe86   :  { %7705 = vmatprep.mubr.bf16.mxu0 %v18820_v56 }
 0xe8d   :  { %7706 = vmatmul.mubr.bf16.gmra.mxu0 %v17436_v43 }
 0xe8e   :  { %7715 = vmatprep.mubr.bf16.mxu0 %v18820_v56 }
 0xe95   :  { %7716 = vmatmul.mubr.bf16.gmra.mxu0 %v17449_v23 }
 0xe96   :  { %7725 = vmatprep.mubr.bf16.mxu0 %v18820_v56 }
 0xe9d   :  { %7726 = vmatmul.mubr.bf16.gmra.mxu0 %v17459_v5 }
 0xe9e   :  { %7735 = vmatprep.mubr.bf16.mxu0 %v18820_v56 }
 0xea5   :  { %7736 = vmatmul.mubr.bf16.gmra.mxu0 %v17469_v31 }
 0xea6   :  { %7745 = vmatprep.mubr.bf16.mxu0 %v18820_v56 }
 0xead   :  { %7746 = vmatmul.mubr.bf16.gmra.mxu0 %v17480_v8 }
 0xeae   :  { %7755 = vmatprep.mubr.bf16.mxu0 %v18820_v56 }
 0xeb5   :  { %7756 = vmatmul.mubr.bf16.gmra.mxu0 %v17488_v7 }
 0xeb6   :  { %12203 = vmatprep.mubr.msk.bf16.mxu0 %vm1199_vm2, %v14126_v12 }
 0xeed   :  { %v17512_v15 = vpop.f32.mrf.mxu0  ;;  %v17514_v59 = vpop.f32.mrf.mxu1 }
 0xeee   :  { %18844 = vst [vmem:[#allocation116_spill] sm:$0xff] %v17512_v15  ;;  %18845 = vst [vmem:[#allocation120_spill] sm:$0xff] %v17514_v59 }
 0xeef   :  { %v17516_v40 = vpop.f32.mrf.mxu0  ;;  %v17518_v27 = vpop.f32.mrf.mxu1 }
 0xef0   :  { %18846 = vst [vmem:[#allocation123_spill] sm:$0xff] %v17518_v27 }
 0xef1   :  { %v17520_v14 = vpop.f32.mrf.mxu0  ;;  %v17522_v62 = vpop.f32.mrf.mxu1 }
 0xef2   :  { %18847 = vst [vmem:[#allocation121_spill] sm:$0xff] %v17520_v14  ;;  %18848 = vst [vmem:[#allocation124_spill] sm:$0xff] %v17522_v62 }
 0xef3   :  { %v17528_v33 = vpop.f32.mrf.mxu0  ;;  %v17530_v22 = vpop.f32.mrf.mxu1 }
 0xef4   :  { %18849 = vst [vmem:[#allocation122_spill] sm:$0xff] %v17528_v33  ;;  %18850 = vst [vmem:[#allocation117_spill] sm:$0xff] %v17530_v22 }
 0xef5   :  { %v17532_v47 = vpop.f32.mrf.mxu0  ;;  %v17534_v39 = vpop.f32.mrf.mxu1 }
 0xef6   :  { %18851 = vst [vmem:[#allocation114_spill] sm:$0xff] %v17532_v47  ;;  %18852 = vst [vmem:[#allocation118_spill] sm:$0xff] %v17534_v39 }
 0xef7   :  { %v17536_v58 = vpop.f32.mrf.mxu0  ;;  %v17538_v25 = vpop.f32.mrf.mxu1 }
 0xef9   :  { %v17540_v17 = vpop.f32.mrf.mxu0  ;;  %v17542_v53 = vpop.f32.mrf.mxu1 }
 0xefa   :  { %18853 = vst [vmem:[#allocation115_spill] sm:$0xff] %v17540_v17  ;;  %18854 = vst [vmem:[#allocation107_spill] sm:$0xff] %v17542_v53 }
 0xefb   :  { %v17548_v2 = vpop.f32.mrf.mxu0  ;;  %v17550_v9 = vpop.f32.mrf.mxu1 }
 0xefd   :  { %v17552_v20 = vpop.f32.mrf.mxu0  ;;  %v17554_v18 = vpop.f32.mrf.mxu1 }
 0xeff   :  { %v17556_v60 = vpop.f32.mrf.mxu0  ;;  %v17558_v4 = vpop.f32.mrf.mxu1 }
 0xf01   :  { %v17560_v32 = vpop.f32.mrf.mxu0  ;;  %v17562_v34 = vpop.f32.mrf.mxu1 }
 0xf03   :  { %v17564_v36 = vpop.f32.mrf.mxu0  ;;  %v17566_v57 = vpop.f32.mrf.mxu1 }
 0xf05   :  { %v17568_v61 = vpop.f32.mrf.mxu0  ;;  %v17570_v24 = vpop.f32.mrf.mxu1 }
 0xf07   :  { %v17572_v63 = vpop.f32.mrf.mxu0  ;;  %v17574_v35 = vpop.f32.mrf.mxu1 }
 0xf09   :  { %v17576_v10 = vpop.f32.mrf.mxu0  ;;  %v17578_v0 = vpop.f32.mrf.mxu1 }
 0xf0b   :  { %v17580_v16 = vpop.f32.mrf.mxu0  ;;  %v17582_v52 = vpop.f32.mrf.mxu1 }
 0xf0d   :  { %v17584_v55 = vpop.f32.mrf.mxu0  ;;  %v17586_v30 = vpop.f32.mrf.mxu1 }
 0xf0f   :  { %v7473_v41 = vpop.f32.mrf.mxu0  ;;  %v7596_v38 = vpop.f32.mrf.mxu1 }
 0xf11   :  { %v17588_v28 = vpop.f32.mrf.mxu0  ;;  %v17590_v51 = vpop.f32.mrf.mxu1 }
 0xf13   :  { %v7477_v6 = vpop.f32.mrf.mxu0  ;;  %v7600_v45 = vpop.f32.mrf.mxu1 }
 0xf15   :  { %v7481_v48 = vpop.f32.mrf.mxu0  ;;  %v7604_v46 = vpop.f32.mrf.mxu1 }
 0xf17   :  { %v7483_v1 = vpop.f32.mrf.mxu0  ;;  %v7606_v3 = vpop.f32.mrf.mxu1 }
 0xf19   :  { %v7485_v19 = vpop.f32.mrf.mxu0  ;;  %v7608_v26 = vpop.f32.mrf.mxu1 }
 0xf1b   :  { %v7487_v13 = vpop.f32.mrf.mxu0  ;;  %v7610_v11 = vpop.f32.mrf.mxu1 }
 0xf1d   :  { %v7491_v12 = vpop.f32.mrf.mxu0  ;;  %v7614_v42 = vpop.f32.mrf.mxu1 }
 0xf1f   :  { %v7493_v54 = vpop.f32.mrf.mxu0  ;;  %v7616_v29 = vpop.f32.mrf.mxu1 }
 0xf21   :  { %v7495_v37 = vpop.f32.mrf.mxu0  ;;  %v7618_v56 = vpop.f32.mrf.mxu1 }
 0xf22   :  { %v7814_v22 = vpack.c.bf16 %v7495_v37, %v7491_v12  ;;  %v8118_v27 = vpack.c.bf16 %v7618_v56, %v7614_v42  ;;  %v7810_v56 = vpack.c.bf16 %v17588_v28, %v17584_v55  ;;  %v7808_v42 = vpack.c.bf16 %v17576_v10, %v17568_v61  ;;  %v18861_v55 = vld [vmem:[#allocation107_spill] sm:$0xff] }
 0xf23   :  { %v7497_v7 = vpop.f32.mrf.mxu0  ;;  %v7620_v8 = vpop.f32.mrf.mxu1  ;;  %v8111_v37 = vpack.c.bf16 %v17566_v57, %v17558_v4  ;;  %v7806_v61 = vpack.c.bf16 %v17560_v32, %v17552_v20  ;;  %v8109_v4 = vpack.c.bf16 %v17550_v9, %v17538_v25  ;;  %v18858_v9 = vld [vmem:[#allocation115_spill] sm:$0xff] }
 0xf24   :  { %v7815_v53 = vpack.c.bf16 %v7497_v7, %v7493_v54  ;;  %v8119_v47 = vpack.c.bf16 %v7620_v8, %v7616_v29  ;;  %v8114_v7 = vpack.c.bf16 %v17590_v51, %v17586_v30  ;;  %v18862_v30 = vld [vmem:[#allocation118_spill] sm:$0xff] }
 0xf25   :  { %v7501_v31 = vpop.f32.mrf.mxu0  ;;  %v7624_v5 = vpop.f32.mrf.mxu1 }
 0xf27   :  { %v7503_v23 = vpop.f32.mrf.mxu0  ;;  %v7626_v43 = vpop.f32.mrf.mxu1 }
 0xf29   :  { %v7505_v44 = vpop.f32.mrf.mxu0  ;;  %v7628_v21 = vpop.f32.mrf.mxu1 }
 0xf2a   :  { %v7816_v15 = vpack.c.bf16 %v7505_v44, %v7501_v31  ;;  %v8120_v14 = vpack.c.bf16 %v7628_v21, %v7624_v5  ;;  %v7812_v21 = vpack.c.bf16 %v7485_v19, %v7481_v48  ;;  %v7811_v5 = vpack.c.bf16 %v7477_v6, %v7473_v41  ;;  %v18864_v6 = vld [vmem:[#allocation121_spill] sm:$0xff] }
 0xf2b   :  { %v7507_v50 = vpop.f32.mrf.mxu0  ;;  %v7630_v49 = vpop.f32.mrf.mxu1  ;;  %v8115_v31 = vpack.c.bf16 %v7600_v45, %v7596_v38  ;;  %v18863_v41 = vpack.c.bf16 %v18861_v55, %v18862_v30  ;;  %v18865_v45 = vld [vmem:[#allocation116_spill] sm:$0xff] }
 0xf2c   :  { %v7817_v59 = vpack.c.bf16 %v7507_v50, %v7503_v23  ;;  %v8121_v62 = vpack.c.bf16 %v7630_v49, %v7626_v43  ;;  %v7813_v50 = vpack.c.bf16 %v7487_v13, %v7483_v1  ;;  %v8117_v49 = vpack.c.bf16 %v7610_v11, %v7606_v3  ;;  %v18868_v1 = vld [vmem:[#allocation120_spill] sm:$0xff]  ;;  %v14124_v11 = vld [vmem:[#allocation2 + $0x750] ss:$8 sps:$4 sm:$0xff]  }
 0xf2d   :  { %v17592_v39 = vpop.f32.mrf.mxu0  ;;  %v8116_v43 = vpack.c.bf16 %v7608_v26, %v7604_v46  ;;  %v18866_v48 = vpack.c.bf16 %v18864_v6, %v18865_v45  ;;  %v18867_v46 = vld [vmem:[#allocation124_spill] sm:$0xff]  ;;  %v14153_v45 = vld [vmem:[#allocation2 + $0x710] ss:$8 sps:$4 sm:$0xff]  }
 0xf2e   :  { %7947 = vmatprep.subr.bf16.mxu1 %v7817_v59  ;;  %8251 = vmatprep.subr.bf16.mxu0 %v8121_v62  ;;  %v7809_v59 = vpack.c.bf16 %v17580_v16, %v17572_v63  ;;  %v7634_v62 = vpop.f32.mrf.mxu1  ;;  %v18859_v16 = vld [vmem:[#allocation114_spill] sm:$0xff]  ;;  %v18869_v3 = vpack.c.bf16 %v18867_v46, %v18868_v1  ;;  %v14154_v55 = vld [vmem:[#allocation2 + $0x7a4] ss:$8 sps:$4 sm:$0xff]  }
 0xf2f   :  { %v17594_v17 = vpop.f32.mrf.mxu0  ;;  %7948 = vmatpush1.bf16.msra.mxu1 %v7816_v15  ;;  %8252 = vmatpush1.bf16.msra.mxu0 %v8120_v14  ;;  %v14157_v46 = vld [vmem:[#allocation2 + $0x724] ss:$8 sps:$4 sm:$0xff]   ;;  %v14160_v1 = vld [vmem:[#allocation2 + $0x7b4] ss:$8 sps:$4 sm:$0xff]  }
 0xf30   :  { %7949 = vmatprep.subr.bf16.mxu1 %v7815_v53  ;;  %8253 = vmatprep.subr.bf16.mxu0 %v8119_v47  ;;  %v7807_v53 = vpack.c.bf16 %v17564_v36, %v17556_v60  ;;  %v7636_v29 = vpop.f32.mrf.mxu1  ;;  %v7805_v60 = vpack.c.bf16 %v17548_v2, %v17536_v58  ;;  %v18857_v58 = vld [vmem:[#allocation117_spill] sm:$0xff] }
 0xf31   :  { %v17596_v33 = vpop.f32.mrf.mxu0 }
 0xf32   :  { %v7638_v57 = vpop.f32.mrf.mxu1  ;;  %v7818_v19 = vpack.c.bf16 %v17596_v33, %v17592_v39  ;;  %v14129_v39 = vld [vmem:[#allocation2 + $0x6d0] ss:$8 sps:$4 sm:$0xff]  }
 0xf33   :  { %v17598_v44 = vpop.f32.mrf.mxu0  ;;  %7950 = vmatpush1.bf16.msra.mxu1 %v7814_v22  ;;  %8254 = vmatpush1.bf16.msra.mxu0 %v8118_v27  ;;  %v8113_v27 = vpack.c.bf16 %v17582_v52, %v17574_v35  ;;  %v8112_v22 = vpack.c.bf16 %v17578_v0, %v17570_v24  ;;  %v8110_v24 = vpack.c.bf16 %v17562_v34, %v17554_v18  ;;  %v18855_v18 = vld [vmem:[#allocation122_spill] sm:$0xff]  ;;  %v18856_v34 = vld [vmem:[#allocation123_spill] sm:$0xff] }
 0xf34   :  { %7951 = vmatprep.subr.bf16.mxu1 %v7813_v50  ;;  %8255 = vmatprep.subr.bf16.mxu0 %v8117_v49  ;;  %v7803_v32 = vpack.c.bf16 %v18855_v18, %v17516_v40  ;;  %v8107_v2 = vpack.c.bf16 %v18857_v58, %v18856_v34  ;;  %v7640_v0 = vpop.f32.mrf.mxu1  ;;  %v18860_v52 = vpack.c.bf16 %v18858_v9, %v18859_v16  ;;  %v14127_v50 = vld [vmem:[#allocation2 + $0x6d4] ss:$8 sps:$4 sm:$0xff]   ;;  %v14130_v49 = vld [vmem:[#allocation2 + $0x764] ss:$8 sps:$4 sm:$0xff]   ;;  %v14150_v9 = vld [vmem:[#allocation2 + $0x790] ss:$8 sps:$4 sm:$0xff]  }
 0xf35   :  { %v17600_v23 = vpop.f32.mrf.mxu0  ;;  %v7819_v40 = vpack.c.bf16 %v17598_v44, %v17594_v17  ;;  %v8123_v28 = vpack.c.bf16 %v7640_v0, %v7636_v29  ;;  %v8122_v26 = vpack.c.bf16 %v7638_v57, %v7634_v62  ;;  %v14121_v17 = vld [vmem:[#allocation2 + $0x6c0] ss:$8 sps:$4 sm:$0xff]   ;;  %v14145_v18 = vld [vmem:[#allocation2 + $0x704] ss:$8 sps:$4 sm:$0xff]  }
 0xf36   :  { %v14135_v62 = vld [vmem:[#allocation2 + $0x6e0] ss:$8 sps:$4 sm:$0xff]  }
 0xf37   :  { %v17602_v8 = vpop.f32.mrf.mxu0  ;;  %7952 = vmatpush1.bf16.msra.mxu1 %v7812_v21  ;;  %8256 = vmatpush1.bf16.msra.mxu0 %v8116_v43  ;;  %v14132_v43 = vld [vmem:[#allocation2 + $0x760] ss:$8 sps:$4 sm:$0xff]  }
 0xf38   :  { %7953 = vmatprep.subr.bf16.mxu1 %v7811_v5  ;;  %8257 = vmatprep.subr.bf16.mxu0 %v8115_v31  ;;  %v14133_v31 = vld [vmem:[#allocation2 + $0x6e4] ss:$8 sps:$4 sm:$0xff]   ;;  %v14147_v0 = vld [vmem:[#allocation2 + $0x700] ss:$8 sps:$4 sm:$0xff]  }
 0xf39   :  { %v17608_v15 = vpop.f32.mrf.mxu0 }
 0xf3a   :  { %v8410_v14 = vpack.c.bf16 %v17608_v15, %v17600_v23  ;;  %v14181_v23 = vld [vmem:[#allocation2 + $0x804] ss:$8 sps:$4 sm:$0xff]  }
 0xf3b   :  { %v17616_v54 = vpop.f32.mrf.mxu0  ;;  %7954 = vmatpush1.bf16.msra.mxu1 %v7810_v56  ;;  %8258 = vmatpush1.bf16.msra.mxu0 %v8114_v7  ;;  %v14136_v56 = vld [vmem:[#allocation2 + $0x774] ss:$8 sps:$4 sm:$0xff]   ;;  %v14198_v15 = vld [vmem:[#allocation28 + $0x28] sm:$0xff]  }
 0xf3c   :  { %7955 = vmatprep.subr.bf16.mxu1 %v7809_v59  ;;  %8259 = vmatprep.subr.bf16.mxu0 %v8113_v27 }
 0xf3d   :  { %v17622_v47 = vpop.f32.mrf.mxu0 }
 0xf3f   :  { %v17628_v63 = vpop.f32.mrf.mxu0  ;;  %7956 = vmatpush1.bf16.msra.mxu1 %v7808_v42  ;;  %8260 = vmatpush1.bf16.msra.mxu0 %v8112_v22  ;;  %v14138_v42 = vld [vmem:[#allocation2 + $0x770] ss:$8 sps:$4 sm:$0xff]  }
 0xf40   :  { %7957 = vmatprep.subr.bf16.mxu1 %v7807_v53  ;;  %8261 = vmatprep.subr.bf16.mxu0 %v8111_v37  ;;  %v14139_v53 = vld [vmem:[#allocation2 + $0x6f4] ss:$8 sps:$4 sm:$0xff]   ;;  %v14142_v37 = vld [vmem:[#allocation2 + $0x784] ss:$8 sps:$4 sm:$0xff]  }
 0xf41   :  { %v17634_v35 = vpop.f32.mrf.mxu0 }
 0xf42   :  { %v8412_v36 = vpack.c.bf16 %v17634_v35, %v17622_v47  ;;  %v14194_v47 = vld [vmem:[#allocation28 + $0x30] sm:$0xff]  }
 0xf43   :  { %v17642_v10 = vpop.f32.mrf.mxu0  ;;  %7958 = vmatpush1.bf16.msra.mxu1 %v7806_v61  ;;  %8262 = vmatpush1.bf16.msra.mxu0 %v8110_v24  ;;  %v14180_v35 = vld [vmem:[#allocation2 + $0x7f0] ss:$8 sps:$4 sm:$0xff]  }
 0xf44   :  { %7959 = vmatprep.subr.bf16.mxu1 %v7805_v60  ;;  %8263 = vmatprep.subr.bf16.mxu0 %v8109_v4  ;;  %v14141_v60 = vld [vmem:[#allocation2 + $0x6f0] ss:$8 sps:$4 sm:$0xff]   ;;  %v14144_v4 = vld [vmem:[#allocation2 + $0x780] ss:$8 sps:$4 sm:$0xff]  }
 0xf45   :  { %v17644_v20 = vpop.f32.mrf.mxu0 }
 0xf47   :  { %v17650_v25 = vpop.f32.mrf.mxu0  ;;  %7960 = vmatpush1.bf16.msra.mxu1 %v18860_v52  ;;  %8264 = vmatpush1.bf16.msra.mxu0 %v18863_v41  ;;  %v14151_v52 = vld [vmem:[#allocation2 + $0x714] ss:$8 sps:$4 sm:$0xff]  }
 0xf48   :  { %7961 = vmatprep.subr.bf16.mxu1 %v7803_v32  ;;  %8265 = vmatprep.subr.bf16.mxu0 %v8107_v2  ;;  %v14148_v32 = vld [vmem:[#allocation2 + $0x794] ss:$8 sps:$4 sm:$0xff]  }
 0xf49   :  { %v17658_v38 = vpop.f32.mrf.mxu0 }
 0xf4b   :  { %v17662_v51 = vpop.f32.mrf.mxu0  ;;  %7962 = vmatpush1.bf16.msra.mxu1 %v18866_v48  ;;  %8266 = vmatpush1.bf16.msra.mxu0 %v18869_v3  ;;  %v14156_v48 = vld [vmem:[#allocation2 + $0x7a0] ss:$8 sps:$4 sm:$0xff]  }
 0xf4c   :  { %7977 = vmatprep.subr.bf16.mxu1 %v7819_v40  ;;  %8281 = vmatprep.subr.bf16.mxu0 %v8123_v28 }
 0xf4d   :  { %v17672_v13 = vpop.f32.mrf.mxu0 }
 0xf4f   :  { %v17674_v12 = vpop.f32.mrf.mxu0  ;;  %7978 = vmatpush2.bf16.msra.mxu1 %v7818_v19  ;;  %8282 = vmatpush2.bf16.msra.mxu0 %v8122_v26 }
 0xf51   :  { %v17676_v44 = vpop.f32.mrf.mxu0 }
 0xf52   :  { %7980 = vmatmul.mubr.bf16.vlgmr.msra.gmra.mxu1 %v14121_v17  ;;  %8284 = vmatmul.mubr.bf16.vlgmr.msra.gmra.mxu0 %v14124_v11  ;;  %v14159_v11 = vld [vmem:[#allocation2 + $0x720] ss:$8 sps:$4 sm:$0xff]  }
 0xf53   :  { %v17678_v21 = vpop.f32.mrf.mxu0  ;;  %12177 = vmatprep.mubr.msk.bf16.mxu1 %vm1199_vm2, %v14127_v50  ;;  %12204 = vmatprep.mubr.msk.bf16.mxu0 %vm1199_vm2, %v14130_v49  ;;  %v14162_v50 = vld [vmem:[#allocation2 + $0x7b0] ss:$8 sps:$4 sm:$0xff]   ;;  %v14163_v49 = vld [vmem:[#allocation2 + $0x734] ss:$8 sps:$4 sm:$0xff]  }
 0xf55   :  { %v17682_v33 = vpop.f32.mrf.mxu0 }
 0xf57   :  { %v17684_v5 = vpop.f32.mrf.mxu0 }
 0xf59   :  { %v17686_v7 = vpop.f32.mrf.mxu0 }
 0xf5a   :  { %7990 = vmatmul.mubr.bf16.gmra.mxu1 %v14129_v39  ;;  %8294 = vmatmul.mubr.bf16.gmra.mxu0 %v14132_v43  ;;  %v14166_v39 = vld [vmem:[#allocation2 + $0x7c4] ss:$8 sps:$4 sm:$0xff]   ;;  %v8418_v43 = vpack.c.bf16 %v17686_v7, %v17682_v33  ;;  %v14168_v33 = vld [vmem:[#allocation2 + $0x7c0] ss:$8 sps:$4 sm:$0xff]  }
 0xf5b   :  { %v17688_v59 = vpop.f32.mrf.mxu0  ;;  %12178 = vmatprep.mubr.msk.bf16.mxu1 %vm1199_vm2, %v14133_v31  ;;  %12205 = vmatprep.mubr.msk.bf16.mxu0 %vm1199_vm2, %v14136_v56  ;;  %v8417_v31 = vpack.c.bf16 %v17678_v21, %v17674_v12  ;;  %v14169_v12 = vld [vmem:[#allocation2 + $0x744] ss:$8 sps:$4 sm:$0xff]   ;;  %v14172_v21 = vld [vmem:[#allocation2 + $0x7d4] ss:$8 sps:$4 sm:$0xff]  }
 0xf5c   :  { %v8419_v17 = vpack.c.bf16 %v17688_v59, %v17684_v5  ;;  %v8416_v5 = vpack.c.bf16 %v17676_v44, %v17672_v13  ;;  %v8415_v59 = vpack.c.bf16 %v17662_v51, %v17650_v25  ;;  %v8411_v25 = vpack.c.bf16 %v17616_v54, %v17602_v8  ;;  %v14171_v51 = vld [vmem:[#allocation2 + $0x740] ss:$8 sps:$4 sm:$0xff]   ;;  %v14174_v13 = vld [vmem:[#allocation2 + $0x7d0] ss:$8 sps:$4 sm:$0xff]  }
 0xf5d   :  { %v7727_v27 = vpop.f32.mrf.mxu0  ;;  %v14175_v54 = vld [vmem:[#allocation2 + $0x7e0] ss:$8 sps:$4 sm:$0xff]  }
 0xf5f   :  { %v7729_v22 = vpop.f32.mrf.mxu0 }
 0xf61   :  { %v7731_v29 = vpop.f32.mrf.mxu0 }
 0xf62   :  { %8000 = vmatmul.mubr.bf16.gmra.mxu1 %v14135_v62  ;;  %8304 = vmatmul.mubr.bf16.gmra.mxu0 %v14138_v42  ;;  %v8420_v26 = vpack.c.bf16 %v7731_v29, %v7727_v27  ;;  %v14165_v27 = vld [vmem:[#allocation2 + $0x730] ss:$8 sps:$4 sm:$0xff]   ;;  %v8414_v62 = vpack.c.bf16 %v17658_v38, %v17644_v20  ;;  %v8413_v42 = vpack.c.bf16 %v17642_v10, %v17628_v63  ;;  %v14177_v63 = vld [vmem:[#allocation2 + $0x7e4] ss:$8 sps:$4 sm:$0xff]   ;;  %v14178_v20 = vld [vmem:[#allocation2 + $0x7f4] ss:$8 sps:$4 sm:$0xff]  }
 0xf63   :  { %v7733_v61 = vpop.f32.mrf.mxu0  ;;  %12179 = vmatprep.mubr.msk.bf16.mxu1 %vm1199_vm2, %v14139_v53  ;;  %12206 = vmatprep.mubr.msk.bf16.mxu0 %vm1199_vm2, %v14142_v37  ;;  %v14193_v38 = vld [vmem:[#allocation28 + $0x38] sm:$0xff]   ;;  %v18870_v53 = vmov 0.0  }
 0xf64   :  { %v8421_v19 = vpack.c.bf16 %v7733_v61, %v7729_v22  ;;  %v14184_v37 = vld [vmem:[#allocation2 + $0x814] ss:$8 sps:$4 sm:$0xff]  }
 0xf65   :  { %v7737_v24 = vpop.f32.mrf.mxu0  ;;  %v14203_v29 = vld [vmem:[#allocation28 + $0x18] sm:$0xff]   ;;  %v14204_v61 = vld [vmem:[#allocation28 + $0x10] sm:$0xff]  }
 0xf67   :  { %v7739_v57 = vpop.f32.mrf.mxu0 }
 0xf69   :  { %v7741_v34 = vpop.f32.mrf.mxu0 }
 0xf6a   :  { %8010 = vmatmul.mubr.bf16.gmra.mxu1 %v14141_v60  ;;  %8314 = vmatmul.mubr.bf16.gmra.mxu0 %v14144_v4  ;;  %v8422_v3 = vpack.c.bf16 %v7741_v34, %v7737_v24  ;;  %v14186_v24 = vld [vmem:[#allocation2 + $0x810] ss:$8 sps:$4 sm:$0xff]   ;;  %v14187_v60 = vld [vmem:[#allocation2 + $0x824] ss:$8 sps:$4 sm:$0xff]  }
 0xf6b   :  { %v7743_v58 = vpop.f32.mrf.mxu0  ;;  %12180 = vmatprep.mubr.msk.bf16.mxu1 %vm1199_vm2, %v14145_v18  ;;  %12207 = vmatprep.mubr.msk.bf16.mxu0 %vm1199_vm2, %v14148_v32  ;;  %v14208_v4 = vld [vmem:[#allocation28 + $0x8] sm:$0xff]   ;;  %v14190_v32 = vld [vmem:[#allocation2 + $0x834] ss:$8 sps:$4 sm:$0xff]   ;;  %v14192_v34 = vld [vmem:[#allocation2 + $0x830] ss:$8 sps:$4 sm:$0xff]  }
 0xf6c   :  { %v8423_v6 = vpack.c.bf16 %v7743_v58, %v7739_v57  ;;  %v14209_v57 = vld [vmem:[#allocation28] sm:$0xff]  }
 0xf6d   :  { %v7747_v2 = vpop.f32.mrf.mxu0  ;;  %v14189_v18 = vld [vmem:[#allocation2 + $0x820] ss:$8 sps:$4 sm:$0xff]   ;;  %v14195_v58 = vld [vmem:[#allocation2 + $0x844] ss:$8 sps:$4 sm:$0xff]  }
 0xf6f   :  { %v7749_v16 = vpop.f32.mrf.mxu0 }
 0xf71   :  { %v7751_v30 = vpop.f32.mrf.mxu0 }
 0xf72   :  { %8020 = vmatmul.mubr.bf16.gmra.mxu1 %v14147_v0  ;;  %8324 = vmatmul.mubr.bf16.gmra.mxu0 %v14150_v9  ;;  %v8424_v28 = vpack.c.bf16 %v7751_v30, %v7747_v2  ;;  %v14197_v2 = vld [vmem:[#allocation2 + $0x840] ss:$8 sps:$4 sm:$0xff]   ;;  %v14210_v0 = vld [vmem:[#allocation29 + $0x78] sm:$0xff]  }
 0xf73   :  { %v7753_v41 = vpop.f32.mrf.mxu0  ;;  %12181 = vmatprep.mubr.msk.bf16.mxu1 %vm1199_vm2, %v14151_v52  ;;  %12208 = vmatprep.mubr.msk.bf16.mxu0 %vm1199_vm2, %v14154_v55  ;;  %v14200_v9 = vld [vmem:[#allocation2 + $0x854] ss:$8 sps:$4 sm:$0xff]   ;;  %v14202_v30 = vld [vmem:[#allocation2 + $0x850] ss:$8 sps:$4 sm:$0xff]  }
 0xf74   :  { %v8425_v40 = vpack.c.bf16 %v7753_v41, %v7749_v16  ;;  %v14211_v16 = vld [vmem:[#allocation29 + $0x38] sm:$0xff]   ;;  %12588 = vmatprep.subr.bf16.mxu0 %v14210_v0  ;;  %v14212_v52 = vld [vmem:[#allocation29 + $0x70] sm:$0xff]   ;;  %v14214_v41 = vld [vmem:[#allocation29 + $0x68] sm:$0xff]  }
 0xf75   :  { %v7757_v56 = vpop.f32.mrf.mxu0  ;;  %12589 = vmatpush3.bf16.msra.mxu0 %v14211_v16  ;;  %v14213_v55 = vld [vmem:[#allocation29 + $0x30] sm:$0xff]  }
 0xf76   :  { %8555 = vmatprep.subr.bf16.mxu1 %v8425_v40  ;;  %12590 = vmatprep.subr.bf16.mxu0 %v14212_v52  ;;  %v14205_v40 = vld [vmem:[#allocation2 + $0x864] ss:$8 sps:$4 sm:$0xff]  }
 0xf77   :  { %8556 = vmatpush1.bf16.msra.mxu1 %v8424_v28  ;;  %v7759_v7 = vpop.f32.mrf.mxu0  ;;  %v14215_v28 = vld [vmem:[#allocation29 + $0x28] sm:$0xff]  }
 0xf78   :  { %8557 = vmatprep.subr.bf16.mxu1 %v8423_v6  ;;  %v14216_v6 = vld [vmem:[#allocation29 + $0x60] sm:$0xff]  }
 0xf79   :  { %v7761_v22 = vpop.f32.mrf.mxu0  ;;  %12591 = vmatpush3.bf16.msra.mxu0 %v14213_v55 }
 0xf7a   :  { %8030 = vmatmul.mubr.bf16.gmra.mxu1 %v14153_v45  ;;  %8334 = vmatmul.mubr.bf16.gmra.mxu0 %v14156_v48  ;;  %v8426_v8 = vpack.c.bf16 %v7761_v22, %v7757_v56  ;;  %v14217_v45 = vld [vmem:[#allocation29 + $0x20] sm:$0xff]  }
 0xf7b   :  { %8558 = vmatpush1.bf16.msra.mxu1 %v8422_v3  ;;  %12182 = vmatprep.mubr.msk.bf16.mxu1 %vm1199_vm2, %v14157_v46  ;;  %v7763_v44 = vpop.f32.mrf.mxu0  ;;  %v14207_v48 = vld [vmem:[#allocation2 + $0x860] ss:$8 sps:$4 sm:$0xff]   ;;  %v14218_v46 = vld [vmem:[#allocation29 + $0x58] sm:$0xff]   ;;  %v14220_v3 = vld [vmem:[#allocation29 + $0x50] sm:$0xff]  }
 0xf7c   :  { %8559 = vmatprep.subr.bf16.mxu1 %v8421_v19  ;;  %12209 = vmatprep.mubr.msk.bf16.mxu0 %vm1199_vm2, %v14160_v1  ;;  %v8427_v10 = vpack.c.bf16 %v7763_v44, %v7759_v7  ;;  %v14219_v1 = vld [vmem:[#allocation29 + $0x18] sm:$0xff]   ;;  %v14221_v19 = vld [vmem:[#allocation29 + $0x10] sm:$0xff]   ;;  %v18875_v56 = vld [vmem:[#allocation112_spill] sm:$0xff] }
 0xf7d   :  { %12592 = vmatprep.subr.bf16.mxu0 %v14214_v41 }
 0xf7e   :  { %12593 = vmatpush3.bf16.msra.mxu0 %v14215_v28 }
 0xf7f   :  { %8560 = vmatpush1.bf16.msra.mxu1 %v8420_v26  ;;  %12594 = vmatprep.subr.bf16.mxu0 %v14216_v6  ;;  %v14222_v26 = vld [vmem:[#allocation29 + $0x48] sm:$0xff]  }
 0xf80   :  { %8561 = vmatprep.subr.bf16.mxu1 %v8419_v17  ;;  %v14223_v17 = vld [vmem:[#allocation29 + $0x8] sm:$0xff]  }
 0xf82   :  { %8040 = vmatmul.mubr.bf16.gmra.mxu1 %v14159_v11  ;;  %8344 = vmatmul.mubr.bf16.gmra.mxu0 %v14162_v50  ;;  %v18871_v11 = vld [vmem:[#allocation108_spill] sm:$0xff] }
 0xf83   :  { %8562 = vmatpush1.bf16.msra.mxu1 %v8418_v43  ;;  %12183 = vmatprep.mubr.msk.bf16.mxu1 %vm1199_vm2, %v14163_v49  ;;  %v14224_v50 = vld [vmem:[#allocation29 + $0x40] sm:$0xff]   ;;  %v18873_v43 = vld [vmem:[#allocation110_spill] sm:$0xff] }
 0xf84   :  { %8563 = vmatprep.subr.bf16.mxu1 %v8417_v31  ;;  %12210 = vmatprep.mubr.msk.bf16.mxu0 %vm1199_vm2, %v14166_v39  ;;  %v14225_v49 = vld [vmem:[#allocation29] sm:$0xff]   ;;  %v18872_v39 = vld [vmem:[#allocation109_spill] sm:$0xff] }
 0xf85   :  { %12595 = vmatpush3.bf16.msra.mxu0 %v14217_v45  ;;  %v18874_v31 = vld [vmem:[#allocation111_spill] sm:$0xff] }
 0xf86   :  { %12596 = vmatprep.subr.bf16.mxu0 %v14218_v46 }
 0xf87   :  { %8564 = vmatpush1.bf16.msra.mxu1 %v8416_v5  ;;  %v18876_v5 = vld [vmem:[#allocation113_spill] sm:$0xff] }
 0xf88   :  { %8565 = vmatprep.subr.bf16.mxu1 %v8415_v59 }
 0xf89   :  { %12597 = vmatpush3.bf16.msra.mxu0 %v14219_v1 }
 0xf8a   :  { %8050 = vmatmul.mubr.bf16.gmra.mxu1 %v14165_v27  ;;  %8354 = vmatmul.mubr.bf16.gmra.mxu0 %v14168_v33  ;;  %v18877_v27 = vld [vmem:[#allocation105_spill] sm:$0xff] }
 0xf8b   :  { %8566 = vmatpush1.bf16.msra.mxu1 %v8414_v62  ;;  %12184 = vmatprep.mubr.msk.bf16.mxu1 %vm1199_vm2, %v14169_v12 }
 0xf8c   :  { %8567 = vmatprep.subr.bf16.mxu1 %v8413_v42  ;;  %12211 = vmatprep.mubr.msk.bf16.mxu0 %vm1199_vm2, %v14172_v21 }
 0xf8d   :  { %12598 = vmatprep.subr.bf16.mxu0 %v14220_v3 }
 0xf8e   :  { %12599 = vmatpush3.bf16.msra.mxu0 %v14221_v19 }
 0xf8f   :  { %8568 = vmatpush1.bf16.msra.mxu1 %v8412_v36  ;;  %v14183_v36 = vld [vmem:[#allocation2 + $0x800] ss:$8 sps:$4 sm:$0xff]   ;;  %12600 = vmatprep.subr.bf16.mxu0 %v14222_v26 }
 0xf90   :  { %8569 = vmatprep.subr.bf16.mxu1 %v8411_v25  ;;  %v18878_v25 = vld [vmem:[#allocation106_spill] sm:$0xff]  ;;  %v7766_v26 = vld [vmem:[%s18880_s21] sm:$0xff] }
 0xf92   :  { %8060 = vmatmul.mubr.bf16.gmra.mxu1 %v14171_v51  ;;  %8364 = vmatmul.mubr.bf16.gmra.mxu0 %v14174_v13 }
 0xf93   :  { %8570 = vmatpush1.bf16.msra.mxu1 %v8410_v14  ;;  %12230 = vmatprep.mubr.msk.bf16.mxu1 %vm1199_vm2, %v14177_v63  ;;  %v14199_v14 = vld [vmem:[#allocation28 + $0x20] sm:$0xff]  }
 0xf94   :  { %8585 = vmatprep.subr.bf16.mxu1 %v8427_v10  ;;  %12601 = vmatpush3.bf16.msra.mxu0 %v14223_v17 }
 0xf95   :  { %12602 = vmatprep.subr.bf16.mxu0 %v14224_v50  ;;  %v7767_v50 = vld [vmem:[%s18880_s21 + $0x8] sm:$0xff] }
 0xf97   :  { %8586 = vmatpush2.bf16.msra.mxu1 %v8426_v8 }
 0xf98   :  { %13085 = vmatprep.subr.bf16.mxu1 %v18870_v53  ;;  %12603 = vmatpush3.bf16.msra.mxu0 %v14225_v49  ;;  %v7768_v49 = vld [vmem:[%s18880_s21 + $0x10] sm:$0xff] }
 0xf9a   :  { %8588 = vmatmul.mubr.bf16.vlgmr.msra.gmra.mxu1 %v14175_v54  ;;  %v18879_v54 = vld [vmem:[#allocation119_spill] sm:$0xff] }
 0xf9b   :  { %12231 = vmatprep.mubr.msk.bf16.mxu1 %vm1199_vm2, %v14178_v20  ;;  %13086 = vmatpush3.bf16.msra.mxu1 %v14193_v38 }
 0xf9c   :  { %13087 = vmatprep.subr.bf16.mxu1 %v18870_v53 }
 0xf9f   :  { %13088 = vmatpush3.bf16.msra.mxu1 %v14194_v47 }
 0xfa0   :  { %13089 = vmatprep.subr.bf16.mxu1 %v18870_v53 }
 0xfa2   :  { %8598 = vmatmul.mubr.bf16.gmra.mxu1 %v14180_v35 }
 0xfa3   :  { %12232 = vmatprep.mubr.msk.bf16.mxu1 %vm1199_vm2, %v14181_v23  ;;  %13090 = vmatpush3.bf16.msra.mxu1 %v14198_v15 }
 0xfa4   :  { %13091 = vmatprep.subr.bf16.mxu1 %v18870_v53 }
 0xfa7   :  { %13092 = vmatpush3.bf16.msra.mxu1 %v14199_v14 }
 0xfa8   :  { %13093 = vmatprep.subr.bf16.mxu1 %v18870_v53 }
 0xfaa   :  { %8608 = vmatmul.mubr.bf16.gmra.mxu1 %v14183_v36 }
 0xfab   :  { %12233 = vmatprep.mubr.msk.bf16.mxu1 %vm1199_vm2, %v14184_v37  ;;  %13094 = vmatpush3.bf16.msra.mxu1 %v14203_v29 }
 0xfac   :  { %13095 = vmatprep.subr.bf16.mxu1 %v18870_v53 }
 0xfaf   :  { %13096 = vmatpush3.bf16.msra.mxu1 %v14204_v61 }
 0xfb0   :  { %13097 = vmatprep.subr.bf16.mxu1 %v18870_v53 }
 0xfb2   :  { %8618 = vmatmul.mubr.bf16.gmra.mxu1 %v14186_v24 }
 0xfb3   :  { %12234 = vmatprep.mubr.msk.bf16.mxu1 %vm1199_vm2, %v14187_v60  ;;  %13098 = vmatpush3.bf16.msra.mxu1 %v14208_v4 }
 0xfb4   :  { %13099 = vmatprep.subr.bf16.mxu1 %v18870_v53 }
 0xfb7   :  { %13100 = vmatpush3.bf16.msra.mxu1 %v14209_v57 }
 0xfb8   :  { %13137 = vmatprep.subr.bf16.mxu1 %v18870_v53 }
 0xfba   :  { %8628 = vmatmul.mubr.bf16.gmra.mxu1 %v14189_v18 }
 0xfbb   :  { %12235 = vmatprep.mubr.msk.bf16.mxu1 %vm1199_vm2, %v14190_v32 }
 0xfc2   :  { %8638 = vmatmul.mubr.bf16.gmra.mxu1 %v14192_v34 }
 0xfc3   :  { %12236 = vmatprep.mubr.msk.bf16.mxu1 %vm1199_vm2, %v14195_v58 }
 0xfca   :  { %8648 = vmatmul.mubr.bf16.gmra.mxu1 %v14197_v2 }
 0xfcb   :  { %12237 = vmatprep.mubr.msk.bf16.mxu1 %vm1199_vm2, %v14200_v9 }
 0xfd2   :  { %8658 = vmatmul.mubr.bf16.gmra.mxu1 %v14202_v30 }
 0xfd3   :  { %12238 = vmatprep.mubr.msk.bf16.mxu1 %vm1199_vm2, %v14205_v40 }
 0xfda   :  { %8668 = vmatmul.mubr.bf16.gmra.mxu1 %v14207_v48 }
 0xfdb   :  { %13101 = vmatprep.mubr.msk.bf16.mxu1 %vm15303_vm0, %v18870_v53 }
 0xfe2   :  { %13102 = vmatmul.mubr.bf16.vlgmr.msra.gmra.mxu1 %v18871_v11 }
 0xfe3   :  { %13105 = vmatprep.mubr.msk.bf16.mxu1 %vm15303_vm0, %v18870_v53 }
 0xfea   :  { %13106 = vmatmul.mubr.bf16.gmra.mxu1 %v18872_v39 }
 0xfeb   :  { %13109 = vmatprep.mubr.msk.bf16.mxu1 %vm15303_vm0, %v18870_v53 }
 0xff2   :  { %13110 = vmatmul.mubr.bf16.gmra.mxu1 %v18873_v43 }
 0xff3   :  { %13113 = vmatprep.mubr.msk.bf16.mxu1 %vm15303_vm0, %v18870_v53 }
 0xffa   :  { %13114 = vmatmul.mubr.bf16.gmra.mxu1 %v18874_v31  ;;  %v7769_v31 = vld [vmem:[%s18880_s21 + $0x18] sm:$0xff] }
 0xffb   :  { %13117 = vmatprep.mubr.msk.bf16.mxu1 %vm15303_vm0, %v18870_v53 }
0x1002   :  { %13118 = vmatmul.mubr.bf16.gmra.mxu1 %v18875_v56 }
0x1003   :  { %13121 = vmatprep.mubr.msk.bf16.mxu1 %vm15303_vm0, %v18870_v53 }
0x100a   :  { %13122 = vmatmul.mubr.bf16.gmra.mxu1 %v18876_v5 }
0x100b   :  { %13125 = vmatprep.mubr.msk.bf16.mxu1 %vm15303_vm0, %v18870_v53 }
0x1012   :  { %v7981_v59 = vpop.f32.mrf.mxu1  ;;  %13126 = vmatmul.mubr.bf16.gmra.mxu1 %v18877_v27  ;;  %v17765_v33 = vpop.f32.mrf.mxu0 }
0x1013   :  { %13129 = vmatprep.mubr.msk.bf16.mxu1 %vm15303_vm0, %v18870_v53  ;;  %v8070_v43 = vadd.f32 %v7981_v59, %v7766_v26 }
0x1014   :  { %v7983_v7 = vpop.f32.mrf.mxu1  ;;  %v17769_v12 = vpop.f32.mrf.mxu0 }
0x1015   :  { %v8071_v27 = vadd.f32 %v7983_v7, %v7767_v50  ;;  %v7772_v7 = vld [vmem:[%s18880_s21 + $0x30] sm:$0xff] }
0x1016   :  { %v7985_v21 = vpop.f32.mrf.mxu1  ;;  %v17773_v42 = vpop.f32.mrf.mxu0 }
0x1017   :  { %v8375_v59 = vadd.f32 %v17769_v12, %v8071_v27 }
0x1018   :  { %v17771_v62 = vpop.f32.mrf.mxu1  ;;  %v17780_v51 = vpop.f32.mrf.mxu0 }
0x101a   :  { %v17775_v22 = vpop.f32.mrf.mxu1  ;;  %13130 = vmatmul.mubr.bf16.gmra.mxu1 %v18878_v25  ;;  %v17786_v63 = vpop.f32.mrf.mxu0  ;;  %v8072_v25 = vadd.f32 %v7985_v21, %v7768_v49 }
0x101b   :  { %13133 = vmatprep.mubr.msk.bf16.mxu1 %vm15303_vm0, %v18870_v53 }
0x101c   :  { %v17782_v13 = vpop.f32.mrf.mxu1  ;;  %v17795_v20 = vpop.f32.mrf.mxu0  ;;  %v8376_v26 = vadd.f32 %v17773_v42, %v8072_v25 }
0x101e   :  { %v17784_v44 = vpop.f32.mrf.mxu1  ;;  %v17801_v35 = vpop.f32.mrf.mxu0 }
0x101f   :  { %v8076_v12 = vadd.f32 %v17784_v44, %v7772_v7 }
0x1020   :  { %v17788_v10 = vpop.f32.mrf.mxu1  ;;  %v17807_v14 = vpop.f32.mrf.mxu0 }
0x1021   :  { %v8380_v44 = vadd.f32 %v17801_v35, %v8076_v12  ;;  %v14226_v35 = vld [vmem:[#allocation34 + $0xa8] ss:$12 sps:$4 sm:$0xff]   ;;  %v14229_v12 = vld [vmem:[#allocation34 + $0xb0] ss:$12 sps:$4 sm:$0xff]  }
0x1022   :  { %v17790_v8 = vpop.f32.mrf.mxu1  ;;  %13134 = vmatmul.mubr.bf16.gmra.mxu1 %v18879_v54  ;;  %v17813_v29 = vpop.f32.mrf.mxu0 }
0x1023   :  { %13153 = vmatprep.mubr.msk.bf16.mxu1 %vm15303_vm0, %v18870_v53  ;;  %13138 = vmatpush3.bf16.msra.mxu1 %v14229_v12 }
0x1024   :  { %v17797_v38 = vpop.f32.mrf.mxu1  ;;  %v17819_v60 = vpop.f32.mrf.mxu0  ;;  %13139 = vmatprep.subr.bf16.mxu1 %v18870_v53 }
0x1026   :  { %v17799_v47 = vpop.f32.mrf.mxu1  ;;  %v17825_v18 = vpop.f32.mrf.mxu0 }
0x1028   :  { %v17803_v23 = vpop.f32.mrf.mxu1  ;;  %v17831_v58 = vpop.f32.mrf.mxu0 }
0x102a   :  { %v17805_v15 = vpop.f32.mrf.mxu1  ;;  %v17837_v9 = vpop.f32.mrf.mxu0 }
0x102c   :  { %v17809_v36 = vpop.f32.mrf.mxu1  ;;  %v17843_v55 = vpop.f32.mrf.mxu0 }
0x102e   :  { %v17811_v37 = vpop.f32.mrf.mxu1  ;;  %v17849_v40 = vpop.f32.mrf.mxu0 }
0x1030   :  { %v17815_v61 = vpop.f32.mrf.mxu1  ;;  %v17855_v45 = vpop.f32.mrf.mxu0 }
0x1032   :  { %v17817_v24 = vpop.f32.mrf.mxu1  ;;  %v17861_v1 = vpop.f32.mrf.mxu0 }
0x1034   :  { %v17821_v4 = vpop.f32.mrf.mxu1  ;;  %v17868_v17 = vpop.f32.mrf.mxu0 }
0x1036   :  { %v17823_v57 = vpop.f32.mrf.mxu1  ;;  %v17877_v56 = vpop.f32.mrf.mxu0 }
0x1038   :  { %v17827_v32 = vpop.f32.mrf.mxu1 }
0x103a   :  { %v17829_v34 = vpop.f32.mrf.mxu1 }
0x103c   :  { %v17833_v2 = vpop.f32.mrf.mxu1 }
0x103e   :  { %v17835_v0 = vpop.f32.mrf.mxu1 }
0x1040   :  { %v17839_v16 = vpop.f32.mrf.mxu1 }
0x1042   :  { %v17841_v52 = vpop.f32.mrf.mxu1 }
0x1044   :  { %v17845_v30 = vpop.f32.mrf.mxu1 }
0x1046   :  { %v17847_v41 = vpop.f32.mrf.mxu1 }
0x1048   :  { %v17851_v28 = vpop.f32.mrf.mxu1 }
0x1049   :  { %18881 = vst [vmem:[#allocation122_spill] sm:$0xff] %v17851_v28 }
0x104a   :  { %v17853_v6 = vpop.f32.mrf.mxu1 }
0x104b   :  { %18882 = vst [vmem:[#allocation123_spill] sm:$0xff] %v17853_v6 }
0x104c   :  { %v17857_v48 = vpop.f32.mrf.mxu1 }
0x104d   :  { %18883 = vst [vmem:[#allocation117_spill] sm:$0xff] %v17857_v48 }
0x104e   :  { %v17859_v46 = vpop.f32.mrf.mxu1 }
0x104f   :  { %18884 = vst [vmem:[#allocation115_spill] sm:$0xff] %v17859_v46  ;;  %v17884_v46 = vpop.f32.mrf.mxu0 }
0x1050   :  { %v17863_v3 = vpop.f32.mrf.mxu1 }
0x1051   :  { %18885 = vst [vmem:[#allocation114_spill] sm:$0xff] %v17863_v3  ;;  %v7770_v3 = vld [vmem:[%s18880_s21 + $0x20] sm:$0xff] }
0x1052   :  { %v17865_v19 = vpop.f32.mrf.mxu1 }
0x1053   :  { %18886 = vst [vmem:[#allocation107_spill] sm:$0xff] %v17865_v19  ;;  %v8374_v19 = vadd.f32 %v17765_v33, %v8070_v43  ;;  %v7773_v43 = vld [vmem:[%s18880_s21 + $0x38] sm:$0xff] }
0x1054   :  { %v17870_v11 = vpop.f32.mrf.mxu1 }
0x1055   :  { %18887 = vst [vmem:[#allocation118_spill] sm:$0xff] %v17870_v11  ;;  %v8073_v11 = vadd.f32 %v17771_v62, %v7769_v31  ;;  %v17894_v31 = vpop.f32.mrf.mxu0 }
0x1056   :  { %v17874_v39 = vpop.f32.mrf.mxu1 }
0x1057   :  { %18888 = vst [vmem:[#allocation121_spill] sm:$0xff] %v17874_v39  ;;  %v7771_v39 = vld [vmem:[%s18880_s21 + $0x28] sm:$0xff]  ;;  %v8377_v33 = vadd.f32 %v17780_v51, %v8073_v11  ;;  %v8077_v51 = vadd.f32 %v17788_v10, %v7773_v43  ;;  %v17900_v25 = vpop.f32.mrf.mxu0 }
0x1058   :  { %v17879_v5 = vpop.f32.mrf.mxu1  ;;  %v8075_v62 = vadd.f32 %v17782_v13, %v7771_v39 }
0x1059   :  { %18889 = vst [vmem:[#allocation116_spill] sm:$0xff] %v17879_v5  ;;  %v8074_v5 = vadd.f32 %v17775_v22, %v7770_v3  ;;  %v8381_v10 = vadd.f32 %v17807_v14, %v8077_v51  ;;  %v17910_v43 = vpop.f32.mrf.mxu0  ;;  %v14232_v14 = vld [vmem:[#allocation34 + $0x94] ss:$12 sps:$4 sm:$0xff]  }
0x105a   :  { %v8589_v54 = vpop.f32.mrf.mxu1 }
0x105b   :  { %v8678_v6 = vadd.f32 %v8589_v54, %v8374_v19  ;;  %v8378_v22 = vadd.f32 %v17786_v63, %v8074_v5  ;;  %v7776_v5 = vld [vmem:[%s18880_s21 + $0x50] sm:$0xff] }
0x105c   :  { %v8591_v48 = vpop.f32.mrf.mxu1 }
0x105d   :  { %v8679_v50 = vadd.f32 %v8591_v48, %v8375_v59  ;;  %v8714_v42 = vmax.f32 %v8678_v6, 0.0  ;;  %v7774_v48 = vld [vmem:[%s18880_s21 + $0x40] sm:$0xff]  ;;  %v8379_v59 = vadd.f32 %v17795_v20, %v8075_v62  ;;  %v7775_v6 = vld [vmem:[%s18880_s21 + $0x48] sm:$0xff] }
0x105e   :  { %v8593_v21 = vpop.f32.mrf.mxu1  ;;  %v8078_v63 = vadd.f32 %v17790_v8, %v7774_v48  ;;  %v14228_v62 = vld [vmem:[#allocation34 + $0xac] ss:$12 sps:$4 sm:$0xff]   ;;  %v8080_v8 = vadd.f32 %v17799_v47, %v7776_v5  ;;  %v7778_v48 = vld [vmem:[%s18880_s21 + $0x60] sm:$0xff] }
0x105f   :  { %v8680_v49 = vadd.f32 %v8593_v21, %v8376_v26  ;;  %v8715_v11 = vmax.f32 %v8679_v50, 0.0  ;;  %v7777_v21 = vld [vmem:[%s18880_s21 + $0x58] sm:$0xff]  ;;  %9382 = vmatprep.subr.bf16.mxu0 %v14228_v62  ;;  %v7780_v5 = vld [vmem:[%s18880_s21 + $0x70] sm:$0xff] }
0x1060   :  { %v8595_v28 = vpop.f32.mrf.mxu1  ;;  %v8081_v51 = vadd.f32 %v17803_v23, %v7777_v21  ;;  %v14230_v47 = vld [vmem:[#allocation34 + $0x90] ss:$12 sps:$4 sm:$0xff]   ;;  %v7779_v23 = vld [vmem:[%s18880_s21 + $0x68] sm:$0xff]  ;;  %v8084_v62 = vadd.f32 %v17811_v37, %v7780_v5 }
0x1061   :  { %v8716_v19 = vmax.f32 %v8680_v49, 0.0  ;;  %v8681_v27 = vadd.f32 %v8595_v28, %v8377_v33  ;;  %v8079_v49 = vadd.f32 %v17797_v38, %v7775_v6  ;;  %v14233_v38 = vld [vmem:[#allocation34 + $0x98] ss:$12 sps:$4 sm:$0xff]   ;;  %v8384_v6 = vadd.f32 %v17825_v18, %v8080_v8  ;;  %v14238_v37 = vld [vmem:[#allocation34 + $0x60] ss:$12 sps:$4 sm:$0xff]  }
0x1062   :  { %v8599_v3 = vpop.f32.mrf.mxu1  ;;  %13140 = vmatpush3.bf16.msra.mxu1 %v14233_v38  ;;  %v8385_v21 = vadd.f32 %v17831_v58, %v8081_v51  ;;  %v7781_v18 = vld [vmem:[%s18880_s21 + $0x78] sm:$0xff] }
0x1063   :  { %v8750_v13 = vpack.c.bf16 %v8716_v19, %v8714_v42  ;;  %v8717_v39 = vmax.f32 %v8681_v27, 0.0  ;;  %v8682_v28 = vadd.f32 %v8599_v3, %v8378_v22  ;;  %v8382_v22 = vadd.f32 %v17813_v29, %v8078_v63  ;;  %v14236_v29 = vld [vmem:[#allocation34 + $0x7c] ss:$12 sps:$4 sm:$0xff]   ;;  %13141 = vmatprep.subr.bf16.mxu1 %v18870_v53 }
0x1064   :  { %v8601_v54 = vpop.f32.mrf.mxu1  ;;  %v8082_v63 = vadd.f32 %v17805_v15, %v7778_v48  ;;  %v14240_v15 = vld [vmem:[#allocation34 + $0x64] ss:$12 sps:$4 sm:$0xff]  }
0x1065   :  { %v8751_v26 = vpack.c.bf16 %v8717_v39, %v8715_v11  ;;  %v8683_v33 = vadd.f32 %v8601_v54, %v8379_v59  ;;  %v8718_v42 = vmax.f32 %v8682_v28, 0.0  ;;  %v17917_v54 = vpop.f32.mrf.mxu0 }
0x1066   :  { %v8603_v7 = vpop.f32.mrf.mxu1 }
0x1067   :  { %v8684_v50 = vadd.f32 %v8603_v7, %v8380_v44  ;;  %8935 = vmatprep.mubr.bf16.mxu0 %v8751_v26  ;;  %v8719_v11 = vmax.f32 %v8683_v33, 0.0  ;;  %v8383_v44 = vadd.f32 %v17819_v60, %v8079_v49  ;;  %v8083_v60 = vadd.f32 %v17809_v36, %v7779_v23  ;;  %v17927_v49 = vpop.f32.mrf.mxu0  ;;  %v14241_v36 = vld [vmem:[#allocation34 + $0x68] ss:$12 sps:$4 sm:$0xff]  }
0x1068   :  { %v8605_v20 = vpop.f32.mrf.mxu1  ;;  %8936 = vmatmul.mubr.bf16.vlgmr.msra.gmra.mxu0 %v8750_v13 }
0x1069   :  { %v8720_v19 = vmax.f32 %v8684_v50, 0.0  ;;  %v8685_v27 = vadd.f32 %v8605_v20, %v8381_v10  ;;  %9383 = vmatpush1.bf16.msra.mxu0 %v14226_v35  ;;  %v14237_v10 = vld [vmem:[#allocation34 + $0x80] ss:$12 sps:$4 sm:$0xff]   ;;  %v14234_v20 = vld [vmem:[#allocation34 + $0x78] ss:$12 sps:$4 sm:$0xff]   ;;  %v17935_v51 = vpop.f32.mrf.mxu0 }
0x106a   :  { %v8609_v3 = vpop.f32.mrf.mxu1  ;;  %9384 = vmatprep.subr.bf16.mxu0 %v14232_v14  ;;  %13142 = vmatpush3.bf16.msra.mxu1 %v14237_v10  ;;  %v7782_v14 = vld [vmem:[%s18880_s21 + $0x80] sm:$0xff] }
0x106b   :  { %v8752_v13 = vpack.c.bf16 %v8720_v19, %v8718_v42  ;;  %v8721_v39 = vmax.f32 %v8685_v27, 0.0  ;;  %v8686_v28 = vadd.f32 %v8609_v3, %v8382_v22  ;;  %v8386_v42 = vadd.f32 %v17837_v9, %v8082_v63  ;;  %13143 = vmatprep.subr.bf16.mxu1 %v18870_v53 }
0x106c   :  { %v8611_v59 = vpop.f32.mrf.mxu1  ;;  %v8085_v27 = vadd.f32 %v17815_v61, %v7781_v18  ;;  %v8387_v9 = vadd.f32 %v17843_v55, %v8083_v60  ;;  %v7785_v55 = vld [vmem:[%s18880_s21 + $0x98] sm:$0xff] }
0x106d   :  { %v8753_v26 = vpack.c.bf16 %v8721_v39, %v8719_v11  ;;  %v8687_v33 = vadd.f32 %v8611_v59, %v8383_v44  ;;  %9385 = vmatpush1.bf16.msra.mxu0 %v14230_v47  ;;  %v8722_v12 = vmax.f32 %v8686_v28, 0.0  ;;  %v8388_v11 = vadd.f32 %v17849_v40, %v8084_v62  ;;  %v7784_v59 = vld [vmem:[%s18880_s21 + $0x90] sm:$0xff] }
0x106e   :  { %v8613_v7 = vpop.f32.mrf.mxu1  ;;  %9386 = vmatprep.subr.bf16.mxu0 %v14236_v29  ;;  %v8086_v47 = vadd.f32 %v17817_v24, %v7782_v14  ;;  %13144 = vmatpush3.bf16.msra.mxu1 %v14241_v36  ;;  %v8389_v44 = vadd.f32 %v17855_v45, %v8085_v27  ;;  %v8088_v24 = vadd.f32 %v17823_v57, %v7784_v59  ;;  %v7789_v27 = vld [vmem:[%s18880_s21 + $0xb8] sm:$0xff] }
0x106f   :  { %v8688_v50 = vadd.f32 %v8613_v7, %v8384_v6  ;;  %8943 = vmatprep.mubr.bf16.mxu0 %v8753_v26  ;;  %v8723_v22 = vmax.f32 %v8687_v33, 0.0  ;;  %v17945_v26 = vpop.f32.mrf.mxu0  ;;  %13145 = vmatprep.subr.bf16.mxu1 %v18870_v53 }
0x1070   :  { %v8615_v35 = vpop.f32.mrf.mxu1  ;;  %8944 = vmatmul.mubr.bf16.gmra.mxu0 %v8752_v13  ;;  %v7783_v13 = vld [vmem:[%s18880_s21 + $0x88] sm:$0xff]  ;;  %v8390_v7 = vadd.f32 %v17861_v1, %v8086_v47  ;;  %v8392_v57 = vadd.f32 %v17877_v56, %v8088_v24 }
0x1071   :  { %v8724_v8 = vmax.f32 %v8688_v50, 0.0  ;;  %v8689_v58 = vadd.f32 %v8615_v35, %v8385_v21  ;;  %9387 = vmatpush1.bf16.msra.mxu0 %v14234_v20  ;;  %v8087_v28 = vadd.f32 %v17821_v4, %v7783_v13  ;;  %v8089_v21 = vadd.f32 %v17827_v32, %v7785_v55  ;;  %v7786_v4 = vld [vmem:[%s18880_s21 + $0xa0] sm:$0xff]  ;;  %v17952_v60 = vpop.f32.mrf.mxu0  ;;  %v7791_v47 = vld [vmem:[%s18880_s21 + $0xc8] sm:$0xff] }
0x1072   :  { %v8619_v19 = vpop.f32.mrf.mxu1  ;;  %9388 = vmatprep.subr.bf16.mxu0 %v14240_v15  ;;  %v7787_v15 = vld [vmem:[%s18880_s21 + $0xa8] sm:$0xff]  ;;  %v8090_v1 = vadd.f32 %v17829_v34, %v7786_v4  ;;  %v8095_v55 = vadd.f32 %v17845_v30, %v7791_v47 }
0x1073   :  { %v8754_v3 = vpack.c.bf16 %v8724_v8, %v8722_v12  ;;  %v8725_v38 = vmax.f32 %v8689_v58, 0.0  ;;  %v8690_v61 = vadd.f32 %v8619_v19, %v8386_v42  ;;  %v8391_v35 = vadd.f32 %v17868_v17, %v8087_v28  ;;  %v7788_v8 = vld [vmem:[%s18880_s21 + $0xb0] sm:$0xff]  ;;  %v17962_v14 = vpop.f32.mrf.mxu0  ;;  %v7799_v47 = vld [vmem:[%s18880_s21 + $0x108] sm:$0xff] }
0x1074   :  { %v8621_v48 = vpop.f32.mrf.mxu1  ;;  %v8393_v32 = vadd.f32 %v17884_v46, %v8089_v21  ;;  %v8091_v36 = vadd.f32 %v17833_v2, %v7787_v15  ;;  %v8092_v56 = vadd.f32 %v17835_v0, %v7788_v8  ;;  %v8394_v46 = vadd.f32 %v17894_v31, %v8090_v1  ;;  %v7792_v31 = vld [vmem:[%s18880_s21 + $0xd0] sm:$0xff]  ;;  %v7794_v21 = vld [vmem:[%s18880_s21 + $0xe0] sm:$0xff] }
0x1075   :  { %v8755_v39 = vpack.c.bf16 %v8725_v38, %v8723_v22  ;;  %v8691_v6 = vadd.f32 %v8621_v48, %v8387_v9  ;;  %9389 = vmatpush1.bf16.msra.mxu0 %v14238_v37  ;;  %v8726_v63 = vmax.f32 %v8690_v61, 0.0  ;;  %v8093_v37 = vadd.f32 %v17839_v16, %v7789_v27  ;;  %v7790_v48 = vld [vmem:[%s18880_s21 + $0xc0] sm:$0xff]  ;;  %v8357_v13 = vpop.f32.mrf.mxu0 }
0x1076   :  { %v8623_v29 = vpop.f32.mrf.mxu1  ;;  %v8396_v0 = vadd.f32 %v17910_v43, %v8092_v56  ;;  %v8096_v43 = vadd.f32 %v17847_v41, %v7792_v31 }
0x1077   :  { %v8692_v23 = vadd.f32 %v8623_v29, %v8388_v11  ;;  %8951 = vmatprep.mubr.bf16.mxu0 %v8755_v39  ;;  %v8727_v33 = vmax.f32 %v8691_v6, 0.0  ;;  %v8395_v39 = vadd.f32 %v17900_v25, %v8091_v36  ;;  %v8397_v16 = vadd.f32 %v17917_v54, %v8093_v37  ;;  %v8359_v24 = vpop.f32.mrf.mxu0  ;;  %v7797_v36 = vld [vmem:[%s18880_s21 + $0xf8] sm:$0xff]  ;;  %v7798_v37 = vld [vmem:[%s18880_s21 + $0x100] sm:$0xff] }
0x1078   :  { %v8625_v40 = vpop.f32.mrf.mxu1  ;;  %8952 = vmatmul.mubr.bf16.gmra.mxu0 %v8754_v3  ;;  %v8400_v41 = vadd.f32 %v17945_v26, %v8096_v43  ;;  %v18893_v26 = vld [vmem:[#allocation115_spill] sm:$0xff] }
0x1079   :  { %v8728_v5 = vmax.f32 %v8692_v23, 0.0  ;;  %v8693_v45 = vadd.f32 %v8625_v40, %v8389_v44  ;;  %v8094_v44 = vadd.f32 %v17841_v52, %v7790_v48  ;;  %v7793_v40 = vld [vmem:[%s18880_s21 + $0xd8] sm:$0xff] }
0x107a   :  { %v8629_v10 = vpop.f32.mrf.mxu1 }
0x107b   :  { %v8756_v50 = vpack.c.bf16 %v8728_v5, %v8726_v63  ;;  %v8729_v20 = vmax.f32 %v8693_v45, 0.0  ;;  %v8694_v62 = vadd.f32 %v8629_v10, %v8390_v7  ;;  %v8398_v45 = vadd.f32 %v17927_v49, %v8094_v44  ;;  %v18890_v7 = vld [vmem:[#allocation122_spill] sm:$0xff]  ;;  %v18895_v44 = vld [vmem:[#allocation107_spill] sm:$0xff] }
0x107c   :  { %v8631_v18 = vpop.f32.mrf.mxu1  ;;  %v8097_v10 = vadd.f32 %v18890_v7, %v7793_v40  ;;  %v7796_v49 = vld [vmem:[%s18880_s21 + $0xf0] sm:$0xff]  ;;  %v8102_v31 = vadd.f32 %v18895_v44, %v7798_v37 }
0x107d   :  { %v8757_v12 = vpack.c.bf16 %v8729_v20, %v8727_v33  ;;  %v8695_v42 = vadd.f32 %v8631_v18, %v8391_v35  ;;  %v8730_v22 = vmax.f32 %v8694_v62, 0.0  ;;  %v8399_v18 = vadd.f32 %v17935_v51, %v8095_v55  ;;  %v7795_v35 = vld [vmem:[%s18880_s21 + $0xe8] sm:$0xff]  ;;  %v18891_v62 = vld [vmem:[#allocation123_spill] sm:$0xff]  ;;  %v18896_v55 = vld [vmem:[#allocation118_spill] sm:$0xff] }
0x107e   :  { %v8633_v58 = vpop.f32.mrf.mxu1  ;;  %v8401_v8 = vadd.f32 %v17952_v60, %v8097_v10  ;;  %v8103_v40 = vadd.f32 %v18896_v55, %v7799_v47  ;;  %v18898_v10 = vld [vmem:[#allocation116_spill] sm:$0xff] }
0x107f   :  { %v8696_v19 = vadd.f32 %v8633_v58, %v8392_v57  ;;  %8959 = vmatprep.mubr.bf16.mxu0 %v8757_v12  ;;  %v8731_v9 = vmax.f32 %v8695_v42, 0.0  ;;  %v8098_v12 = vadd.f32 %v18891_v62, %v7794_v21  ;;  %v18892_v42 = vld [vmem:[#allocation117_spill] sm:$0xff] }
0x1080   :  { %v8635_v17 = vpop.f32.mrf.mxu1  ;;  %8960 = vmatmul.mubr.bf16.gmra.mxu0 %v8756_v50  ;;  %v8361_v50 = vpop.f32.mrf.mxu0  ;;  %v14254_v44 = vld [vmem:[#allocation34] ss:$12 sps:$4 sm:$0xff]  }
0x1081   :  { %v8732_v34 = vmax.f32 %v8696_v19, 0.0  ;;  %v8697_v3 = vadd.f32 %v8635_v17, %v8393_v32  ;;  %v8099_v19 = vadd.f32 %v18892_v42, %v7795_v35  ;;  %v8100_v17 = vadd.f32 %v18893_v26, %v7796_v49 }
0x1082   :  { %v8639_v38 = vpop.f32.mrf.mxu1  ;;  %v8365_v27 = vpop.f32.mrf.mxu0 }
0x1083   :  { %v8758_v2 = vpack.c.bf16 %v8732_v34, %v8730_v22  ;;  %v8733_v11 = vmax.f32 %v8697_v3, 0.0  ;;  %v8698_v59 = vadd.f32 %v8639_v38, %v8394_v46  ;;  %v8402_v3 = vadd.f32 %v17962_v14, %v8098_v12  ;;  %v18894_v46 = vld [vmem:[#allocation114_spill] sm:$0xff] }
0x1084   :  { %v8641_v61 = vpop.f32.mrf.mxu1  ;;  %v8101_v38 = vadd.f32 %v18894_v46, %v7797_v36 }
0x1085   :  { %v8759_v29 = vpack.c.bf16 %v8733_v11, %v8731_v9  ;;  %v8699_v23 = vadd.f32 %v8641_v61, %v8395_v39  ;;  %v8734_v63 = vmax.f32 %v8698_v59, 0.0  ;;  %v8367_v11 = vpop.f32.mrf.mxu0  ;;  %v8403_v39 = vadd.f32 %v8357_v13, %v8099_v19 }
0x1086   :  { %v8643_v6 = vpop.f32.mrf.mxu1  ;;  %v8405_v14 = vadd.f32 %v8361_v50, %v8101_v38  ;;  %v14248_v38 = vld [vmem:[#allocation34 + $0x34] ss:$12 sps:$4 sm:$0xff]  }
0x1087   :  { %v8700_v28 = vadd.f32 %v8643_v6, %v8396_v0  ;;  %8967 = vmatprep.mubr.bf16.mxu0 %v8759_v29  ;;  %v8735_v4 = vmax.f32 %v8699_v23, 0.0  ;;  %v8404_v0 = vadd.f32 %v8359_v24, %v8100_v17  ;;  %v7800_v6 = vld [vmem:[%s18880_s21 + $0x110] sm:$0xff]  ;;  %v8369_v43 = vpop.f32.mrf.mxu0 }
0x1088   :  { %v8645_v25 = vpop.f32.mrf.mxu1  ;;  %8968 = vmatmul.mubr.bf16.gmra.mxu0 %v8758_v2 }
0x1089   :  { %v8736_v5 = vmax.f32 %v8700_v28, 0.0  ;;  %v8701_v52 = vadd.f32 %v8645_v25, %v8397_v16  ;;  %v7801_v25 = vld [vmem:[%s18880_s21 + $0x118] sm:$0xff]  ;;  %v8371_v50 = vpop.f32.mrf.mxu0 }
0x108a   :  { %v8649_v54 = vpop.f32.mrf.mxu1  ;;  %v8105_v21 = vadd.f32 %v18898_v10, %v7801_v25 }
0x108b   :  { %v8760_v33 = vpack.c.bf16 %v8736_v5, %v8734_v63  ;;  %v8737_v30 = vmax.f32 %v8701_v52, 0.0  ;;  %v8702_v57 = vadd.f32 %v8649_v54, %v8398_v45  ;;  %v18897_v5 = vld [vmem:[#allocation121_spill] sm:$0xff]  ;;  %v8406_v54 = vadd.f32 %v8365_v27, %v8102_v31 }
0x108c   :  { %v8651_v20 = vpop.f32.mrf.mxu1  ;;  %v8104_v13 = vadd.f32 %v18897_v5, %v7800_v6  ;;  %v8409_v62 = vadd.f32 %v8371_v50, %v8105_v21  ;;  %v14257_v31 = vld [vmem:[#allocation34 + $0x8] ss:$12 sps:$4 sm:$0xff]  }
0x108d   :  { %v8761_v15 = vpack.c.bf16 %v8737_v30, %v8735_v4  ;;  %v8703_v58 = vadd.f32 %v8651_v20, %v8399_v18  ;;  %v8738_v56 = vmax.f32 %v8702_v57, 0.0  ;;  %v8407_v18 = vadd.f32 %v8367_v11, %v8103_v40  ;;  %v14252_v11 = vld [vmem:[#allocation34 + $0x1c] ss:$12 sps:$4 sm:$0xff]  }
0x108e   :  { %v8653_v1 = vpop.f32.mrf.mxu1 }
0x108f   :  { %v8704_v32 = vadd.f32 %v8653_v1, %v8400_v41  ;;  %8975 = vmatprep.mubr.bf16.mxu0 %v8761_v15  ;;  %v8739_v48 = vmax.f32 %v8703_v58, 0.0  ;;  %v8408_v41 = vadd.f32 %v8369_v43, %v8104_v13 }
0x1090   :  { %v8655_v51 = vpop.f32.mrf.mxu1  ;;  %8976 = vmatmul.mubr.bf16.gmra.mxu0 %v8760_v33 }
0x1091   :  { %v8740_v22 = vmax.f32 %v8704_v32, 0.0  ;;  %v8705_v34 = vadd.f32 %v8655_v51, %v8401_v8 }
0x1092   :  { %v8659_v60 = vpop.f32.mrf.mxu1 }
0x1093   :  { %v8762_v9 = vpack.c.bf16 %v8740_v22, %v8738_v56  ;;  %v8741_v2 = vmax.f32 %v8705_v34, 0.0  ;;  %v8706_v59 = vadd.f32 %v8659_v60, %v8402_v3  ;;  %v14244_v56 = vld [vmem:[#allocation34 + $0x4c] ss:$12 sps:$4 sm:$0xff]   ;;  %v14242_v34 = vld [vmem:[#allocation34 + $0x48] ss:$12 sps:$4 sm:$0xff]   ;;  %v18899_v60 = vmov 0  }
0x1094   :  { %v8661_v61 = vpop.f32.mrf.mxu1  ;;  %v14245_v3 = vld [vmem:[#allocation34 + $0x50] ss:$12 sps:$4 sm:$0xff]   ;;  %9390 = vmatprep.subr.bf16.mxu0 %v14244_v56 }
0x1095   :  { %v8763_v29 = vpack.c.bf16 %v8741_v2, %v8739_v48  ;;  %v8707_v23 = vadd.f32 %v8661_v61, %v8403_v39  ;;  %v8742_v24 = vmax.f32 %v8706_v59, 0.0  ;;  %9391 = vmatpush1.bf16.msra.mxu0 %v14242_v34  ;;  %13146 = vmatpush3.bf16.msra.mxu1 %v14245_v3  ;;  %v14246_v48 = vld [vmem:[#allocation34 + $0x30] ss:$12 sps:$4 sm:$0xff]   ;;  %v14250_v39 = vld [vmem:[#allocation34 + $0x18] ss:$12 sps:$4 sm:$0xff]  }
0x1096   :  { %v8663_v16 = vpop.f32.mrf.mxu1  ;;  %13147 = vmatprep.subr.bf16.mxu1 %v18870_v53  ;;  %9392 = vmatprep.subr.bf16.mxu0 %v14248_v38  ;;  %v14256_v59 = vld [vmem:[#allocation34 + $0x4] ss:$12 sps:$4 sm:$0xff]  }
0x1097   :  { %v8708_v28 = vadd.f32 %v8663_v16, %v8404_v0  ;;  %8983 = vmatprep.mubr.bf16.mxu0 %v8763_v29  ;;  %v8743_v4 = vmax.f32 %v8707_v23, 0.0  ;;  %v14253_v0 = vld [vmem:[#allocation34 + $0x20] ss:$12 sps:$4 sm:$0xff]  }
0x1098   :  { %v8665_v63 = vpop.f32.mrf.mxu1  ;;  %8984 = vmatmul.mubr.bf16.gmra.mxu0 %v8762_v9  ;;  %v14249_v9 = vld [vmem:[#allocation34 + $0x38] ss:$12 sps:$4 sm:$0xff]  }
0x1099   :  { %v8744_v52 = vmax.f32 %v8708_v28, 0.0  ;;  %v8709_v45 = vadd.f32 %v8665_v63, %v8405_v14  ;;  %9393 = vmatpush1.bf16.msra.mxu0 %v14246_v48  ;;  %13148 = vmatpush3.bf16.msra.mxu1 %v14249_v9 }
0x109a   :  { %v8669_v7 = vpop.f32.mrf.mxu1  ;;  %13149 = vmatprep.subr.bf16.mxu1 %v18870_v53  ;;  %9394 = vmatprep.subr.bf16.mxu0 %v14252_v11 }
0x109b   :  { %v8764_v33 = vpack.c.bf16 %v8744_v52, %v8742_v24  ;;  %v8745_v30 = vmax.f32 %v8709_v45, 0.0  ;;  %v8710_v35 = vadd.f32 %v8669_v7, %v8406_v54 }
0x109c   :  { %v8671_v20 = vpop.f32.mrf.mxu1 }
0x109d   :  { %v8765_v57 = vpack.c.bf16 %v8745_v30, %v8743_v4  ;;  %v8711_v12 = vadd.f32 %v8671_v20, %v8407_v18  ;;  %v8746_v8 = vmax.f32 %v8710_v35, 0.0  ;;  %9395 = vmatpush1.bf16.msra.mxu0 %v14250_v39  ;;  %13150 = vmatpush3.bf16.msra.mxu1 %v14253_v0 }
0x109e   :  { %v8673_v15 = vpop.f32.mrf.mxu1  ;;  %13151 = vmatprep.subr.bf16.mxu1 %v18870_v53  ;;  %9396 = vmatprep.subr.bf16.mxu0 %v14256_v59 }
0x109f   :  { %v8712_v49 = vadd.f32 %v8673_v15, %v8408_v41  ;;  %8991 = vmatprep.mubr.bf16.mxu0 %v8765_v57  ;;  %v8747_v19 = vmax.f32 %v8711_v12, 0.0  ;;  %v18041_v57 = vld [vmem:[#allocation31] ss:$0 sm:$0xff] }
0x10a0   :  { %v8675_v1 = vpop.f32.mrf.mxu1  ;;  %8992 = vmatmul.mubr.bf16.gmra.mxu0 %v8764_v33 }
0x10a1   :  { %v8748_v58 = vmax.f32 %v8712_v49, 0.0  ;;  %v8713_v32 = vadd.f32 %v8675_v1, %v8409_v62  ;;  %9397 = vmatpush1.bf16.msra.mxu0 %v14254_v44  ;;  %13152 = vmatpush3.bf16.msra.mxu1 %v14257_v31 }
0x10a2   :  { %v17999_v42 = vpop.f32.mrf.mxu1  ;;  %9764 = vmatprep.subr.bf16.mxu0 %v18899_v60  ;;  %10023 = vmatprep.subr.bf16.mxu1 %v18899_v60 }
0x10a3   :  { %v8766_v36 = vpack.c.bf16 %v8748_v58, %v8746_v8  ;;  %v8749_v27 = vmax.f32 %v8713_v32, 0.0 }
0x10a4   :  { %v13103_v51 = vpop.f32.mrf.mxu1 }
0x10a5   :  { %v8767_v26 = vpack.c.bf16 %v8749_v27, %v8747_v19 }
0x10a6   :  { %v18001_v17 = vpop.f32.mrf.mxu1 }
0x10a7   :  { %8999 = vmatprep.mubr.bf16.mxu0 %v8767_v26 }
0x10a8   :  { %9000 = vmatmul.mubr.bf16.gmra.mxu0 %v8766_v36  ;;  %v13104_v22 = vpop.f32.mrf.mxu1 }
0x10a9   :  { %9414 = vmatprep.mubr.bf16.mxu0 %v18899_v60 }
0x10aa   :  { %v18004_v46 = vpop.f32.mrf.mxu1 }
0x10ac   :  { %v13107_v37 = vpop.f32.mrf.mxu1 }
0x10ae   :  { %v18007_v2 = vpop.f32.mrf.mxu1 }
0x10b0   :  { %v13108_v61 = vpop.f32.mrf.mxu1 }
0x10b2   :  { %v18010_v47 = vpop.f32.mrf.mxu1 }
0x10b4   :  { %v13111_v29 = vpop.f32.mrf.mxu1 }
0x10b6   :  { %v18013_v6 = vpop.f32.mrf.mxu1 }
0x10b8   :  { %v13112_v16 = vpop.f32.mrf.mxu1 }
0x10ba   :  { %v18017_v14 = vpop.f32.mrf.mxu1 }
0x10bc   :  { %v13115_v23 = vpop.f32.mrf.mxu1 }
0x10be   :  { %v18019_v28 = vpop.f32.mrf.mxu1 }
0x10c0   :  { %v13116_v55 = vpop.f32.mrf.mxu1 }
0x10c2   :  { %v18021_v40 = vpop.f32.mrf.mxu1 }
0x10c4   :  { %v13119_v25 = vpop.f32.mrf.mxu1 }
0x10c6   :  { %v18023_v43 = vpop.f32.mrf.mxu1 }
0x10c8   :  { %v13120_v63 = vpop.f32.mrf.mxu1 }
0x10ca   :  { %v18025_v5 = vpop.f32.mrf.mxu1 }
0x10cc   :  { %v13123_v13 = vpop.f32.mrf.mxu1 }
0x10ce   :  { %v18027_v24 = vpop.f32.mrf.mxu1 }
0x10d0   :  { %v13124_v52 = vpop.f32.mrf.mxu1 }
0x10d2   :  { %v18029_v45 = vpop.f32.mrf.mxu1 }
0x10d4   :  { %v13127_v54 = vpop.f32.mrf.mxu1 }
0x10d6   :  { %v18031_v7 = vpop.f32.mrf.mxu1 }
0x10d8   :  { %v13128_v10 = vpop.f32.mrf.mxu1 }
0x10da   :  { %v18033_v21 = vpop.f32.mrf.mxu1 }
0x10dc   :  { %v13131_v4 = vpop.f32.mrf.mxu1 }
0x10de   :  { %v18035_v33 = vpop.f32.mrf.mxu1 }
0x10e0   :  { %v13132_v30 = vpop.f32.mrf.mxu1 }
0x10e2   :  { %v18037_v50 = vpop.f32.mrf.mxu1 }
0x10e4   :  { %v13135_v20 = vpop.f32.mrf.mxu1 }
0x10e6   :  { %v18039_v18 = vpop.f32.mrf.mxu1 }
0x10e8   :  { %v13136_v41 = vpop.f32.mrf.mxu1 }
0x1128   :  { %v12604_v35 = vpop.f32.mrf.mxu0 }
0x112a   :  { %v12605_v15 = vpop.f32.mrf.mxu0 }
0x112b   :  { %v12606_v62 = vadd.f32 %v12605_v15, %v12604_v35 }
0x112c   :  { %v12607_v12 = vpop.f32.mrf.mxu0 }
0x112d   :  { %v8938_v49 = vadd.f32 %v12606_v62, %v18041_v57 }
0x112e   :  { %v12608_v1 = vpop.f32.mrf.mxu0 }
0x112f   :  { %v12609_v8 = vadd.f32 %v12608_v1, %v12607_v12  ;;  %v9177_v32 = vadd.f32 %v17999_v42, %v8938_v49 }
0x1130   :  { %v12610_v58 = vpop.f32.mrf.mxu0 }
0x1131   :  { %v8941_v19 = vadd.f32 %v12609_v8, %v18041_v57  ;;  %v9195_v56 = vmax.f32 %v9177_v32, 0.0 }
0x1132   :  { %v12611_v36 = vpop.f32.mrf.mxu0 }
0x1133   :  { %v9178_v27 = vadd.f32 %v18001_v17, %v8941_v19  ;;  %v12612_v51 = vadd.f32 %v12611_v36, %v12610_v58 }
0x1134   :  { %v12613_v26 = vpop.f32.mrf.mxu0 }
0x1135   :  { %v9196_v22 = vmax.f32 %v9178_v27, 0.0  ;;  %v8946_v34 = vadd.f32 %v12612_v51, %v18041_v57 }
0x1136   :  { %v12614_v3 = vpop.f32.mrf.mxu0 }
0x1137   :  { %v18048_v38 = vpack.c.bf16 %v9196_v22, %v9195_v56  ;;  %v12615_v37 = vadd.f32 %v12614_v3, %v12613_v26  ;;  %v9179_v9 = vadd.f32 %v18004_v46, %v8946_v34 }
0x1138   :  { %v12616_v48 = vpop.f32.mrf.mxu0 }
0x1139   :  { %v8949_v42 = vadd.f32 %v12615_v37, %v18041_v57  ;;  %9415 = vmatmul.mubr.bf16.vlgmr.msra.gmra.mxu0 %v18048_v38  ;;  %13154 = vmatmul.mubr.bf16.vlgmr.msra.gmra.mxu1 %v18048_v38  ;;  %v9197_v0 = vmax.f32 %v9179_v9, 0.0 }
0x113a   :  { %v12617_v17 = vpop.f32.mrf.mxu0  ;;  %9424 = vmatprep.mubr.bf16.mxu0 %v18899_v60  ;;  %13157 = vmatprep.mubr.msk.bf16.mxu1 %vm15303_vm0, %v18870_v53 }
0x113b   :  { %v9180_v11 = vadd.f32 %v18007_v2, %v8949_v42  ;;  %v12618_v61 = vadd.f32 %v12617_v17, %v12616_v48 }
0x113c   :  { %v12619_v39 = vpop.f32.mrf.mxu0 }
0x113d   :  { %v9198_v59 = vmax.f32 %v9180_v11, 0.0  ;;  %v8954_v46 = vadd.f32 %v12618_v61, %v18041_v57 }
0x113e   :  { %v12620_v29 = vpop.f32.mrf.mxu0 }
0x113f   :  { %v12621_v44 = vadd.f32 %v12620_v29, %v12619_v39  ;;  %v18059_v31 = vpack.c.bf16 %v9198_v59, %v9197_v0  ;;  %v9181_v23 = vadd.f32 %v18010_v47, %v8954_v46 }
0x1140   :  { %v12622_v16 = vpop.f32.mrf.mxu0 }
0x1141   :  { %v8957_v55 = vadd.f32 %v12621_v44, %v18041_v57  ;;  %9425 = vmatmul.mubr.bf16.gmra.mxu0 %v18059_v31  ;;  %13158 = vmatmul.mubr.bf16.gmra.mxu1 %v18059_v31  ;;  %v9199_v52 = vmax.f32 %v9181_v23, 0.0 }
0x1142   :  { %v12623_v2 = vpop.f32.mrf.mxu0  ;;  %9434 = vmatprep.mubr.bf16.mxu0 %v18899_v60  ;;  %13161 = vmatprep.mubr.msk.bf16.mxu1 %vm15303_vm0, %v18870_v53 }
0x1143   :  { %v9182_v25 = vadd.f32 %v18013_v6, %v8957_v55  ;;  %v12624_v63 = vadd.f32 %v12623_v2, %v12622_v16 }
0x1144   :  { %v12625_v13 = vpop.f32.mrf.mxu0 }
0x1145   :  { %v9200_v54 = vmax.f32 %v9182_v25, 0.0  ;;  %v8962_v47 = vadd.f32 %v12624_v63, %v18041_v57 }
0x1146   :  { %v12626_v10 = vpop.f32.mrf.mxu0 }
0x1147   :  { %v12627_v4 = vadd.f32 %v12626_v10, %v12625_v13  ;;  %v18070_v30 = vpack.c.bf16 %v9200_v54, %v9199_v52  ;;  %v9183_v41 = vadd.f32 %v18017_v14, %v8962_v47 }
0x1148   :  { %v12628_v20 = vpop.f32.mrf.mxu0 }
0x1149   :  { %18900 = vst [vmem:[#allocation124_spill] sm:$0xff] %v18070_v30  ;;  %v8965_v35 = vadd.f32 %v12627_v4, %v18041_v57  ;;  %9435 = vmatmul.mubr.bf16.gmra.mxu0 %v18070_v30  ;;  %13162 = vmatmul.mubr.bf16.gmra.mxu1 %v18070_v30  ;;  %v9201_v49 = vmax.f32 %v9183_v41, 0.0 }
0x114a   :  { %v12629_v6 = vpop.f32.mrf.mxu0  ;;  %9444 = vmatprep.mubr.bf16.mxu0 %v18899_v60  ;;  %13165 = vmatprep.mubr.msk.bf16.mxu1 %vm15303_vm0, %v18870_v53 }
0x114b   :  { %v9184_v15 = vadd.f32 %v18019_v28, %v8965_v35  ;;  %v12630_v62 = vadd.f32 %v12629_v6, %v12628_v20 }
0x114c   :  { %v12631_v12 = vpop.f32.mrf.mxu0 }
0x114d   :  { %v9202_v1 = vmax.f32 %v9184_v15, 0.0  ;;  %v8970_v14 = vadd.f32 %v12630_v62, %v18041_v57 }
0x114e   :  { %v12632_v8 = vpop.f32.mrf.mxu0 }
0x114f   :  { %v12633_v58 = vadd.f32 %v12632_v8, %v12631_v12  ;;  %v18081_v32 = vpack.c.bf16 %v9202_v1, %v9201_v49  ;;  %v9185_v36 = vadd.f32 %v18021_v40, %v8970_v14 }
0x1150   :  { %v12634_v19 = vpop.f32.mrf.mxu0 }
0x1151   :  { %v8973_v27 = vadd.f32 %v12633_v58, %v18041_v57  ;;  %9445 = vmatmul.mubr.bf16.gmra.mxu0 %v18081_v32  ;;  %13166 = vmatmul.mubr.bf16.gmra.mxu1 %v18081_v32  ;;  %v9203_v22 = vmax.f32 %v9185_v36, 0.0 }
0x1152   :  { %v12635_v28 = vpop.f32.mrf.mxu0  ;;  %9454 = vmatprep.mubr.bf16.mxu0 %v18899_v60  ;;  %13169 = vmatprep.mubr.msk.bf16.mxu1 %vm15303_vm0, %v18870_v53 }
0x1153   :  { %v9186_v51 = vadd.f32 %v18023_v43, %v8973_v27  ;;  %v12636_v26 = vadd.f32 %v12635_v28, %v12634_v19 }
0x1154   :  { %v12637_v56 = vpop.f32.mrf.mxu0 }
0x1155   :  { %v9204_v34 = vmax.f32 %v9186_v51, 0.0  ;;  %v8978_v40 = vadd.f32 %v12636_v26, %v18041_v57 }
0x1156   :  { %v12638_v3 = vpop.f32.mrf.mxu0 }
0x1157   :  { %v12639_v37 = vadd.f32 %v12638_v3, %v12637_v56  ;;  %v18092_v48 = vpack.c.bf16 %v9204_v34, %v9203_v22  ;;  %v9187_v42 = vadd.f32 %v18025_v5, %v8978_v40 }
0x1158   :  { %v12640_v9 = vpop.f32.mrf.mxu0 }
0x1159   :  { %v8981_v17 = vadd.f32 %v12639_v37, %v18041_v57  ;;  %9455 = vmatmul.mubr.bf16.gmra.mxu0 %v18092_v48  ;;  %13170 = vmatmul.mubr.bf16.gmra.mxu1 %v18092_v48  ;;  %v9205_v0 = vmax.f32 %v9187_v42, 0.0 }
0x115a   :  { %v12641_v43 = vpop.f32.mrf.mxu0  ;;  %9464 = vmatprep.mubr.bf16.mxu0 %v18899_v60  ;;  %13173 = vmatprep.mubr.msk.bf16.mxu1 %vm15303_vm0, %v18870_v53 }
0x115b   :  { %v9188_v11 = vadd.f32 %v18027_v24, %v8981_v17  ;;  %v12642_v61 = vadd.f32 %v12641_v43, %v12640_v9 }
0x115c   :  { %v12643_v39 = vpop.f32.mrf.mxu0 }
0x115d   :  { %v9206_v59 = vmax.f32 %v9188_v11, 0.0  ;;  %v8986_v5 = vadd.f32 %v12642_v61, %v18041_v57 }
0x115e   :  { %v12644_v46 = vpop.f32.mrf.mxu0 }
0x115f   :  { %v12645_v29 = vadd.f32 %v12644_v46, %v12643_v39  ;;  %v18103_v44 = vpack.c.bf16 %v9206_v59, %v9205_v0  ;;  %v9189_v23 = vadd.f32 %v18029_v45, %v8986_v5 }
0x1160   :  { %v12646_v16 = vpop.f32.mrf.mxu0 }
0x1161   :  { %v8989_v55 = vadd.f32 %v12645_v29, %v18041_v57  ;;  %9465 = vmatmul.mubr.bf16.gmra.mxu0 %v18103_v44  ;;  %13174 = vmatmul.mubr.bf16.gmra.mxu1 %v18103_v44  ;;  %v9207_v13 = vmax.f32 %v9189_v23, 0.0 }
0x1162   :  { %v12647_v24 = vpop.f32.mrf.mxu0  ;;  %9474 = vmatprep.mubr.bf16.mxu0 %v18899_v60  ;;  %13177 = vmatprep.mubr.msk.bf16.mxu1 %vm15303_vm0, %v18870_v53 }
0x1163   :  { %v9190_v2 = vadd.f32 %v18031_v7, %v8989_v55  ;;  %v12648_v25 = vadd.f32 %v12647_v24, %v12646_v16 }
0x1164   :  { %v12649_v63 = vpop.f32.mrf.mxu0 }
0x1165   :  { %v9208_v52 = vmax.f32 %v9190_v2, 0.0  ;;  %v8994_v45 = vadd.f32 %v12648_v25, %v18041_v57 }
0x1166   :  { %v12650_v54 = vpop.f32.mrf.mxu0 }
0x1167   :  { %v12651_v47 = vadd.f32 %v12650_v54, %v12649_v63  ;;  %v18114_v10 = vpack.c.bf16 %v9208_v52, %v9207_v13  ;;  %v9191_v20 = vadd.f32 %v18033_v21, %v8994_v45 }
0x1168   :  { %v12652_v4 = vpop.f32.mrf.mxu0 }
0x1169   :  { %v8997_v41 = vadd.f32 %v12651_v47, %v18041_v57  ;;  %9475 = vmatmul.mubr.bf16.gmra.mxu0 %v18114_v10  ;;  %13178 = vmatmul.mubr.bf16.gmra.mxu1 %v18114_v10  ;;  %v9209_v62 = vmax.f32 %v9191_v20, 0.0 }
0x116a   :  { %v12653_v7 = vpop.f32.mrf.mxu0  ;;  %9484 = vmatprep.mubr.bf16.mxu0 %v18899_v60  ;;  %13181 = vmatprep.mubr.msk.bf16.mxu1 %vm15303_vm0, %v18870_v53 }
0x116b   :  { %v9192_v35 = vadd.f32 %v18035_v33, %v8997_v41  ;;  %v12654_v6 = vadd.f32 %v12653_v7, %v12652_v4 }
0x116c   :  { %v12655_v15 = vpop.f32.mrf.mxu0 }
0x116d   :  { %v9210_v12 = vmax.f32 %v9192_v35, 0.0  ;;  %v9002_v21 = vadd.f32 %v12654_v6, %v18041_v57 }
0x116e   :  { %v12656_v49 = vpop.f32.mrf.mxu0 }
0x116f   :  { %v12657_v1 = vadd.f32 %v12656_v49, %v12655_v15  ;;  %v18125_v14 = vpack.c.bf16 %v9210_v12, %v9209_v62  ;;  %v9193_v8 = vadd.f32 %v18037_v50, %v9002_v21  ;;  %v14260_v50 = vld [vmem:[#allocation2 + $0x874] ss:$8 sps:$4 sm:$0xff]  }
0x1171   :  { %18901 = vst [vmem:[#allocation120_spill] sm:$0xff] %v18125_v14  ;;  %v9005_v58 = vadd.f32 %v12657_v1, %v18041_v57  ;;  %9485 = vmatmul.mubr.bf16.gmra.mxu0 %v18125_v14  ;;  %13182 = vmatmul.mubr.bf16.gmra.mxu1 %v18125_v14  ;;  %v9211_v19 = vmax.f32 %v9193_v8, 0.0  ;;  %v14263_v57 = vld [vmem:[#allocation2 + $0x904] ss:$8 sps:$4 sm:$0xff]  }
0x1172   :  { %9494 = vmatprep.mubr.bf16.mxu0 %v18899_v60  ;;  %13185 = vmatprep.mubr.msk.bf16.mxu1 %vm15303_vm0, %v18870_v53 }
0x1173   :  { %v9194_v33 = vadd.f32 %v18039_v18, %v9005_v58 }
0x1175   :  { %v9212_v36 = vmax.f32 %v9194_v33, 0.0 }
0x1177   :  { %v18135_v27 = vpack.c.bf16 %v9212_v36, %v9211_v19 }
0x1179   :  { %18902 = vst [vmem:[#allocation108_spill] sm:$0xff] %v18135_v27  ;;  %9495 = vmatmul.mubr.bf16.gmra.mxu0 %v18135_v27  ;;  %13186 = vmatmul.mubr.bf16.gmra.mxu1 %v18135_v27 }
0x117a   :  { %12306 = vmatprep.mubr.msk.bf16.mxu0 %vm1199_vm2, %v14260_v50  ;;  %12333 = vmatprep.mubr.msk.bf16.mxu1 %vm1199_vm2, %v14263_v57 }
0x11f9   :  { %v18141_v28 = vpop.f32.mrf.mxu0  ;;  %v18143_v51 = vpop.f32.mrf.mxu1 }
0x11fb   :  { %v18145_v26 = vpop.f32.mrf.mxu0  ;;  %v13155_v18 = vpop.f32.mrf.mxu1 }
0x11fd   :  { %v18147_v56 = vpop.f32.mrf.mxu0  ;;  %v18149_v22 = vpop.f32.mrf.mxu1 }
0x11ff   :  { %v18155_v3 = vpop.f32.mrf.mxu0  ;;  %v13156_v37 = vpop.f32.mrf.mxu1 }
0x1201   :  { %v18157_v9 = vpop.f32.mrf.mxu0  ;;  %v18159_v42 = vpop.f32.mrf.mxu1 }
0x1203   :  { %v18161_v17 = vpop.f32.mrf.mxu0  ;;  %v13159_v43 = vpop.f32.mrf.mxu1 }
0x1205   :  { %v18163_v11 = vpop.f32.mrf.mxu0  ;;  %v18165_v61 = vpop.f32.mrf.mxu1 }
0x1207   :  { %v18171_v59 = vpop.f32.mrf.mxu0  ;;  %v13160_v5 = vpop.f32.mrf.mxu1 }
0x1209   :  { %v18173_v46 = vpop.f32.mrf.mxu0  ;;  %v18175_v29 = vpop.f32.mrf.mxu1 }
0x120b   :  { %v18177_v16 = vpop.f32.mrf.mxu0  ;;  %v13163_v23 = vpop.f32.mrf.mxu1 }
0x120d   :  { %v18179_v55 = vpop.f32.mrf.mxu0  ;;  %v18181_v24 = vpop.f32.mrf.mxu1 }
0x120f   :  { %v18185_v25 = vpop.f32.mrf.mxu0  ;;  %v13164_v63 = vpop.f32.mrf.mxu1 }
0x1211   :  { %v18187_v13 = vpop.f32.mrf.mxu0  ;;  %v18189_v52 = vpop.f32.mrf.mxu1 }
0x1213   :  { %v18191_v45 = vpop.f32.mrf.mxu0  ;;  %v13167_v54 = vpop.f32.mrf.mxu1 }
0x1215   :  { %v18193_v47 = vpop.f32.mrf.mxu0  ;;  %v18195_v4 = vpop.f32.mrf.mxu1 }
0x1217   :  { %v18199_v41 = vpop.f32.mrf.mxu0  ;;  %v13168_v7 = vpop.f32.mrf.mxu1 }
0x1219   :  { %v9456_v35 = vpop.f32.mrf.mxu0  ;;  %v18201_v6 = vpop.f32.mrf.mxu1 }
0x121b   :  { %v9458_v15 = vpop.f32.mrf.mxu0  ;;  %v13171_v62 = vpop.f32.mrf.mxu1 }
0x121d   :  { %v9460_v12 = vpop.f32.mrf.mxu0  ;;  %v18203_v21 = vpop.f32.mrf.mxu1 }
0x121f   :  { %v9462_v1 = vpop.f32.mrf.mxu0  ;;  %v13172_v8 = vpop.f32.mrf.mxu1 }
0x1221   :  { %v9466_v58 = vpop.f32.mrf.mxu0  ;;  %v18207_v33 = vpop.f32.mrf.mxu1 }
0x1223   :  { %v9468_v19 = vpop.f32.mrf.mxu0  ;;  %v13175_v36 = vpop.f32.mrf.mxu1 }
0x1225   :  { %v9470_v50 = vpop.f32.mrf.mxu0  ;;  %v18209_v57 = vpop.f32.mrf.mxu1 }
0x1227   :  { %v9472_v18 = vpop.f32.mrf.mxu0  ;;  %v13176_v37 = vpop.f32.mrf.mxu1 }
0x1229   :  { %v9476_v43 = vpop.f32.mrf.mxu0  ;;  %v18211_v5 = vpop.f32.mrf.mxu1 }
0x122b   :  { %v9478_v23 = vpop.f32.mrf.mxu0  ;;  %v13179_v63 = vpop.f32.mrf.mxu1 }
0x122d   :  { %v9480_v54 = vpop.f32.mrf.mxu0  ;;  %v18213_v7 = vpop.f32.mrf.mxu1 }
0x122e   :  { %v9634_v63 = vpack.c.bf16 %v9480_v54, %v9476_v43  ;;  %v14275_v43 = vld [vmem:[#allocation2 + $0x920] ss:$8 sps:$4 sm:$0xff]   ;;  %v14285_v54 = vld [vmem:[#allocation2 + $0x944] ss:$8 sps:$4 sm:$0xff]  }
0x122f   :  { %v9482_v62 = vpop.f32.mrf.mxu0  ;;  %v13180_v8 = vpop.f32.mrf.mxu1 }
0x1230   :  { %v9893_v14 = vpack.c.bf16 %v9482_v62, %v9478_v23  ;;  %v14281_v23 = vld [vmem:[#allocation2 + $0x930] ss:$8 sps:$4 sm:$0xff]   ;;  %v14290_v62 = vld [vmem:[#allocation2 + $0x8c0] ss:$8 sps:$4 sm:$0xff]  }
0x1231   :  { %v9486_v40 = vpop.f32.mrf.mxu0  ;;  %v18215_v0 = vpop.f32.mrf.mxu1 }
0x1233   :  { %v9488_v2 = vpop.f32.mrf.mxu0  ;;  %v13183_v36 = vpop.f32.mrf.mxu1 }
0x1235   :  { %v9490_v20 = vpop.f32.mrf.mxu0  ;;  %v18217_v49 = vpop.f32.mrf.mxu1 }
0x1236   :  { %v9635_v34 = vpack.c.bf16 %v9490_v20, %v9486_v40  ;;  %v9633_v40 = vpack.c.bf16 %v9470_v50, %v9466_v58  ;;  %v9631_v20 = vpack.c.bf16 %v18193_v47, %v18187_v13  ;;  %v18903_v47 = vpack.c.bf16 %v18163_v11, %v18157_v9  ;;  %v14258_v9 = vld [vmem:[#allocation2 + $0x870] ss:$8 sps:$4 sm:$0xff]  }
0x1237   :  { %v9492_v37 = vpop.f32.mrf.mxu0  ;;  %v13184_v39 = vpop.f32.mrf.mxu1  ;;  %v18905_v50 = vpack.c.bf16 %v18203_v21, %v18201_v6  ;;  %v18907_v6 = vpack.c.bf16 %v18181_v24, %v18175_v29  ;;  %v14282_v21 = vld [vmem:[#allocation2 + $0x8b4] ss:$8 sps:$4 sm:$0xff]   ;;  %v18909_v29 = vpack.c.bf16 %v18149_v22, %v18143_v51  ;;  %v14288_v24 = vld [vmem:[#allocation2 + $0x8c4] ss:$8 sps:$4 sm:$0xff]   ;;  %v14293_v22 = vld [vmem:[#allocation2 + $0x950] ss:$8 sps:$4 sm:$0xff]  }
0x1238   :  { %v9894_v27 = vpack.c.bf16 %v9492_v37, %v9488_v2  ;;  %9765 = vmatpush1.bf16.msra.mxu0 %v9635_v34  ;;  %v9892_v34 = vpack.c.bf16 %v9472_v18, %v9468_v19  ;;  %v9632_v2 = vpack.c.bf16 %v9460_v12, %v9456_v35  ;;  %v9630_v35 = vpack.c.bf16 %v18179_v55, %v18173_v46  ;;  %v14270_v12 = vld [vmem:[#allocation2 + $0x894] ss:$8 sps:$4 sm:$0xff]   ;;  %v14272_v19 = vld [vmem:[#allocation2 + $0x890] ss:$8 sps:$4 sm:$0xff]   ;;  %v14276_v18 = vld [vmem:[#allocation2 + $0x8a4] ss:$8 sps:$4 sm:$0xff]  }
0x1239   :  { %v18219_v30 = vpop.f32.mrf.mxu1  ;;  %9766 = vmatprep.subr.bf16.mxu0 %v18899_v60  ;;  %v9496_v58 = vpop.f32.mrf.mxu0  ;;  %v18904_v55 = vpack.c.bf16 %v18147_v56, %v18141_v28  ;;  %v14267_v28 = vld [vmem:[#allocation2 + $0x914] ss:$8 sps:$4 sm:$0xff]   ;;  %v10152_v56 = vpack.c.bf16 %v18213_v7, %v18211_v5  ;;  %v14278_v5 = vld [vmem:[#allocation2 + $0x8a0] ss:$8 sps:$4 sm:$0xff]   ;;  %v14297_v37 = vld [vmem:[#allocation2 + $0x964] ss:$8 sps:$4 sm:$0xff]  }
0x123a   :  { %10024 = vmatpush1.bf16.msra.mxu1 %v9894_v27  ;;  %v9891_v27 = vpack.c.bf16 %v9462_v1, %v9458_v15  ;;  %v9889_v15 = vpack.c.bf16 %v18185_v25, %v18177_v16  ;;  %v9887_v16 = vpack.c.bf16 %v18155_v3, %v18145_v26  ;;  %v10153_v26 = vpack.c.bf16 %v18217_v49, %v18215_v0  ;;  %v14266_v3 = vld [vmem:[#allocation2 + $0x880] ss:$8 sps:$4 sm:$0xff]   ;;  %v14269_v0 = vld [vmem:[#allocation2 + $0x910] ss:$8 sps:$4 sm:$0xff]   ;;  %v14273_v1 = vld [vmem:[#allocation2 + $0x924] ss:$8 sps:$4 sm:$0xff]  }
0x123b   :  { %v13187_v8 = vpop.f32.mrf.mxu1  ;;  %10025 = vmatprep.subr.bf16.mxu1 %v18899_v60  ;;  %v9498_v13 = vpop.f32.mrf.mxu0  ;;  %v10151_v49 = vpack.c.bf16 %v18209_v57, %v18207_v33  ;;  %v14279_v33 = vld [vmem:[#allocation2 + $0x934] ss:$8 sps:$4 sm:$0xff]   ;;  %v18906_v57 = vpack.c.bf16 %v18195_v4, %v18189_v52  ;;  %v18908_v52 = vpack.c.bf16 %v18165_v61, %v18159_v42  ;;  %v14284_v4 = vld [vmem:[#allocation2 + $0x8b0] ss:$8 sps:$4 sm:$0xff]   ;;  %v14287_v7 = vld [vmem:[#allocation2 + $0x940] ss:$8 sps:$4 sm:$0xff]  }
0x123c   :  { %9767 = vmatpush1.bf16.msra.mxu0 %v9634_v63  ;;  %v14291_v61 = vld [vmem:[#allocation2 + $0x954] ss:$8 sps:$4 sm:$0xff]   ;;  %v14300_v63 = vld [vmem:[#allocation2 + $0x8e4] ss:$8 sps:$4 sm:$0xff]   ;;  %v14299_v8 = vld [vmem:[#allocation2 + $0x960] ss:$8 sps:$4 sm:$0xff]  }
0x123d   :  { %v18223_v36 = vpop.f32.mrf.mxu1  ;;  %9768 = vmatprep.subr.bf16.mxu0 %v18899_v60  ;;  %v9500_v46 = vpop.f32.mrf.mxu0  ;;  %v14294_v51 = vld [vmem:[#allocation2 + $0x8d4] ss:$8 sps:$4 sm:$0xff]  }
0x123e   :  { %10026 = vmatpush1.bf16.msra.mxu1 %v9893_v14  ;;  %v9890_v14 = vpack.c.bf16 %v18199_v41, %v18191_v45  ;;  %v9888_v45 = vpack.c.bf16 %v18171_v59, %v18161_v17  ;;  %v9636_v17 = vpack.c.bf16 %v9500_v46, %v9496_v58  ;;  %v14264_v59 = vld [vmem:[#allocation2 + $0x884] ss:$8 sps:$4 sm:$0xff]   ;;  %v14261_v41 = vld [vmem:[#allocation2 + $0x900] ss:$8 sps:$4 sm:$0xff]   ;;  %v10154_v42 = vpack.c.bf16 %v18223_v36, %v18219_v30  ;;  %v14296_v30 = vld [vmem:[#allocation2 + $0x8d0] ss:$8 sps:$4 sm:$0xff]  }
0x123f   :  { %v13188_v39 = vpop.f32.mrf.mxu1  ;;  %10027 = vmatprep.subr.bf16.mxu1 %v18899_v60  ;;  %v9502_v25 = vpop.f32.mrf.mxu0  ;;  %v14303_v36 = vld [vmem:[#allocation2 + $0x974] ss:$8 sps:$4 sm:$0xff]   ;;  %v14312_v58 = vld [vmem:[#allocation2 + $0x990] ss:$8 sps:$4 sm:$0xff]   ;;  %v14323_v46 = vld [vmem:[#allocation2 + $0x9c0] ss:$8 sps:$4 sm:$0xff]  }
0x1240   :  { %9769 = vmatpush1.bf16.msra.mxu0 %v9633_v40  ;;  %v9895_v11 = vpack.c.bf16 %v9502_v25, %v9498_v13  ;;  %v14302_v40 = vld [vmem:[#allocation2 + $0x8e0] ss:$8 sps:$4 sm:$0xff]   ;;  %v14306_v39 = vld [vmem:[#allocation2 + $0x8f4] ss:$8 sps:$4 sm:$0xff]   ;;  %v14327_v25 = vld [vmem:[#allocation2 + $0x9e4] ss:$8 sps:$4 sm:$0xff]  }
0x1241   :  { %9770 = vmatprep.subr.bf16.mxu0 %v18899_v60  ;;  %v14318_v13 = vld [vmem:[#allocation2 + $0x9b4] ss:$8 sps:$4 sm:$0xff]  }
0x1242   :  { %10028 = vmatpush1.bf16.msra.mxu1 %v9892_v34  ;;  %v14305_v34 = vld [vmem:[#allocation2 + $0x970] ss:$8 sps:$4 sm:$0xff]  }
0x1243   :  { %10029 = vmatprep.subr.bf16.mxu1 %v18899_v60 }
0x1244   :  { %9771 = vmatpush1.bf16.msra.mxu0 %v9632_v2  ;;  %v14309_v2 = vld [vmem:[#allocation2 + $0x984] ss:$8 sps:$4 sm:$0xff]  }
0x1245   :  { %9772 = vmatprep.subr.bf16.mxu0 %v18899_v60 }
0x1246   :  { %10030 = vmatpush1.bf16.msra.mxu1 %v9891_v27  ;;  %v14308_v27 = vld [vmem:[#allocation2 + $0x8f0] ss:$8 sps:$4 sm:$0xff]  }
0x1247   :  { %10031 = vmatprep.subr.bf16.mxu1 %v18899_v60 }
0x1248   :  { %9773 = vmatpush1.bf16.msra.mxu0 %v9631_v20  ;;  %v14314_v20 = vld [vmem:[#allocation2 + $0x994] ss:$8 sps:$4 sm:$0xff]  }
0x1249   :  { %9774 = vmatprep.subr.bf16.mxu0 %v18899_v60 }
0x124a   :  { %10032 = vmatpush1.bf16.msra.mxu1 %v9890_v14  ;;  %v14311_v14 = vld [vmem:[#allocation2 + $0x980] ss:$8 sps:$4 sm:$0xff]  }
0x124b   :  { %10033 = vmatprep.subr.bf16.mxu1 %v18899_v60 }
0x124c   :  { %9775 = vmatpush1.bf16.msra.mxu0 %v9630_v35  ;;  %v14315_v35 = vld [vmem:[#allocation2 + $0x9a4] ss:$8 sps:$4 sm:$0xff]  }
0x124d   :  { %9776 = vmatprep.subr.bf16.mxu0 %v18899_v60 }
0x124e   :  { %10034 = vmatpush1.bf16.msra.mxu1 %v9889_v15  ;;  %v14317_v15 = vld [vmem:[#allocation2 + $0x9a0] ss:$8 sps:$4 sm:$0xff]  }
0x124f   :  { %10035 = vmatprep.subr.bf16.mxu1 %v18899_v60 }
0x1250   :  { %9777 = vmatpush1.bf16.msra.mxu0 %v18903_v47  ;;  %v14321_v47 = vld [vmem:[#allocation2 + $0x9c4] ss:$8 sps:$4 sm:$0xff]  }
0x1251   :  { %9778 = vmatprep.subr.bf16.mxu0 %v18899_v60 }
0x1252   :  { %10036 = vmatpush1.bf16.msra.mxu1 %v9888_v45  ;;  %v14320_v45 = vld [vmem:[#allocation2 + $0x9b0] ss:$8 sps:$4 sm:$0xff]  }
0x1253   :  { %10037 = vmatprep.subr.bf16.mxu1 %v18899_v60 }
0x1254   :  { %9779 = vmatpush1.bf16.msra.mxu0 %v18904_v55  ;;  %v14326_v55 = vld [vmem:[#allocation2 + $0x9d0] ss:$8 sps:$4 sm:$0xff]  }
0x1255   :  { %9794 = vmatprep.subr.bf16.mxu0 %v18899_v60 }
0x1256   :  { %10038 = vmatpush1.bf16.msra.mxu1 %v9887_v16  ;;  %v14324_v16 = vld [vmem:[#allocation2 + $0x9d4] ss:$8 sps:$4 sm:$0xff]  }
0x1257   :  { %10053 = vmatprep.subr.bf16.mxu1 %v18899_v60 }
0x1258   :  { %9795 = vmatpush2.bf16.msra.mxu0 %v9636_v17  ;;  %v14329_v17 = vld [vmem:[#allocation2 + $0x9e0] ss:$8 sps:$4 sm:$0xff]  }
0x1259   :  { %10282 = vmatprep.subr.bf16.mxu0 %v18899_v60 }
0x125a   :  { %10054 = vmatpush2.bf16.msra.mxu1 %v9895_v11  ;;  %v14339_v11 = vld [vmem:[#allocation32 + $0x38] sm:$0xff]  }
0x125b   :  { %9797 = vmatmul.mubr.bf16.vlgmr.msra.gmra.mxu0 %v14258_v9  ;;  %13189 = vmatprep.subr.bf16.mxu1 %v18870_v53  ;;  %v14330_v9 = vld [vmem:[#allocation2 + $0x9f4] ss:$8 sps:$4 sm:$0xff]  }
0x125c   :  { %10283 = vmatpush1.bf16.msra.mxu0 %v10153_v26  ;;  %12307 = vmatprep.mubr.msk.bf16.mxu0 %vm1199_vm2, %v14264_v59  ;;  %v14332_v59 = vld [vmem:[#allocation2 + $0x9f0] ss:$8 sps:$4 sm:$0xff]  }
0x125d   :  { %10056 = vmatmul.mubr.bf16.vlgmr.msra.gmra.mxu1 %v14261_v41  ;;  %10284 = vmatprep.subr.bf16.mxu0 %v18899_v60  ;;  %v14333_v41 = vld [vmem:[#allocation2 + $0xa04] ss:$8 sps:$4 sm:$0xff]   ;;  %v14340_v26 = vld [vmem:[#allocation32 + $0x30] sm:$0xff]  }
0x125e   :  { %12334 = vmatprep.mubr.msk.bf16.mxu1 %vm1199_vm2, %v14267_v28  ;;  %13190 = vmatpush3.bf16.msra.mxu1 %v14339_v11  ;;  %v14341_v28 = vld [vmem:[#allocation32 + $0x28] sm:$0xff]  }
0x125f   :  { %13191 = vmatprep.subr.bf16.mxu1 %v18870_v53 }
0x1260   :  { %10285 = vmatpush1.bf16.msra.mxu0 %v10152_v56  ;;  %v14335_v56 = vld [vmem:[#allocation2 + $0xa00] ss:$8 sps:$4 sm:$0xff]  }
0x1261   :  { %10286 = vmatprep.subr.bf16.mxu0 %v18899_v60 }
0x1262   :  { %13192 = vmatpush3.bf16.msra.mxu1 %v14340_v26 }
0x1263   :  { %9805 = vmatmul.mubr.bf16.gmra.mxu0 %v14266_v3  ;;  %13193 = vmatprep.subr.bf16.mxu1 %v18870_v53  ;;  %v14336_v3 = vld [vmem:[#allocation2 + $0xa14] ss:$8 sps:$4 sm:$0xff]  }
0x1264   :  { %10287 = vmatpush1.bf16.msra.mxu0 %v10151_v49  ;;  %12308 = vmatprep.mubr.msk.bf16.mxu0 %vm1199_vm2, %v14270_v12  ;;  %v14342_v12 = vld [vmem:[#allocation32 + $0x20] sm:$0xff]   ;;  %v14338_v49 = vld [vmem:[#allocation2 + $0xa10] ss:$8 sps:$4 sm:$0xff]  }
0x1265   :  { %10064 = vmatmul.mubr.bf16.gmra.mxu1 %v14269_v0  ;;  %10288 = vmatprep.subr.bf16.mxu0 %v18899_v60  ;;  %v14343_v0 = vld [vmem:[#allocation32 + $0x18] sm:$0xff]  }
0x1266   :  { %12335 = vmatprep.mubr.msk.bf16.mxu1 %vm1199_vm2, %v14273_v1  ;;  %13194 = vmatpush3.bf16.msra.mxu1 %v14341_v28  ;;  %v14344_v1 = vld [vmem:[#allocation32 + $0x10] sm:$0xff]   ;;  %v9617_v28 = vld [vmem:[#allocation37 + $0x38] sm:$0xff] }
0x1267   :  { %13195 = vmatprep.subr.bf16.mxu1 %v18870_v53 }
0x1268   :  { %10289 = vmatpush1.bf16.msra.mxu0 %v18905_v50  ;;  %v14346_v50 = vld [vmem:[#allocation32] sm:$0xff]  }
0x1269   :  { %10290 = vmatprep.subr.bf16.mxu0 %v18899_v60 }
0x126a   :  { %13196 = vmatpush3.bf16.msra.mxu1 %v14342_v12 }
0x126b   :  { %9813 = vmatmul.mubr.bf16.gmra.mxu0 %v14272_v19  ;;  %13197 = vmatprep.subr.bf16.mxu1 %v18870_v53  ;;  %v14345_v19 = vld [vmem:[#allocation32 + $0x8] sm:$0xff]  }
0x126c   :  { %10291 = vmatpush1.bf16.msra.mxu0 %v18906_v57  ;;  %12309 = vmatprep.mubr.msk.bf16.mxu0 %vm1199_vm2, %v14276_v18  ;;  %v9610_v18 = vld [vmem:[#allocation37] sm:$0xff] }
0x126d   :  { %10072 = vmatmul.mubr.bf16.gmra.mxu1 %v14275_v43  ;;  %10292 = vmatprep.subr.bf16.mxu0 %v18899_v60 }
0x126e   :  { %12336 = vmatprep.mubr.msk.bf16.mxu1 %vm1199_vm2, %v14279_v33  ;;  %13198 = vmatpush3.bf16.msra.mxu1 %v14343_v0 }
0x126f   :  { %13199 = vmatprep.subr.bf16.mxu1 %v18870_v53 }
0x1270   :  { %10293 = vmatpush1.bf16.msra.mxu0 %v18907_v6  ;;  %v9611_v6 = vld [vmem:[#allocation37 + $0x8] sm:$0xff] }
0x1271   :  { %10294 = vmatprep.subr.bf16.mxu0 %v18899_v60 }
0x1272   :  { %13200 = vmatpush3.bf16.msra.mxu1 %v14344_v1 }
0x1273   :  { %9821 = vmatmul.mubr.bf16.gmra.mxu0 %v14278_v5  ;;  %13201 = vmatprep.subr.bf16.mxu1 %v18870_v53 }
0x1274   :  { %10295 = vmatpush1.bf16.msra.mxu0 %v18908_v52  ;;  %12310 = vmatprep.mubr.msk.bf16.mxu0 %vm1199_vm2, %v14282_v21 }
0x1275   :  { %10080 = vmatmul.mubr.bf16.gmra.mxu1 %v14281_v23  ;;  %10296 = vmatprep.subr.bf16.mxu0 %v18899_v60 }
0x1276   :  { %12337 = vmatprep.mubr.msk.bf16.mxu1 %vm1199_vm2, %v14285_v54  ;;  %13202 = vmatpush3.bf16.msra.mxu1 %v14345_v19  ;;  %v9618_v19 = vld [vmem:[#allocation37 + $0x40] sm:$0xff] }
0x1277   :  { %13203 = vmatprep.subr.bf16.mxu1 %v18870_v53 }
0x1278   :  { %10297 = vmatpush1.bf16.msra.mxu0 %v18909_v29 }
0x1279   :  { %10312 = vmatprep.subr.bf16.mxu0 %v18899_v60 }
0x127a   :  { %13204 = vmatpush3.bf16.msra.mxu1 %v14346_v50 }
0x127b   :  { %9829 = vmatmul.mubr.bf16.gmra.mxu0 %v14284_v4  ;;  %13241 = vmatprep.subr.bf16.mxu1 %v18870_v53 }
0x127c   :  { %10313 = vmatpush2.bf16.msra.mxu0 %v10154_v42  ;;  %12311 = vmatprep.mubr.msk.bf16.mxu0 %vm1199_vm2, %v14288_v24  ;;  %v9612_v24 = vld [vmem:[#allocation37 + $0x10] sm:$0xff] }
0x127d   :  { %10088 = vmatmul.mubr.bf16.gmra.mxu1 %v14287_v7  ;;  %10964 = vmatprep.subr.bf16.mxu0 %v18899_v60 }
0x127e   :  { %12338 = vmatprep.mubr.msk.bf16.mxu1 %vm1199_vm2, %v14291_v61 }
0x1283   :  { %9837 = vmatmul.mubr.bf16.gmra.mxu0 %v14290_v62 }
0x1284   :  { %12312 = vmatprep.mubr.msk.bf16.mxu0 %vm1199_vm2, %v14294_v51 }
0x1285   :  { %10096 = vmatmul.mubr.bf16.gmra.mxu1 %v14293_v22 }
0x1286   :  { %12339 = vmatprep.mubr.msk.bf16.mxu1 %vm1199_vm2, %v14297_v37  ;;  %v9613_v37 = vld [vmem:[#allocation37 + $0x18] sm:$0xff] }
0x128b   :  { %9845 = vmatmul.mubr.bf16.gmra.mxu0 %v14296_v30 }
0x128c   :  { %12313 = vmatprep.mubr.msk.bf16.mxu0 %vm1199_vm2, %v14300_v63 }
0x128d   :  { %10104 = vmatmul.mubr.bf16.gmra.mxu1 %v14299_v8 }
0x128e   :  { %12340 = vmatprep.mubr.msk.bf16.mxu1 %vm1199_vm2, %v14303_v36 }
0x1293   :  { %9853 = vmatmul.mubr.bf16.gmra.mxu0 %v14302_v40 }
0x1294   :  { %12314 = vmatprep.mubr.msk.bf16.mxu0 %vm1199_vm2, %v14306_v39 }
0x1295   :  { %10112 = vmatmul.mubr.bf16.gmra.mxu1 %v14305_v34  ;;  %v9614_v34 = vld [vmem:[#allocation37 + $0x20] sm:$0xff] }
0x1296   :  { %12341 = vmatprep.mubr.msk.bf16.mxu1 %vm1199_vm2, %v14309_v2 }
0x129b   :  { %9861 = vmatmul.mubr.bf16.gmra.mxu0 %v14308_v27 }
0x129c   :  { %12360 = vmatprep.mubr.msk.bf16.mxu0 %vm1199_vm2, %v14314_v20 }
0x129d   :  { %10120 = vmatmul.mubr.bf16.gmra.mxu1 %v14311_v14 }
0x129e   :  { %13205 = vmatprep.mubr.msk.bf16.mxu1 %vm15303_vm0, %v18870_v53 }
0x12a3   :  { %10315 = vmatmul.mubr.bf16.vlgmr.msra.gmra.mxu0 %v14312_v58 }
0x12a4   :  { %12361 = vmatprep.mubr.msk.bf16.mxu0 %vm1199_vm2, %v14315_v35 }
0x12ab   :  { %10323 = vmatmul.mubr.bf16.gmra.mxu0 %v14317_v15  ;;  %v9615_v15 = vld [vmem:[#allocation37 + $0x28] sm:$0xff] }
0x12ac   :  { %12362 = vmatprep.mubr.msk.bf16.mxu0 %vm1199_vm2, %v14318_v13 }
0x12b3   :  { %10331 = vmatmul.mubr.bf16.gmra.mxu0 %v14320_v45 }
0x12b4   :  { %12363 = vmatprep.mubr.msk.bf16.mxu0 %vm1199_vm2, %v14321_v47 }
0x12bb   :  { %10339 = vmatmul.mubr.bf16.gmra.mxu0 %v14323_v46 }
0x12bc   :  { %12364 = vmatprep.mubr.msk.bf16.mxu0 %vm1199_vm2, %v14324_v16 }
0x12c3   :  { %10347 = vmatmul.mubr.bf16.gmra.mxu0 %v14326_v55 }
0x12c4   :  { %12365 = vmatprep.mubr.msk.bf16.mxu0 %vm1199_vm2, %v14327_v25  ;;  %v9616_v25 = vld [vmem:[#allocation37 + $0x30] sm:$0xff] }
0x12cb   :  { %10355 = vmatmul.mubr.bf16.gmra.mxu0 %v14329_v17 }
0x12cc   :  { %12366 = vmatprep.mubr.msk.bf16.mxu0 %vm1199_vm2, %v14330_v9 }
0x12d3   :  { %10363 = vmatmul.mubr.bf16.gmra.mxu0 %v14332_v59 }
0x12d4   :  { %12367 = vmatprep.mubr.msk.bf16.mxu0 %vm1199_vm2, %v14333_v41 }
0x12db   :  { %10371 = vmatmul.mubr.bf16.gmra.mxu0 %v14335_v56 }
0x12dc   :  { %12368 = vmatprep.mubr.msk.bf16.mxu0 %vm1199_vm2, %v14336_v3 }
0x12e3   :  { %10379 = vmatmul.mubr.bf16.gmra.mxu0 %v14338_v49 }
0x131b   :  { %v9798_v43 = vpop.f32.mrf.mxu0 }
0x131c   :  { %v9869_v33 = vadd.f32 %v9798_v43, %v9610_v18 }
0x131d   :  { %v9800_v57 = vpop.f32.mrf.mxu0  ;;  %v10057_v5 = vpop.f32.mrf.mxu1 }
0x131e   :  { %v18326_v21 = vadd.f32 %v10057_v5, %v9869_v33 }
0x131f   :  { %v9801_v23 = vpop.f32.mrf.mxu0  ;;  %v10059_v54 = vpop.f32.mrf.mxu1 }
0x1320   :  { %v9870_v52 = vadd.f32 %v9801_v23, %v9611_v6  ;;  %v9619_v6 = vld [vmem:[#allocation37 + $0x48] sm:$0xff] }
0x1321   :  { %v9803_v4 = vpop.f32.mrf.mxu0  ;;  %v10060_v29 = vpop.f32.mrf.mxu1 }
0x1322   :  { %v18328_v7 = vadd.f32 %v10060_v29, %v9870_v52 }
0x1323   :  { %v9806_v42 = vpop.f32.mrf.mxu0  ;;  %v10062_v61 = vpop.f32.mrf.mxu1 }
0x1324   :  { %v9871_v62 = vadd.f32 %v9806_v42, %v9612_v24  ;;  %v9620_v42 = vld [vmem:[#allocation37 + $0x50] sm:$0xff] }
0x1325   :  { %v9808_v51 = vpop.f32.mrf.mxu0  ;;  %v10065_v22 = vpop.f32.mrf.mxu1 }
0x1326   :  { %v18330_v30 = vadd.f32 %v10065_v22, %v9871_v62 }
0x1327   :  { %v9809_v63 = vpop.f32.mrf.mxu0  ;;  %v10067_v8 = vpop.f32.mrf.mxu1 }
0x1328   :  { %v9872_v36 = vadd.f32 %v9809_v63, %v9613_v37  ;;  %v9621_v8 = vld [vmem:[#allocation37 + $0x58] sm:$0xff] }
0x1329   :  { %v9811_v40 = vpop.f32.mrf.mxu0  ;;  %v10068_v39 = vpop.f32.mrf.mxu1 }
0x132a   :  { %v18332_v2 = vadd.f32 %v10068_v39, %v9872_v36 }
0x132b   :  { %v9814_v27 = vpop.f32.mrf.mxu0  ;;  %v10070_v20 = vpop.f32.mrf.mxu1 }
0x132c   :  { %v9873_v14 = vadd.f32 %v9814_v27, %v9614_v34 }
0x132d   :  { %v9816_v58 = vpop.f32.mrf.mxu0  ;;  %v10073_v35 = vpop.f32.mrf.mxu1 }
0x132e   :  { %v18334_v13 = vadd.f32 %v10073_v35, %v9873_v14  ;;  %v9622_v14 = vld [vmem:[#allocation37 + $0x60] sm:$0xff] }
0x132f   :  { %v9817_v45 = vpop.f32.mrf.mxu0  ;;  %v10075_v47 = vpop.f32.mrf.mxu1 }
0x1330   :  { %v9874_v46 = vadd.f32 %v9817_v45, %v9615_v15 }
0x1331   :  { %v9819_v16 = vpop.f32.mrf.mxu0  ;;  %v10076_v55 = vpop.f32.mrf.mxu1 }
0x1332   :  { %v18336_v17 = vadd.f32 %v10076_v55, %v9874_v46  ;;  %v9623_v16 = vld [vmem:[#allocation37 + $0x68] sm:$0xff] }
0x1333   :  { %v9822_v9 = vpop.f32.mrf.mxu0  ;;  %v10078_v11 = vpop.f32.mrf.mxu1 }
0x1334   :  { %v9875_v59 = vadd.f32 %v9822_v9, %v9616_v25 }
0x1335   :  { %v9824_v41 = vpop.f32.mrf.mxu0  ;;  %v10081_v26 = vpop.f32.mrf.mxu1 }
0x1336   :  { %v18338_v56 = vadd.f32 %v10081_v26, %v9875_v59  ;;  %v9624_v26 = vld [vmem:[#allocation37 + $0x70] sm:$0xff] }
0x1337   :  { %v9825_v3 = vpop.f32.mrf.mxu0  ;;  %v10083_v12 = vpop.f32.mrf.mxu1 }
0x1338   :  { %v9876_v0 = vadd.f32 %v9825_v3, %v9617_v28 }
0x1339   :  { %v9827_v49 = vpop.f32.mrf.mxu0  ;;  %v10084_v1 = vpop.f32.mrf.mxu1 }
0x133a   :  { %v18340_v50 = vadd.f32 %v10084_v1, %v9876_v0 }
0x133b   :  { %v9830_v18 = vpop.f32.mrf.mxu0  ;;  %v10086_v43 = vpop.f32.mrf.mxu1 }
0x133c   :  { %v9877_v33 = vadd.f32 %v9830_v18, %v9618_v19  ;;  %v9625_v19 = vld [vmem:[#allocation37 + $0x78] sm:$0xff] }
0x133d   :  { %v9832_v57 = vpop.f32.mrf.mxu0  ;;  %v10089_v5 = vpop.f32.mrf.mxu1 }
0x133e   :  { %v18342_v23 = vadd.f32 %v10089_v5, %v9877_v33 }
0x133f   :  { %v9833_v54 = vpop.f32.mrf.mxu0  ;;  %v10091_v52 = vpop.f32.mrf.mxu1 }
0x1340   :  { %v9878_v4 = vadd.f32 %v9833_v54, %v9619_v6  ;;  %v9626_v54 = vld [vmem:[#allocation37 + $0x80] sm:$0xff] }
0x1341   :  { %v9835_v29 = vpop.f32.mrf.mxu0  ;;  %v10092_v24 = vpop.f32.mrf.mxu1 }
0x1342   :  { %v18344_v61 = vadd.f32 %v10092_v24, %v9878_v4 }
0x1343   :  { %v9838_v62 = vpop.f32.mrf.mxu0  ;;  %v10094_v51 = vpop.f32.mrf.mxu1 }
0x1344   :  { %v9879_v22 = vadd.f32 %v9838_v62, %v9620_v42  ;;  %v9627_v51 = vld [vmem:[#allocation37 + $0x88] sm:$0xff] }
0x1345   :  { %v9840_v37 = vpop.f32.mrf.mxu0  ;;  %v10097_v63 = vpop.f32.mrf.mxu1 }
0x1346   :  { %v18346_v36 = vadd.f32 %v10097_v63, %v9879_v22 }
0x1347   :  { %v9841_v40 = vpop.f32.mrf.mxu0  ;;  %v10099_v39 = vpop.f32.mrf.mxu1 }
0x1348   :  { %v9880_v34 = vadd.f32 %v9841_v40, %v9621_v8 }
0x1349   :  { %v9843_v27 = vpop.f32.mrf.mxu0  ;;  %v10100_v20 = vpop.f32.mrf.mxu1 }
0x134a   :  { %v18348_v58 = vadd.f32 %v10100_v20, %v9880_v34 }
0x134b   :  { %v9846_v35 = vpop.f32.mrf.mxu0  ;;  %v10102_v15 = vpop.f32.mrf.mxu1 }
0x134c   :  { %v9881_v45 = vadd.f32 %v9846_v35, %v9622_v14 }
0x134d   :  { %v9848_v47 = vpop.f32.mrf.mxu0  ;;  %v10105_v46 = vpop.f32.mrf.mxu1 }
0x134e   :  { %v18350_v55 = vadd.f32 %v10105_v46, %v9881_v45 }
0x134f   :  { %v9849_v25 = vpop.f32.mrf.mxu0  ;;  %v10107_v9 = vpop.f32.mrf.mxu1 }
0x1350   :  { %v9882_v11 = vadd.f32 %v9849_v25, %v9623_v16 }
0x1351   :  { %v9851_v59 = vpop.f32.mrf.mxu0  ;;  %v10108_v41 = vpop.f32.mrf.mxu1 }
0x1352   :  { %v18352_v28 = vadd.f32 %v10108_v41, %v9882_v11 }
0x1353   :  { %v9854_v3 = vpop.f32.mrf.mxu0  ;;  %v10110_v12 = vpop.f32.mrf.mxu1 }
0x1354   :  { %v9883_v0 = vadd.f32 %v9854_v3, %v9624_v26 }
0x1355   :  { %v9856_v49 = vpop.f32.mrf.mxu0  ;;  %v10113_v1 = vpop.f32.mrf.mxu1 }
0x1356   :  { %v18354_v18 = vadd.f32 %v10113_v1, %v9883_v0 }
0x1357   :  { %v9857_v43 = vpop.f32.mrf.mxu0  ;;  %v10115_v33 = vpop.f32.mrf.mxu1 }
0x1358   :  { %v9884_v57 = vadd.f32 %v9857_v43, %v9625_v19 }
0x1359   :  { %v9859_v5 = vpop.f32.mrf.mxu0  ;;  %v10116_v6 = vpop.f32.mrf.mxu1 }
0x135a   :  { %v18356_v52 = vadd.f32 %v10116_v6, %v9884_v57 }
0x135b   :  { %v9862_v4 = vpop.f32.mrf.mxu0  ;;  %v10118_v29 = vpop.f32.mrf.mxu1 }
0x135c   :  { %v9885_v24 = vadd.f32 %v9862_v4, %v9626_v54 }
0x135d   :  { %v9864_v42 = vpop.f32.mrf.mxu0  ;;  %v10121_v62 = vpop.f32.mrf.mxu1 }
0x135e   :  { %v18358_v22 = vadd.f32 %v10121_v62, %v9885_v24 }
0x135f   :  { %v9865_v37 = vpop.f32.mrf.mxu0  ;;  %v10123_v63 = vpop.f32.mrf.mxu1 }
0x1360   :  { %v9886_v8 = vadd.f32 %v9865_v37, %v9627_v51 }
0x1361   :  { %v9867_v40 = vpop.f32.mrf.mxu0  ;;  %v10124_v39 = vpop.f32.mrf.mxu1 }
0x1362   :  { %v18360_v34 = vadd.f32 %v10124_v39, %v9886_v8 }
0x1363   :  { %v10316_v27 = vpop.f32.mrf.mxu0  ;;  %v10126_v20 = vpop.f32.mrf.mxu1 }
0x1364   :  { %v10387_v35 = vadd.f32 %v10316_v27, %v18326_v21 }
0x1365   :  { %v10318_v14 = vpop.f32.mrf.mxu0 }
0x1366   :  { %v10405_v46 = vmax.f32 %v10387_v35, 0.0 }
0x1367   :  { %v10319_v15 = vpop.f32.mrf.mxu0 }
0x1368   :  { %v10388_v45 = vadd.f32 %v10319_v15, %v18328_v7 }
0x1369   :  { %v10321_v47 = vpop.f32.mrf.mxu0 }
0x136a   :  { %v10406_v16 = vmax.f32 %v10388_v45, 0.0 }
0x136b   :  { %v10324_v25 = vpop.f32.mrf.mxu0 }
0x136c   :  { %v10423_v9 = vpack.c.bf16 %v10406_v16, %v10405_v46  ;;  %v10389_v59 = vadd.f32 %v10324_v25, %v18330_v30 }
0x136d   :  { %v10326_v11 = vpop.f32.mrf.mxu0 }
0x136e   :  { %13206 = vmatmul.mubr.bf16.vlgmr.msra.gmra.mxu1 %v10423_v9  ;;  %v10407_v21 = vmax.f32 %v10389_v59, 0.0 }
0x136f   :  { %v10327_v41 = vpop.f32.mrf.mxu0  ;;  %13209 = vmatprep.mubr.msk.bf16.mxu1 %vm15303_vm0, %v18870_v53 }
0x1370   :  { %v10390_v26 = vadd.f32 %v10327_v41, %v18332_v2 }
0x1371   :  { %v10329_v3 = vpop.f32.mrf.mxu0 }
0x1372   :  { %v10408_v12 = vmax.f32 %v10390_v26, 0.0 }
0x1373   :  { %v10332_v0 = vpop.f32.mrf.mxu0 }
0x1374   :  { %v10424_v7 = vpack.c.bf16 %v10408_v12, %v10407_v21  ;;  %v10391_v1 = vadd.f32 %v10332_v0, %v18334_v13 }
0x1375   :  { %v10334_v49 = vpop.f32.mrf.mxu0 }
0x1376   :  { %13210 = vmatmul.mubr.bf16.gmra.mxu1 %v10424_v7  ;;  %v10409_v33 = vmax.f32 %v10391_v1, 0.0 }
0x1377   :  { %v10335_v19 = vpop.f32.mrf.mxu0  ;;  %13213 = vmatprep.mubr.msk.bf16.mxu1 %vm15303_vm0, %v18870_v53 }
0x1378   :  { %v10392_v30 = vadd.f32 %v10335_v19, %v18336_v17 }
0x1379   :  { %v10337_v43 = vpop.f32.mrf.mxu0 }
0x137a   :  { %v10410_v57 = vmax.f32 %v10392_v30, 0.0 }
0x137b   :  { %v10340_v5 = vpop.f32.mrf.mxu0 }
0x137c   :  { %v10425_v2 = vpack.c.bf16 %v10410_v57, %v10409_v33  ;;  %v10393_v54 = vadd.f32 %v10340_v5, %v18338_v56 }
0x137d   :  { %v10342_v6 = vpop.f32.mrf.mxu0 }
0x137e   :  { %13214 = vmatmul.mubr.bf16.gmra.mxu1 %v10425_v2  ;;  %v10411_v24 = vmax.f32 %v10393_v54, 0.0  ;;  %v10608_v54 = vunpack.c.l.bf16 %v18048_v38 }
0x137f   :  { %v10343_v4 = vpop.f32.mrf.mxu0  ;;  %13217 = vmatprep.mubr.msk.bf16.mxu1 %vm15303_vm0, %v18870_v53 }
0x1380   :  { %v10394_v13 = vadd.f32 %v10343_v4, %v18340_v50 }
0x1381   :  { %v10345_v29 = vpop.f32.mrf.mxu0 }
0x1382   :  { %v10412_v42 = vmax.f32 %v10394_v13, 0.0 }
0x1383   :  { %v10348_v62 = vpop.f32.mrf.mxu0 }
0x1384   :  { %v10426_v17 = vpack.c.bf16 %v10412_v42, %v10411_v24  ;;  %v10395_v37 = vadd.f32 %v10348_v62, %v18342_v23  ;;  %v10609_v24 = vunpack.c.h.bf16 %v18048_v38 }
0x1385   :  { %v10350_v51 = vpop.f32.mrf.mxu0 }
0x1386   :  { %13218 = vmatmul.mubr.bf16.gmra.mxu1 %v10426_v17  ;;  %v10413_v40 = vmax.f32 %v10395_v37, 0.0 }
0x1387   :  { %v10351_v63 = vpop.f32.mrf.mxu0  ;;  %13221 = vmatprep.mubr.msk.bf16.mxu1 %vm15303_vm0, %v18870_v53 }
0x1388   :  { %v10396_v56 = vadd.f32 %v10351_v63, %v18344_v61 }
0x1389   :  { %v10353_v8 = vpop.f32.mrf.mxu0 }
0x138a   :  { %v10414_v39 = vmax.f32 %v10396_v56, 0.0  ;;  %v10610_v56 = vunpack.c.l.bf16 %v18059_v31 }
0x138b   :  { %v10356_v27 = vpop.f32.mrf.mxu0 }
0x138c   :  { %v10427_v50 = vpack.c.bf16 %v10414_v39, %v10413_v40  ;;  %v10397_v14 = vadd.f32 %v10356_v27, %v18346_v36 }
0x138d   :  { %v10358_v20 = vpop.f32.mrf.mxu0 }
0x138e   :  { %13222 = vmatmul.mubr.bf16.gmra.mxu1 %v10427_v50  ;;  %v10415_v45 = vmax.f32 %v10397_v14, 0.0  ;;  %v10611_v20 = vunpack.c.h.bf16 %v18059_v31 }
0x138f   :  { %v10359_v35 = vpop.f32.mrf.mxu0  ;;  %13225 = vmatprep.mubr.msk.bf16.mxu1 %vm15303_vm0, %v18870_v53 }
0x1390   :  { %v10398_v23 = vadd.f32 %v10359_v35, %v18348_v58 }
0x1391   :  { %v10361_v15 = vpop.f32.mrf.mxu0 }
0x1392   :  { %v10416_v47 = vmax.f32 %v10398_v23, 0.0 }
0x1393   :  { %v10364_v46 = vpop.f32.mrf.mxu0 }
0x1394   :  { %v10428_v61 = vpack.c.bf16 %v10416_v47, %v10415_v45  ;;  %v10399_v25 = vadd.f32 %v10364_v46, %v18350_v55 }
0x1395   :  { %v10366_v16 = vpop.f32.mrf.mxu0 }
0x1396   :  { %13226 = vmatmul.mubr.bf16.gmra.mxu1 %v10428_v61  ;;  %v10417_v59 = vmax.f32 %v10399_v25, 0.0 }
0x1397   :  { %v10367_v9 = vpop.f32.mrf.mxu0  ;;  %13229 = vmatprep.mubr.msk.bf16.mxu1 %vm15303_vm0, %v18870_v53 }
0x1398   :  { %v10400_v36 = vadd.f32 %v10367_v9, %v18352_v28 }
0x1399   :  { %v10369_v11 = vpop.f32.mrf.mxu0 }
0x139a   :  { %v10418_v41 = vmax.f32 %v10400_v36, 0.0 }
0x139b   :  { %v10372_v26 = vpop.f32.mrf.mxu0 }
0x139c   :  { %v10429_v58 = vpack.c.bf16 %v10418_v41, %v10417_v59  ;;  %v10401_v21 = vadd.f32 %v10372_v26, %v18354_v18  ;;  %v10616_v41 = vunpack.c.l.bf16 %v18092_v48 }
0x139d   :  { %v10374_v3 = vpop.f32.mrf.mxu0 }
0x139e   :  { %13230 = vmatmul.mubr.bf16.gmra.mxu1 %v10429_v58  ;;  %v10419_v7 = vmax.f32 %v10401_v21, 0.0  ;;  %v10617_v21 = vunpack.c.h.bf16 %v18092_v48 }
0x139f   :  { %v10375_v12 = vpop.f32.mrf.mxu0  ;;  %13233 = vmatprep.mubr.msk.bf16.mxu1 %vm15303_vm0, %v18870_v53 }
0x13a0   :  { %v10402_v55 = vadd.f32 %v10375_v12, %v18356_v52  ;;  %v18398_v52 = vld [vmem:[#allocation35] ss:$0 sm:$0xff] }
0x13a1   :  { %v10377_v0 = vpop.f32.mrf.mxu0 }
0x13a2   :  { %v10420_v49 = vmax.f32 %v10402_v55, 0.0 }
0x13a3   :  { %v10380_v1 = vpop.f32.mrf.mxu0 }
0x13a4   :  { %v10430_v28 = vpack.c.bf16 %v10420_v49, %v10419_v7  ;;  %v10403_v30 = vadd.f32 %v10380_v1, %v18358_v22 }
0x13a5   :  { %v10382_v19 = vpop.f32.mrf.mxu0 }
0x13a6   :  { %13234 = vmatmul.mubr.bf16.gmra.mxu1 %v10430_v28  ;;  %v10421_v57 = vmax.f32 %v10403_v30, 0.0  ;;  %v10618_v30 = vunpack.c.l.bf16 %v18103_v44 }
0x13a7   :  { %v10383_v43 = vpop.f32.mrf.mxu0  ;;  %13237 = vmatprep.mubr.msk.bf16.mxu1 %vm15303_vm0, %v18870_v53 }
0x13a8   :  { %v10404_v18 = vadd.f32 %v10383_v43, %v18360_v34 }
0x13a9   :  { %v10385_v33 = vpop.f32.mrf.mxu0 }
0x13aa   :  { %v10422_v5 = vmax.f32 %v10404_v18, 0.0  ;;  %v10619_v18 = vunpack.c.h.bf16 %v18103_v44 }
0x13ac   :  { %v10431_v2 = vpack.c.bf16 %v10422_v5, %v10421_v57 }
0x13ae   :  { %13238 = vmatmul.mubr.bf16.gmra.mxu1 %v10431_v2 }
0x13af   :  { %13243 = vmatprep.mubr.msk.bf16.mxu1 %vm15303_vm0, %v18870_v53 }
0x142e   :  { %v10537_v6 = vpop.f32.mrf.mxu1 }
0x142f   :  { %v10538_v22 = vadd.f32 %v18398_v52, %v10537_v6 }
0x1430   :  { %v13207_v4 = vpop.f32.mrf.mxu1 }
0x1431   :  { %v10626_v13 = vadd.f32 %v10608_v54, %v10538_v22 }
0x1432   :  { %v10540_v29 = vpop.f32.mrf.mxu1 }
0x1433   :  { %v10541_v34 = vadd.f32 %v18398_v52, %v10540_v29  ;;  %v10644_v51 = vmax.f32 %v10626_v13, 0.0 }
0x1434   :  { %v13208_v42 = vpop.f32.mrf.mxu1 }
0x1435   :  { %v10627_v62 = vadd.f32 %v10609_v24, %v10541_v34  ;;  %v10620_v24 = vunpack.c.l.bf16 %v18114_v10 }
0x1436   :  { %v10545_v17 = vpop.f32.mrf.mxu1 }
0x1437   :  { %v10645_v37 = vmax.f32 %v10627_v62, 0.0  ;;  %v10546_v63 = vadd.f32 %v18398_v52, %v10545_v17  ;;  %v10621_v62 = vunpack.c.h.bf16 %v18114_v10  ;;  %v10615_v10 = vunpack.c.h.bf16 %v18081_v32 }
0x1438   :  { %v13211_v8 = vpop.f32.mrf.mxu1 }
0x1439   :  { %v18406_v40 = vpack.c.bf16 %v10645_v37, %v10644_v51  ;;  %v10628_v39 = vadd.f32 %v10610_v56, %v10546_v63 }
0x143a   :  { %v10548_v27 = vpop.f32.mrf.mxu1 }
0x143b   :  { %v10549_v50 = vadd.f32 %v18398_v52, %v10548_v27  ;;  %v10646_v23 = vmax.f32 %v10628_v39, 0.0 }
0x143c   :  { %v13212_v14 = vpop.f32.mrf.mxu1 }
0x143d   :  { %v10629_v38 = vadd.f32 %v10611_v20, %v10549_v50 }
0x143e   :  { %v18410_v35 = vpop.f32.mrf.mxu1 }
0x143f   :  { %v10647_v15 = vmax.f32 %v10629_v38, 0.0 }
0x1440   :  { %v13215_v45 = vpop.f32.mrf.mxu1 }
0x1441   :  { %v18412_v47 = vpack.c.bf16 %v10647_v15, %v10646_v23  ;;  %v10614_v15 = vunpack.c.l.bf16 %v18081_v32 }
0x1442   :  { %v18414_v46 = vpop.f32.mrf.mxu1 }
0x1444   :  { %v13216_v61 = vpop.f32.mrf.mxu1 }
0x1446   :  { %v10561_v16 = vpop.f32.mrf.mxu1 }
0x1447   :  { %v10562_v50 = vadd.f32 %v18398_v52, %v10561_v16 }
0x1448   :  { %v13219_v25 = vpop.f32.mrf.mxu1 }
0x144a   :  { %v10564_v9 = vpop.f32.mrf.mxu1 }
0x144b   :  { %v10565_v8 = vadd.f32 %v18398_v52, %v10564_v9  ;;  %v18910_v9 = vld [vmem:[#allocation120_spill] sm:$0xff] }
0x144c   :  { %v13220_v36 = vpop.f32.mrf.mxu1  ;;  %v10623_v16 = vunpack.c.h.bf16 %v18910_v9 }
0x144d   :  { %v10633_v61 = vadd.f32 %v10615_v10, %v10565_v8  ;;  %v10622_v36 = vunpack.c.l.bf16 %v18910_v9 }
0x144e   :  { %v10569_v11 = vpop.f32.mrf.mxu1 }
0x144f   :  { %v10570_v59 = vadd.f32 %v18398_v52, %v10569_v11  ;;  %v10632_v11 = vadd.f32 %v10614_v15, %v10562_v50  ;;  %v10673_v50 = vunpack.c.l.bf16 %v18412_v47 }
0x1450   :  { %v13223_v31 = vpop.f32.mrf.mxu1 }
0x1451   :  { %v10634_v58 = vadd.f32 %v10616_v41, %v10570_v59 }
0x1452   :  { %v10572_v26 = vpop.f32.mrf.mxu1 }
0x1453   :  { %v10573_v3 = vadd.f32 %v18398_v52, %v10572_v26  ;;  %v10652_v7 = vmax.f32 %v10634_v58, 0.0 }
0x1454   :  { %v13224_v12 = vpop.f32.mrf.mxu1 }
0x1455   :  { %v10635_v55 = vadd.f32 %v10617_v21, %v10573_v3  ;;  %v10651_v3 = vmax.f32 %v10633_v61, 0.0 }
0x1456   :  { %v10577_v0 = vpop.f32.mrf.mxu1 }
0x1457   :  { %v10653_v49 = vmax.f32 %v10635_v55, 0.0  ;;  %v10578_v1 = vadd.f32 %v18398_v52, %v10577_v0  ;;  %v10650_v0 = vmax.f32 %v10632_v11, 0.0  ;;  %v10672_v11 = vunpack.c.h.bf16 %v18406_v40 }
0x1458   :  { %v13227_v28 = vpop.f32.mrf.mxu1 }
0x1459   :  { %v18421_v19 = vpack.c.bf16 %v10653_v49, %v10652_v7  ;;  %v10636_v48 = vadd.f32 %v10618_v30, %v10578_v1  ;;  %v10557_v1 = vadd.f32 %v18398_v52, %v18414_v46  ;;  %v18470_v30 = vpack.c.bf16 %v10651_v3, %v10650_v0 }
0x145a   :  { %v10580_v43 = vpop.f32.mrf.mxu1 }
0x145b   :  { %v10679_v33 = vunpack.c.l.bf16 %v18421_v19  ;;  %v10680_v57 = vunpack.c.h.bf16 %v18421_v19  ;;  %v10581_v5 = vadd.f32 %v18398_v52, %v10580_v43  ;;  %v10654_v4 = vmax.f32 %v10636_v48, 0.0  ;;  %v18911_v48 = vld [vmem:[#allocation124_spill] sm:$0xff] }
0x145c   :  { %v13228_v2 = vpop.f32.mrf.mxu1  ;;  %v10612_v46 = vunpack.c.l.bf16 %v18911_v48 }
0x145d   :  { %v10637_v6 = vadd.f32 %v10619_v18, %v10581_v5  ;;  %v18432_v22 = vpack.i.bf16 %v10680_v57, %v10679_v33  ;;  %v10554_v18 = vadd.f32 %v18398_v52, %v18410_v35  ;;  %v10613_v5 = vunpack.c.h.bf16 %v18911_v48 }
0x145e   :  { %v10585_v54 = vpop.f32.mrf.mxu1 }
0x145f   :  { %v10655_v13 = vmax.f32 %v10637_v6, 0.0  ;;  %v10586_v44 = vadd.f32 %v18398_v52, %v10585_v54  ;;  %13395 = vrot.lane.b32.xlu0 %v18432_v22, %s15304_s19 }
0x1460   :  { %v13231_v29 = vpop.f32.mrf.mxu1 }
0x1461   :  { %v18437_v34 = vpack.c.bf16 %v10655_v13, %v10654_v4  ;;  %v10638_v37 = vadd.f32 %v10620_v24, %v10586_v44  ;;  %v10631_v4 = vadd.f32 %v10613_v5, %v10557_v1  ;;  %v10677_v44 = vunpack.c.l.bf16 %v18470_v30 }
0x1462   :  { %v10588_v42 = vpop.f32.mrf.mxu1  ;;  %v10678_v29 = vunpack.c.h.bf16 %v18470_v30  ;;  %v10630_v24 = vadd.f32 %v10612_v46, %v10554_v18 }
0x1463   :  { %v10681_v17 = vunpack.c.l.bf16 %v18437_v34  ;;  %v10682_v51 = vunpack.c.h.bf16 %v18437_v34  ;;  %v10589_v63 = vadd.f32 %v18398_v52, %v10588_v42  ;;  %v10656_v14 = vmax.f32 %v10638_v37, 0.0 }
0x1464   :  { %v13232_v56 = vpop.f32.mrf.mxu1  ;;  %v10649_v42 = vmax.f32 %v10631_v4, 0.0  ;;  %v10648_v37 = vmax.f32 %v10630_v24, 0.0 }
0x1465   :  { %v10639_v39 = vadd.f32 %v10621_v62, %v10589_v63  ;;  %v13399_v27 = vpack.i.bf16 %v10682_v51, %v10681_v17  ;;  %v13449_v62 = vpack.i.bf16 %v10678_v29, %v10677_v44 }
0x1466   :  { %v10593_v20 = vpop.f32.mrf.mxu1  ;;  %v18496_v63 = vpack.c.bf16 %v10649_v42, %v10648_v37 }
0x1467   :  { %v10657_v38 = vmax.f32 %v10639_v39, 0.0  ;;  %v10594_v23 = vadd.f32 %v18398_v52, %v10593_v20  ;;  %13400 = vrot.lane.b32.xlu1 %v13399_v27, %s15304_s19  ;;  %v18912_v39 = vld [vmem:[#allocation108_spill] sm:$0xff]  ;;  %v10674_v20 = vunpack.c.h.bf16 %v18412_v47 }
0x1468   :  { %v13235_v45 = vpop.f32.mrf.mxu1  ;;  %v10675_v10 = vunpack.c.l.bf16 %v18496_v63 }
0x1469   :  { %v18454_v25 = vpack.c.bf16 %v10657_v38, %v10656_v14  ;;  %v10640_v26 = vadd.f32 %v10622_v36, %v10594_v23  ;;  %v10624_v14 = vunpack.c.l.bf16 %v18912_v39  ;;  %v10676_v38 = vunpack.c.h.bf16 %v18496_v63 }
0x146a   :  { %v10596_v59 = vpop.f32.mrf.mxu1  ;;  %v13479_v45 = vpack.i.bf16 %v10674_v20, %v10673_v50 }
0x146b   :  { %v10683_v31 = vunpack.c.l.bf16 %v18454_v25  ;;  %v10684_v41 = vunpack.c.h.bf16 %v18454_v25  ;;  %v10597_v58 = vadd.f32 %v18398_v52, %v10596_v59  ;;  %13405 = vrot.lane.b32.xlu1 %v13399_v27, %s15259_s18  ;;  %v10658_v7 = vmax.f32 %v10640_v26, 0.0 }
0x146c   :  { %v13236_v32 = vpop.f32.mrf.mxu1  ;;  %v13464_v61 = vpack.i.bf16 %v10676_v38, %v10675_v10 }
0x146d   :  { %v10641_v21 = vadd.f32 %v10623_v16, %v10597_v58  ;;  %v13419_v12 = vpack.i.bf16 %v10684_v41, %v10683_v31  ;;  %v14349_v32 = vld [vmem:[#allocation58 + $0x4] ss:$8 sps:$4 sm:$0x3f]  }
0x146e   :  { %v10601_v55 = vpop.f32.mrf.mxu1  ;;  %12380 = vmatprep.mubr.msk.bf16.mxu0 %vm1199_vm2, %v14349_v32 }
0x146f   :  { %v10659_v49 = vmax.f32 %v10641_v21, 0.0  ;;  %13410 = vrot.lane.b32.xlu1 %v13399_v27, %s15305_s10  ;;  %13420 = vrot.lane.b32.xlu0 %v13419_v12, %s15259_s18  ;;  %v10602_v8 = vadd.f32 %v18398_v52, %v10601_v55  ;;  %v10625_v27 = vunpack.c.h.bf16 %v18912_v39 }
0x1470   :  { %v13239_v28 = vpop.f32.mrf.mxu1 }
0x1471   :  { %v18472_v43 = vpack.c.bf16 %v10659_v49, %v10658_v7  ;;  %v10642_v15 = vadd.f32 %v10624_v14, %v10602_v8 }
0x1472   :  { %v10604_v2 = vpop.f32.mrf.mxu1 }
0x1473   :  { %v10685_v6 = vunpack.c.l.bf16 %v18472_v43  ;;  %v10686_v54 = vunpack.c.h.bf16 %v18472_v43  ;;  %13425 = vrot.lane.b32.xlu0 %v13419_v12, %s15305_s10  ;;  %13415 = vrot.lane.b32.xlu1 %v13419_v12, %s15304_s19  ;;  %v10605_v56 = vadd.f32 %v18398_v52, %v10604_v2  ;;  %v10660_v9 = vmax.f32 %v10642_v15, 0.0 }
0x1474   :  { %v13240_v13 = vpop.f32.mrf.mxu1 }
0x1475   :  { %v13444_v35 = vpack.i.bf16 %v10686_v54, %v10685_v6  ;;  %v10643_v23 = vadd.f32 %v10625_v27, %v10605_v56 }
0x1477   :  { %13445 = vrot.lane.b32.xlu1 %v13444_v35, %s15305_s10  ;;  %13430 = vrot.lane.b32.xlu0 %v13444_v35, %s15304_s19  ;;  %v10661_v52 = vmax.f32 %v10643_v23, 0.0 }
0x1479   :  { %v18522_v36 = vpack.c.bf16 %v10661_v52, %v10660_v9 }
0x147b   :  { %13450 = vrot.lane.b32.xlu1 %v13449_v62, %s15304_s19  ;;  %13435 = vrot.lane.b32.xlu0 %v13444_v35, %s15259_s18  ;;  %v10687_v59 = vunpack.c.l.bf16 %v18522_v36  ;;  %v10688_v16 = vunpack.c.h.bf16 %v18522_v36 }
0x147d   :  { %v13514_v58 = vpack.i.bf16 %v10688_v16, %v10687_v59 }
0x147f   :  { %13460 = vrot.lane.b32.xlu1 %v13449_v62, %s15259_s18  ;;  %13440 = vrot.lane.b32.xlu0 %v18432_v22, %s15259_s18 }
0x1483   :  { %13470 = vrot.lane.b32.xlu1 %v13449_v62, %s15305_s10  ;;  %13455 = vrot.lane.b32.xlu0 %v18432_v22, %s15305_s10  ;;  %v10671_v22 = vunpack.c.l.bf16 %v18406_v40 }
0x1485   :  { %v13494_v26 = vpack.i.bf16 %v10672_v11, %v10671_v22 }
0x1487   :  { %13480 = vrot.lane.b32.xlu1 %v13479_v45, %s15304_s19  ;;  %13465 = vrot.lane.b32.xlu0 %v13464_v61, %s15304_s19 }
0x148b   :  { %13490 = vrot.lane.b32.xlu1 %v13479_v45, %s15259_s18  ;;  %13475 = vrot.lane.b32.xlu0 %v13464_v61, %s15259_s18 }
0x148f   :  { %13500 = vrot.lane.b32.xlu1 %v13479_v45, %s15305_s10  ;;  %13485 = vrot.lane.b32.xlu0 %v13464_v61, %s15305_s10 }
0x1493   :  { %13495 = vrot.lane.b32.xlu0 %v13494_v26, %s15304_s19  ;;  %13515 = vrot.lane.b32.xlu1 %v13514_v58, %s15304_s19 }
0x1497   :  { %13505 = vrot.lane.b32.xlu0 %v13494_v26, %s15259_s18  ;;  %13520 = vrot.lane.b32.xlu1 %v13514_v58, %s15259_s18  ;;  %s15306_s18 = smov [#allocation59]  }
0x1498   :  { %s11542_s9 = sshll.u32 %s15306_s18, 4  ;;  %s11543_s9 = int_to_ptr.vmem [resolvable:$true] %s11542_s9 }
0x1499   :  { %s15156_s29 = scalar_lea.vmem %s11543_s9, 32  ;;  %p15161_p4 = scmp.lt.s32.totalorder %s11543_s9, %s11543_s9 }
0x149a   :  { %p15157_p3 = scmp.ne.s32.totalorder %s11543_s9, %s15156_s29  ;;  %p15162_p5 = scmp.lt.s32.totalorder %s15156_s29, %s15156_s29 }
0x149b   :  { %13510 = vrot.lane.b32.xlu0 %v13494_v26, %s15305_s10 }
0x149c   :  { %p15163_p6 = por %p15162_p5, %p15161_p4 }
0x149e   :  { %p15164_p7 = pnand %p15163_p6, %p15157_p3 }
0x149f   :  { %13525 = vrot.lane.b32.xlu0 %v13514_v58, %s15305_s10 }
0x14d1   :  { %v13396_v21 = vpop.permute.xlu0 %13395 }
0x14d2   :  { %v14377_v27 = vadd.high.f32.bf16 %v10680_v57, %v13396_v21 }
0x14d9   :  { %v13401_v3 = vpop.permute.xlu1 %13400 }
0x14da   :  { %v14364_v5 = vadd.low.f32.bf16 %v10681_v17, %v13401_v3  ;;  %v14371_v25 = vadd.high.f32.bf16 %v10682_v51, %v13401_v3 }
0x14dd   :  { %v13406_v12 = vpop.permute.xlu1 %13405 }
0x14de   :  { %v14378_v14 = vadd.high.f32.bf16 %v14371_v25, %v13406_v12 }
0x14e1   :  { %v13411_v55 = vpop.permute.xlu1 %13410  ;;  %v13421_v0 = vpop.permute.xlu0 %13420 }
0x14e2   :  { %v14381_v51 = vadd.high.f32.bf16 %v14378_v14, %v13411_v55 }
0x14e5   :  { %v13426_v7 = vpop.permute.xlu0 %13425  ;;  %v13416_v49 = vpop.permute.xlu1 %13415 }
0x14e6   :  { %v14362_v1 = vadd.high.f32.bf16 %v10684_v41, %v13416_v49  ;;  %v14363_v28 = vadd.low.f32.bf16 %v10683_v31, %v13416_v49  ;;  %v14372_v31 = vadd.low.f32.bf16 %v14364_v5, %v13406_v12  ;;  %v10934_v12 = vmul.f32 0.25, %v14381_v51 }
0x14e8   :  { %v14365_v2 = vadd.high.f32.bf16 %v14362_v1, %v13421_v0  ;;  %v14366_v46 = vadd.low.f32.bf16 %v14363_v28, %v13421_v0 }
0x14e9   :  { %v13446_v18 = vpop.permute.xlu1 %13445  ;;  %v13431_v48 = vpop.permute.xlu0 %13430 }
0x14ea   :  { %v14367_v35 = vadd.high.f32.bf16 %v10686_v54, %v13431_v48  ;;  %v14368_v24 = vadd.low.f32.bf16 %v10685_v6, %v13431_v48  ;;  %v14373_v56 = vadd.high.f32.bf16 %v14365_v2, %v13426_v7  ;;  %v14374_v17 = vadd.low.f32.bf16 %v14366_v46, %v13426_v7 }
0x14eb   :  { %v14379_v54 = vadd.low.f32.bf16 %v14372_v31, %v13411_v55  ;;  %v14380_v6 = vadd.low.f32.bf16 %v10679_v33, %v13396_v21 }
0x14ec   :  { %v10936_v52 = vmul.f32 0.25, %v14373_v56  ;;  %v10935_v45 = vmul.f32 0.25, %v14374_v17 }
0x14ed   :  { %v13451_v4 = vpop.permute.xlu1 %13450  ;;  %v13436_v13 = vpop.permute.xlu0 %13435  ;;  %v10933_v9 = vmul.f32 0.25, %v14379_v54 }
0x14ee   :  { %v14369_v42 = vadd.low.f32.bf16 %v14368_v24, %v13436_v13  ;;  %v14370_v41 = vadd.high.f32.bf16 %v14367_v35, %v13436_v13  ;;  %v14382_v26 = vadd.low.f32.bf16 %v10677_v44, %v13451_v4  ;;  %v14385_v19 = vadd.high.f32.bf16 %v10678_v29, %v13451_v4 }
0x14ef   :  { %v10947_v33 = vpack.c.bf16 %v10936_v52, %v10935_v45  ;;  %v10946_v28 = vpack.c.bf16 %v10934_v12, %v10933_v9 }
0x14f0   :  { %v14375_v8 = vadd.low.f32.bf16 %v14369_v42, %v13446_v18  ;;  %v14376_v39 = vadd.high.f32.bf16 %v14370_v41, %v13446_v18 }
0x14f1   :  { %v13461_v62 = vpop.permute.xlu1 %13460  ;;  %v13441_v37 = vpop.permute.xlu0 %13440 }
0x14f2   :  { %v10937_v23 = vmul.f32 0.25, %v14375_v8  ;;  %v10938_v43 = vmul.f32 0.25, %v14376_v39  ;;  %v14383_v58 = vadd.high.f32.bf16 %v14377_v27, %v13441_v37  ;;  %v14384_v32 = vadd.low.f32.bf16 %v14380_v6, %v13441_v37 }
0x14f3   :  { %v14386_v21 = vadd.low.f32.bf16 %v14382_v26, %v13461_v62  ;;  %v14389_v7 = vadd.high.f32.bf16 %v14385_v19, %v13461_v62 }
0x14f4   :  { %v10948_v61 = vpack.c.bf16 %v10938_v43, %v10937_v23 }
0x14f5   :  { %v13471_v15 = vpop.permute.xlu1 %13470  ;;  %v13456_v34 = vpop.permute.xlu0 %13455 }
0x14f6   :  { %10965 = vmatpush1.bf16.msra.mxu0 %v10948_v61  ;;  %v14387_v55 = vadd.low.f32.bf16 %v14384_v32, %v13456_v34  ;;  %v14388_v0 = vadd.high.f32.bf16 %v14383_v58, %v13456_v34  ;;  %v14390_v49 = vadd.low.f32.bf16 %v14386_v21, %v13471_v15  ;;  %v14391_v18 = vadd.high.f32.bf16 %v14389_v7, %v13471_v15 }
0x14f7   :  { %10966 = vmatprep.subr.bf16.mxu0 %v18899_v60 }
0x14f8   :  { %v10931_v48 = vmul.f32 0.25, %v14387_v55  ;;  %v10932_v5 = vmul.f32 0.25, %v14388_v0  ;;  %v10929_v2 = vmul.f32 0.25, %v14390_v49  ;;  %v10930_v42 = vmul.f32 0.25, %v14391_v18  ;;  %v14350_v49 = vld [vmem:[#allocation41] sm:$0x3f]  }
0x14f9   :  { %v13481_v57 = vpop.permute.xlu1 %13480  ;;  %v13466_v3 = vpop.permute.xlu0 %13465  ;;  %v14355_v18 = vld [vmem:[#allocation44] sm:$0xff]  }
0x14fa   :  { %10967 = vmatpush1.bf16.msra.mxu0 %v10947_v33  ;;  %v14392_v30 = vadd.low.f32.bf16 %v10675_v10, %v13466_v3  ;;  %v14393_v29 = vadd.high.f32.bf16 %v10676_v38, %v13466_v3  ;;  %v14394_v46 = vadd.low.f32.bf16 %v10673_v50, %v13481_v57  ;;  %v10945_v41 = vpack.c.bf16 %v10932_v5, %v10931_v48 }
0x14fb   :  { %10968 = vmatprep.subr.bf16.mxu0 %v18899_v60  ;;  %v14397_v25 = vadd.high.f32.bf16 %v10674_v20, %v13481_v57  ;;  %v10944_v56 = vpack.c.bf16 %v10930_v42, %v10929_v2 }
0x14fd   :  { %v13491_v1 = vpop.permute.xlu1 %13490  ;;  %v13476_v44 = vpop.permute.xlu0 %13475 }
0x14fe   :  { %v14395_v4 = vadd.low.f32.bf16 %v14392_v30, %v13476_v44  ;;  %10969 = vmatpush1.bf16.msra.mxu0 %v10946_v28  ;;  %v14396_v24 = vadd.high.f32.bf16 %v14393_v29, %v13476_v44  ;;  %v14398_v10 = vadd.low.f32.bf16 %v14394_v46, %v13491_v1  ;;  %v14401_v38 = vadd.high.f32.bf16 %v14397_v25, %v13491_v1  ;;  %v14351_v1 = vld [vmem:[#allocation43] sm:$0x3f]   ;;  %v14353_v44 = vld [vmem:[#allocation44 + $0x8] sm:$0xff]   ;;  %v14354_v28 = vld [vmem:[#allocation46] sm:$0xff]  }
0x14ff   :  { %10970 = vmatprep.subr.bf16.mxu0 %v18899_v60 }
0x1501   :  { %v13501_v13 = vpop.permute.xlu1 %13500  ;;  %v13486_v35 = vpop.permute.xlu0 %13485 }
0x1502   :  { %v14399_v31 = vadd.low.f32.bf16 %v14395_v4, %v13486_v35  ;;  %v14400_v63 = vadd.high.f32.bf16 %v14396_v24, %v13486_v35  ;;  %10971 = vmatpush1.bf16.msra.mxu0 %v10945_v41  ;;  %v14402_v50 = vadd.low.f32.bf16 %v14398_v10, %v13501_v13  ;;  %v14403_v17 = vadd.high.f32.bf16 %v14401_v38, %v13501_v13  ;;  %v12391_v10 = vld [vmem:[#allocation47] ss:$0 sm:$0xff] }
0x1503   :  { %10972 = vmatprep.subr.bf16.mxu0 %v18899_v60 }
0x1504   :  { %v10927_v8 = vmul.f32 0.25, %v14399_v31  ;;  %v10928_v39 = vmul.f32 0.25, %v14400_v63  ;;  %v10925_v14 = vmul.f32 0.25, %v14402_v50  ;;  %v10926_v47 = vmul.f32 0.25, %v14403_v17 }
0x1505   :  { %v13496_v62 = vpop.permute.xlu0 %13495  ;;  %v13516_v37 = vpop.permute.xlu1 %13515 }
0x1506   :  { %10973 = vmatpush1.bf16.msra.mxu0 %v10944_v56  ;;  %v10943_v20 = vpack.c.bf16 %v10928_v39, %v10927_v8  ;;  %v14404_v23 = vadd.high.f32.bf16 %v10672_v11, %v13496_v62  ;;  %v14405_v43 = vadd.low.f32.bf16 %v10671_v22, %v13496_v62  ;;  %v10942_v51 = vpack.c.bf16 %v10926_v47, %v10925_v14  ;;  %v14356_v47 = vld [vmem:[#allocation49] sm:$0x3f]  }
0x1507   :  { %10974 = vmatprep.subr.bf16.mxu0 %v18899_v60  ;;  %v14408_v52 = vadd.high.f32.bf16 %v10688_v16, %v13516_v37  ;;  %v14409_v45 = vadd.low.f32.bf16 %v10687_v59, %v13516_v37  ;;  %v14347_v59 = vld [vmem:[#allocation58] ss:$8 sps:$4 sm:$0x3f]  }
0x1509   :  { %v13506_v27 = vpop.permute.xlu0 %13505  ;;  %v13521_v54 = vpop.permute.xlu1 %13520 }
0x150a   :  { %10975 = vmatpush1.bf16.msra.mxu0 %v10943_v20  ;;  %v14406_v15 = vadd.low.f32.bf16 %v14405_v43, %v13506_v27  ;;  %v14407_v34 = vadd.high.f32.bf16 %v14404_v23, %v13506_v27  ;;  %v14412_v26 = vadd.low.f32.bf16 %v14409_v45, %v13521_v54  ;;  %v14413_v11 = vadd.high.f32.bf16 %v14408_v52, %v13521_v54  ;;  %v14357_v20 = vld [vmem:[#allocation50] sm:$0x3f]   ;;  %v14359_v43 = vld [vmem:[#allocation52 + $0x8] sm:$0xff]  }
0x150b   :  { %10976 = vmatprep.subr.bf16.mxu0 %v18899_v60  ;;  %v14358_v23 = vld [vmem:[#allocation53 + $0x8] sm:$0xff]  }
0x150d   :  { %v13511_v6 = vpop.permute.xlu0 %13510 }
0x150e   :  { %v14410_v61 = vadd.low.f32.bf16 %v14406_v15, %v13511_v6  ;;  %v14411_v9 = vadd.high.f32.bf16 %v14407_v34, %v13511_v6  ;;  %10977 = vmatpush1.bf16.msra.mxu0 %v10942_v51  ;;  %v14360_v6 = vld [vmem:[#allocation53] sm:$0xff]   ;;  %v14361_v15 = vld [vmem:[#allocation52] sm:$0xff]  }
0x150f   :  { %10978 = vmatprep.subr.bf16.mxu0 %v18899_v60 }
0x1510   :  { %v10923_v22 = vmul.f32 0.25, %v14410_v61  ;;  %v10924_v58 = vmul.f32 0.25, %v14411_v9 }
0x1511   :  { %v13526_v40 = vpop.permute.xlu0 %13525 }
0x1512   :  { %v10941_v32 = vpack.c.bf16 %v10924_v58, %v10923_v22  ;;  %v14414_v57 = vadd.low.f32.bf16 %v14412_v26, %v13526_v40  ;;  %v14415_v3 = vadd.high.f32.bf16 %v14413_v11, %v13526_v40 }
0x1514   :  { %v10939_v12 = vmul.f32 0.25, %v14414_v57  ;;  %v10940_v19 = vmul.f32 0.25, %v14415_v3  ;;  %10979 = vmatpush1.bf16.msra.mxu0 %v10941_v32  ;;  %v12402_v3 = vld [vmem:[#allocation55] ss:$0 sm:$0xff] }
0x1515   :  { %10994 = vmatprep.subr.bf16.mxu0 %v18899_v60  ;;  %v14352_v60 = vld [vmem:[#allocation46 + $0x8] sm:$0xff]  }
0x1516   :  { %v10949_v36 = vpack.c.bf16 %v10940_v19, %v10939_v12 }
0x1518   :  { %10995 = vmatpush2.bf16.msra.mxu0 %v10949_v36 }
0x1519   :  { %13247 = vmatprep.subr.bf16.mxu0 %v18870_v53 }
0x151b   :  { %10997 = vmatmul.mubr.bf16.vlgmr.msra.gmra.mxu0 %v14347_v59 }
0x151c   :  { %13249 = vmatprep.mubr.msk.bf16.mxu0 %vm15303_vm0, %v18870_v53 }
0x15db   :  { %v10998_v16 = vpop.f32.mrf.mxu0 }
0x15dd   :  { %v11000_v33 = vpop.f32.mrf.mxu0 }
0x15df   :  { %v11001_v21 = vpop.f32.mrf.mxu0 }
0x15e0   :  { %v11005_v55 = vpack.c.bf16 %v11001_v21, %v10998_v16 }
0x15e1   :  { %v11003_v0 = vpop.f32.mrf.mxu0 }
0x15e2   :  { %v11019_v7 = vsel %vm11017_vm3, %v11005_v55, 0 }
0x15e3   :  { %13242 = vmatpush3.bf16.msra.mxu1 %v11019_v7  ;;  %13248 = vmatpush3.bf16.msra.mxu0 %v11019_v7 }
0x15e4   :  { %13253 = vmatprep.subr.bf16.mxu1 %v18870_v53  ;;  %13261 = vmatprep.subr.bf16.mxu0 %v18870_v53 }
0x15e6   :  { %13244 = vmatmul.mubr.msk.bf16.vlgmr.msra.gmra.mxu1 %vm11013_vm4, %v14350_v49  ;;  %13250 = vmatmul.mubr.msk.bf16.vlgmr.msra.gmra.mxu0 %vm11013_vm4, %v14351_v1 }
0x15e7   :  { %13257 = vmatprep.mubr.msk.bf16.mxu1 %vm15303_vm0, %v18870_v53  ;;  %13265 = vmatprep.mubr.msk.bf16.mxu0 %vm15303_vm0, %v18870_v53 }
0x15e8   :  { %13254 = vmatpush3.bf16.msra.mxu1 %v14352_v60  ;;  %13262 = vmatpush3.bf16.msra.mxu0 %v14353_v44 }
0x15e9   :  { %13255 = vmatprep.subr.bf16.mxu1 %v18870_v53  ;;  %13263 = vmatprep.subr.bf16.mxu0 %v18870_v53 }
0x15ec   :  { %13256 = vmatpush3.bf16.msra.mxu1 %v14354_v28  ;;  %13264 = vmatpush3.bf16.msra.mxu0 %v14355_v18 }
0x15ed   :  { %13269 = vmatprep.subr.bf16.mxu1 %v18870_v53  ;;  %13275 = vmatprep.subr.bf16.mxu0 %v18870_v53 }
0x16a6   :  { %v11055_v48 = vpop.f32.mrf.mxu1  ;;  %v11106_v5 = vpop.f32.mrf.mxu0 }
0x16a8   :  { %v13245_v30 = vpop.f32.mrf.mxu1  ;;  %v13251_v29 = vpop.f32.mrf.mxu0 }
0x16aa   :  { %v11058_v2 = vpop.f32.mrf.mxu1  ;;  %v11109_v46 = vpop.f32.mrf.mxu0 }
0x16ab   :  { %v11113_v4 = vpack.c.bf16 %v11058_v2, %v11055_v48  ;;  %v11118_v13 = vpack.c.bf16 %v11109_v46, %v11106_v5 }
0x16ac   :  { %v13246_v35 = vpop.f32.mrf.mxu1  ;;  %v13252_v24 = vpop.f32.mrf.mxu0 }
0x16ad   :  { %13258 = vmatmul.mubr.msk.bf16.vlgmr.msra.gmra.mxu1 %vm11135_vm5, %v11118_v13  ;;  %13266 = vmatmul.mubr.msk.bf16.vlgmr.msra.gmra.mxu0 %vm11135_vm5, %v11113_v4 }
0x16ae   :  { %13271 = vmatprep.mubr.msk.bf16.mxu1 %vm15303_vm0, %v18870_v53  ;;  %13277 = vmatprep.mubr.msk.bf16.mxu0 %vm15303_vm0, %v18870_v53 }
0x176d   :  { %v11173_v42 = vpop.f32.mrf.mxu1  ;;  %v11229_v41 = vpop.f32.mrf.mxu0 }
0x176e   :  { %v11230_v25 = vadd.f32 %v11229_v41, %v11173_v42 }
0x176f   :  { %v13259_v31 = vpop.f32.mrf.mxu1  ;;  %v13267_v63 = vpop.f32.mrf.mxu0 }
0x1770   :  { %v11243_v37 = vadd.f32 %v12391_v10, %v11230_v25 }
0x1771   :  { %v11176_v38 = vpop.f32.mrf.mxu1  ;;  %v11232_v62 = vpop.f32.mrf.mxu0 }
0x1772   :  { %v11233_v50 = vadd.f32 %v11232_v62, %v11176_v38  ;;  %v11245_v39 = vmax.f32 %v11243_v37, 0.0 }
0x1773   :  { %v13260_v56 = vpop.f32.mrf.mxu1  ;;  %v13268_v17 = vpop.f32.mrf.mxu0 }
0x1774   :  { %v11244_v8 = vadd.f32 %v12391_v10, %v11233_v50 }
0x1776   :  { %v11246_v27 = vmax.f32 %v11244_v8, 0.0 }
0x1778   :  { %v11247_v14 = vpack.c.bf16 %v11246_v27, %v11245_v39 }
0x177a   :  { %v11259_v54 = vsel %vm11017_vm3, %v11247_v14, 0 }
0x177b   :  { %13270 = vmatpush3.bf16.msra.mxu1 %v11259_v54  ;;  %13276 = vmatpush3.bf16.msra.mxu0 %v11259_v54 }
0x177c   :  { %13281 = vmatprep.subr.bf16.mxu1 %v18870_v53  ;;  %13289 = vmatprep.subr.bf16.mxu0 %v18870_v53 }
0x177e   :  { %13272 = vmatmul.mubr.msk.bf16.vlgmr.msra.gmra.mxu1 %vm11013_vm4, %v14356_v47  ;;  %13278 = vmatmul.mubr.msk.bf16.vlgmr.msra.gmra.mxu0 %vm11013_vm4, %v14357_v20 }
0x177f   :  { %13285 = vmatprep.mubr.msk.bf16.mxu1 %vm15303_vm0, %v18870_v53  ;;  %13293 = vmatprep.mubr.msk.bf16.mxu0 %vm15303_vm0, %v18870_v53 }
0x1780   :  { %13282 = vmatpush3.bf16.msra.mxu1 %v14358_v23  ;;  %13290 = vmatpush3.bf16.msra.mxu0 %v14359_v43 }
0x1781   :  { %13283 = vmatprep.subr.bf16.mxu1 %v18870_v53  ;;  %13291 = vmatprep.subr.bf16.mxu0 %v18870_v53 }
0x1784   :  { %13284 = vmatpush3.bf16.msra.mxu1 %v14360_v6  ;;  %13292 = vmatpush3.bf16.msra.mxu0 %v14361_v15 }
0x1785   :  { %13297 = vmatprep.subr.bf16.mxu1 %v18870_v53 }
0x183e   :  { %v11295_v34 = vpop.f32.mrf.mxu1  ;;  %v11346_v51 = vpop.f32.mrf.mxu0 }
0x1840   :  { %v13273_v52 = vpop.f32.mrf.mxu1  ;;  %v13279_v45 = vpop.f32.mrf.mxu0 }
0x1842   :  { %v11298_v61 = vpop.f32.mrf.mxu1  ;;  %v11349_v9 = vpop.f32.mrf.mxu0 }
0x1843   :  { %v11353_v26 = vpack.c.bf16 %v11298_v61, %v11295_v34  ;;  %v11358_v11 = vpack.c.bf16 %v11349_v9, %v11346_v51 }
0x1844   :  { %v13274_v40 = vpop.f32.mrf.mxu1  ;;  %v13280_v22 = vpop.f32.mrf.mxu0 }
0x1845   :  { %13286 = vmatmul.mubr.msk.bf16.vlgmr.msra.gmra.mxu1 %vm11135_vm5, %v11358_v11  ;;  %13294 = vmatmul.mubr.msk.bf16.vlgmr.msra.gmra.mxu0 %vm11135_vm5, %v11353_v26 }
0x1846   :  { %13299 = vmatprep.mubr.msk.bf16.mxu1 %vm15303_vm0, %v18870_v53  ;;  %v11486_v53 = vld [vmem:[#allocation56] sm:$0x1] }
0x1905   :  { %v11412_v58 = vpop.f32.mrf.mxu1  ;;  %v11468_v32 = vpop.f32.mrf.mxu0 }
0x1906   :  { %v11469_v57 = vadd.f32 %v11468_v32, %v11412_v58 }
0x1907   :  { %v13287_v12 = vpop.f32.mrf.mxu1  ;;  %v13295_v19 = vpop.f32.mrf.mxu0 }
0x1908   :  { %v11482_v16 = vadd.f32 %v12402_v3, %v11469_v57 }
0x1909   :  { %v11415_v36 = vpop.f32.mrf.mxu1  ;;  %v11471_v59 = vpop.f32.mrf.mxu0 }
0x190a   :  { %v11472_v33 = vadd.f32 %v11471_v59, %v11415_v36  ;;  %v11484_v7 = vmax.f32 %v11482_v16, 0.0 }
0x190b   :  { %v13288_v21 = vpop.f32.mrf.mxu1  ;;  %v13296_v55 = vpop.f32.mrf.mxu0 }
0x190c   :  { %v11483_v0 = vadd.f32 %v12402_v3, %v11472_v33 }
0x190e   :  { %v11485_v49 = vmax.f32 %v11483_v0, 0.0 }
0x1910   :  { %v11487_v1 = vpack.c.bf16 %v11485_v49, %v11484_v7 }
0x1912   :  { %v11492_v60 = vsel %vm11017_vm3, %v11487_v1, 0 }
0x1913   :  { %13298 = vmatpush3.bf16.msra.mxu1 %v11492_v60 }
0x1916   :  { %13300 = vmatmul.mubr.msk.bf16.vlgmr.msra.gmra.mxu1 %vm11013_vm4, %v11486_v53 }
0x19d6   :  { %v11528_v44 = vpop.f32.mrf.mxu1 }
0x19d7   :  { %11535 = vst.msk [vmem:[#allocation59] sm:$0x3] %vm11534_vm6, %v11528_v44 }
0x19d8   :  { %v13301_v28 = vpop.f32.mrf.mxu1 }
0x19d9   :  { %15167 = shalt.err (!%p15164_p7)
}
0x19da   :  { %11545 = dma.vmem_to_hbm [thread:$0]  %s11543_s9, 32, %s15525_s17, [#allocation4]   ;;  %v11531_v18 = vpop.f32.mrf.mxu1 }
0x19dc   :  { %v13302_v48 = vpop.f32.mrf.mxu1 }
0x19dd   :  { %15214 = dma.done.wait [#allocation4], 32  }
0x19de   :  { %15215 = vsyncadd [#allocation4], 4294967264 }
0x19df   :  { %11549 = vsyncpa [#allocation3], 1 }
0x19e0   :  { %11550 = vsyncpa [#allocation6], 1 }
0x19e1   :  { %11551 = vsyncpa [#allocation9], 1 }
0x19e2   :  { %11552 = vsyncpa [#allocation12], 1 }
0x19e3   :  { %11553 = vsyncpa [#allocation15], 1 }
0x19e4   :  { %11554 = vsyncpa [#allocation18], 1 }
0x19e5   :  { %11555 = vsyncpa [#allocation21], 1 }
0x19e6   :  { %11556 = vsyncpa [#allocation24], 1 }
0x19e7   :  { %11557 = vsyncpa [#allocation27], 1 }
0x19e8   :  { %11558 = vsyncpa [#allocation30], 1 }
0x19e9   :  { %11559 = vsyncpa [#allocation33], 1 }
0x19ea   :  { %11560 = vsyncpa [#allocation36], 1 }
0x19eb   :  { %11561 = vsyncpa [#allocation39], 1 }
0x19ec   :  { %11562 = vsyncpa [#allocation42], 1 }
0x19ed   :  { %11563 = vsyncpa [#allocation45], 1 }
0x19ee   :  { %11564 = vsyncpa [#allocation48], 1 }
0x19ef   :  { %11565 = vsyncpa [#allocation51], 1 }
0x19f0   :  { %11566 = vsyncpa [#allocation54], 1 }
0x19f1   :  { %11567 = vsyncpa [#allocation57], 1 }
0x19f2   :  { %11568 = vsyncpa [#allocation4], 1 }

</bundles_post_ra>
